<compile_context>
chip_gen: v5e
topology: v5e:2x2
jax: 0.10.0
libtpu: 0.0.40
codegen_flags: <defaults>
</compile_context>

<pallas_src>
import functools

import numpy as np
import jax
import jax.numpy as jnp
from jax import lax
from jax.experimental import pallas as pl
from jax.experimental.pallas import tpu as pltpu

LRELU_SLOPE = 0.2
BN_EPS = 1e-5
GN_EPS = 1e-5

_VMEM_LIMIT_CACHE = None


def _vmem_limit_bytes():
    # Per-generation scoped-VMEM limit: ~75% of physical VMEM, capped at
    # 100 MiB (128-MiB v5e/v6e -> 96 MiB, 64-MiB v7x -> 48 MiB of headroom).
    global _VMEM_LIMIT_CACHE
    if _VMEM_LIMIT_CACHE is None:
        try:
            cap = int(pltpu.get_tpu_info().vmem_capacity_bytes)
        except Exception:
            cap = 64 * 1024 * 1024
        _VMEM_LIMIT_CACHE = min((cap * 3) // 4, 100 * 1024 * 1024)
    return _VMEM_LIMIT_CACHE


def _compiler_params():
    return pltpu.CompilerParams(dimension_semantics=("parallel",),
                                vmem_limit_bytes=_vmem_limit_bytes())


def _leaky(x):
    return jnp.where(x > 0, x, LRELU_SLOPE * x)


def _dot_bf16(a, b):
    # bf16 operands, f32 accumulation (native MXU path)
    return jnp.dot(a.astype(jnp.bfloat16), b.astype(jnp.bfloat16),
                   preferred_element_type=jnp.float32)


# ----------------------------------------------------------------------------
# Pallas kernels
# ----------------------------------------------------------------------------

def conv_block_kernel(x_ref, w1_ref, f1_ref, w2_ref, y2_ref, st_ref, y1pad_ref,
                      *, k, H, W, pad):
    # One padded image per grid step.
    #   x_ref    : (1, H+2p, W+2p, Cin)  bf16   halo'd input
    #   w1_ref   : (k*k, Cin, mid)       bf16   conv1 weight, tap-major (resident)
    #   f1_ref   : (4, mid)              f32    fuse1 affines (conv1 bias folded)
    #   w2_ref   : (k*k, mid, C)         bf16   conv2 weight, shuffle-folded cols
    #   y2_ref   : (H*W, C)              bf16   conv2 output (final channel order)
    #   st_ref   : (1, 2, C)             f32    per-image BN sum / sumsq partials
    #   y1pad_ref: (H+2p, W+2p, mid)     f32    VMEM scratch (padded conv1 out)
    HW = H * W
    Cin = x_ref.shape[-1]
    mid = w1_ref.shape[-1]
    C = w2_ref.shape[-1]

    # whole halo'd image in vregs; slicing/reshape kept in f32 (lane dim fixed)
    xr = x_ref[0].astype(jnp.float32)                       # (Hp, Wp, Cin)

    # ---- conv1: k*k tap-accumulated GEMMs (bf16 operands, f32 accumulate) ----
    acc1 = jnp.zeros((HW, mid), jnp.float32)
    for di in range(k):
        for dj in range(k):
            tap = xr[di:di + H, dj:dj + W, :].reshape(HW, Cin)
            acc1 = acc1 + jnp.dot(tap.astype(jnp.bfloat16), w1_ref[di * k + dj],
                                  preferred_element_type=jnp.float32)

    # ---- fuse1: affine -> lrelu -> affine -> lrelu (conv1 bias in shift0) ----
    y1 = _leaky(f1_ref[0:1, :] * acc1 + f1_ref[1:2, :])
    y1 = _leaky(f1_ref[2:3, :] * y1 + f1_ref[3:4, :])

    # ---- zero-pad conv1 output into VMEM scratch for conv2's halo ----------
    # (zeroed every step: scratch is uninitialized and the grid may be split
    #  across v7x cores, so a one-time init under pl.when would be unsafe)
    y1pad_ref[...] = jnp.zeros_like(y1pad_ref)
    y1pad_ref[pad:pad + H, pad:pad + W, :] = y1.reshape(H, W, mid)
    y1p = y1pad_ref[...]                                    # (Hp, Wp, mid) f32

    # ---- conv2 (bias=False); channel_shuffle folded into w2 column order ----
    acc2 = jnp.zeros((HW, C), jnp.float32)
    for di in range(k):
        for dj in range(k):
            tap = y1p[di:di + H, dj:dj + W, :].reshape(HW, mid)
            acc2 = acc2 + jnp.dot(tap.astype(jnp.bfloat16), w2_ref[di * k + dj],
                                  preferred_element_type=jnp.float32)

    # ---- outputs: bf16 activations + f32 BatchNorm partials (direct stores) --
    y2_ref[...] = acc2.astype(y2_ref.dtype)
    st_ref[0, 0:1, :] = jnp.sum(acc2, axis=0, keepdims=True)
    st_ref[0, 1:2, :] = jnp.sum(acc2 * acc2, axis=0, keepdims=True)


def bn_sa_fuse2_sc_kernel(y_ref, x_ref, bn_ref, sa_ref, f2_ref, wsc_ref, o_ref):
    # One (H*W, C) image block per grid step; columns are final-order channels.
    y = _leaky(y_ref[...].astype(jnp.float32) * bn_ref[0:1, :] + bn_ref[1:2, :])

    # ShuffleAttention, column-wise (one column == one (image, channel)):
    # per-channel pooling for channel attention, per-channel GroupNorm over HW
    # for spatial attention; select the gate argument, then ONE sigmoid.
    mean = jnp.mean(y, axis=0, keepdims=True)
    var = jnp.maximum(jnp.mean(y * y, axis=0, keepdims=True) - mean * mean, 0.0)
    gn = (y - mean) * lax.rsqrt(var + GN_EPS) * sa_ref[5:6, :] + sa_ref[6:7, :]
    gate_arg = jnp.where(sa_ref[0:1, :] > 0.5,
                         sa_ref[1:2, :] * mean + sa_ref[2:3, :],   # channel attn
                         sa_ref[3:4, :] * gn + sa_ref[4:5, :])     # spatial attn
    sa = y * jax.nn.sigmoid(gate_arg)

    # fuse2 (channel_shuffle already folded into conv2's weight-column order)
    r = _leaky(f2_ref[0:1, :] * sa + f2_ref[1:2, :])
    r = _leaky(f2_ref[2:3, :] * r + f2_ref[3:4, :])

    # learnable 1x1 shortcut + residual add
    sc = jnp.dot(x_ref[...], wsc_ref[...], preferred_element_type=jnp.float32) \
        + f2_ref[4:5, :]
    o_ref[...] = sc + r


# ----------------------------------------------------------------------------
# pallas_call wrappers
# ----------------------------------------------------------------------------

def _residual_convs(xpad, w1, f1p, w2, *, B, H, W, k, pad):
    Hp, Wp = H + 2 * pad, W + 2 * pad
    Cin = xpad.shape[-1]
    mid = w1.shape[-1]
    C = w2.shape[-1]
    HW = H * W
    M = B * HW
    kernel = functools.partial(conv_block_kernel, k=k, H=H, W=W, pad=pad)
    return pl.pallas_call(
        kernel,
        out_shape=(jax.ShapeDtypeStruct((M, C), jnp.bfloat16),
                   jax.ShapeDtypeStruct((B, 2, C), jnp.float32)),
        grid=(B,),
        in_specs=[
            pl.BlockSpec((1, Hp, Wp, Cin), lambda b: (b, 0, 0, 0)),
            pl.BlockSpec((k * k, Cin, mid), lambda b: (0, 0, 0)),   # resident
            pl.BlockSpec((4, mid), lambda b: (0, 0)),               # resident
            pl.BlockSpec((k * k, mid, C), lambda b: (0, 0, 0)),     # resident
        ],
        out_specs=(pl.BlockSpec((HW, C), lambda b: (b, 0)),
                   pl.BlockSpec((1, 2, C), lambda b: (b, 0, 0))),
        scratch_shapes=[pltpu.VMEM((Hp, Wp, mid), jnp.float32)],
        compiler_params=_compiler_params(),
        cost_estimate=pl.CostEstimate(
            flops=2 * M * (k * k) * (Cin * mid + mid * C) + 10 * M * (mid + C),
            transcendentals=0,
            bytes_accessed=(2 * B * Hp * Wp * Cin
                            + 2 * (k * k) * (Cin * mid + mid * C)
                            + 2 * M * C + 8 * B * C + 16 * mid)),
    )(xpad, w1, f1p, w2)


def _bn_sa_fuse2_shortcut(y2, x_flat, bn_p, sa_p, f2_p, wsc, B, HW):
    M, C = y2.shape
    Cin = x_flat.shape[1]
    return pl.pallas_call(
        bn_sa_fuse2_sc_kernel,
        out_shape=jax.ShapeDtypeStruct((M, C), jnp.float32),
        grid=(B,),
        in_specs=[
            pl.BlockSpec((HW, C), lambda b: (b, 0)),
            pl.BlockSpec((HW, Cin), lambda b: (b, 0)),
            pl.BlockSpec((2, C), lambda b: (0, 0)),       # BN scale/shift (resident)
            pl.BlockSpec((8, C), lambda b: (0, 0)),       # SA per-column params
            pl.BlockSpec((5, C), lambda b: (0, 0)),       # fuse2 params + csc bias
            pl.BlockSpec((Cin, C), lambda b: (0, 0)),     # 1x1 shortcut weight
        ],
        out_specs=pl.BlockSpec((HW, C), lambda b: (b, 0)),
        compiler_params=_compiler_params(),
        cost_estimate=pl.CostEstimate(
            flops=2 * M * Cin * C + 40 * M * C,
            transcendentals=2 * M * C,
            bytes_accessed=2 * M * C + 2 * M * Cin + 4 * M * C),
    )(y2, x_flat, bn_p, sa_p, f2_p, wsc)


# ----------------------------------------------------------------------------
# Plain-JAX glue: tiny sequential LSTM conditioning heads (parameter setup)
# ----------------------------------------------------------------------------

def _lstm_final_h(lstm, y):
    # nn.LSTM(cond_dim, hidden, batch_first=True) on y.unsqueeze(0); batch=1,
    # seq=8 sequential recurrence -> plain JAX scan (parameter-setup glue).
    Hh = lstm["whh"].shape[1]

    def step(carry, x_t):
        h, c = carry
        gates = lstm["wih"] @ x_t + lstm["bih"] + lstm["whh"] @ h + lstm["bhh"]
        i, f, g, o = jnp.split(gates, 4)
        i, f, o = jax.nn.sigmoid(i), jax.nn.sigmoid(f), jax.nn.sigmoid(o)
        g = jnp.tanh(g)
        c = f * c + i * g
        h = o * jnp.tanh(c)
        return (h, c), None

    init = (jnp.zeros((Hh,), jnp.float32), jnp.zeros((Hh,), jnp.float32))
    (h, _), _ = jax.lax.scan(step, init, y)
    return h


def _affine_gamma_beta(ap, text):
    h = _lstm_final_h(ap["lstm"], text)
    gamma = jnp.maximum(h @ ap["gw1"] + ap["gb1"], 0.0) @ ap["gw2"] + ap["gb2"]
    beta = jnp.maximum(h @ ap["bw1"] + ap["bb1"], 0.0) @ ap["bw2"] + ap["bb2"]
    return gamma[None, :], beta[None, :]


def _conditioning(params, text):
    g10, bt10 = _affine_gamma_beta(params["fuse1_a0"], text)
    g11, bt11 = _affine_gamma_beta(params["fuse1_a1"], text)
    g20, bt20 = _affine_gamma_beta(params["fuse2_a0"], text)
    g21, bt21 = _affine_gamma_beta(params["fuse2_a1"], text)
    return g10, bt10, g11, bt11, g20, bt20, g21, bt21


# ----------------------------------------------------------------------------
# Full M_Block_RAT forward (Pallas path)
# ----------------------------------------------------------------------------

def m_block_rat_pallas(params, cfg, h_nchw, text):
    k, s, p, G = cfg["k"], cfg["s"], cfg["p"], cfg["G"]
    assert s == 1 and 2 * p == k - 1, "kernel written for stride-1 'same' convs"
    x = jnp.transpose(h_nchw, (0, 2, 3, 1)).astype(jnp.float32)   # NCHW -> NHWC
    B, H, W, Cin = x.shape
    HW, M = H * W, B * H * W
    assert HW % 8 == 0

    g10, bt10, g11, bt11, g20, bt20, g21, bt21 = _conditioning(params, text)
    mid = params["conv1_w"].shape[-1]
    C = params["conv2_w"].shape[-1]
    CpG, Cg = C // G, C // (2 * G)

    # channel_shuffle(groups=2): sigma[r] = pre-shuffle channel landing at r
    sigma = np.array([(r % 2) * (C // 2) + r // 2 for r in range(C)], dtype=np.int32)

    # ---- K1: conv1 + fuse1 + conv2 + BN partials (bf16 halo'd input) --------
    x_bf = x.astype(jnp.bfloat16)
    xpad = jnp.pad(x_bf, ((0, 0), (p, p), (p, p), (0, 0)))
    w1 = params["conv1_w"].reshape(k * k, Cin, mid).astype(jnp.bfloat16)
    w2 = params["conv2_w"].reshape(k * k, mid, C)[:, :, sigma].astype(jnp.bfloat16)
    f1p = jnp.concatenate(
        [g10, g10 * params["conv1_b"][None, :] + bt10, g11, bt11], axis=0)
    y2, partial = _residual_convs(xpad, w1, f1p, w2, B=B, H=H, W=W, k=k, pad=p)

    # ---- BN finalize: tiny per-channel vector math (two-phase reduction) ----
    ssum = jnp.sum(partial[:, 0, :], axis=0)
    ssq = jnp.sum(partial[:, 1, :], axis=0)
    mean = ssum / M
    var = jnp.maximum(ssq / M - mean * mean, 0.0)
    bn_scale = params["bn_w"][sigma] * lax.rsqrt(var + BN_EPS)
    bn_shift = params["bn_b"][sigma] - mean * bn_scale
    bn_p = jnp.stack([bn_scale, bn_shift], axis=0)                 # (2, C)

    # per-column ShuffleAttention params in sigma (final channel) order
    cc = sigma % CpG
    in_x0 = cc < Cg
    i0 = np.where(in_x0, cc, 0)
    i1 = np.where(in_x0, 0, cc - Cg)
    m0 = jnp.asarray(in_x0.astype(np.float32))
    sa = params["sa"]
    pick0 = lambda v: jnp.where(m0 > 0, v[i0], 0.0)
    pick1 = lambda v: jnp.where(m0 > 0, 0.0, v[i1])
    sa_p = jnp.stack([m0, pick0(sa["cw"]), pick0(sa["cb"]),
                      pick1(sa["sw"]), pick1(sa["sb"]),
                      pick1(sa["gnw"]), pick1(sa["gnb"]),
                      jnp.zeros((C,), jnp.float32)], axis=0)       # (8, C)

    f2_p = jnp.concatenate([g20, bt20, g21, bt21, params["csc_b"][None, :]], axis=0)
    x_flat = x_bf.reshape(M, Cin)
    wsc = params["csc_w"].astype(jnp.bfloat16)

    # ---- K2: BN apply + act + SA + fuse2 + shortcut + add -------------------
    out = _bn_sa_fuse2_shortcut(y2, x_flat, bn_p, sa_p, f2_p, wsc, B, HW)
    return jnp.transpose(out.reshape(B, H, W, C), (0, 3, 1, 2))    # back to NCHW


# ----------------------------------------------------------------------------
# Pure-JAX reference (straightforward port of the PyTorch module)
# ----------------------------------------------------------------------------

def _im2col(x, k, p):
    # stride-1 im2col (reference only); (B,H,W,C) -> (B*H*W, k*k*C)
    B, H, W, C = x.shape
    xp = jnp.pad(x, ((0, 0), (p, p), (p, p), (0, 0)))
    Ho = H + 2 * p - k + 1
    Wo = W + 2 * p - k + 1
    cols = [xp[:, i:i + Ho, j:j + Wo, :] for i in range(k) for j in range(k)]
    return jnp.concatenate(cols, axis=-1).reshape(B * Ho * Wo, k * k * C)


def m_block_rat_reference(params, cfg, h_nchw, text):
    k, s, p, G = cfg["k"], cfg["s"], cfg["p"], cfg["G"]
    x = jnp.transpose(h_nchw, (0, 2, 3, 1)).astype(jnp.float32)
    B, H, W, Cin = x.shape
    HW, M = H * W, B * H * W
    g10, bt10, g11, bt11, g20, bt20, g21, bt21 = _conditioning(params, text)
    mid = params["conv1_w"].shape[-1]
    C = params["conv2_w"].shape[-1]
    CpG, Cg = C // G, C // (2 * G)

    # conv1 + bias + fuse1
    y = _dot_bf16(_im2col(x, k, p), params["conv1_w"].reshape(k * k * Cin, mid))
    y = y + params["conv1_b"][None, :]
    y = _leaky(g10 * y + bt10)
    y = _leaky(g11 * y + bt11)

    # conv2 (bias=False) + BatchNorm (batch stats) + LeakyReLU
    y = _dot_bf16(_im2col(y.reshape(B, H, W, mid), k, p),
                  params["conv2_w"].reshape(k * k * mid, C))
    mu = jnp.mean(y, axis=0, keepdims=True)
    var = jnp.mean((y - mu) ** 2, axis=0, keepdims=True)
    y = (y - mu) * lax.rsqrt(var + BN_EPS) * params["bn_w"][None, :] + params["bn_b"][None, :]
    y = _leaky(y)

    # ShuffleAttention + channel_shuffle(groups=2)
    t = y.reshape(B, HW, G, CpG)
    t = jnp.transpose(t, (0, 2, 3, 1)).reshape(B * G, CpG, HW)
    x0, x1 = t[:, :Cg, :], t[:, Cg:, :]
    sa = params["sa"]
    p3 = lambda v: v.reshape(1, Cg, 1)
    pooled = jnp.mean(x0, axis=-1, keepdims=True)
    o0 = x0 * jax.nn.sigmoid(p3(sa["cw"]) * pooled + p3(sa["cb"]))
    mu1 = jnp.mean(x1, axis=-1, keepdims=True)
    v1 = jnp.mean((x1 - mu1) ** 2, axis=-1, keepdims=True)
    gn = (x1 - mu1) * lax.rsqrt(v1 + GN_EPS) * p3(sa["gnw"]) + p3(sa["gnb"])
    o1 = x1 * jax.nn.sigmoid(p3(sa["sw"]) * gn + p3(sa["sb"]))
    t = jnp.concatenate([o0, o1], axis=1).reshape(B, G, CpG, HW)
    t = jnp.transpose(t, (0, 3, 1, 2)).reshape(B, HW, C)
    t = t.reshape(B, HW, 2, C // 2)
    t = jnp.swapaxes(t, -1, -2).reshape(M, C)

    # fuse2 + learnable 1x1 shortcut + residual add
    r = _leaky(g20 * t + bt20)
    r = _leaky(g21 * r + bt21)
    sc = _dot_bf16(x.reshape(M, Cin), params["csc_w"]) + params["csc_b"][None, :]
    return jnp.transpose((sc + r).reshape(B, H, W, C), (0, 3, 1, 2))


# ----------------------------------------------------------------------------
# Deterministic parameter construction (shapes from the module's __init__).
# torch's Affine_rnn._initialize would zero the last FC layers; small random
# values are used instead so the whole path is exercised.
# ----------------------------------------------------------------------------

def init_params(key, *, in_ch, mid_ch, out_ch, cond_dim, k, hidden_size, G):
    keys = iter(jax.random.split(key, 80))

    def nrm(shape, scale=0.1):
        return (scale * jax.random.normal(next(keys), shape)).astype(jnp.float32)

    def affine_rnn(num_features):
        Hh = hidden_size
        return {
            "lstm": {"wih": nrm((4 * Hh, cond_dim)), "whh": nrm((4 * Hh, Hh)),
                     "bih": nrm((4 * Hh,)), "bhh": nrm((4 * Hh,))},
            "gw1": nrm((Hh, num_features)), "gb1": nrm((num_features,)),
            "gw2": nrm((num_features, num_features)),
            "gb2": (1.0 + nrm((num_features,))).astype(jnp.float32),
            "bw1": nrm((Hh, num_features)), "bb1": nrm((num_features,)),
            "bw2": nrm((num_features, num_features)), "bb2": nrm((num_features,)),
        }

    Cg = out_ch // (2 * G)
    return {
        "conv1_w": nrm((k, k, in_ch, mid_ch)),    # HWIO
        "conv1_b": nrm((mid_ch,)),
        "fuse1_a0": affine_rnn(mid_ch), "fuse1_a1": affine_rnn(mid_ch),
        "conv2_w": nrm((k, k, mid_ch, out_ch)),   # HWIO, bias=False
        "bn_w": (1.0 + nrm((out_ch,))).astype(jnp.float32), "bn_b": nrm((out_ch,)),
        "sa": {"cw": nrm((Cg,)), "cb": (1.0 + nrm((Cg,))).astype(jnp.float32),
               "sw": nrm((Cg,)), "sb": (1.0 + nrm((Cg,))).astype(jnp.float32),
               "gnw": (1.0 + nrm((Cg,))).astype(jnp.float32), "gnb": nrm((Cg,))},
        "fuse2_a0": affine_rnn(out_ch), "fuse2_a1": affine_rnn(out_ch),
        "csc_w": nrm((in_ch, out_ch)), "csc_b": nrm((out_ch,)),
    }


if __name__ == "__main__":
    B, in_ch, mid_ch, out_ch = 2, 4, 8, 16
    H = W = 16
    cond_dim, seq_len, hidden_size = 8, 8, 32
    k, s, p, G = 3, 1, 1, 8          # out_ch must be divisible by 2*G
    cfg = {"k": k, "s": s, "p": p, "G": G}

    key = jax.random.PRNGKey(0)
    kp, kh, kt = jax.random.split(key, 3)
    params = init_params(kp, in_ch=in_ch, mid_ch=mid_ch, out_ch=out_ch,
                         cond_dim=cond_dim, k=k, hidden_size=hidden_size, G=G)
    h = jax.random.normal(kh, (B, in_ch, H, W), jnp.float32)      # NCHW like PyTorch
    text = jax.random.normal(kt, (seq_len, cond_dim), jnp.float32)

    fwd = jax.jit(lambda hh, tt: m_block_rat_pallas(params, cfg, hh, tt))
    out = jax.block_until_ready(fwd(h, text))
    assert out.shape == (B, out_ch, H, W), out.shape

    ref_fn = jax.jit(lambda hh, tt: m_block_rat_reference(params, cfg, hh, tt))
    ref = jax.block_until_ready(ref_fn(h, text))
    # tolerance slightly looser than before: the conv2 activation intermediate
    # is intentionally stored in bf16 (perf-review item) on the Pallas path.
    np.testing.assert_allclose(np.asarray(out), np.asarray(ref), rtol=2e-2, atol=2e-2)

    print("KERNEL_OK")
</pallas_src>

<mosaic_0001>
module attributes {stable_mosaic.version = 11 : i64} {
  func.func @conv_block_kernel(%arg0: i32, %arg1: memref<1x18x18x4xbf16, #tpu.memory_space<vmem>>, %arg2: memref<9x4x8xbf16, #tpu.memory_space<vmem>>, %arg3: memref<4x8xf32, #tpu.memory_space<vmem>>, %arg4: memref<9x8x16xbf16, #tpu.memory_space<vmem>>, %arg5: memref<256x16xbf16, #tpu.memory_space<vmem>>, %arg6: memref<1x2x16xf32, #tpu.memory_space<vmem>>, %arg7: memref<18x18x8xf32, #tpu.memory_space<vmem>>) attributes {dimension_semantics = [#tpu.dimension_semantics<parallel>], iteration_bounds = array<i64: 2>, scalar_prefetch = 0 : i64, scratch_operands = 1 : i64, tpu.core_type = #tpu.core_type<tc>, window_params = [{transform_indices = @transform_0, window_bounds = array<i64: 1, 18, 18, 4>}, {pipeline_mode = #tpu.pipeline_mode<synchronous>, transform_indices = @transform_1, window_bounds = array<i64: 9, 4, 8>}, {pipeline_mode = #tpu.pipeline_mode<synchronous>, transform_indices = @transform_2, window_bounds = array<i64: 4, 8>}, {pipeline_mode = #tpu.pipeline_mode<synchronous>, transform_indices = @transform_3, window_bounds = array<i64: 9, 8, 16>}, {transform_indices = @transform_4, window_bounds = array<i64: 256, 16>}, {transform_indices = @transform_5, window_bounds = array<i64: 1, 2, 16>}]} {
    %c0 = arith.constant 0 : index
    %c0_0 = arith.constant 0 : index
    %c0_1 = arith.constant 0 : index
    %c0_2 = arith.constant 0 : index
    %0 = vector.load %arg1[%c0, %c0_0, %c0_1, %c0_2] : memref<1x18x18x4xbf16, #tpu.memory_space<vmem>>, vector<1x18x18x4xbf16>
    %1 = vector.shape_cast %0 : vector<1x18x18x4xbf16> to vector<18x18x4xbf16>
    %2 = arith.extf %1 : vector<18x18x4xbf16> to vector<18x18x4xf32>
    %cst = arith.constant 0.000000e+00 : f32
    %3 = vector.broadcast %cst : f32 to vector<256x8xf32>
    %4 = vector.extract_strided_slice %2 {offsets = [0, 0, 0], sizes = [16, 16, 4], strides = [1, 1, 1]} : vector<18x18x4xf32> to vector<16x16x4xf32>
    %5 = vector.shape_cast %4 : vector<16x16x4xf32> to vector<256x4xf32>
    %6 = arith.truncf %5 : vector<256x4xf32> to vector<256x4xbf16>
    %c0_3 = arith.constant 0 : index
    %c0_4 = arith.constant 0 : index
    %c0_5 = arith.constant 0 : index
    %7 = vector.load %arg2[%c0_3, %c0_4, %c0_5] : memref<9x4x8xbf16, #tpu.memory_space<vmem>>, vector<1x4x8xbf16>
    %8 = vector.shape_cast %7 : vector<1x4x8xbf16> to vector<4x8xbf16>
    %cst_6 = arith.constant dense<0.000000e+00> : vector<256x8xf32>
    %9 = tpu.matmul %6, %8, %cst_6 {dimension_numbers = #tpu.dot_dimension_numbers<[1], [0], [0], [1], [0, 0, 1, 1], [], []>} : vector<256x4xbf16>, vector<4x8xbf16>, vector<256x8xf32> -> vector<256x8xf32>
    %10 = arith.addf %3, %9 : vector<256x8xf32>
    %11 = vector.extract_strided_slice %2 {offsets = [0, 1, 0], sizes = [16, 16, 4], strides = [1, 1, 1]} : vector<18x18x4xf32> to vector<16x16x4xf32>
    %12 = vector.shape_cast %11 : vector<16x16x4xf32> to vector<256x4xf32>
    %13 = arith.truncf %12 : vector<256x4xf32> to vector<256x4xbf16>
    %c1 = arith.constant 1 : index
    %c0_7 = arith.constant 0 : index
    %c0_8 = arith.constant 0 : index
    %14 = vector.load %arg2[%c1, %c0_7, %c0_8] : memref<9x4x8xbf16, #tpu.memory_space<vmem>>, vector<1x4x8xbf16>
    %15 = vector.shape_cast %14 : vector<1x4x8xbf16> to vector<4x8xbf16>
    %cst_9 = arith.constant dense<0.000000e+00> : vector<256x8xf32>
    %16 = tpu.matmul %13, %15, %cst_9 {dimension_numbers = #tpu.dot_dimension_numbers<[1], [0], [0], [1], [0, 0, 1, 1], [], []>} : vector<256x4xbf16>, vector<4x8xbf16>, vector<256x8xf32> -> vector<256x8xf32>
    %17 = arith.addf %10, %16 : vector<256x8xf32>
    %18 = vector.extract_strided_slice %2 {offsets = [0, 2, 0], sizes = [16, 16, 4], strides = [1, 1, 1]} : vector<18x18x4xf32> to vector<16x16x4xf32>
    %19 = vector.shape_cast %18 : vector<16x16x4xf32> to vector<256x4xf32>
    %20 = arith.truncf %19 : vector<256x4xf32> to vector<256x4xbf16>
    %c2 = arith.constant 2 : index
    %c0_10 = arith.constant 0 : index
    %c0_11 = arith.constant 0 : index
    %21 = vector.load %arg2[%c2, %c0_10, %c0_11] : memref<9x4x8xbf16, #tpu.memory_space<vmem>>, vector<1x4x8xbf16>
    %22 = vector.shape_cast %21 : vector<1x4x8xbf16> to vector<4x8xbf16>
    %cst_12 = arith.constant dense<0.000000e+00> : vector<256x8xf32>
    %23 = tpu.matmul %20, %22, %cst_12 {dimension_numbers = #tpu.dot_dimension_numbers<[1], [0], [0], [1], [0, 0, 1, 1], [], []>} : vector<256x4xbf16>, vector<4x8xbf16>, vector<256x8xf32> -> vector<256x8xf32>
    %24 = arith.addf %17, %23 : vector<256x8xf32>
    %25 = vector.extract_strided_slice %2 {offsets = [1, 0, 0], sizes = [16, 16, 4], strides = [1, 1, 1]} : vector<18x18x4xf32> to vector<16x16x4xf32>
    %26 = vector.shape_cast %25 : vector<16x16x4xf32> to vector<256x4xf32>
    %27 = arith.truncf %26 : vector<256x4xf32> to vector<256x4xbf16>
    %c3 = arith.constant 3 : index
    %c0_13 = arith.constant 0 : index
    %c0_14 = arith.constant 0 : index
    %28 = vector.load %arg2[%c3, %c0_13, %c0_14] : memref<9x4x8xbf16, #tpu.memory_space<vmem>>, vector<1x4x8xbf16>
    %29 = vector.shape_cast %28 : vector<1x4x8xbf16> to vector<4x8xbf16>
    %cst_15 = arith.constant dense<0.000000e+00> : vector<256x8xf32>
    %30 = tpu.matmul %27, %29, %cst_15 {dimension_numbers = #tpu.dot_dimension_numbers<[1], [0], [0], [1], [0, 0, 1, 1], [], []>} : vector<256x4xbf16>, vector<4x8xbf16>, vector<256x8xf32> -> vector<256x8xf32>
    %31 = arith.addf %24, %30 : vector<256x8xf32>
    %32 = vector.extract_strided_slice %2 {offsets = [1, 1, 0], sizes = [16, 16, 4], strides = [1, 1, 1]} : vector<18x18x4xf32> to vector<16x16x4xf32>
    %33 = vector.shape_cast %32 : vector<16x16x4xf32> to vector<256x4xf32>
    %34 = arith.truncf %33 : vector<256x4xf32> to vector<256x4xbf16>
    %c4 = arith.constant 4 : index
    %c0_16 = arith.constant 0 : index
    %c0_17 = arith.constant 0 : index
    %35 = vector.load %arg2[%c4, %c0_16, %c0_17] : memref<9x4x8xbf16, #tpu.memory_space<vmem>>, vector<1x4x8xbf16>
    %36 = vector.shape_cast %35 : vector<1x4x8xbf16> to vector<4x8xbf16>
    %cst_18 = arith.constant dense<0.000000e+00> : vector<256x8xf32>
    %37 = tpu.matmul %34, %36, %cst_18 {dimension_numbers = #tpu.dot_dimension_numbers<[1], [0], [0], [1], [0, 0, 1, 1], [], []>} : vector<256x4xbf16>, vector<4x8xbf16>, vector<256x8xf32> -> vector<256x8xf32>
    %38 = arith.addf %31, %37 : vector<256x8xf32>
    %39 = vector.extract_strided_slice %2 {offsets = [1, 2, 0], sizes = [16, 16, 4], strides = [1, 1, 1]} : vector<18x18x4xf32> to vector<16x16x4xf32>
    %40 = vector.shape_cast %39 : vector<16x16x4xf32> to vector<256x4xf32>
    %41 = arith.truncf %40 : vector<256x4xf32> to vector<256x4xbf16>
    %c5 = arith.constant 5 : index
    %c0_19 = arith.constant 0 : index
    %c0_20 = arith.constant 0 : index
    %42 = vector.load %arg2[%c5, %c0_19, %c0_20] : memref<9x4x8xbf16, #tpu.memory_space<vmem>>, vector<1x4x8xbf16>
    %43 = vector.shape_cast %42 : vector<1x4x8xbf16> to vector<4x8xbf16>
    %cst_21 = arith.constant dense<0.000000e+00> : vector<256x8xf32>
    %44 = tpu.matmul %41, %43, %cst_21 {dimension_numbers = #tpu.dot_dimension_numbers<[1], [0], [0], [1], [0, 0, 1, 1], [], []>} : vector<256x4xbf16>, vector<4x8xbf16>, vector<256x8xf32> -> vector<256x8xf32>
    %45 = arith.addf %38, %44 : vector<256x8xf32>
    %46 = vector.extract_strided_slice %2 {offsets = [2, 0, 0], sizes = [16, 16, 4], strides = [1, 1, 1]} : vector<18x18x4xf32> to vector<16x16x4xf32>
    %47 = vector.shape_cast %46 : vector<16x16x4xf32> to vector<256x4xf32>
    %48 = arith.truncf %47 : vector<256x4xf32> to vector<256x4xbf16>
    %c6 = arith.constant 6 : index
    %c0_22 = arith.constant 0 : index
    %c0_23 = arith.constant 0 : index
    %49 = vector.load %arg2[%c6, %c0_22, %c0_23] : memref<9x4x8xbf16, #tpu.memory_space<vmem>>, vector<1x4x8xbf16>
    %50 = vector.shape_cast %49 : vector<1x4x8xbf16> to vector<4x8xbf16>
    %cst_24 = arith.constant dense<0.000000e+00> : vector<256x8xf32>
    %51 = tpu.matmul %48, %50, %cst_24 {dimension_numbers = #tpu.dot_dimension_numbers<[1], [0], [0], [1], [0, 0, 1, 1], [], []>} : vector<256x4xbf16>, vector<4x8xbf16>, vector<256x8xf32> -> vector<256x8xf32>
    %52 = arith.addf %45, %51 : vector<256x8xf32>
    %53 = vector.extract_strided_slice %2 {offsets = [2, 1, 0], sizes = [16, 16, 4], strides = [1, 1, 1]} : vector<18x18x4xf32> to vector<16x16x4xf32>
    %54 = vector.shape_cast %53 : vector<16x16x4xf32> to vector<256x4xf32>
    %55 = arith.truncf %54 : vector<256x4xf32> to vector<256x4xbf16>
    %c7 = arith.constant 7 : index
    %c0_25 = arith.constant 0 : index
    %c0_26 = arith.constant 0 : index
    %56 = vector.load %arg2[%c7, %c0_25, %c0_26] : memref<9x4x8xbf16, #tpu.memory_space<vmem>>, vector<1x4x8xbf16>
    %57 = vector.shape_cast %56 : vector<1x4x8xbf16> to vector<4x8xbf16>
    %cst_27 = arith.constant dense<0.000000e+00> : vector<256x8xf32>
    %58 = tpu.matmul %55, %57, %cst_27 {dimension_numbers = #tpu.dot_dimension_numbers<[1], [0], [0], [1], [0, 0, 1, 1], [], []>} : vector<256x4xbf16>, vector<4x8xbf16>, vector<256x8xf32> -> vector<256x8xf32>
    %59 = arith.addf %52, %58 : vector<256x8xf32>
    %60 = vector.extract_strided_slice %2 {offsets = [2, 2, 0], sizes = [16, 16, 4], strides = [1, 1, 1]} : vector<18x18x4xf32> to vector<16x16x4xf32>
    %61 = vector.shape_cast %60 : vector<16x16x4xf32> to vector<256x4xf32>
    %62 = arith.truncf %61 : vector<256x4xf32> to vector<256x4xbf16>
    %c8 = arith.constant 8 : index
    %c0_28 = arith.constant 0 : index
    %c0_29 = arith.constant 0 : index
    %63 = vector.load %arg2[%c8, %c0_28, %c0_29] : memref<9x4x8xbf16, #tpu.memory_space<vmem>>, vector<1x4x8xbf16>
    %64 = vector.shape_cast %63 : vector<1x4x8xbf16> to vector<4x8xbf16>
    %cst_30 = arith.constant dense<0.000000e+00> : vector<256x8xf32>
    %65 = tpu.matmul %62, %64, %cst_30 {dimension_numbers = #tpu.dot_dimension_numbers<[1], [0], [0], [1], [0, 0, 1, 1], [], []>} : vector<256x4xbf16>, vector<4x8xbf16>, vector<256x8xf32> -> vector<256x8xf32>
    %66 = arith.addf %59, %65 : vector<256x8xf32>
    %c0_31 = arith.constant 0 : index
    %c0_32 = arith.constant 0 : index
    %67 = vector.load %arg3[%c0_31, %c0_32] : memref<4x8xf32, #tpu.memory_space<vmem>>, vector<1x8xf32>
    %68 = vector.broadcast %67 : vector<1x8xf32> to vector<256x8xf32>
    %69 = arith.mulf %68, %66 : vector<256x8xf32>
    %c1_33 = arith.constant 1 : index
    %c0_34 = arith.constant 0 : index
    %70 = vector.load %arg3[%c1_33, %c0_34] : memref<4x8xf32, #tpu.memory_space<vmem>>, vector<1x8xf32>
    %71 = vector.broadcast %70 : vector<1x8xf32> to vector<256x8xf32>
    %72 = arith.addf %69, %71 : vector<256x8xf32>
    %cst_35 = arith.constant 0.000000e+00 : f32
    %73 = vector.broadcast %cst_35 : f32 to vector<256x8xf32>
    %74 = arith.cmpf ogt, %72, %73 : vector<256x8xf32>
    %cst_36 = arith.constant 2.000000e-01 : f32
    %75 = vector.broadcast %cst_36 : f32 to vector<256x8xf32>
    %76 = arith.mulf %75, %72 : vector<256x8xf32>
    %77 = arith.select %74, %72, %76 : vector<256x8xi1>, vector<256x8xf32>
    %c2_37 = arith.constant 2 : index
    %c0_38 = arith.constant 0 : index
    %78 = vector.load %arg3[%c2_37, %c0_38] : memref<4x8xf32, #tpu.memory_space<vmem>>, vector<1x8xf32>
    %79 = vector.broadcast %78 : vector<1x8xf32> to vector<256x8xf32>
    %80 = arith.mulf %79, %77 : vector<256x8xf32>
    %c3_39 = arith.constant 3 : index
    %c0_40 = arith.constant 0 : index
    %81 = vector.load %arg3[%c3_39, %c0_40] : memref<4x8xf32, #tpu.memory_space<vmem>>, vector<1x8xf32>
    %82 = vector.broadcast %81 : vector<1x8xf32> to vector<256x8xf32>
    %83 = arith.addf %80, %82 : vector<256x8xf32>
    %cst_41 = arith.constant 0.000000e+00 : f32
    %84 = vector.broadcast %cst_41 : f32 to vector<256x8xf32>
    %85 = arith.cmpf ogt, %83, %84 : vector<256x8xf32>
    %cst_42 = arith.constant 2.000000e-01 : f32
    %86 = vector.broadcast %cst_42 : f32 to vector<256x8xf32>
    %87 = arith.mulf %86, %83 : vector<256x8xf32>
    %88 = arith.select %85, %83, %87 : vector<256x8xi1>, vector<256x8xf32>
    %cst_43 = arith.constant 0.000000e+00 : f32
    %89 = vector.broadcast %cst_43 : f32 to vector<18x18x8xf32>
    %c0_44 = arith.constant 0 : index
    %c0_45 = arith.constant 0 : index
    %c0_46 = arith.constant 0 : index
    %90 = vector.load %arg7[%c0_44, %c0_45, %c0_46] : memref<18x18x8xf32, #tpu.memory_space<vmem>>, vector<18x18x8xf32>
    tpu.vector_store %arg7[%c0_44, %c0_45, %c0_46], %89 {strides = array<i32>} : memref<18x18x8xf32, #tpu.memory_space<vmem>>, vector<18x18x8xf32>,
    %91 = vector.shape_cast %88 : vector<256x8xf32> to vector<16x16x8xf32>
    %c1_47 = arith.constant 1 : index
    %c1_48 = arith.constant 1 : index
    %c0_49 = arith.constant 0 : index
    %92 = vector.load %arg7[%c1_47, %c1_48, %c0_49] : memref<18x18x8xf32, #tpu.memory_space<vmem>>, vector<16x16x8xf32>
    tpu.vector_store %arg7[%c1_47, %c1_48, %c0_49], %91 {strides = array<i32>} : memref<18x18x8xf32, #tpu.memory_space<vmem>>, vector<16x16x8xf32>,
    %c0_50 = arith.constant 0 : index
    %c0_51 = arith.constant 0 : index
    %c0_52 = arith.constant 0 : index
    %93 = vector.load %arg7[%c0_50, %c0_51, %c0_52] : memref<18x18x8xf32, #tpu.memory_space<vmem>>, vector<18x18x8xf32>
    %cst_53 = arith.constant 0.000000e+00 : f32
    %94 = vector.broadcast %cst_53 : f32 to vector<256x16xf32>
    %95 = vector.extract_strided_slice %93 {offsets = [0, 0, 0], sizes = [16, 16, 8], strides = [1, 1, 1]} : vector<18x18x8xf32> to vector<16x16x8xf32>
    %96 = vector.shape_cast %95 : vector<16x16x8xf32> to vector<256x8xf32>
    %97 = arith.truncf %96 : vector<256x8xf32> to vector<256x8xbf16>
    %c0_54 = arith.constant 0 : index
    %c0_55 = arith.constant 0 : index
    %c0_56 = arith.constant 0 : index
    %98 = vector.load %arg4[%c0_54, %c0_55, %c0_56] : memref<9x8x16xbf16, #tpu.memory_space<vmem>>, vector<1x8x16xbf16>
    %99 = vector.shape_cast %98 : vector<1x8x16xbf16> to vector<8x16xbf16>
    %cst_57 = arith.constant dense<0.000000e+00> : vector<256x16xf32>
    %100 = tpu.matmul %97, %99, %cst_57 {dimension_numbers = #tpu.dot_dimension_numbers<[1], [0], [0], [1], [0, 0, 1, 1], [], []>} : vector<256x8xbf16>, vector<8x16xbf16>, vector<256x16xf32> -> vector<256x16xf32>
    %101 = arith.addf %94, %100 : vector<256x16xf32>
    %102 = vector.extract_strided_slice %93 {offsets = [0, 1, 0], sizes = [16, 16, 8], strides = [1, 1, 1]} : vector<18x18x8xf32> to vector<16x16x8xf32>
    %103 = vector.shape_cast %102 : vector<16x16x8xf32> to vector<256x8xf32>
    %104 = arith.truncf %103 : vector<256x8xf32> to vector<256x8xbf16>
    %c1_58 = arith.constant 1 : index
    %c0_59 = arith.constant 0 : index
    %c0_60 = arith.constant 0 : index
    %105 = vector.load %arg4[%c1_58, %c0_59, %c0_60] : memref<9x8x16xbf16, #tpu.memory_space<vmem>>, vector<1x8x16xbf16>
    %106 = vector.shape_cast %105 : vector<1x8x16xbf16> to vector<8x16xbf16>
    %cst_61 = arith.constant dense<0.000000e+00> : vector<256x16xf32>
    %107 = tpu.matmul %104, %106, %cst_61 {dimension_numbers = #tpu.dot_dimension_numbers<[1], [0], [0], [1], [0, 0, 1, 1], [], []>} : vector<256x8xbf16>, vector<8x16xbf16>, vector<256x16xf32> -> vector<256x16xf32>
    %108 = arith.addf %101, %107 : vector<256x16xf32>
    %109 = vector.extract_strided_slice %93 {offsets = [0, 2, 0], sizes = [16, 16, 8], strides = [1, 1, 1]} : vector<18x18x8xf32> to vector<16x16x8xf32>
    %110 = vector.shape_cast %109 : vector<16x16x8xf32> to vector<256x8xf32>
    %111 = arith.truncf %110 : vector<256x8xf32> to vector<256x8xbf16>
    %c2_62 = arith.constant 2 : index
    %c0_63 = arith.constant 0 : index
    %c0_64 = arith.constant 0 : index
    %112 = vector.load %arg4[%c2_62, %c0_63, %c0_64] : memref<9x8x16xbf16, #tpu.memory_space<vmem>>, vector<1x8x16xbf16>
    %113 = vector.shape_cast %112 : vector<1x8x16xbf16> to vector<8x16xbf16>
    %cst_65 = arith.constant dense<0.000000e+00> : vector<256x16xf32>
    %114 = tpu.matmul %111, %113, %cst_65 {dimension_numbers = #tpu.dot_dimension_numbers<[1], [0], [0], [1], [0, 0, 1, 1], [], []>} : vector<256x8xbf16>, vector<8x16xbf16>, vector<256x16xf32> -> vector<256x16xf32>
    %115 = arith.addf %108, %114 : vector<256x16xf32>
    %116 = vector.extract_strided_slice %93 {offsets = [1, 0, 0], sizes = [16, 16, 8], strides = [1, 1, 1]} : vector<18x18x8xf32> to vector<16x16x8xf32>
    %117 = vector.shape_cast %116 : vector<16x16x8xf32> to vector<256x8xf32>
    %118 = arith.truncf %117 : vector<256x8xf32> to vector<256x8xbf16>
    %c3_66 = arith.constant 3 : index
    %c0_67 = arith.constant 0 : index
    %c0_68 = arith.constant 0 : index
    %119 = vector.load %arg4[%c3_66, %c0_67, %c0_68] : memref<9x8x16xbf16, #tpu.memory_space<vmem>>, vector<1x8x16xbf16>
    %120 = vector.shape_cast %119 : vector<1x8x16xbf16> to vector<8x16xbf16>
    %cst_69 = arith.constant dense<0.000000e+00> : vector<256x16xf32>
    %121 = tpu.matmul %118, %120, %cst_69 {dimension_numbers = #tpu.dot_dimension_numbers<[1], [0], [0], [1], [0, 0, 1, 1], [], []>} : vector<256x8xbf16>, vector<8x16xbf16>, vector<256x16xf32> -> vector<256x16xf32>
    %122 = arith.addf %115, %121 : vector<256x16xf32>
    %123 = vector.extract_strided_slice %93 {offsets = [1, 1, 0], sizes = [16, 16, 8], strides = [1, 1, 1]} : vector<18x18x8xf32> to vector<16x16x8xf32>
    %124 = vector.shape_cast %123 : vector<16x16x8xf32> to vector<256x8xf32>
    %125 = arith.truncf %124 : vector<256x8xf32> to vector<256x8xbf16>
    %c4_70 = arith.constant 4 : index
    %c0_71 = arith.constant 0 : index
    %c0_72 = arith.constant 0 : index
    %126 = vector.load %arg4[%c4_70, %c0_71, %c0_72] : memref<9x8x16xbf16, #tpu.memory_space<vmem>>, vector<1x8x16xbf16>
    %127 = vector.shape_cast %126 : vector<1x8x16xbf16> to vector<8x16xbf16>
    %cst_73 = arith.constant dense<0.000000e+00> : vector<256x16xf32>
    %128 = tpu.matmul %125, %127, %cst_73 {dimension_numbers = #tpu.dot_dimension_numbers<[1], [0], [0], [1], [0, 0, 1, 1], [], []>} : vector<256x8xbf16>, vector<8x16xbf16>, vector<256x16xf32> -> vector<256x16xf32>
    %129 = arith.addf %122, %128 : vector<256x16xf32>
    %130 = vector.extract_strided_slice %93 {offsets = [1, 2, 0], sizes = [16, 16, 8], strides = [1, 1, 1]} : vector<18x18x8xf32> to vector<16x16x8xf32>
    %131 = vector.shape_cast %130 : vector<16x16x8xf32> to vector<256x8xf32>
    %132 = arith.truncf %131 : vector<256x8xf32> to vector<256x8xbf16>
    %c5_74 = arith.constant 5 : index
    %c0_75 = arith.constant 0 : index
    %c0_76 = arith.constant 0 : index
    %133 = vector.load %arg4[%c5_74, %c0_75, %c0_76] : memref<9x8x16xbf16, #tpu.memory_space<vmem>>, vector<1x8x16xbf16>
    %134 = vector.shape_cast %133 : vector<1x8x16xbf16> to vector<8x16xbf16>
    %cst_77 = arith.constant dense<0.000000e+00> : vector<256x16xf32>
    %135 = tpu.matmul %132, %134, %cst_77 {dimension_numbers = #tpu.dot_dimension_numbers<[1], [0], [0], [1], [0, 0, 1, 1], [], []>} : vector<256x8xbf16>, vector<8x16xbf16>, vector<256x16xf32> -> vector<256x16xf32>
    %136 = arith.addf %129, %135 : vector<256x16xf32>
    %137 = vector.extract_strided_slice %93 {offsets = [2, 0, 0], sizes = [16, 16, 8], strides = [1, 1, 1]} : vector<18x18x8xf32> to vector<16x16x8xf32>
    %138 = vector.shape_cast %137 : vector<16x16x8xf32> to vector<256x8xf32>
    %139 = arith.truncf %138 : vector<256x8xf32> to vector<256x8xbf16>
    %c6_78 = arith.constant 6 : index
    %c0_79 = arith.constant 0 : index
    %c0_80 = arith.constant 0 : index
    %140 = vector.load %arg4[%c6_78, %c0_79, %c0_80] : memref<9x8x16xbf16, #tpu.memory_space<vmem>>, vector<1x8x16xbf16>
    %141 = vector.shape_cast %140 : vector<1x8x16xbf16> to vector<8x16xbf16>
    %cst_81 = arith.constant dense<0.000000e+00> : vector<256x16xf32>
    %142 = tpu.matmul %139, %141, %cst_81 {dimension_numbers = #tpu.dot_dimension_numbers<[1], [0], [0], [1], [0, 0, 1, 1], [], []>} : vector<256x8xbf16>, vector<8x16xbf16>, vector<256x16xf32> -> vector<256x16xf32>
    %143 = arith.addf %136, %142 : vector<256x16xf32>
    %144 = vector.extract_strided_slice %93 {offsets = [2, 1, 0], sizes = [16, 16, 8], strides = [1, 1, 1]} : vector<18x18x8xf32> to vector<16x16x8xf32>
    %145 = vector.shape_cast %144 : vector<16x16x8xf32> to vector<256x8xf32>
    %146 = arith.truncf %145 : vector<256x8xf32> to vector<256x8xbf16>
    %c7_82 = arith.constant 7 : index
    %c0_83 = arith.constant 0 : index
    %c0_84 = arith.constant 0 : index
    %147 = vector.load %arg4[%c7_82, %c0_83, %c0_84] : memref<9x8x16xbf16, #tpu.memory_space<vmem>>, vector<1x8x16xbf16>
    %148 = vector.shape_cast %147 : vector<1x8x16xbf16> to vector<8x16xbf16>
    %cst_85 = arith.constant dense<0.000000e+00> : vector<256x16xf32>
    %149 = tpu.matmul %146, %148, %cst_85 {dimension_numbers = #tpu.dot_dimension_numbers<[1], [0], [0], [1], [0, 0, 1, 1], [], []>} : vector<256x8xbf16>, vector<8x16xbf16>, vector<256x16xf32> -> vector<256x16xf32>
    %150 = arith.addf %143, %149 : vector<256x16xf32>
    %151 = vector.extract_strided_slice %93 {offsets = [2, 2, 0], sizes = [16, 16, 8], strides = [1, 1, 1]} : vector<18x18x8xf32> to vector<16x16x8xf32>
    %152 = vector.shape_cast %151 : vector<16x16x8xf32> to vector<256x8xf32>
    %153 = arith.truncf %152 : vector<256x8xf32> to vector<256x8xbf16>
    %c8_86 = arith.constant 8 : index
    %c0_87 = arith.constant 0 : index
    %c0_88 = arith.constant 0 : index
    %154 = vector.load %arg4[%c8_86, %c0_87, %c0_88] : memref<9x8x16xbf16, #tpu.memory_space<vmem>>, vector<1x8x16xbf16>
    %155 = vector.shape_cast %154 : vector<1x8x16xbf16> to vector<8x16xbf16>
    %cst_89 = arith.constant dense<0.000000e+00> : vector<256x16xf32>
    %156 = tpu.matmul %153, %155, %cst_89 {dimension_numbers = #tpu.dot_dimension_numbers<[1], [0], [0], [1], [0, 0, 1, 1], [], []>} : vector<256x8xbf16>, vector<8x16xbf16>, vector<256x16xf32> -> vector<256x16xf32>
    %157 = arith.addf %150, %156 : vector<256x16xf32>
    %158 = arith.truncf %157 : vector<256x16xf32> to vector<256x16xbf16>
    %c0_90 = arith.constant 0 : index
    %c0_91 = arith.constant 0 : index
    %159 = vector.load %arg5[%c0_90, %c0_91] : memref<256x16xbf16, #tpu.memory_space<vmem>>, vector<256x16xbf16>
    tpu.vector_store %arg5[%c0_90, %c0_91], %158 {strides = array<i32>} : memref<256x16xbf16, #tpu.memory_space<vmem>>, vector<256x16xbf16>,
    %cst_92 = arith.constant dense<0.000000e+00> : vector<16xf32>
    %160 = vector.multi_reduction <add>, %157, %cst_92 [0] : vector<256x16xf32> to vector<16xf32>
    %161 = vector.shape_cast %160 : vector<16xf32> to vector<1x16xf32>
    %c0_93 = arith.constant 0 : index
    %c0_94 = arith.constant 0 : index
    %c0_95 = arith.constant 0 : index
    %162 = vector.load %arg6[%c0_93, %c0_94, %c0_95] : memref<1x2x16xf32, #tpu.memory_space<vmem>>, vector<1x1x16xf32>
    %163 = vector.shape_cast %162 : vector<1x1x16xf32> to vector<1x16xf32>
    %164 = vector.shape_cast %161 : vector<1x16xf32> to vector<1x1x16xf32>
    tpu.vector_store %arg6[%c0_93, %c0_94, %c0_95], %164 {strides = array<i32>} : memref<1x2x16xf32, #tpu.memory_space<vmem>>, vector<1x1x16xf32>,
    %165 = arith.mulf %157, %157 : vector<256x16xf32>
    %cst_96 = arith.constant dense<0.000000e+00> : vector<16xf32>
    %166 = vector.multi_reduction <add>, %165, %cst_96 [0] : vector<256x16xf32> to vector<16xf32>
    %167 = vector.shape_cast %166 : vector<16xf32> to vector<1x16xf32>
    %c0_97 = arith.constant 0 : index
    %c1_98 = arith.constant 1 : index
    %c0_99 = arith.constant 0 : index
    %168 = vector.load %arg6[%c0_97, %c1_98, %c0_99] : memref<1x2x16xf32, #tpu.memory_space<vmem>>, vector<1x1x16xf32>
    %169 = vector.shape_cast %168 : vector<1x1x16xf32> to vector<1x16xf32>
    %170 = vector.shape_cast %167 : vector<1x16xf32> to vector<1x1x16xf32>
    tpu.vector_store %arg6[%c0_97, %c1_98, %c0_99], %170 {strides = array<i32>} : memref<1x2x16xf32, #tpu.memory_space<vmem>>, vector<1x1x16xf32>,
    return
  }
  func.func @transform_0(%arg0: i32) -> (i32, i32, i32, i32) {
    %c0_i32 = arith.constant 0 : i32
    %c0_i32_0 = arith.constant 0 : i32
    %c0_i32_1 = arith.constant 0 : i32
    %c0_i32_2 = arith.constant 0 : i32
    return %arg0, %c0_i32, %c0_i32_0, %c0_i32_1 : i32, i32, i32, i32
  }
  func.func @transform_1(%arg0: i32) -> (i32, i32, i32) {
    %c0_i32 = arith.constant 0 : i32
    %c0_i32_0 = arith.constant 0 : i32
    %c0_i32_1 = arith.constant 0 : i32
    %c0_i32_2 = arith.constant 0 : i32
    return %c0_i32, %c0_i32_0, %c0_i32_1 : i32, i32, i32
  }
  func.func @transform_2(%arg0: i32) -> (i32, i32) {
    %c0_i32 = arith.constant 0 : i32
    %c0_i32_0 = arith.constant 0 : i32
    %c0_i32_1 = arith.constant 0 : i32
    return %c0_i32, %c0_i32_0 : i32, i32
  }
  func.func @transform_3(%arg0: i32) -> (i32, i32, i32) {
    %c0_i32 = arith.constant 0 : i32
    %c0_i32_0 = arith.constant 0 : i32
    %c0_i32_1 = arith.constant 0 : i32
    %c0_i32_2 = arith.constant 0 : i32
    return %c0_i32, %c0_i32_0, %c0_i32_1 : i32, i32, i32
  }
  func.func @transform_4(%arg0: i32) -> (i32, i32) {
    %c0_i32 = arith.constant 0 : i32
    %c0_i32_0 = arith.constant 0 : i32
    return %arg0, %c0_i32 : i32, i32
  }
  func.func @transform_5(%arg0: i32) -> (i32, i32, i32) {
    %c0_i32 = arith.constant 0 : i32
    %c0_i32_0 = arith.constant 0 : i32
    %c0_i32_1 = arith.constant 0 : i32
    return %arg0, %c0_i32, %c0_i32_0 : i32, i32, i32
  }
}

module attributes {stable_mosaic.version = 11 : i64} {
  func.func @bn_sa_fuse2_sc_kernel(%arg0: i32, %arg1: memref<256x16xbf16, #tpu.memory_space<vmem>>, %arg2: memref<256x4xbf16, #tpu.memory_space<vmem>>, %arg3: memref<2x16xf32, #tpu.memory_space<vmem>>, %arg4: memref<8x16xf32, #tpu.memory_space<vmem>>, %arg5: memref<5x16xf32, #tpu.memory_space<vmem>>, %arg6: memref<4x16xbf16, #tpu.memory_space<vmem>>, %arg7: memref<256x16xf32, #tpu.memory_space<vmem>>) attributes {dimension_semantics = [#tpu.dimension_semantics<parallel>], iteration_bounds = array<i64: 2>, scalar_prefetch = 0 : i64, scratch_operands = 0 : i64, tpu.core_type = #tpu.core_type<tc>, window_params = [{transform_indices = @transform_0, window_bounds = array<i64: 256, 16>}, {transform_indices = @transform_1, window_bounds = array<i64: 256, 4>}, {pipeline_mode = #tpu.pipeline_mode<synchronous>, transform_indices = @transform_2, window_bounds = array<i64: 2, 16>}, {pipeline_mode = #tpu.pipeline_mode<synchronous>, transform_indices = @transform_3, window_bounds = array<i64: 8, 16>}, {pipeline_mode = #tpu.pipeline_mode<synchronous>, transform_indices = @transform_4, window_bounds = array<i64: 5, 16>}, {pipeline_mode = #tpu.pipeline_mode<synchronous>, transform_indices = @transform_5, window_bounds = array<i64: 4, 16>}, {transform_indices = @transform_6, window_bounds = array<i64: 256, 16>}]} {
    %c0 = arith.constant 0 : index
    %c0_0 = arith.constant 0 : index
    %0 = vector.load %arg1[%c0, %c0_0] : memref<256x16xbf16, #tpu.memory_space<vmem>>, vector<256x16xbf16>
    %1 = arith.extf %0 : vector<256x16xbf16> to vector<256x16xf32>
    %c0_1 = arith.constant 0 : index
    %c0_2 = arith.constant 0 : index
    %2 = vector.load %arg3[%c0_1, %c0_2] : memref<2x16xf32, #tpu.memory_space<vmem>>, vector<1x16xf32>
    %3 = vector.broadcast %2 : vector<1x16xf32> to vector<256x16xf32>
    %4 = arith.mulf %1, %3 : vector<256x16xf32>
    %c1 = arith.constant 1 : index
    %c0_3 = arith.constant 0 : index
    %5 = vector.load %arg3[%c1, %c0_3] : memref<2x16xf32, #tpu.memory_space<vmem>>, vector<1x16xf32>
    %6 = vector.broadcast %5 : vector<1x16xf32> to vector<256x16xf32>
    %7 = arith.addf %4, %6 : vector<256x16xf32>
    %cst = arith.constant 0.000000e+00 : f32
    %8 = vector.broadcast %cst : f32 to vector<256x16xf32>
    %9 = arith.cmpf ogt, %7, %8 : vector<256x16xf32>
    %cst_4 = arith.constant 2.000000e-01 : f32
    %10 = vector.broadcast %cst_4 : f32 to vector<256x16xf32>
    %11 = arith.mulf %10, %7 : vector<256x16xf32>
    %12 = arith.select %9, %7, %11 : vector<256x16xi1>, vector<256x16xf32>
    %cst_5 = arith.constant dense<0.000000e+00> : vector<16xf32>
    %13 = vector.multi_reduction <add>, %12, %cst_5 [0] : vector<256x16xf32> to vector<16xf32>
    %14 = vector.shape_cast %13 : vector<16xf32> to vector<1x16xf32>
    %cst_6 = arith.constant 2.560000e+02 : f32
    %15 = vector.broadcast %cst_6 : f32 to vector<1x16xf32>
    %16 = arith.divf %14, %15 : vector<1x16xf32>
    %17 = arith.mulf %12, %12 : vector<256x16xf32>
    %cst_7 = arith.constant dense<0.000000e+00> : vector<16xf32>
    %18 = vector.multi_reduction <add>, %17, %cst_7 [0] : vector<256x16xf32> to vector<16xf32>
    %19 = vector.shape_cast %18 : vector<16xf32> to vector<1x16xf32>
    %cst_8 = arith.constant 2.560000e+02 : f32
    %20 = vector.broadcast %cst_8 : f32 to vector<1x16xf32>
    %21 = arith.divf %19, %20 : vector<1x16xf32>
    %22 = arith.mulf %16, %16 : vector<1x16xf32>
    %23 = arith.subf %21, %22 : vector<1x16xf32>
    %cst_9 = arith.constant 0.000000e+00 : f32
    %24 = vector.broadcast %cst_9 : f32 to vector<1x16xf32>
    %25 = arith.maximumf %23, %24 : vector<1x16xf32>
    %26 = vector.broadcast %16 : vector<1x16xf32> to vector<256x16xf32>
    %27 = arith.subf %12, %26 : vector<256x16xf32>
    %cst_10 = arith.constant 9.99999974E-6 : f32
    %28 = vector.broadcast %cst_10 : f32 to vector<1x16xf32>
    %29 = arith.addf %25, %28 : vector<1x16xf32>
    %30 = math.rsqrt %29 : vector<1x16xf32>
    %31 = vector.broadcast %30 : vector<1x16xf32> to vector<256x16xf32>
    %32 = arith.mulf %27, %31 : vector<256x16xf32>
    %c5 = arith.constant 5 : index
    %c0_11 = arith.constant 0 : index
    %33 = vector.load %arg4[%c5, %c0_11] : memref<8x16xf32, #tpu.memory_space<vmem>>, vector<1x16xf32>
    %34 = vector.broadcast %33 : vector<1x16xf32> to vector<256x16xf32>
    %35 = arith.mulf %32, %34 : vector<256x16xf32>
    %c6 = arith.constant 6 : index
    %c0_12 = arith.constant 0 : index
    %36 = vector.load %arg4[%c6, %c0_12] : memref<8x16xf32, #tpu.memory_space<vmem>>, vector<1x16xf32>
    %37 = vector.broadcast %36 : vector<1x16xf32> to vector<256x16xf32>
    %38 = arith.addf %35, %37 : vector<256x16xf32>
    %c0_13 = arith.constant 0 : index
    %c0_14 = arith.constant 0 : index
    %39 = vector.load %arg4[%c0_13, %c0_14] : memref<8x16xf32, #tpu.memory_space<vmem>>, vector<1x16xf32>
    %cst_15 = arith.constant 5.000000e-01 : f32
    %40 = vector.broadcast %cst_15 : f32 to vector<1x16xf32>
    %41 = arith.cmpf ogt, %39, %40 : vector<1x16xf32>
    %c1_16 = arith.constant 1 : index
    %c0_17 = arith.constant 0 : index
    %42 = vector.load %arg4[%c1_16, %c0_17] : memref<8x16xf32, #tpu.memory_space<vmem>>, vector<1x16xf32>
    %43 = arith.mulf %42, %16 : vector<1x16xf32>
    %c2 = arith.constant 2 : index
    %c0_18 = arith.constant 0 : index
    %44 = vector.load %arg4[%c2, %c0_18] : memref<8x16xf32, #tpu.memory_space<vmem>>, vector<1x16xf32>
    %45 = arith.addf %43, %44 : vector<1x16xf32>
    %c3 = arith.constant 3 : index
    %c0_19 = arith.constant 0 : index
    %46 = vector.load %arg4[%c3, %c0_19] : memref<8x16xf32, #tpu.memory_space<vmem>>, vector<1x16xf32>
    %47 = vector.broadcast %46 : vector<1x16xf32> to vector<256x16xf32>
    %48 = arith.mulf %47, %38 : vector<256x16xf32>
    %c4 = arith.constant 4 : index
    %c0_20 = arith.constant 0 : index
    %49 = vector.load %arg4[%c4, %c0_20] : memref<8x16xf32, #tpu.memory_space<vmem>>, vector<1x16xf32>
    %50 = vector.broadcast %49 : vector<1x16xf32> to vector<256x16xf32>
    %51 = arith.addf %48, %50 : vector<256x16xf32>
    %52 = vector.shape_cast %41 : vector<1x16xi1> to vector<1x16xi1>
    %53 = vector.broadcast %52 : vector<1x16xi1> to vector<256x16xi1>
    %54 = vector.shape_cast %45 : vector<1x16xf32> to vector<1x16xf32>
    %55 = vector.broadcast %54 : vector<1x16xf32> to vector<256x16xf32>
    %56 = arith.select %53, %55, %51 : vector<256x16xi1>, vector<256x16xf32>
    %57 = arith.negf %56 : vector<256x16xf32>
    %58 = math.exp %57 : vector<256x16xf32>
    %cst_21 = arith.constant 1.000000e+00 : f32
    %59 = vector.broadcast %cst_21 : f32 to vector<256x16xf32>
    %60 = arith.addf %59, %58 : vector<256x16xf32>
    %61 = arith.divf %59, %60 : vector<256x16xf32>
    %62 = arith.mulf %12, %61 : vector<256x16xf32>
    %c0_22 = arith.constant 0 : index
    %c0_23 = arith.constant 0 : index
    %63 = vector.load %arg5[%c0_22, %c0_23] : memref<5x16xf32, #tpu.memory_space<vmem>>, vector<1x16xf32>
    %64 = vector.broadcast %63 : vector<1x16xf32> to vector<256x16xf32>
    %65 = arith.mulf %64, %62 : vector<256x16xf32>
    %c1_24 = arith.constant 1 : index
    %c0_25 = arith.constant 0 : index
    %66 = vector.load %arg5[%c1_24, %c0_25] : memref<5x16xf32, #tpu.memory_space<vmem>>, vector<1x16xf32>
    %67 = vector.broadcast %66 : vector<1x16xf32> to vector<256x16xf32>
    %68 = arith.addf %65, %67 : vector<256x16xf32>
    %cst_26 = arith.constant 0.000000e+00 : f32
    %69 = vector.broadcast %cst_26 : f32 to vector<256x16xf32>
    %70 = arith.cmpf ogt, %68, %69 : vector<256x16xf32>
    %cst_27 = arith.constant 2.000000e-01 : f32
    %71 = vector.broadcast %cst_27 : f32 to vector<256x16xf32>
    %72 = arith.mulf %71, %68 : vector<256x16xf32>
    %73 = arith.select %70, %68, %72 : vector<256x16xi1>, vector<256x16xf32>
    %c2_28 = arith.constant 2 : index
    %c0_29 = arith.constant 0 : index
    %74 = vector.load %arg5[%c2_28, %c0_29] : memref<5x16xf32, #tpu.memory_space<vmem>>, vector<1x16xf32>
    %75 = vector.broadcast %74 : vector<1x16xf32> to vector<256x16xf32>
    %76 = arith.mulf %75, %73 : vector<256x16xf32>
    %c3_30 = arith.constant 3 : index
    %c0_31 = arith.constant 0 : index
    %77 = vector.load %arg5[%c3_30, %c0_31] : memref<5x16xf32, #tpu.memory_space<vmem>>, vector<1x16xf32>
    %78 = vector.broadcast %77 : vector<1x16xf32> to vector<256x16xf32>
    %79 = arith.addf %76, %78 : vector<256x16xf32>
    %cst_32 = arith.constant 0.000000e+00 : f32
    %80 = vector.broadcast %cst_32 : f32 to vector<256x16xf32>
    %81 = arith.cmpf ogt, %79, %80 : vector<256x16xf32>
    %cst_33 = arith.constant 2.000000e-01 : f32
    %82 = vector.broadcast %cst_33 : f32 to vector<256x16xf32>
    %83 = arith.mulf %82, %79 : vector<256x16xf32>
    %84 = arith.select %81, %79, %83 : vector<256x16xi1>, vector<256x16xf32>
    %c0_34 = arith.constant 0 : index
    %c0_35 = arith.constant 0 : index
    %85 = vector.load %arg2[%c0_34, %c0_35] : memref<256x4xbf16, #tpu.memory_space<vmem>>, vector<256x4xbf16>
    %c0_36 = arith.constant 0 : index
    %c0_37 = arith.constant 0 : index
    %86 = vector.load %arg6[%c0_36, %c0_37] : memref<4x16xbf16, #tpu.memory_space<vmem>>, vector<4x16xbf16>
    %cst_38 = arith.constant dense<0.000000e+00> : vector<256x16xf32>
    %87 = tpu.matmul %85, %86, %cst_38 {dimension_numbers = #tpu.dot_dimension_numbers<[1], [0], [0], [1], [0, 0, 1, 1], [], []>} : vector<256x4xbf16>, vector<4x16xbf16>, vector<256x16xf32> -> vector<256x16xf32>
    %c4_39 = arith.constant 4 : index
    %c0_40 = arith.constant 0 : index
    %88 = vector.load %arg5[%c4_39, %c0_40] : memref<5x16xf32, #tpu.memory_space<vmem>>, vector<1x16xf32>
    %89 = vector.broadcast %88 : vector<1x16xf32> to vector<256x16xf32>
    %90 = arith.addf %87, %89 : vector<256x16xf32>
    %91 = arith.addf %90, %84 : vector<256x16xf32>
    %c0_41 = arith.constant 0 : index
    %c0_42 = arith.constant 0 : index
    %92 = vector.load %arg7[%c0_41, %c0_42] : memref<256x16xf32, #tpu.memory_space<vmem>>, vector<256x16xf32>
    tpu.vector_store %arg7[%c0_41, %c0_42], %91 {strides = array<i32>} : memref<256x16xf32, #tpu.memory_space<vmem>>, vector<256x16xf32>,
    return
  }
  func.func @transform_0(%arg0: i32) -> (i32, i32) {
    %c0_i32 = arith.constant 0 : i32
    %c0_i32_0 = arith.constant 0 : i32
    return %arg0, %c0_i32 : i32, i32
  }
  func.func @transform_1(%arg0: i32) -> (i32, i32) {
    %c0_i32 = arith.constant 0 : i32
    %c0_i32_0 = arith.constant 0 : i32
    return %arg0, %c0_i32 : i32, i32
  }
  func.func @transform_2(%arg0: i32) -> (i32, i32) {
    %c0_i32 = arith.constant 0 : i32
    %c0_i32_0 = arith.constant 0 : i32
    %c0_i32_1 = arith.constant 0 : i32
    return %c0_i32, %c0_i32_0 : i32, i32
  }
  func.func @transform_3(%arg0: i32) -> (i32, i32) {
    %c0_i32 = arith.constant 0 : i32
    %c0_i32_0 = arith.constant 0 : i32
    %c0_i32_1 = arith.constant 0 : i32
    return %c0_i32, %c0_i32_0 : i32, i32
  }
  func.func @transform_4(%arg0: i32) -> (i32, i32) {
    %c0_i32 = arith.constant 0 : i32
    %c0_i32_0 = arith.constant 0 : i32
    %c0_i32_1 = arith.constant 0 : i32
    return %c0_i32, %c0_i32_0 : i32, i32
  }
  func.func @transform_5(%arg0: i32) -> (i32, i32) {
    %c0_i32 = arith.constant 0 : i32
    %c0_i32_0 = arith.constant 0 : i32
    %c0_i32_1 = arith.constant 0 : i32
    return %c0_i32, %c0_i32_0 : i32, i32
  }
  func.func @transform_6(%arg0: i32) -> (i32, i32) {
    %c0_i32 = arith.constant 0 : i32
    %c0_i32_0 = arith.constant 0 : i32
    return %arg0, %c0_i32 : i32, i32
  }
}

</mosaic_0001>

<bundles_post_ra>
// kernel: _lambda_.3
= control target key start
LH: loop header
LB: loop body
LE: loop exit
PB: predicated region body
PF: predicated region fallthrough
CT: control target
= control target key end

     0   :  { %s2738_s21 = smov 0   ;;  %s4718_s0 = inlined_call_operand.vmem [shape: bf16[512,16], index: 0, kind: input, shape index: {}]   ;;  %s4719_s1 = inlined_call_operand.vmem [shape: bf16[512,4], index: 1, kind: input, shape index: {}]   ;;  %s4720_s2 = inlined_call_operand.vmem [shape: f32[2,16], index: 2, kind: input, shape index: {}]   ;;  %s4721_s3 = inlined_call_operand.vmem [shape: f32[8,16], index: 3, kind: input, shape index: {}]   ;;  %s4722_s4 = inlined_call_operand.vmem [shape: f32[5,16], index: 4, kind: input, shape index: {}]   ;;  %s4723_s5 = inlined_call_operand.vmem [shape: bf16[4,16], index: 5, kind: input, shape index: {}]   ;;  %s4724_s6 = inlined_call_operand.vmem [shape: f32[512,16], index: 6, kind: output, shape index: {}]  }
   0x1 LB: > { %s2299_s22 = sadd.s32 4294967295, %s2699_s21   ;;  %p2303_p0 = scmp.ge.s32.totalorder %s2699_s21, 1  ;;  %s2699_s21 = sphi %s2738_s21, %s16_s21  }
   0x2   : > { %p224_p1 = scmp.lt.s32.totalorder %s2699_s21, 3 }
   0x4   : > { %p225_p2 = pnand %p2303_p0, %p224_p1 }
   0x6   : > { %228 = sbr.rel (%p225_p2) target bundleno = 482 (0x1e2), region = 44 }
   0xb   : > { %v1942_v0 = vld [vmem:[%s4723_s5] sm:$0x3]  ;;  %vm2074_vm0 = vcmask 1041408   ;;  %s2304_s25 = sshll.u32 %s2299_s22, 5  ;;  %vm2025_vm1 = vcmask 31744   ;;  %vm4758_vm6 = vcmask 130048  }
   0xc   : > { %v2076_v1 = vsel %vm2074_vm0, %v1942_v0, 0  ;;  %p260_p3 = scmp.lt.s32.totalorder %s2304_s25, 63  ;;  %v2791_v27 = vld [vmem:[%s4720_s2] ss:$0 sm:$0xff]  ;;  %v2816_v58 = vld [vmem:[%s4720_s2 + $0x1] ss:$0 sm:$0xff] }
   0xd   : > { %2085 = vmatpush.bf16.msra.mxu0 %v2076_v1  ;;  %2519 = vmatpush.bf16.msra.mxu1 %v2076_v1 }
   0xe   : > { %2520 = vmatpush.bf16.msra.mxu2 %v2076_v1  ;;  %2521 = vmatpush.bf16.msra.mxu3 %v2076_v1  ;;  %s4970_s25 = smov (!%p260_p3, %s2304_s25), 63 }
   0xf   : > { %s2305_s26 = sshll.u32 %s4970_s25, 2  ;;  %s2309_s15 = sshll.u32 %s4970_s25, 3 }
  0x10   : > { %s2755_s29 = scalar_lea.vmem %s4719_s1, %s2305_s26  ;;  %s2776_s8 = scalar_lea.vmem %s4718_s0, %s2305_s26 }
  0x11   : > { %v2424_v2 = vld [vmem:[%s2755_s29] sm:$0xff]  ;;  %v2425_v6 = vld [vmem:[%s2755_s29 + $0x8] sm:$0xff]  ;;  %v2505_v12 = vld [vmem:[%s2776_s8 + $0x10] sm:$0xff]   ;;  %s3678_s18 = scalar_lea.vmem %s4724_s6, %s2309_s15 }
  0x12   : > { %v2428_v3 = vld [vmem:[%s2755_s29 + $0x20] sm:$0xff]  ;;  %2406 = vmatmul.msk.bf16.vlgmr.msra.gmra.mxu0 %vm2025_vm1, %v2424_v2  ;;  %v2429_v7 = vld [vmem:[%s2755_s29 + $0x28] sm:$0xff]  ;;  %v2506_v13 = vld [vmem:[%s2776_s8 + $0x18] sm:$0xff]   ;;  %v2450_v22 = vunpack.c.l.bf16 %v2505_v12  ;;  %v2451_v23 = vunpack.c.h.bf16 %v2505_v12 }
  0x13   : > { %v2432_v4 = vld [vmem:[%s2755_s29 + $0x40] sm:$0xff]  ;;  %2410 = vmatmul.msk.bf16.vlgmr.msra.gmra.mxu1 %vm2025_vm1, %v2428_v3  ;;  %v2433_v8 = vld [vmem:[%s2755_s29 + $0x48] sm:$0xff]  ;;  %v2509_v19 = vld [vmem:[%s2776_s8 + $0x30] sm:$0xff]   ;;  %v2454_v24 = vunpack.c.l.bf16 %v2506_v13  ;;  %v2455_v30 = vunpack.c.h.bf16 %v2506_v13 }
  0x14   : > { %v2436_v5 = vld [vmem:[%s2755_s29 + $0x60] sm:$0xff]  ;;  %2414 = vmatmul.msk.bf16.vlgmr.msra.gmra.mxu2 %vm2025_vm1, %v2432_v4  ;;  %v2437_v9 = vld [vmem:[%s2755_s29 + $0x68] sm:$0xff]  ;;  %v2510_v20 = vld [vmem:[%s2776_s8 + $0x38] sm:$0xff]   ;;  %v2466_v37 = vunpack.c.l.bf16 %v2509_v19  ;;  %v2467_v38 = vunpack.c.h.bf16 %v2509_v19  ;;  %v348_v50 = vmul.f32 %v2791_v27, %v2450_v22  ;;  %v349_v51 = vmul.f32 %v2791_v27, %v2451_v23 }
  0x15   : > { %2418 = vmatmul.msk.bf16.vlgmr.msra.gmra.mxu3 %vm2025_vm1, %v2436_v5  ;;  %v2441_v10 = vld [vmem:[%s2776_s8] sm:$0xff]   ;;  %v2504_v11 = vld [vmem:[%s2776_s8 + $0x8] sm:$0xff]   ;;  %v2426_v28 = vld [vmem:[%s2755_s29 + $0x10] sm:$0xff]  ;;  %v2470_v39 = vunpack.c.l.bf16 %v2510_v20  ;;  %v2471_v40 = vunpack.c.h.bf16 %v2510_v20  ;;  %v350_v52 = vmul.f32 %v2791_v27, %v2454_v24  ;;  %v351_v55 = vmul.f32 %v2791_v27, %v2455_v30 }
  0x16   : > { %v2507_v14 = vld [vmem:[%s2776_s8 + $0x20] sm:$0xff]   ;;  %v2508_v15 = vld [vmem:[%s2776_s8 + $0x28] sm:$0xff]   ;;  %v2442_v16 = vunpack.c.l.bf16 %v2441_v10  ;;  %v2443_v17 = vunpack.c.h.bf16 %v2441_v10  ;;  %v2446_v18 = vunpack.c.l.bf16 %v2504_v11  ;;  %v2447_v21 = vunpack.c.h.bf16 %v2504_v11  ;;  %v2430_v29 = vld [vmem:[%s2755_s29 + $0x30] sm:$0xff] }
  0x17   : > { %v2511_v25 = vld [vmem:[%s2776_s8 + $0x40] sm:$0xff]   ;;  %v2512_v26 = vld [vmem:[%s2776_s8 + $0x48] sm:$0xff]   ;;  %v2458_v31 = vunpack.c.l.bf16 %v2507_v14  ;;  %v2459_v32 = vunpack.c.h.bf16 %v2507_v14  ;;  %v2462_v33 = vunpack.c.l.bf16 %v2508_v15  ;;  %v2434_v34 = vld [vmem:[%s2755_s29 + $0x50] sm:$0xff]  ;;  %v2463_v36 = vunpack.c.h.bf16 %v2508_v15 }
  0x18   : > { %v2438_v35 = vld [vmem:[%s2755_s29 + $0x70] sm:$0xff]  ;;  %v2474_v41 = vunpack.c.l.bf16 %v2511_v25  ;;  %v2475_v42 = vunpack.c.h.bf16 %v2511_v25  ;;  %v2478_v43 = vunpack.c.l.bf16 %v2512_v26  ;;  %v344_v45 = vmul.f32 %v2791_v27, %v2442_v16  ;;  %v2514_v54 = vld [vmem:[%s2776_s8 + $0x58] sm:$0xff]   ;;  %v2515_v63 = vld [vmem:[%s2776_s8 + $0x60] sm:$0xff]  }
  0x19   : > { %v2513_v44 = vld [vmem:[%s2776_s8 + $0x50] sm:$0xff]   ;;  %v345_v46 = vmul.f32 %v2791_v27, %v2443_v17  ;;  %v346_v47 = vmul.f32 %v2791_v27, %v2446_v18  ;;  %v347_v48 = vmul.f32 %v2791_v27, %v2447_v21  ;;  %v2479_v49 = vunpack.c.h.bf16 %v2512_v26  ;;  %v2516_v5 = vld [vmem:[%s2776_s8 + $0x68] sm:$0xff]   ;;  %v2518_v10 = vld [vmem:[%s2776_s8 + $0x78] sm:$0xff]  }
  0x1a   : > { %v2482_v53 = vunpack.c.l.bf16 %v2513_v44  ;;  %v352_v56 = vmul.f32 %v2791_v27, %v2458_v31  ;;  %v353_v57 = vmul.f32 %v2791_v27, %v2459_v32  ;;  %v2483_v59 = vunpack.c.h.bf16 %v2513_v44 }
  0x1b   : > { %v354_v60 = vmul.f32 %v2791_v27, %v2462_v33  ;;  %v355_v61 = vmul.f32 %v2791_v27, %v2463_v36  ;;  %v356_v62 = vmul.f32 %v2791_v27, %v2466_v37  ;;  %v357_v0 = vmul.f32 %v2791_v27, %v2467_v38 }
  0x1c   : > { %v358_v1 = vmul.f32 %v2791_v27, %v2470_v39  ;;  %v359_v2 = vmul.f32 %v2791_v27, %v2471_v40  ;;  %v360_v3 = vmul.f32 %v2791_v27, %v2474_v41  ;;  %v2486_v4 = vunpack.c.l.bf16 %v2514_v54  ;;  %v2427_v39 = vld [vmem:[%s2755_s29 + $0x18] sm:$0xff] }
  0x1d   : > { %v2837_v11 = vmul.f32 %v2791_v27, %v2482_v53  ;;  %v378_v12 = vadd.f32 %v2816_v58, %v344_v45  ;;  %v379_v13 = vadd.f32 %v2816_v58, %v345_v46  ;;  %v380_v14 = vadd.f32 %v2816_v58, %v346_v47  ;;  %v2431_v40 = vld [vmem:[%s2755_s29 + $0x38] sm:$0xff] }
  0x1e   : > { %v2487_v15 = vunpack.c.h.bf16 %v2514_v54  ;;  %v2490_v16 = vunpack.c.l.bf16 %v2515_v63  ;;  %v381_v17 = vadd.f32 %v2816_v58, %v347_v48  ;;  %v2844_v18 = vadd.f32 %v2816_v58, %v348_v50  ;;  %v2435_v45 = vld [vmem:[%s2755_s29 + $0x58] sm:$0xff] }
  0x1f   : > { %v2491_v19 = vunpack.c.h.bf16 %v2515_v63  ;;  %v2494_v20 = vunpack.c.l.bf16 %v2516_v5  ;;  %v2495_v21 = vunpack.c.h.bf16 %v2516_v5  ;;  %v2847_v22 = vadd.f32 %v2816_v58, %v349_v51  ;;  %v2439_v46 = vld [vmem:[%s2755_s29 + $0x78] sm:$0xff] }
  0x20   : > { %v2502_v25 = vunpack.c.l.bf16 %v2518_v10  ;;  %v2503_v26 = vunpack.c.h.bf16 %v2518_v10  ;;  %v2854_v30 = vadd.f32 %v2816_v58, %v351_v55  ;;  %v2857_v31 = vadd.f32 %v2816_v58, %v352_v56 }
  0x21   : > { %v366_v32 = vmul.f32 %v2791_v27, %v2486_v4  ;;  %v367_v33 = vmul.f32 %v2791_v27, %v2487_v15  ;;  %vm410_vm2 = vcmp.gt.f32.partialorder %v378_v12, 0.0  ;;  %v370_v36 = vmul.f32 %v2791_v27, %v2494_v20 }
  0x22   : > { %2407 = vmatmul.msk.bf16.gmra.mxu0 %vm2025_vm1, %v2425_v6  ;;  %v361_v6 = vmul.f32 %v2791_v27, %v2475_v42  ;;  %v371_v37 = vmul.f32 %v2791_v27, %v2495_v21  ;;  %v442_v38 = vmul.f32 0.2, %v378_v12  ;;  %v375_v44 = vmul.f32 %v2791_v27, %v2503_v26 }
  0x23   : > { %2411 = vmatmul.msk.bf16.gmra.mxu1 %vm2025_vm1, %v2429_v7  ;;  %v2829_v7 = vmul.f32 %v2791_v27, %v2478_v43  ;;  %v374_v43 = vmul.f32 %v2791_v27, %v2502_v25  ;;  %v2874_v47 = vadd.f32 %v2816_v58, %v353_v57  ;;  %v2877_v48 = vadd.f32 %v2816_v58, %v354_v60 }
  0x24   : > { %2415 = vmatmul.msk.bf16.gmra.mxu2 %vm2025_vm1, %v2433_v8  ;;  %v2832_v8 = vmul.f32 %v2791_v27, %v2479_v49  ;;  %v443_v49 = vmul.f32 0.2, %v379_v13  ;;  %v444_v50 = vmul.f32 0.2, %v380_v14  ;;  %v2880_v51 = vadd.f32 %v2816_v58, %v355_v61 }
  0x25   : > { %2419 = vmatmul.msk.bf16.gmra.mxu3 %vm2025_vm1, %v2437_v9  ;;  %v2517_v9 = vld [vmem:[%s2776_s8 + $0x70] sm:$0xff]   ;;  %vm411_vm3 = vcmp.gt.f32.partialorder %v379_v13, 0.0  ;;  %vm412_vm4 = vcmp.gt.f32.partialorder %v380_v14, 0.0  ;;  %v2889_v53 = vadd.f32 %v2816_v58, %v358_v1  ;;  %v445_v54 = vmul.f32 0.2, %v381_v17 }
  0x26   : > { %v2498_v23 = vunpack.c.l.bf16 %v2517_v9  ;;  %v2499_v24 = vunpack.c.h.bf16 %v2517_v9  ;;  %v2892_v55 = vsel %vm410_vm2, %v378_v12, %v442_v38  ;;  %v2897_v56 = vadd.f32 %v2816_v58, %v359_v2 }
  0x27   : > { %v2900_v57 = vadd.f32 %v2816_v58, %v360_v3  ;;  %vm413_vm5 = vcmp.gt.f32.partialorder %v381_v17, 0.0  ;;  %v446_v60 = vmul.f32 0.2, %v2844_v18  ;;  %v2909_v61 = vsel %vm411_vm3, %v379_v13, %v443_v49 }
  0x28   : > { %v372_v41 = vmul.f32 %v2791_v27, %v2498_v23  ;;  %v373_v42 = vmul.f32 %v2791_v27, %v2499_v24  ;;  %v2916_v63 = vadd.f32 %v2816_v58, %v2829_v7  ;;  %vm414_vm7 = vcmp.gt.f32.partialorder %v2844_v18, 0.0 }
  0x29   : > { %v507_v1 = vsel %vm4758_vm6, %v2892_v55, 0.0  ;;  %v2927_v2 = vadd.f32 %v2816_v58, %v2837_v11  ;;  %v447_v4 = vmul.f32 0.2, %v2847_v22  ;;  %v2933_v5 = vsel %vm413_vm5, %v381_v17, %v445_v54 }
  0x2a   : > { %4771 = vst [vmem:[#allocation3_spill] sm:$0xff] %v2933_v5  ;;  %vm415_vm8 = vcmp.gt.f32.partialorder %v2847_v22, 0.0  ;;  %v508_v7 = vsel %vm4758_vm6, %v2909_v61, 0.0  ;;  %v2944_v9 = vadd.f32 %v2816_v58, %v367_v33  ;;  %v2948_v11 = vsel %vm414_vm7, %v2844_v18, %v446_v60 }
  0x2b   : > { %4772 = vst [vmem:[#allocation4_spill] sm:$0xff] %v2948_v11  ;;  %v509_v12 = vadd.f32 %v508_v7, %v507_v1  ;;  %v512_v15 = vsel %vm4758_vm6, %v2933_v5, 0.0  ;;  %v449_v17 = vmul.f32 0.2, %v2854_v30  ;;  %v2964_v18 = vsel %vm415_vm8, %v2847_v22, %v447_v4 }
  0x2c   : > { %4773 = vst [vmem:[#allocation5_spill] sm:$0xff] %v2964_v18  ;;  %v2967_v20 = vadd.f32 %v2816_v58, %v371_v37  ;;  %v2970_v21 = vadd.f32 %v2816_v58, %v372_v41  ;;  %vm417_vm10 = vcmp.gt.f32.partialorder %v2854_v30, 0.0  ;;  %v514_v23 = vsel %vm4758_vm6, %v2948_v11, 0.0 }
  0x2d   : > { %v2976_v24 = vadd.f32 %v2816_v58, %v373_v42  ;;  %v450_v25 = vmul.f32 0.2, %v2857_v31  ;;  %vm418_vm11 = vcmp.gt.f32.partialorder %v2857_v31, 0.0  ;;  %v516_v33 = vsel %vm4758_vm6, %v2964_v18, 0.0 }
  0x2e   : > { %vm419_vm12 = vcmp.gt.f32.partialorder %v2874_v47, 0.0  ;;  %vm420_vm13 = vcmp.gt.f32.partialorder %v2877_v48, 0.0  ;;  %v585_v37 = vmul.f32 %v2909_v61, %v2909_v61  ;;  %v452_v38 = vmul.f32 0.2, %v2877_v48 }
  0x2f   : > { %vm421_vm14 = vcmp.gt.f32.partialorder %v2880_v51, 0.0  ;;  %v587_v42 = vmul.f32 %v2933_v5, %v2933_v5  ;;  %v588_v49 = vmul.f32 %v2948_v11, %v2948_v11  ;;  %vm425_vm2 = vcmp.gt.f32.partialorder %v2897_v56, 0.0 }
  0x30   : > { %v617_v54 = vsel %vm4758_vm6, %v585_v37, 0.0  ;;  %v3031_v60 = vsel %vm420_vm13, %v2877_v48, %v452_v38  ;;  %v457_v37 = vmul.f32 0.2, %v2897_v56  ;;  %vm426_vm3 = vcmp.gt.f32.partialorder %v2900_v57, 0.0 }
  0x31   : > { %4775 = vst [vmem:[#allocation7_spill] sm:$0xff] %v3031_v60  ;;  %vm428_vm5 = vcmp.gt.f32.partialorder %v2916_v63, 0.0  ;;  %vm430_vm8 = vcmp.gt.f32.partialorder %v2927_v2, 0.0 }
  0x32   : > { %2408 = vmatmul.msk.bf16.gmra.mxu0 %vm2025_vm1, %v2426_v28  ;;  %v365_v28 = vmul.f32 %v2791_v27, %v2483_v59  ;;  %v2905_v59 = vadd.f32 %v2816_v58, %v361_v6  ;;  %v2936_v6 = vadd.f32 %v2816_v58, %v366_v32  ;;  %v2986_v32 = vadd.f32 %v2816_v58, %v375_v44 }
  0x33   : > { %2412 = vmatmul.msk.bf16.gmra.mxu1 %vm2025_vm1, %v2430_v29  ;;  %v2851_v29 = vadd.f32 %v2816_v58, %v350_v52  ;;  %v2883_v52 = vadd.f32 %v2816_v58, %v356_v62  ;;  %v2912_v62 = vsel %vm412_vm4, %v380_v14, %v444_v50 }
  0x34   : > { %2416 = vmatmul.msk.bf16.gmra.mxu2 %vm2025_vm1, %v2434_v34  ;;  %v368_v34 = vmul.f32 %v2791_v27, %v2490_v16  ;;  %4770 = vst [vmem:[#allocation2_spill] sm:$0xff] %v2912_v62  ;;  %v2930_v3 = vadd.f32 %v2816_v58, %v365_v28  ;;  %v2960_v16 = vadd.f32 %v2816_v58, %v370_v36  ;;  %vm427_vm4 = vcmp.gt.f32.partialorder %v2905_v59, 0.0 }
  0x35   : > { %2420 = vmatmul.msk.bf16.gmra.mxu3 %vm2025_vm1, %v2438_v35  ;;  %v369_v35 = vmul.f32 %v2791_v27, %v2491_v19  ;;  %v2886_v27 = vadd.f32 %v2816_v58, %v357_v0  ;;  %v2920_v0 = vadd.f32 %v2816_v58, %v2832_v8  ;;  %v510_v8 = vsel %vm4758_vm6, %v2912_v62, 0.0 }
  0x36   : > { %v448_v10 = vmul.f32 0.2, %v2851_v29  ;;  %v2951_v13 = vadd.f32 %v2816_v58, %v368_v34  ;;  %vm416_vm9 = vcmp.gt.f32.partialorder %v2851_v29, 0.0  ;;  %v511_v19 = vadd.f32 %v510_v8, %v509_v12 }
  0x37   : > { %v2954_v14 = vadd.f32 %v2816_v58, %v369_v35  ;;  %v2983_v28 = vadd.f32 %v2816_v58, %v374_v43  ;;  %v451_v34 = vmul.f32 0.2, %v2874_v47  ;;  %v2994_v35 = vsel %vm417_vm10, %v2854_v30, %v449_v17 }
  0x38   : > { %v2980_v22 = vsel %vm416_vm9, %v2851_v29, %v448_v10  ;;  %v513_v26 = vadd.f32 %v512_v15, %v511_v19  ;;  %4774 = vst [vmem:[#allocation6_spill] sm:$0xff] %v2994_v35  ;;  %v584_v58 = vmul.f32 %v2892_v55, %v2892_v55  ;;  %v586_v30 = vmul.f32 %v2912_v62, %v2912_v62 }
  0x39   : > { %v518_v36 = vsel %vm4758_vm6, %v2980_v22, 0.0  ;;  %vm422_vm15 = vcmp.gt.f32.partialorder %v2883_v52, 0.0  ;;  %v520_v41 = vsel %vm4758_vm6, %v2994_v35, 0.0  ;;  %v453_v43 = vmul.f32 0.2, %v2880_v51 }
  0x3a   : > { %v515_v29 = vadd.f32 %v514_v23, %v513_v26  ;;  %v454_v44 = vmul.f32 0.2, %v2883_v52  ;;  %v616_v50 = vsel %vm4758_vm6, %v584_v58, 0.0  ;;  %vm423_vm0 = vcmp.gt.f32.partialorder %v2886_v27, 0.0 }
  0x3b   : > { %v618_v4 = vadd.f32 %v617_v54, %v616_v50  ;;  %v589_v8 = vmul.f32 %v2964_v18, %v2964_v18  ;;  %v621_v10 = vsel %vm4758_vm6, %v587_v42, 0.0  ;;  %v455_v12 = vmul.f32 0.2, %v2886_v27 }
  0x3c   : > { %v3044_v48 = vsel %vm421_vm14, %v2880_v51, %v453_v43  ;;  %v526_v19 = vsel %vm4758_vm6, %v3031_v60, 0.0  ;;  %v590_v23 = vmul.f32 %v2980_v22, %v2980_v22  ;;  %v456_v26 = vmul.f32 0.2, %v2889_v53 }
  0x3d   : > { %4776 = vst [vmem:[#allocation8_spill] sm:$0xff] %v3044_v48  ;;  %v625_v58 = vsel %vm4758_vm6, %v589_v8, 0.0  ;;  %v3068_v38 = vsel %vm423_vm0, %v2886_v27, %v455_v12  ;;  %v458_v43 = vmul.f32 0.2, %v2900_v57  ;;  %v459_v54 = vmul.f32 0.2, %v2905_v59 }
  0x3e   : > { %4778 = vst [vmem:[#allocation10_spill] sm:$0xff] %v3068_v38  ;;  %v627_v42 = vsel %vm4758_vm6, %v590_v23, 0.0  ;;  %vm429_vm7 = vcmp.gt.f32.partialorder %v2920_v0, 0.0  ;;  %vm431_vm9 = vcmp.gt.f32.partialorder %v2930_v3, 0.0  ;;  %vm432_vm10 = vcmp.gt.f32.partialorder %v2936_v6, 0.0 }
  0x3f   : > { %v3104_v12 = vsel %vm426_vm3, %v2900_v57, %v458_v43  ;;  %vm435_vm13 = vcmp.gt.f32.partialorder %v2954_v14, 0.0  ;;  %vm436_vm14 = vcmp.gt.f32.partialorder %v2960_v16, 0.0  ;;  %vm438_vm0 = vcmp.gt.f32.partialorder %v2970_v21, 0.0 }
  0x40   : > { %vm441_vm3 = vcmp.gt.f32.partialorder %v2986_v32, 0.0 }
  0x42   : > { %2409 = vmatmul.msk.bf16.gmra.mxu0 %vm2025_vm1, %v2427_v39  ;;  %v3005_v39 = vsel %vm418_vm11, %v2857_v31, %v450_v25  ;;  %v3020_v31 = vsel %vm419_vm12, %v2874_v47, %v451_v34  ;;  %v619_v47 = vsel %vm4758_vm6, %v586_v30, 0.0  ;;  %v623_v25 = vsel %vm4758_vm6, %v588_v49, 0.0 }
  0x43   : > { %2413 = vmatmul.msk.bf16.gmra.mxu1 %vm2025_vm1, %v2431_v40  ;;  %v517_v40 = vadd.f32 %v516_v33, %v515_v29  ;;  %v524_v7 = vsel %vm4758_vm6, %v3020_v31, 0.0  ;;  %v620_v17 = vadd.f32 %v619_v47, %v618_v4  ;;  %v3056_v33 = vsel %vm422_vm15, %v2883_v52, %v454_v44 }
  0x44   : > { %2417 = vmatmul.msk.bf16.gmra.mxu2 %vm2025_vm1, %v2435_v45  ;;  %4777 = vst [vmem:[#allocation9_spill] sm:$0xff] %v3056_v33  ;;  %v528_v29 = vsel %vm4758_vm6, %v3044_v48, 0.0  ;;  %v530_v30 = vsel %vm4758_vm6, %v3056_v33, 0.0  ;;  %v593_v49 = vmul.f32 %v3020_v31, %v3020_v31  ;;  %vm433_vm11 = vcmp.gt.f32.partialorder %v2944_v9, 0.0 }
  0x45   : > { %2421 = vmatmul.msk.bf16.gmra.mxu3 %vm2025_vm1, %v2439_v46  ;;  %v519_v45 = vadd.f32 %v518_v36, %v517_v40  ;;  %v522_v46 = vsel %vm4758_vm6, %v3005_v39, 0.0  ;;  %vm424_vm1 = vcmp.gt.f32.partialorder %v2889_v53, 0.0  ;;  %v622_v34 = vadd.f32 %v621_v10, %v620_v17 }
  0x46   : > { %v591_v36 = vmul.f32 %v2994_v35, %v2994_v35  ;;  %v3080_v44 = vsel %vm424_vm1, %v2889_v53, %v456_v26  ;;  %v460_v10 = vmul.f32 0.2, %v2916_v63  ;;  %v633_v23 = vsel %vm4758_vm6, %v593_v49, 0.0 }
  0x47   : > { %v521_v1 = vadd.f32 %v520_v41, %v519_v45  ;;  %v624_v40 = vadd.f32 %v623_v25, %v622_v34  ;;  %v592_v41 = vmul.f32 %v3005_v39, %v3005_v39  ;;  %4779 = vst [vmem:[#allocation11_spill] sm:$0xff] %v3080_v44  ;;  %v534_v47 = vsel %vm4758_vm6, %v3080_v44, 0.0 }
  0x48   : > { %v629_v50 = vsel %vm4758_vm6, %v591_v36, 0.0  ;;  %v461_v25 = vmul.f32 0.2, %v2920_v0  ;;  %v3116_v26 = vsel %vm427_vm4, %v2905_v59, %v459_v54  ;;  %v538_v34 = vsel %vm4758_vm6, %v3104_v12, 0.0 }
  0x49   : > { %v523_v15 = vadd.f32 %v522_v46, %v521_v1  ;;  %v626_v45 = vadd.f32 %v625_v58, %v624_v40  ;;  %v532_v46 = vsel %vm4758_vm6, %v3068_v38, 0.0  ;;  %v3092_v1 = vsel %vm425_vm2, %v2897_v56, %v457_v37 }
  0x4a   : > { %4780 = vst [vmem:[#allocation12_spill] sm:$0xff] %v3092_v1  ;;  %v631_v8 = vsel %vm4758_vm6, %v592_v41, 0.0  ;;  %v536_v17 = vsel %vm4758_vm6, %v3092_v1, 0.0  ;;  %v462_v58 = vmul.f32 0.2, %v2927_v2  ;;  %v3128_v37 = vsel %vm428_vm5, %v2916_v63, %v460_v10 }
  0x4b   : > { %v525_v51 = vadd.f32 %v524_v7, %v523_v15  ;;  %v628_v4 = vadd.f32 %v627_v42, %v626_v45  ;;  %v594_v7 = vmul.f32 %v3031_v60, %v3031_v60  ;;  %v540_v40 = vsel %vm4758_vm6, %v3116_v26, 0.0 }
  0x4c   : > { %v463_v42 = vmul.f32 0.2, %v2930_v3  ;;  %v3140_v43 = vsel %vm429_vm7, %v2920_v0, %v461_v25  ;;  %v542_v45 = vsel %vm4758_vm6, %v3128_v37, 0.0  ;;  %v3152_v54 = vsel %vm430_vm8, %v2927_v2, %v462_v58 }
  0x4d   : > { %v527_v52 = vadd.f32 %v526_v19, %v525_v51  ;;  %v630_v15 = vadd.f32 %v629_v50, %v628_v4  ;;  %v595_v19 = vmul.f32 %v3044_v48, %v3044_v48  ;;  %v635_v36 = vsel %vm4758_vm6, %v594_v7, 0.0  ;;  %4781 = vst [vmem:[#allocation13_spill] sm:$0xff] %v3140_v43 }
  0x4e   : > { %v464_v50 = vmul.f32 0.2, %v2936_v6  ;;  %4782 = vst [vmem:[#allocation14_spill] sm:$0xff] %v3152_v54  ;;  %v544_v4 = vsel %vm4758_vm6, %v3140_v43, 0.0  ;;  %v3164_v10 = vsel %vm431_vm9, %v2930_v3, %v463_v42  ;;  %vm434_vm12 = vcmp.gt.f32.partialorder %v2951_v13, 0.0 }
  0x4f   : > { %v529_v27 = vadd.f32 %v528_v29, %v527_v52  ;;  %v632_v51 = vadd.f32 %v631_v8, %v630_v15  ;;  %v596_v29 = vmul.f32 %v3056_v33, %v3056_v33  ;;  %v637_v41 = vsel %vm4758_vm6, %v595_v19, 0.0  ;;  %4783 = vst [vmem:[#allocation15_spill] sm:$0xff] %v3164_v10 }
  0x50   : > { %v465_v8 = vmul.f32 0.2, %v2944_v9  ;;  %v546_v15 = vsel %vm4758_vm6, %v3152_v54, 0.0  ;;  %v3176_v25 = vsel %vm432_vm10, %v2936_v6, %v464_v50  ;;  %vm437_vm15 = vcmp.gt.f32.partialorder %v2967_v20, 0.0 }
  0x51   : > { %v531_v53 = vadd.f32 %v530_v30, %v529_v27  ;;  %v634_v52 = vadd.f32 %v633_v23, %v632_v51  ;;  %v597_v30 = vmul.f32 %v3068_v38, %v3068_v38  ;;  %v639_v49 = vsel %vm4758_vm6, %v596_v29, 0.0  ;;  %4784 = vst [vmem:[#allocation16_spill] sm:$0xff] %v3176_v25 }
  0x52   : > { %v466_v23 = vmul.f32 0.2, %v2951_v13  ;;  %v548_v51 = vsel %vm4758_vm6, %v3164_v10, 0.0  ;;  %v3188_v58 = vsel %vm433_vm11, %v2944_v9, %v465_v8  ;;  %vm439_vm1 = vcmp.gt.f32.partialorder %v2976_v24, 0.0 }
  0x53   : > { %v533_v56 = vadd.f32 %v532_v46, %v531_v53  ;;  %v636_v27 = vadd.f32 %v635_v36, %v634_v52  ;;  %v598_v46 = vmul.f32 %v3080_v44, %v3080_v44  ;;  %v641_v7 = vsel %vm4758_vm6, %v597_v30, 0.0  ;;  %4785 = vst [vmem:[#allocation17_spill] sm:$0xff] %v3188_v58 }
  0x54   : > { %v467_v36 = vmul.f32 0.2, %v2954_v14  ;;  %v550_v52 = vsel %vm4758_vm6, %v3176_v25, 0.0  ;;  %v3200_v42 = vsel %vm434_vm12, %v2951_v13, %v466_v23  ;;  %vm440_vm2 = vcmp.gt.f32.partialorder %v2983_v28, 0.0 }
  0x55   : > { %v535_v57 = vadd.f32 %v534_v47, %v533_v56  ;;  %v638_v53 = vadd.f32 %v637_v41, %v636_v27  ;;  %v599_v47 = vmul.f32 %v3092_v1, %v3092_v1  ;;  %v643_v19 = vsel %vm4758_vm6, %v598_v46, 0.0 }
  0x56   : > { %v468_v41 = vmul.f32 0.2, %v2960_v16  ;;  %v552_v27 = vsel %vm4758_vm6, %v3188_v58, 0.0  ;;  %v3212_v50 = vsel %vm435_vm13, %v2954_v14, %v467_v36 }
  0x57   : > { %v537_v59 = vadd.f32 %v536_v17, %v535_v57  ;;  %v640_v56 = vadd.f32 %v639_v49, %v638_v53  ;;  %v600_v17 = vmul.f32 %v3104_v12, %v3104_v12  ;;  %v645_v29 = vsel %vm4758_vm6, %v599_v47, 0.0  ;;  %4786 = vst [vmem:[#allocation18_spill] sm:$0xff] %v3212_v50 }
  0x58   : > { %v469_v49 = vmul.f32 0.2, %v2967_v20  ;;  %v554_v53 = vsel %vm4758_vm6, %v3200_v42, 0.0  ;;  %v3224_v8 = vsel %vm436_vm14, %v2960_v16, %v468_v41 }
  0x59   : > { %v539_v63 = vadd.f32 %v538_v34, %v537_v59  ;;  %v642_v57 = vadd.f32 %v641_v7, %v640_v56  ;;  %v601_v34 = vmul.f32 %v3116_v26, %v3116_v26  ;;  %v647_v30 = vsel %vm4758_vm6, %v600_v17, 0.0 }
  0x5a   : > { %v470_v7 = vmul.f32 0.2, %v2970_v21  ;;  %v556_v56 = vsel %vm4758_vm6, %v3212_v50, 0.0  ;;  %v3236_v23 = vsel %vm437_vm15, %v2967_v20, %v469_v49 }
  0x5b   : > { %v541_v0 = vadd.f32 %v540_v40, %v539_v63  ;;  %v644_v59 = vadd.f32 %v643_v19, %v642_v57  ;;  %v602_v40 = vmul.f32 %v3128_v37, %v3128_v37  ;;  %v649_v46 = vsel %vm4758_vm6, %v601_v34, 0.0  ;;  %4787 = vst [vmem:[#allocation19_spill] sm:$0xff] %v3236_v23 }
  0x5c   : > { %v471_v19 = vmul.f32 0.2, %v2976_v24  ;;  %v558_v57 = vsel %vm4758_vm6, %v3224_v8, 0.0  ;;  %v3248_v36 = vsel %vm438_vm0, %v2970_v21, %v470_v7 }
  0x5d   : > { %v543_v2 = vadd.f32 %v542_v45, %v541_v0  ;;  %v646_v63 = vadd.f32 %v645_v29, %v644_v59  ;;  %v603_v45 = vmul.f32 %v3140_v43, %v3140_v43  ;;  %v651_v47 = vsel %vm4758_vm6, %v602_v40, 0.0  ;;  %4788 = vst [vmem:[#allocation20_spill] sm:$0xff] %v3248_v36 }
  0x5e   : > { %v472_v29 = vmul.f32 0.2, %v2983_v28  ;;  %v560_v59 = vsel %vm4758_vm6, %v3236_v23, 0.0  ;;  %v3259_v41 = vsel %vm439_vm1, %v2976_v24, %v471_v19  ;;  %v2701_v24 = vmov 256.0  }
  0x5f   : > { %v545_v3 = vadd.f32 %v544_v4, %v543_v2  ;;  %v648_v0 = vadd.f32 %v647_v30, %v646_v63  ;;  %v604_v4 = vmul.f32 %v3152_v54, %v3152_v54  ;;  %v653_v17 = vsel %vm4758_vm6, %v603_v45, 0.0  ;;  %4789 = vst [vmem:[#allocation21_spill] sm:$0xff] %v3259_v41 }
  0x60   : > { %v473_v30 = vmul.f32 0.2, %v2986_v32  ;;  %v562_v63 = vsel %vm4758_vm6, %v3248_v36, 0.0  ;;  %2543 = vrcp.f32 %v2701_v24 }
  0x61   : > { %v547_v6 = vadd.f32 %v546_v15, %v545_v3  ;;  %v650_v2 = vadd.f32 %v649_v46, %v648_v0  ;;  %v605_v15 = vmul.f32 %v3164_v10, %v3164_v10  ;;  %v655_v34 = vsel %vm4758_vm6, %v604_v4, 0.0 }
  0x62   : > { %v3270_v46 = vsel %vm440_vm2, %v2983_v28, %v472_v29  ;;  %v564_v0 = vsel %vm4758_vm6, %v3259_v41, 0.0 }
  0x63   : > { %v549_v9 = vadd.f32 %v548_v51, %v547_v6  ;;  %v652_v3 = vadd.f32 %v651_v47, %v650_v2  ;;  %v606_v51 = vmul.f32 %v3176_v25, %v3176_v25  ;;  %v657_v40 = vsel %vm4758_vm6, %v605_v15, 0.0  ;;  %4790 = vst [vmem:[#allocation22_spill] sm:$0xff] %v3270_v46 }
  0x64   : > { %v3278_v47 = vsel %vm441_vm3, %v2986_v32, %v473_v30  ;;  %v566_v28 = vsel %vm4758_vm6, %v3270_v46, 0.0  ;;  %v610_v2 = vmul.f32 %v3224_v8, %v3224_v8 }
  0x65   : > { %v551_v13 = vadd.f32 %v550_v52, %v549_v9  ;;  %v654_v6 = vadd.f32 %v653_v17, %v652_v3  ;;  %v607_v52 = vmul.f32 %v3188_v58, %v3188_v58  ;;  %v659_v45 = vsel %vm4758_vm6, %v606_v51, 0.0  ;;  %4791 = vst [vmem:[#allocation23_spill] sm:$0xff] %v3278_v47 }
  0x66   : > { %v568_v19 = vsel %vm4758_vm6, %v3278_v47, 0.0  ;;  %v2544_v3 = vpop.eup %2543  ;;  %v667_v29 = vsel %vm4758_vm6, %v610_v2, 0.0  ;;  %v615_v24 = vmul.f32 %v3278_v47, %v3278_v47 }
  0x67   : > { %v553_v14 = vadd.f32 %v552_v27, %v551_v13  ;;  %v656_v21 = vadd.f32 %v655_v34, %v654_v6  ;;  %v608_v27 = vmul.f32 %v3200_v42, %v3200_v42  ;;  %v661_v4 = vsel %vm4758_vm6, %v607_v52, 0.0 }
  0x68   : > { %v612_v34 = vmul.f32 %v3248_v36, %v3248_v36  ;;  %v613_v52 = vmul.f32 %v3259_v41, %v3259_v41  ;;  %v677_v2 = vsel %vm4758_vm6, %v615_v24, 0.0  ;;  %vm581_vm4 = vweird.f32 %v2544_v3 }
  0x69   : > { %v555_v16 = vadd.f32 %v554_v53, %v553_v14  ;;  %v658_v13 = vadd.f32 %v657_v40, %v656_v21  ;;  %v609_v53 = vmul.f32 %v3212_v50, %v3212_v50  ;;  %v614_v21 = vmul.f32 %v3270_v46, %v3270_v46 }
  0x6b   : > { %v557_v20 = vadd.f32 %v556_v56, %v555_v16  ;;  %v660_v14 = vadd.f32 %v659_v45, %v658_v13  ;;  %v663_v56 = vsel %vm4758_vm6, %v608_v27, 0.0  ;;  %v611_v16 = vmul.f32 %v3236_v23, %v3236_v23 }
  0x6c   : > { %v665_v32 = vsel %vm4758_vm6, %v609_v53, 0.0  ;;  %v673_v13 = vsel %vm4758_vm6, %v613_v52, 0.0 }
  0x6d   : > { %v559_v9 = vadd.f32 %v558_v57, %v557_v20  ;;  %v662_v17 = vadd.f32 %v661_v4, %v660_v14  ;;  %v669_v40 = vsel %vm4758_vm6, %v611_v16, 0.0  ;;  %v675_v4 = vsel %vm4758_vm6, %v614_v21, 0.0 }
  0x6f   : > { %v561_v49 = vadd.f32 %v560_v59, %v559_v9  ;;  %v664_v51 = vadd.f32 %v663_v56, %v662_v17  ;;  %v577_v59 = vmul.f32 256.0, %v2544_v3 }
  0x71   : > { %v563_v7 = vadd.f32 %v562_v63, %v561_v49  ;;  %v666_v6 = vadd.f32 %v665_v32, %v664_v51  ;;  %v671_v63 = vsel %vm4758_vm6, %v612_v34, 0.0  ;;  %v578_v49 = vsub.f32 1.0, %v577_v59 }
  0x73   : > { %v565_v15 = vadd.f32 %v564_v0, %v563_v7  ;;  %v668_v9 = vadd.f32 %v667_v29, %v666_v6 }
  0x75   : > { %v567_v57 = vadd.f32 %v566_v28, %v565_v15  ;;  %v670_v45 = vadd.f32 %v669_v40, %v668_v9  ;;  %v579_v28 = vmul.f32 %v2544_v3, %v578_v49  ;;  %v832_v49 = vld [vmem:[%s4721_s3] sm:$0x1] }
  0x76   : > { %vm833_vm8 = vcmp.gt.f32.partialorder %v832_v49, 0.5 }
  0x77   : > { %v569_v20 = vadd.f32 %v568_v19, %v567_v57  ;;  %v672_v53 = vadd.f32 %v671_v63, %v670_v45  ;;  %v580_v19 = vadd.f32 %v2544_v3, %v579_v28 }
  0x79   : > { %v570_v30 = vrot.slane %v569_v20, 4  ;;  %v674_v14 = vadd.f32 %v673_v13, %v672_v53  ;;  %v582_v51 = vsel %vm581_vm4, %v2544_v3, %v580_v19  ;;  %v834_v3 = vld [vmem:[%s4721_s3 + $0x1] sm:$0x1]  ;;  %v3329_v19 = vld [vmem:[%s4721_s3 + $0x5] ss:$0 sm:$0xff] }
  0x7b   : > { %v571_v27 = vadd.f32 %v570_v30, %v569_v20  ;;  %v676_v56 = vadd.f32 %v675_v4, %v674_v14 }
  0x7d   : > { %v572_v0 = vrot.slane %v571_v27, 2  ;;  %v678_v17 = vadd.f32 %v677_v2, %v676_v56  ;;  %v2702_v56 = vmov 0  }
  0x7f   : > { %v573_v7 = vadd.f32 %v572_v0, %v571_v27  ;;  %v679_v16 = vrot.slane %v678_v17, 4  ;;  %v836_v0 = vld [vmem:[%s4721_s3 + $0x2] sm:$0x1] }
  0x81   : > { %v574_v15 = vrot.slane %v573_v7, 1  ;;  %v680_v57 = vadd.f32 %v679_v16, %v678_v17 }
  0x83   : > { %v575_v32 = vadd.f32 %v574_v15, %v573_v7  ;;  %v681_v34 = vrot.slane %v680_v57, 2  ;;  %v906_v15 = vsel %vm833_vm8, 1, %v2702_v56 }
  0x85   : > { %v3304_v29 = vmul.f32 %v582_v51, %v575_v32  ;;  %v682_v20 = vadd.f32 %v681_v34, %v680_v57 }
  0x87   : > { %v683_v6 = vrot.slane %v682_v20, 1  ;;  %v686_v52 = vmul.f32 %v3304_v29, %v3304_v29  ;;  %v835_v13 = vmul.f32 %v834_v3, %v3304_v29  ;;  %v689_v4 = vsub.f32 %v2892_v55, %v3304_v29 }
  0x88   : > { %v690_v7 = vsub.f32 %v2909_v61, %v3304_v29  ;;  %v691_v14 = vsub.f32 %v2912_v62, %v3304_v29  ;;  %v697_v17 = vsub.f32 %v3005_v39, %v3304_v29  ;;  %v705_v32 = vsub.f32 %v3104_v12, %v3304_v29 }
  0x89   : > { %v684_v59 = vadd.f32 %v683_v6, %v682_v20  ;;  %v837_v2 = vadd.f32 %v836_v0, %v835_v13  ;;  %v713_v57 = vsub.f32 %v3200_v42, %v3304_v29  ;;  %v706_v3 = vsub.f32 %v3116_v26, %v3304_v29 }
  0x8a   : > { %v714_v13 = vsub.f32 %v3212_v50, %v3304_v29 }
  0x8b   : > { %v685_v40 = vmul.f32 %v684_v59, %v582_v51  ;;  %v698_v51 = vsub.f32 %v3020_v31, %v3304_v29  ;;  %v3345_v59 = vld [vmem:[%s4721_s3 + $0x6] ss:$0 sm:$0xff] }
  0x8d   : > { %v687_v30 = vsub.f32 %v685_v40, %v686_v52  ;;  %v907_v52 = vperm.slane %v906_v15, 0  ;;  %v3347_v40 = vperm.slane %v837_v2, 0 }
  0x8f   : > { %v688_v9 = vmax.f32 %v687_v30, 0.0  ;;  %4792 = vst [vmem:[#allocation24_spill] sm:$0xff] %v3347_v40  ;;  %vm3372_vm10 = vcmp.eq.s32.totalorder %v907_v52, 1 }
  0x91   : > { %v721_v21 = vadd.f32 1e-05, %v688_v9 }
  0x93   : > { %2545 = vrsqrt.f32 %v721_v21  ;;  %vm728_vm5 = vweird.f32 %v721_v21 }
  0x99   : > { %v2546_v63 = vpop.eup %2545 }
  0x9a   : > { %v723_v27 = vmul.f32 %v2546_v63, %v721_v21  ;;  %vm729_vm7 = vweird.f32 %v2546_v63 }
  0x9b   : > { %vm730_vm9 = vmor %vm728_vm5, %vm729_vm7 }
  0x9c   : > { %v724_v45 = vmul.f32 %v2546_v63, %v723_v27  ;;  %v3356_v27 = vld [vmem:[%s4721_s3 + $0x3] ss:$0 sm:$0xff] }
  0x9e   : > { %v725_v24 = vmul.f32 0.5, %v724_v45 }
  0xa0   : > { %v726_v53 = vsub.f32 1.5, %v725_v24 }
  0xa2   : > { %v727_v28 = vmul.f32 %v2546_v63, %v726_v53 }
  0xa4   : > { %v3331_v16 = vsel %vm730_vm9, %v2546_v63, %v727_v28 }
  0xa5   : > { %v732_v34 = vmul.f32 %v3331_v16, %v689_v4  ;;  %v733_v20 = vmul.f32 %v3331_v16, %v690_v7  ;;  %v734_v6 = vmul.f32 %v3331_v16, %v691_v14  ;;  %v740_v30 = vmul.f32 %v3331_v16, %v697_v17  ;;  %v3370_v4 = vld [vmem:[%s4721_s3 + $0x4] ss:$0 sm:$0xff] }
  0xa6   : > { %v748_v49 = vmul.f32 %v3331_v16, %v705_v32  ;;  %v756_v24 = vmul.f32 %v3331_v16, %v713_v57  ;;  %4793 = vst [vmem:[#allocation25_spill] sm:$0xff] %v3370_v4  ;;  %v4794_v7 = vmov 0  ;;  %v741_v14 = vmul.f32 %v3331_v16, %v698_v51 }
  0xa7   : > { %v766_v9 = vmul.f32 %v3329_v19, %v732_v34  ;;  %v767_v21 = vmul.f32 %v3329_v19, %v733_v20  ;;  %v768_v63 = vmul.f32 %v3329_v19, %v734_v6  ;;  %v774_v45 = vmul.f32 %v3329_v19, %v740_v30  ;;  %v2087_v20 = vpop.f32.mrf.mxu0 }
  0xa8   : > { %v4795_v7 = vsel %vm3372_vm10, 4294967295, %v4794_v7  ;;  %v782_v56 = vmul.f32 %v3329_v19, %v748_v49  ;;  %v790_v15 = vmul.f32 %v3329_v19, %v756_v24  ;;  %v775_v57 = vmul.f32 %v3329_v19, %v741_v14 }
  0xa9   : > { %v800_v0 = vadd.f32 %v3345_v59, %v766_v9  ;;  %v801_v53 = vadd.f32 %v3345_v59, %v767_v21  ;;  %4796 = vst [vmem:[#allocation26_spill] sm:$0xff] %v4795_v7  ;;  %v802_v28 = vadd.f32 %v3345_v59, %v768_v63  ;;  %v808_v2 = vadd.f32 %v3345_v59, %v774_v45 }
  0xaa   : > { %v749_v34 = vmul.f32 %v3331_v16, %v706_v3  ;;  %v816_v51 = vadd.f32 %v3345_v59, %v782_v56  ;;  %v824_v52 = vadd.f32 %v3345_v59, %v790_v15  ;;  %v757_v30 = vmul.f32 %v3331_v16, %v714_v13 }
  0xab   : > { %v840_v17 = vmul.f32 %v3356_v27, %v800_v0  ;;  %v841_v32 = vmul.f32 %v3356_v27, %v801_v53  ;;  %v848_v6 = vmul.f32 %v3356_v27, %v808_v2  ;;  %v809_v63 = vadd.f32 %v3345_v59, %v775_v57 }
  0xac   : > { %v783_v45 = vmul.f32 %v3329_v19, %v749_v34  ;;  %v856_v3 = vmul.f32 %v3356_v27, %v816_v51  ;;  %v864_v24 = vmul.f32 %v3356_v27, %v824_v52  ;;  %v791_v0 = vmul.f32 %v3329_v19, %v757_v30 }
  0xad   : > { %v874_v9 = vadd.f32 %v3370_v4, %v840_v17  ;;  %v875_v21 = vadd.f32 %v3370_v4, %v841_v32  ;;  %v882_v49 = vadd.f32 %v3370_v4, %v848_v6  ;;  %v849_v14 = vmul.f32 %v3356_v27, %v809_v63 }
  0xae   : > { %v817_v2 = vadd.f32 %v3345_v59, %v783_v45  ;;  %v890_v17 = vadd.f32 %v3370_v4, %v856_v3  ;;  %v898_v32 = vadd.f32 %v3370_v4, %v864_v24 }
  0xaf   : > { %v910_v13 = vsel %vm3372_vm10, %v3347_v40, %v874_v9  ;;  %v911_v53 = vsel %vm3372_vm10, %v3347_v40, %v875_v21  ;;  %v918_v15 = vsel %vm3372_vm10, %v3347_v40, %v882_v49  ;;  %v883_v6 = vadd.f32 %v3370_v4, %v849_v14  ;;  %v3425_v49 = vld [vmem:[%s4722_s4 + $0x4] ss:$0 sm:$0xff]  ;;  %v2127_v14 = vpop.f32.mrf.mxu2 }
  0xb0   : > { %v2310_v56 = vmul.f32 -1.442695, %v910_v13  ;;  %v2318_v57 = vmul.f32 -1.442695, %v918_v15  ;;  %v2311_v34 = vmul.f32 -1.442695, %v911_v53  ;;  %v857_v51 = vmul.f32 %v3356_v27, %v817_v2  ;;  %v2089_v15 = vpop.f32.mrf.mxu0 }
  0xb1   : > { %v926_v52 = vsel %vm3372_vm10, %v3347_v40, %v890_v17  ;;  %v934_v30 = vsel %vm3372_vm10, %v3347_v40, %v898_v32  ;;  %v825_v9 = vadd.f32 %v3345_v59, %v791_v0  ;;  %v919_v45 = vsel %vm3372_vm10, %v3347_v40, %v883_v6  ;;  %v2107_v6 = vpop.f32.mrf.mxu1 }
  0xb2   : > { %2547 = vpow2.f32 %v2310_v56  ;;  %v2326_v21 = vmul.f32 -1.442695, %v926_v52  ;;  %v2334_v63 = vmul.f32 -1.442695, %v934_v30  ;;  %v2319_v3 = vmul.f32 -1.442695, %v919_v45  ;;  %v2147_v56 = vpop.f32.mrf.mxu3 }
  0xb3   : > { %2549 = vpow2.f32 %v2318_v57  ;;  %v891_v24 = vadd.f32 %v3370_v4, %v857_v51  ;;  %v865_v13 = vmul.f32 %v3356_v27, %v825_v9  ;;  %v692_v0 = vsub.f32 %v2933_v5, %v3304_v29 }
  0xb4   : > { %2551 = vpow2.f32 %v2311_v34  ;;  %v693_v53 = vsub.f32 %v2948_v11, %v3304_v29  ;;  %v842_v2 = vmul.f32 %v3356_v27, %v802_v28  ;;  %v699_v57 = vsub.f32 %v3031_v60, %v3304_v29 }
  0xb5   : > { %2553 = vpow2.f32 %v2326_v21  ;;  %v927_v17 = vsel %vm3372_vm10, %v3347_v40, %v891_v24  ;;  %v899_v32 = vadd.f32 %v3370_v4, %v865_v13  ;;  %v694_v34 = vsub.f32 %v2964_v18, %v3304_v29 }
  0xb6   : > { %2555 = vpow2.f32 %v2334_v63  ;;  %v2327_v51 = vmul.f32 -1.442695, %v927_v17  ;;  %v876_v28 = vadd.f32 %v3370_v4, %v842_v2  ;;  %v3446_v9 = vadd.f32 %v3425_v49, %v2087_v20 }
  0xb7   : > { %2557 = vpow2.f32 %v2319_v3  ;;  %v3449_v21 = vadd.f32 %v3425_v49, %v2107_v6  ;;  %v3452_v63 = vadd.f32 %v3425_v49, %v2127_v14  ;;  %v3457_v3 = vadd.f32 %v3425_v49, %v2147_v56 }
  0xb8   : > { %v2548_v52 = vpop.eup %2547  ;;  %v3460_v13 = vadd.f32 %v3425_v49, %v2089_v15  ;;  %v935_v20 = vsel %vm3372_vm10, %v3347_v40, %v899_v32  ;;  %v3466_v17 = vmul.f32 %v3331_v16, %v692_v0  ;;  %2559 = vpow2.f32 %v2327_v51 }
  0xb9   : > { %v2550_v45 = vpop.eup %2549  ;;  %v3454_v24 = vadd.f32 1.0, %v2548_v52  ;;  %v742_v14 = vmul.f32 %v3331_v16, %v699_v57  ;;  %v3472_v56 = vmul.f32 %v3331_v16, %v693_v53  ;;  %v912_v32 = vsel %vm3372_vm10, %v3347_v40, %v876_v28 }
  0xba   : > { %v2552_v2 = vpop.eup %2551  ;;  %v3468_v6 = vadd.f32 1.0, %v2550_v45  ;;  %v3480_v0 = vmul.f32 %v3331_v16, %v694_v34  ;;  %v3484_v57 = vmul.f32 -1.442695, %v935_v20  ;;  %v3495_v34 = vmul.f32 -1.442695, %v912_v32 }
  0xbb   : > { %v2554_v52 = vpop.eup %2553  ;;  %2561 = vrcp.f32 %v3454_v24  ;;  %v1081_v15 = vand.u32 2147483648, %v3454_v24  ;;  %v1079_v51 = vand.u32 2147483647, %v3454_v24  ;;  %vm1075_vm11 = vweird.f32 %v3454_v24 }
  0xbc   : > { %v2556_v30 = vpop.eup %2555  ;;  %4797 = vst [vmem:[#allocation27_spill] sm:$0xff] %v3480_v0  ;;  %2563 = vrcp.f32 %v3468_v6  ;;  %v1199_v45 = vand.u32 2147483647, %v3468_v6  ;;  %v1201_v47 = vand.u32 2147483648, %v3468_v6  ;;  %v3488_v58 = vadd.f32 1.0, %v2554_v52 }
  0xbd   : > { %v2558_v53 = vpop.eup %2557  ;;  %v3490_v1 = vadd.f32 1.0, %v2556_v30  ;;  %v3493_v28 = vadd.f32 1.0, %v2552_v2  ;;  %v3498_v46 = vmul.f32 %v3329_v19, %v742_v14  ;;  %v3500_v20 = vor.u32 1.1754944e-38, %v1081_v15 }
  0xbe   : > { %vm1195_vm12 = vweird.f32 %v3468_v6  ;;  %2565 = vrcp.f32 %v3488_v58  ;;  %v1321_v52 = vand.u32 2147483648, %v3488_v58  ;;  %v2560_v25 = vpop.eup %2559  ;;  %vm3505_vm13 = vcmp.eq.f32.partialorder %v1079_v51, 8.507059e+37 }
  0xbf   : > { %v1319_v2 = vand.u32 2147483647, %v3488_v58  ;;  %2567 = vrcp.f32 %v3490_v1  ;;  %v1441_v14 = vand.u32 2147483648, %v3490_v1  ;;  %v3512_v32 = vadd.f32 1.0, %v2558_v53 }
  0xc0   : > { %vm3514_vm14 = vcmp.eq.f32.partialorder %v1199_v45, 8.507059e+37  ;;  %v1202_v44 = vor.u32 1.1754944e-38, %v1201_v47  ;;  %vm1315_vm15 = vweird.f32 %v3488_v58  ;;  %v1439_v51 = vand.u32 2147483647, %v3490_v1 }
  0xc1   : > { %v2562_v15 = vpop.eup %2561  ;;  %2569 = vrcp.f32 %v3493_v28  ;;  %v3522_v10 = vor.u32 1.1754944e-38, %v1321_v52  ;;  %vm1435_vm0 = vweird.f32 %v3490_v1  ;;  %v1094_v47 = vand.u32 2147483647, %v3493_v28 }
  0xc2   : > { %v2564_v35 = vpop.eup %2563  ;;  %v1071_v41 = vmul.f32 %v2562_v15, %v3454_v24  ;;  %vm1076_vm2 = vweird.f32 %v2562_v15  ;;  %v1096_v45 = vand.u32 2147483648, %v3493_v28  ;;  %vm3529_vm4 = vcmp.eq.f32.partialorder %v1319_v2, 8.507059e+37 }
  0xc3   : > { %v1191_v53 = vmul.f32 %v2564_v35, %v3468_v6  ;;  %vm1196_vm3 = vweird.f32 %v2564_v35  ;;  %v3533_v0 = vor.u32 1.1754944e-38, %v1441_v14  ;;  %2571 = vrcp.f32 %v3512_v32  ;;  %vm3551_vm9 = vmor %vm1075_vm11, %vm1076_vm2 }
  0xc4   : > { %v1072_v11 = vsub.f32 1.0, %v1071_v41  ;;  %v2566_v52 = vpop.eup %2565  ;;  %vm3536_vm5 = vcmp.eq.f32.partialorder %v1439_v51, 8.507059e+37  ;;  %v1214_v5 = vand.u32 2147483647, %v3512_v32  ;;  %v1216_v41 = vand.u32 2147483648, %v3512_v32  ;;  %vm3559_vm1 = vmor %vm1195_vm12, %vm1196_vm3 }
  0xc5   : > { %v1192_v36 = vsub.f32 1.0, %v1191_v53  ;;  %v2568_v2 = vpop.eup %2567  ;;  %v1311_v60 = vmul.f32 %v2566_v52, %v3488_v58  ;;  %vm3544_vm8 = vcmp.eq.f32.partialorder %v1094_v47, 8.507059e+37  ;;  %v1097_v62 = vor.u32 1.1754944e-38, %v1096_v45 }
  0xc6   : > { %v1073_v33 = vmul.f32 %v2562_v15, %v1072_v11  ;;  %vm1316_vm6 = vweird.f32 %v2566_v52  ;;  %v1431_v50 = vmul.f32 %v2568_v2, %v3490_v1  ;;  %vm1436_vm7 = vweird.f32 %v2568_v2 }
  0xc7   : > { %v2570_v53 = vpop.eup %2569  ;;  %v1193_v23 = vmul.f32 %v2564_v35, %v1192_v36  ;;  %v1312_v45 = vsub.f32 1.0, %v1311_v60  ;;  %v1217_v43 = vor.u32 1.1754944e-38, %v1216_v41  ;;  %vm3564_vm2 = vcmp.eq.f32.partialorder %v1214_v5, 8.507059e+37  ;;  %v3575_v60 = vld [vmem:[%s4722_s4] ss:$0 sm:$0xff]  ;;  %vm3586_vm12 = vmor %vm1315_vm15, %vm1316_vm6 }
  0xc8   : > { %v1074_v11 = vadd.f32 %v2562_v15, %v1073_v33  ;;  %v1086_v24 = vmul.f32 %v2570_v53, %v3493_v28  ;;  %v1432_v7 = vsub.f32 1.0, %v1431_v50  ;;  %vm1091_vm11 = vweird.f32 %v2570_v53  ;;  %vm3602_vm6 = vmor %vm1435_vm0, %vm1436_vm7 }
  0xc9   : > { %v1194_v48 = vadd.f32 %v2564_v35, %v1193_v23  ;;  %v3568_v40 = vadd.f32 1.0, %v2560_v25  ;;  %v2572_v33 = vpop.eup %2571  ;;  %v1313_v4 = vmul.f32 %v2566_v52, %v1312_v45  ;;  %2573 = vpow2.f32 %v3484_v57  ;;  %v3595_v57 = vld [vmem:[%s4722_s4 + $0x1] ss:$0 sm:$0xff] }
  0xca   : > { %v1078_v6 = vsel %vm3551_vm9, %v2562_v15, %v1074_v11  ;;  %v1087_v41 = vsub.f32 1.0, %v1086_v24  ;;  %v1433_v23 = vmul.f32 %v2568_v2, %v1432_v7  ;;  %v1206_v15 = vmul.f32 %v2572_v33, %v3512_v32 }
  0xcb   : > { %v1083_v5 = vsel %vm3505_vm13, %v3500_v20, %v1078_v6  ;;  %v1198_v25 = vsel %vm3559_vm1, %v2564_v35, %v1194_v48  ;;  %v1314_v48 = vadd.f32 %v2566_v52, %v1313_v4  ;;  %vm4818_vm13 = vweird.f32 %v3493_v28 }
  0xcc   : > { %v1550_v51 = vmul.f32 %v1083_v5, %v2892_v55  ;;  %v1203_v35 = vsel %vm3514_vm14, %v1202_v44, %v1198_v25  ;;  %v1088_v7 = vmul.f32 %v2570_v53, %v1087_v41  ;;  %v1434_v55 = vadd.f32 %v2568_v2, %v1433_v23  ;;  %vm3610_vm15 = vmor %vm4818_vm13, %vm1091_vm11  ;;  %v3653_v25 = vld [vmem:[%s4722_s4 + $0x3] ss:$0 sm:$0xff] }
  0xcd   : > { %v1558_v20 = vmul.f32 %v1203_v35, %v3005_v39  ;;  %v1207_v18 = vsub.f32 1.0, %v1206_v15  ;;  %vm1211_vm14 = vweird.f32 %v2572_v33  ;;  %v1318_v1 = vsel %vm3586_vm12, %v2566_v52, %v1314_v48 }
  0xce   : > { %v1584_v44 = vmul.f32 %v3575_v60, %v1550_v51  ;;  %v1089_v4 = vadd.f32 %v2570_v53, %v1088_v7  ;;  %2575 = vrcp.f32 %v3568_v40  ;;  %v1323_v28 = vsel %vm3529_vm4, %v3522_v10, %v1318_v1  ;;  %v3642_v10 = vld [vmem:[%s4722_s4 + $0x2] ss:$0 sm:$0xff] }
  0xcf   : > { %v1592_v39 = vmul.f32 %v3575_v60, %v1558_v20  ;;  %v1438_v11 = vsel %vm3602_vm6, %v2568_v2, %v1434_v55  ;;  %v1208_v47 = vmul.f32 %v2572_v33, %v1207_v18  ;;  %v3624_v45 = vpop.eup %2573  ;;  %v1566_v6 = vmul.f32 %v1323_v28, %v3104_v12 }
  0xd0   : > { %v1618_v24 = vadd.f32 %v3595_v57, %v1584_v44  ;;  %v1443_v52 = vsel %vm3536_vm5, %v3533_v0, %v1438_v11  ;;  %v1093_v41 = vsel %vm3610_vm15, %v2570_v53, %v1089_v4  ;;  %vm4821_vm0 = vweird.f32 %v3512_v32 }
  0xd1   : > { %vm3635_vm1 = vmor %vm4821_vm0, %vm1211_vm14  ;;  %v1626_v12 = vadd.f32 %v3595_v57, %v1592_v39  ;;  %v1574_v2 = vmul.f32 %v1443_v52, %v3200_v42  ;;  %v1098_v54 = vsel %vm3544_vm8, %v1097_v62, %v1093_v41  ;;  %v1209_v0 = vadd.f32 %v2572_v33, %v1208_v47 }
  0xd2   : > { %vm1650_vm3 = vcmp.gt.f32.partialorder %v1618_v24, 0.0  ;;  %v1682_v53 = vmul.f32 0.2, %v1618_v24  ;;  %v1600_v32 = vmul.f32 %v3575_v60, %v1566_v6  ;;  %v1551_v5 = vmul.f32 %v1098_v54, %v2909_v61 }
  0xd3   : > { %vm1658_vm4 = vcmp.gt.f32.partialorder %v1626_v12, 0.0  ;;  %v1690_v50 = vmul.f32 0.2, %v1626_v12  ;;  %v1608_v23 = vmul.f32 %v3575_v60, %v1574_v2  ;;  %v1213_v42 = vsel %vm3635_vm1, %v2572_v33, %v1209_v0 }
  0xd4   : > { %v3658_v62 = vpop.eup %2575  ;;  %v1714_v14 = vsel %vm1650_vm3, %v1618_v24, %v1682_v53  ;;  %v1634_v15 = vadd.f32 %v3595_v57, %v1600_v32  ;;  %v1585_v61 = vmul.f32 %v3575_v60, %v1551_v5  ;;  %v1218_v51 = vsel %vm3564_vm2, %v1217_v43, %v1213_v42 }
  0xd5   : > { %v1748_v35 = vmul.f32 %v3642_v10, %v1714_v14  ;;  %v1722_v48 = vsel %vm1658_vm4, %v1626_v12, %v1690_v50  ;;  %v1642_v58 = vadd.f32 %v3595_v57, %v1608_v23  ;;  %v1559_v7 = vmul.f32 %v1218_v51, %v3020_v31 }
  0xd6   : > { %v1756_v33 = vmul.f32 %v3642_v10, %v1722_v48  ;;  %vm1666_vm5 = vcmp.gt.f32.partialorder %v1634_v15, 0.0  ;;  %v1698_v20 = vmul.f32 0.2, %v1634_v15  ;;  %v1619_v55 = vadd.f32 %v3595_v57, %v1585_v61 }
  0xd7   : > { %v1782_v30 = vadd.f32 %v3653_v25, %v1748_v35  ;;  %vm1674_vm7 = vcmp.gt.f32.partialorder %v1642_v58, 0.0  ;;  %v1706_v18 = vmul.f32 0.2, %v1642_v58  ;;  %v1593_v36 = vmul.f32 %v3575_v60, %v1559_v7 }
  0xd8   : > { %v1790_v43 = vadd.f32 %v3653_v25, %v1756_v33  ;;  %v1730_v44 = vsel %vm1666_vm5, %v1634_v15, %v1698_v20  ;;  %vm1651_vm8 = vcmp.gt.f32.partialorder %v1619_v55, 0.0  ;;  %v1683_v1 = vmul.f32 0.2, %v1619_v55 }
  0xd9   : > { %vm1814_vm9 = vcmp.gt.f32.partialorder %v1782_v30, 0.0  ;;  %v1846_v31 = vmul.f32 0.2, %v1782_v30  ;;  %v1764_v4 = vmul.f32 %v3642_v10, %v1730_v44  ;;  %v1738_v39 = vsel %vm1674_vm7, %v1642_v58, %v1706_v18 }
  0xda   : > { %vm1822_vm11 = vcmp.gt.f32.partialorder %v1790_v43, 0.0  ;;  %v1854_v28 = vmul.f32 0.2, %v1790_v43  ;;  %v1772_v11 = vmul.f32 %v3642_v10, %v1738_v39  ;;  %v1715_v47 = vsel %vm1651_vm8, %v1619_v55, %v1683_v1 }
  0xdb   : > { %v1878_v24 = vsel %vm1814_vm9, %v1782_v30, %v1846_v31  ;;  %v1798_v6 = vadd.f32 %v3653_v25, %v1764_v4  ;;  %v1749_v52 = vmul.f32 %v3642_v10, %v1715_v47  ;;  %v1627_v41 = vadd.f32 %v3595_v57, %v1593_v36  ;;  %v2129_v30 = vpop.f32.mrf.mxu2 }
  0xdc   : > { %v2167_v38 = vadd.f32 %v3446_v9, %v1878_v24  ;;  %v1886_v12 = vsel %vm1822_vm11, %v1790_v43, %v1854_v28  ;;  %v1806_v2 = vadd.f32 %v3653_v25, %v1772_v11  ;;  %v1326_v54 = vmul.f32 %v3658_v62, %v3568_v40 }
  0xdd   : > { %v2175_v0 = vadd.f32 %v3449_v21, %v1886_v12  ;;  %vm1830_vm2 = vcmp.gt.f32.partialorder %v1798_v6, 0.0  ;;  %v1862_v53 = vmul.f32 0.2, %v1798_v6  ;;  %v1783_v32 = vadd.f32 %v3653_v25, %v1749_v52 }
  0xde   : > { %vm4824_vm12 = vcmask 130048   ;;  %vm1838_vm6 = vcmp.gt.f32.partialorder %v1806_v2, 0.0  ;;  %v1870_v5 = vmul.f32 0.2, %v1806_v2  ;;  %vm1659_vm13 = vcmp.gt.f32.partialorder %v1627_v41, 0.0 }
  0xdf   : > { %2199 = vst.msk [vmem:[%s3678_s18] sm:$0xff] %vm4824_vm12, %v2167_v38  ;;  %v1327_v50 = vsub.f32 1.0, %v1326_v54  ;;  %vm4825_vm15 = vmmov %vm4824_vm12  ;;  %v1894_v9 = vsel %vm1830_vm2, %v1798_v6, %v1862_v53  ;;  %vm1815_vm14 = vcmp.gt.f32.partialorder %v1783_v32, 0.0  ;;  %v1847_v23 = vmul.f32 0.2, %v1783_v32  ;;  %v2092_v38 = vpop.f32.mrf.mxu0 }
  0xe0   : > { %2207 = vst.msk [vmem:[%s3678_s18 + $0x40] sm:$0xff] %vm4825_vm15, %v2175_v0  ;;  %v1691_v42 = vmul.f32 0.2, %v1627_v41  ;;  %v2183_v14 = vadd.f32 %v3452_v63, %v1894_v9  ;;  %v1902_v21 = vsel %vm1838_vm6, %v1806_v2, %v1870_v5  ;;  %vm1330_vm0 = vweird.f32 %v3568_v40  ;;  %vm4826_vm3 = vmmov %vm4824_vm12  ;;  %v2109_v63 = vpop.f32.mrf.mxu1 }
  0xe1   : > { %v1328_v15 = vmul.f32 %v3658_v62, %v1327_v50  ;;  %v2191_v61 = vadd.f32 %v3457_v3, %v1902_v21  ;;  %v1879_v51 = vsel %vm1815_vm14, %v1783_v32, %v1847_v23  ;;  %vm1331_vm1 = vweird.f32 %v3658_v62  ;;  %vm4830_vm5 = vmmov %vm4826_vm3 }
  0xe2   : > { %v1723_v35 = vsel %vm1659_vm13, %v1627_v41, %v1691_v42  ;;  %2215 = vst.msk [vmem:[%s3678_s18 + $0x80] sm:$0xff] %vm4826_vm3, %v2183_v14  ;;  %v2168_v48 = vadd.f32 %v3460_v13, %v1879_v51  ;;  %vm3703_vm4 = vmor %vm1330_vm0, %vm1331_vm1  ;;  %v1334_v3 = vand.u32 2147483647, %v3568_v40  ;;  %v4829_v20 = vsub.f32 %v2980_v22, %v3304_v29  ;;  %v4836_v51 = vld [vmem:[#allocation24_spill] sm:$0xff] }
  0xe3   : > { %v1757_v58 = vmul.f32 %v3642_v10, %v1723_v35  ;;  %v1329_v7 = vadd.f32 %v3658_v62, %v1328_v15  ;;  %2223 = vst.msk [vmem:[%s3678_s18 + $0xc0] sm:$0xff] %vm4830_vm5, %v2191_v61  ;;  %v1336_v13 = vand.u32 2147483648, %v3568_v40  ;;  %v1063_v18 = vadd.f32 1.0, %v3624_v45  ;;  %vm4831_vm7 = vmmov %vm4826_vm3 }
  0xe4   : > { %v3712_v55 = vmul.f32 %v3331_v16, %v4829_v20  ;;  %2577 = vpow2.f32 %v3495_v34  ;;  %v769_v36 = vmul.f32 %v3329_v19, %v3466_v17  ;;  %2200 = vst.msk [vmem:[%s3678_s18 + $0x8] sm:$0xff] %vm4831_vm7, %v2168_v48  ;;  %vm1335_vm8 = vcmp.eq.f32.partialorder %v1334_v3, 8.507059e+37  ;;  %v2149_v34 = vpop.f32.mrf.mxu3  ;;  %vm4833_vm11 = vmmov %vm4826_vm3 }
  0xe5   : > { %v1791_v43 = vadd.f32 %v3653_v25, %v1757_v58  ;;  %v1333_v44 = vsel %vm3703_vm4, %v3658_v62, %v1329_v7  ;;  %v3729_v40 = vmul.f32 %v3329_v19, %v3472_v56  ;;  %v2110_v45 = vadd.f32 %v3425_v49, %v2109_v63 }
  0xe6   : > { %v1337_v1 = vor.u32 1.1754944e-38, %v1336_v13  ;;  %2579 = vrcp.f32 %v1063_v18  ;;  %v3733_v31 = vadd.f32 %v3425_v49, %v2129_v30  ;;  %v810_v4 = vadd.f32 %v3345_v59, %v3498_v46 }
  0xe7   : > { %vm1823_vm9 = vcmp.gt.f32.partialorder %v1791_v43, 0.0  ;;  %v1855_v17 = vmul.f32 0.2, %v1791_v43  ;;  %v1454_v62 = vand.u32 2147483647, %v1063_v18  ;;  %v707_v28 = vsub.f32 %v3128_v37, %v3304_v29 }
  0xe8   : > { %v1338_v39 = vsel %vm1335_vm8, %v1337_v1, %v1333_v44  ;;  %v715_v56 = vsub.f32 %v3224_v8, %v3304_v29  ;;  %v3743_v24 = vadd.f32 %v3425_v49, %v2149_v34  ;;  %v850_v6 = vmul.f32 %v3356_v27, %v810_v4  ;;  %v2112_v33 = vpop.f32.mrf.mxu1  ;;  %v4840_v4 = vld [vmem:[#allocation8_spill] sm:$0xff] }
  0xe9   : > { %v1887_v11 = vsel %vm1823_vm9, %v1791_v43, %v1855_v17  ;;  %v1567_v47 = vmul.f32 %v1338_v39, %v3116_v26  ;;  %v1456_v46 = vand.u32 2147483648, %v1063_v18  ;;  %v750_v12 = vmul.f32 %v3331_v16, %v707_v28  ;;  %v4832_v26 = vld [vmem:[#allocation25_spill] sm:$0xff] }
  0xea   : > { %v2578_v52 = vpop.eup %2577  ;;  %v2176_v41 = vadd.f32 %v2110_v45, %v1887_v11  ;;  %v758_v2 = vmul.f32 %v3331_v16, %v715_v56  ;;  %v3752_v53 = vadd.f32 %v3425_v49, %v2092_v38  ;;  %v884_v32 = vadd.f32 %v4832_v26, %v850_v6 }
  0xeb   : > { %v1601_v54 = vmul.f32 %v3575_v60, %v1567_v47  ;;  %v3749_v0 = vadd.f32 1.0, %v2578_v52  ;;  %vm1450_vm2 = vweird.f32 %v1063_v18  ;;  %vm3757_vm12 = vcmp.eq.f32.partialorder %v1454_v62, 8.507059e+37 }
  0xec   : > { %v2580_v5 = vpop.eup %2579  ;;  %2208 = vst.msk [vmem:[%s3678_s18 + $0x48] sm:$0xff] %vm4833_vm11, %v2176_v41  ;;  %v784_v9 = vmul.f32 %v3329_v19, %v750_v12  ;;  %v792_v23 = vmul.f32 %v3329_v19, %v758_v2  ;;  %v803_v21 = vadd.f32 %v3345_v59, %v769_v36  ;;  %v1457_v15 = vor.u32 1.1754944e-38, %v1456_v46 }
  0xed   : > { %v1635_v42 = vadd.f32 %v3595_v57, %v1601_v54  ;;  %v1446_v14 = vmul.f32 %v2580_v5, %v1063_v18  ;;  %2581 = vrcp.f32 %v3749_v0  ;;  %vm1451_vm6 = vweird.f32 %v2580_v5  ;;  %v4843_v18 = vld [vmem:[#allocation13_spill] sm:$0xff] }
  0xee   : > { %v1109_v61 = vand.u32 2147483647, %v3749_v0  ;;  %v920_v48 = vsel %vm3372_vm10, %v4836_v51, %v884_v32  ;;  %v1111_v3 = vand.u32 2147483648, %v3749_v0  ;;  %v3772_v20 = vadd.f32 %v3425_v49, %v2112_v33  ;;  %vm3780_vm15 = vmor %vm1450_vm2, %vm1451_vm6  ;;  %v2132_v33 = vpop.f32.mrf.mxu2 }
  0xef   : > { %vm1667_vm13 = vcmp.gt.f32.partialorder %v1635_v42, 0.0  ;;  %v1699_v58 = vmul.f32 0.2, %v1635_v42  ;;  %v1447_v63 = vsub.f32 1.0, %v1446_v14  ;;  %v2320_v7 = vmul.f32 -1.442695, %v920_v48 }
  0xf0   : > { %v818_v13 = vadd.f32 %v3345_v59, %v784_v9  ;;  %v826_v30 = vadd.f32 %v3345_v59, %v792_v23  ;;  %v843_v44 = vmul.f32 %v3356_v27, %v803_v21  ;;  %v700_v39 = vsub.f32 %v4840_v4, %v3304_v29  ;;  %v4844_v23 = vld [vmem:[#allocation18_spill] sm:$0xff] }
  0xf1   : > { %v1731_v36 = vsel %vm1667_vm13, %v1635_v42, %v1699_v58  ;;  %v1448_v43 = vmul.f32 %v2580_v5, %v1447_v63  ;;  %2583 = vpow2.f32 %v2320_v7  ;;  %vm1105_vm14 = vweird.f32 %v3749_v0  ;;  %vm4853_vm13 = vmmov %vm4830_vm5 }
  0xf2   : > { %v1765_v45 = vmul.f32 %v3642_v10, %v1731_v36  ;;  %v858_v34 = vmul.f32 %v3356_v27, %v818_v13  ;;  %v866_v17 = vmul.f32 %v3356_v27, %v826_v30  ;;  %vm3789_vm0 = vcmp.eq.f32.partialorder %v1109_v61, 8.507059e+37  ;;  %v4847_v36 = vld [vmem:[#allocation19_spill] sm:$0xff] }
  0xf3   : > { %v2582_v62 = vpop.eup %2581  ;;  %v1449_v28 = vadd.f32 %v2580_v5, %v1448_v43  ;;  %v708_v11 = vsub.f32 %v4843_v18, %v3304_v29  ;;  %v1112_v52 = vor.u32 1.1754944e-38, %v1111_v3  ;;  %v877_v12 = vadd.f32 %v4832_v26, %v843_v44 }
  0xf4   : > { %v1799_v47 = vadd.f32 %v3653_v25, %v1765_v45  ;;  %v1101_v6 = vmul.f32 %v2582_v62, %v3749_v0  ;;  %v892_v41 = vadd.f32 %v4832_v26, %v858_v34  ;;  %vm1106_vm1 = vweird.f32 %v2582_v62  ;;  %v2152_v45 = vpop.f32.mrf.mxu3 }
  0xf5   : > { %v1453_v46 = vsel %vm3780_vm15, %v2580_v5, %v1449_v28  ;;  %v900_v38 = vadd.f32 %v4832_v26, %v866_v17  ;;  %v743_v21 = vmul.f32 %v3331_v16, %v700_v39  ;;  %vm3819_vm4 = vmor %vm1105_vm14, %vm1106_vm1  ;;  %v913_v13 = vsel %vm3372_vm10, %v4836_v51, %v877_v12 }
  0xf6   : > { %vm1831_vm3 = vcmp.gt.f32.partialorder %v1799_v47, 0.0  ;;  %v1863_v2 = vmul.f32 0.2, %v1799_v47  ;;  %v1458_v54 = vsel %vm3757_vm12, %v1457_v15, %v1453_v46  ;;  %v1102_v32 = vsub.f32 1.0, %v1101_v6  ;;  %v2094_v6 = vpop.f32.mrf.mxu0 }
  0xf7   : > { %v2584_v9 = vpop.eup %2583  ;;  %v1575_v42 = vmul.f32 %v1458_v54, %v4844_v23  ;;  %v928_v14 = vsel %vm3372_vm10, %v4836_v51, %v892_v41  ;;  %v936_v5 = vsel %vm3372_vm10, %v4836_v51, %v900_v38  ;;  %v716_v43 = vsub.f32 %v4847_v36, %v3304_v29  ;;  %v4848_v41 = vld [vmem:[#allocation2_spill] sm:$0xff] }
  0xf8   : > { %v1895_v61 = vsel %vm1831_vm3, %v1799_v47, %v1863_v2  ;;  %v1103_v48 = vmul.f32 %v2582_v62, %v1102_v32  ;;  %v3812_v58 = vadd.f32 1.0, %v2584_v9  ;;  %v2328_v50 = vmul.f32 -1.442695, %v928_v14 }
  0xf9   : > { %v2184_v15 = vadd.f32 %v3733_v31, %v1895_v61  ;;  %v1609_v63 = vmul.f32 %v3575_v60, %v1575_v42  ;;  %v2336_v3 = vmul.f32 -1.442695, %v936_v5  ;;  %v751_v31 = vmul.f32 %v3331_v16, %v708_v11 }
  0xfa   : > { %v1104_v30 = vadd.f32 %v2582_v62, %v1103_v48  ;;  %2585 = vrcp.f32 %v3812_v58  ;;  %v1229_v44 = vand.u32 2147483647, %v3812_v58  ;;  %v777_v1 = vmul.f32 %v3329_v19, %v743_v21 }
  0xfb   : > { %2216 = vst.msk [vmem:[%s3678_s18 + $0x88] sm:$0xff] %vm4830_vm5, %v2184_v15  ;;  %v1643_v0 = vadd.f32 %v3595_v57, %v1609_v63  ;;  %2587 = vpow2.f32 %v2328_v50  ;;  %v3838_v17 = vadd.f32 %v3425_v49, %v2132_v33  ;;  %v2313_v39 = vmul.f32 -1.442695, %v913_v13 }
  0xfc   : > { %v1108_v34 = vsel %vm3819_vm4, %v2582_v62, %v1104_v30  ;;  %2589 = vpow2.f32 %v2336_v3  ;;  %v1231_v47 = vand.u32 2147483648, %v3812_v58  ;;  %v3845_v38 = vadd.f32 %v3425_v49, %v2152_v45 }
  0xfd   : > { %vm1675_vm7 = vcmp.gt.f32.partialorder %v1643_v0, 0.0  ;;  %v1707_v28 = vmul.f32 0.2, %v1643_v0  ;;  %v1113_v11 = vsel %vm3789_vm0, %v1112_v52, %v1108_v34  ;;  %v811_v62 = vadd.f32 %v3345_v59, %v777_v1 }
  0xfe   : > { %v1552_v46 = vmul.f32 %v1113_v11, %v4848_v41  ;;  %v785_v12 = vmul.f32 %v3329_v19, %v751_v31  ;;  %vm1225_vm8 = vweird.f32 %v3812_v58  ;;  %vm3850_vm9 = vcmp.eq.f32.partialorder %v1229_v44, 8.507059e+37 }
  0xff   : > { %v1739_v2 = vsel %vm1675_vm7, %v1643_v0, %v1707_v28  ;;  %v759_v56 = vmul.f32 %v3331_v16, %v716_v43  ;;  %2591 = vpow2.f32 %v2313_v39  ;;  %v3858_v23 = vadd.f32 %v3425_v49, %v2094_v6 }
 0x100   : > { %v2586_v52 = vpop.eup %2585  ;;  %v1773_v32 = vmul.f32 %v3642_v10, %v1739_v2  ;;  %v1586_v9 = vmul.f32 %v3575_v60, %v1552_v46  ;;  %v1232_v5 = vor.u32 1.1754944e-38, %v1231_v47  ;;  %v851_v21 = vmul.f32 %v3356_v27, %v811_v62 }
 0x101   : > { %v2588_v42 = vpop.eup %2587  ;;  %v1221_v14 = vmul.f32 %v2586_v52, %v3812_v58  ;;  %v804_v61 = vadd.f32 %v3345_v59, %v3729_v40  ;;  %v819_v7 = vadd.f32 %v3345_v59, %v785_v12  ;;  %vm1226_vm11 = vweird.f32 %v2586_v52 }
 0x102   : > { %v2590_v48 = vpop.eup %2589  ;;  %v1807_v50 = vadd.f32 %v3653_v25, %v1773_v32  ;;  %v1620_v15 = vadd.f32 %v3595_v57, %v1586_v9  ;;  %v3866_v63 = vadd.f32 1.0, %v2588_v42  ;;  %v793_v13 = vmul.f32 %v3329_v19, %v759_v56  ;;  %vm3877_vm6 = vmor %vm1225_vm8, %vm1226_vm11 }
 0x103   : > { %v1222_v33 = vsub.f32 1.0, %v1221_v14  ;;  %v3869_v3 = vadd.f32 1.0, %v2590_v48  ;;  %v885_v43 = vadd.f32 %v4832_v26, %v851_v21  ;;  %v844_v0 = vmul.f32 %v3356_v27, %v804_v61  ;;  %vm4859_vm8 = vmmov %vm4853_vm13 }
 0x104   : > { %vm1839_vm2 = vcmp.gt.f32.partialorder %v1807_v50, 0.0  ;;  %v1871_v30 = vmul.f32 0.2, %v1807_v50  ;;  %vm1652_vm12 = vcmp.gt.f32.partialorder %v1620_v15, 0.0  ;;  %v1684_v31 = vmul.f32 0.2, %v1620_v15 }
 0x105   : > { %v1223_v40 = vmul.f32 %v2586_v52, %v1222_v33  ;;  %2593 = vrcp.f32 %v3866_v63  ;;  %v2592_v44 = vpop.eup %2591  ;;  %v1349_v19 = vand.u32 2147483647, %v3866_v63  ;;  %v859_v47 = vmul.f32 %v3356_v27, %v819_v7 }
 0x106   : > { %v1903_v45 = vsel %vm1839_vm2, %v1807_v50, %v1871_v30  ;;  %v1716_v1 = vsel %vm1652_vm12, %v1620_v15, %v1684_v31  ;;  %2595 = vrcp.f32 %v3869_v3  ;;  %v1351_v6 = vand.u32 2147483648, %v3866_v63 }
 0x107   : > { %v2192_v39 = vadd.f32 %v3743_v24, %v1903_v45  ;;  %v1750_v28 = vmul.f32 %v3642_v10, %v1716_v1  ;;  %v1224_v11 = vadd.f32 %v2586_v52, %v1223_v40  ;;  %v1469_v41 = vand.u32 2147483647, %v3869_v3 }
 0x108   : > { %v1471_v58 = vand.u32 2147483648, %v3869_v3  ;;  %v827_v46 = vadd.f32 %v3345_v59, %v793_v13  ;;  %v3895_v12 = vadd.f32 1.0, %v2592_v44  ;;  %v921_v2 = vsel %vm3372_vm10, %v4836_v51, %v885_v43 }
 0x109   : > { %2224 = vst.msk [vmem:[%s3678_s18 + $0xc8] sm:$0xff] %vm4853_vm13, %v2192_v39  ;;  %v1784_v62 = vadd.f32 %v3653_v25, %v1750_v28  ;;  %v1228_v24 = vsel %vm3877_vm6, %v2586_v52, %v1224_v11  ;;  %vm1345_vm15 = vweird.f32 %v3866_v63  ;;  %vm3903_vm14 = vcmp.eq.f32.partialorder %v1349_v19, 8.507059e+37  ;;  %v4856_v52 = vld [vmem:[#allocation7_spill] sm:$0xff] }
 0x10a   : > { %v1233_v56 = vsel %vm3850_vm9, %v1232_v5, %v1228_v24  ;;  %v2321_v32 = vmul.f32 -1.442695, %v921_v2  ;;  %2597 = vrcp.f32 %v3895_v12  ;;  %v1352_v54 = vor.u32 1.1754944e-38, %v1351_v6 }
 0x10b   : > { %v2594_v9 = vpop.eup %2593  ;;  %vm1816_vm0 = vcmp.gt.f32.partialorder %v1784_v62, 0.0  ;;  %v1848_v42 = vmul.f32 0.2, %v1784_v62  ;;  %v1560_v14 = vmul.f32 %v1233_v56, %v4856_v52  ;;  %vm1465_vm1 = vweird.f32 %v3869_v3 }
 0x10c   : > { %v2596_v21 = vpop.eup %2595  ;;  %v1341_v61 = vmul.f32 %v2594_v9, %v3866_v63  ;;  %vm3911_vm3 = vcmp.eq.f32.partialorder %v1469_v41, 8.507059e+37  ;;  %v1472_v7 = vor.u32 1.1754944e-38, %v1471_v58  ;;  %vm1346_vm4 = vweird.f32 %v2594_v9 }
 0x10d   : > { %v1880_v48 = vsel %vm1816_vm0, %v1784_v62, %v1848_v42  ;;  %v1594_v50 = vmul.f32 %v3575_v60, %v1560_v14  ;;  %v1461_v15 = vmul.f32 %v2596_v21, %v3869_v3  ;;  %vm1120_vm5 = vweird.f32 %v3895_v12  ;;  %vm3927_vm11 = vmor %vm1345_vm15, %vm1346_vm4 }
 0x10e   : > { %v2169_v33 = vadd.f32 %v3752_v53, %v1880_v48  ;;  %v1342_v13 = vsub.f32 1.0, %v1341_v61  ;;  %vm1466_vm7 = vweird.f32 %v2596_v21  ;;  %2599 = vpow2.f32 %v2321_v32  ;;  %vm4870_vm0 = vmmov %vm4859_vm8 }
 0x10f   : > { %v1628_v30 = vadd.f32 %v3595_v57, %v1594_v50  ;;  %v1462_v31 = vsub.f32 1.0, %v1461_v15  ;;  %v1124_v43 = vand.u32 2147483647, %v3895_v12  ;;  %v893_v44 = vadd.f32 %v4832_v26, %v859_v47  ;;  %vm3934_vm2 = vmor %vm1465_vm1, %vm1466_vm7 }
 0x110   : > { %2201 = vst.msk [vmem:[%s3678_s18 + $0x10] sm:$0xff] %vm4859_vm8, %v2169_v33  ;;  %v1343_v40 = vmul.f32 %v2594_v9, %v1342_v13  ;;  %v867_v45 = vmul.f32 %v3356_v27, %v827_v46  ;;  %v2598_v1 = vpop.eup %2597  ;;  %v1126_v39 = vand.u32 2147483648, %v3895_v12  ;;  %v878_v47 = vadd.f32 %v4832_v26, %v844_v0 }
 0x111   : > { %vm1660_vm9 = vcmp.gt.f32.partialorder %v1628_v30, 0.0  ;;  %v1692_v53 = vmul.f32 0.2, %v1628_v30  ;;  %v1463_v19 = vmul.f32 %v2596_v21, %v1462_v31  ;;  %v1116_v27 = vmul.f32 %v2598_v1, %v3895_v12  ;;  %v4868_v12 = vld [vmem:[#allocation9_spill] sm:$0xff] }
 0x112   : > { %v1344_v28 = vadd.f32 %v2594_v9, %v1343_v40  ;;  %v929_v63 = vsel %vm3372_vm10, %v4836_v51, %v893_v44  ;;  %v901_v46 = vadd.f32 %v4832_v26, %v867_v45  ;;  %vm1121_vm12 = vweird.f32 %v2598_v1 }
 0x113   : > { %v1724_v6 = vsel %vm1660_vm9, %v1628_v30, %v1692_v53  ;;  %v1464_v41 = vadd.f32 %v2596_v21, %v1463_v19  ;;  %v2329_v58 = vmul.f32 -1.442695, %v929_v63  ;;  %v1117_v24 = vsub.f32 1.0, %v1116_v27  ;;  %vm3961_vm6 = vmor %vm1120_vm5, %vm1121_vm12  ;;  %v2114_v53 = vpop.f32.mrf.mxu1  ;;  %v4869_v19 = vld [vmem:[#allocation3_spill] sm:$0xff] }
 0x114   : > { %v1758_v62 = vmul.f32 %v3642_v10, %v1724_v6  ;;  %v1348_v3 = vsel %vm3927_vm11, %v2594_v9, %v1344_v28  ;;  %v2600_v2 = vpop.eup %2599  ;;  %v937_v0 = vsel %vm3372_vm10, %v4836_v51, %v901_v46  ;;  %vm3965_vm13 = vcmp.eq.f32.partialorder %v1124_v43, 8.507059e+37  ;;  %vm4875_vm12 = vmmov %vm4870_vm0 }
 0x115   : > { %v1353_v56 = vsel %vm3903_vm14, %v1352_v54, %v1348_v3  ;;  %v1468_v32 = vsel %vm3934_vm2, %v2596_v21, %v1464_v41  ;;  %2601 = vpow2.f32 %v2329_v58  ;;  %v1118_v52 = vmul.f32 %v2598_v1, %v1117_v24 }
 0x116   : > { %v1792_v26 = vadd.f32 %v3653_v25, %v1758_v62  ;;  %v1568_v42 = vmul.f32 %v1353_v56, %v3128_v37  ;;  %v1473_v9 = vsel %vm3911_vm3, %v1472_v7, %v1468_v32  ;;  %v1127_v61 = vor.u32 1.1754944e-38, %v1126_v39 }
 0x117   : > { %v1576_v14 = vmul.f32 %v1473_v9, %v3224_v8  ;;  %v1049_v54 = vadd.f32 1.0, %v2600_v2  ;;  %v1119_v48 = vadd.f32 %v2598_v1, %v1118_v52  ;;  %v2337_v8 = vmul.f32 -1.442695, %v937_v0 }
 0x118   : > { %vm1824_vm15 = vcmp.gt.f32.partialorder %v1792_v26, 0.0  ;;  %v1856_v37 = vmul.f32 0.2, %v1792_v26  ;;  %v1602_v5 = vmul.f32 %v3575_v60, %v1568_v42  ;;  %v701_v15 = vsub.f32 %v4868_v12, %v3304_v29 }
 0x119   : > { %v1610_v50 = vmul.f32 %v3575_v60, %v1576_v14  ;;  %2603 = vrcp.f32 %v1049_v54  ;;  %v1123_v13 = vsel %vm3961_vm6, %v2598_v1, %v1119_v48  ;;  %v914_v30 = vsel %vm3372_vm10, %v4836_v51, %v878_v47 }
 0x11a   : > { %v1888_v7 = vsel %vm1824_vm15, %v1792_v26, %v1856_v37  ;;  %v1636_v33 = vadd.f32 %v3595_v57, %v1602_v5  ;;  %v1128_v44 = vsel %vm3965_vm13, %v1127_v61, %v1123_v13  ;;  %v1244_v45 = vand.u32 2147483647, %v1049_v54  ;;  %vm4876_vm13 = vmmov %vm4870_vm0  ;;  %v4887_v5 = vld [vmem:[#allocation20_spill] sm:$0xff] }
 0x11b   : > { %v2602_v31 = vpop.eup %2601  ;;  %v2177_v40 = vadd.f32 %v3772_v20, %v1888_v7  ;;  %v1644_v43 = vadd.f32 %v3595_v57, %v1610_v50  ;;  %v1553_v39 = vmul.f32 %v1128_v44, %v4869_v19  ;;  %v1246_v28 = vand.u32 2147483648, %v1049_v54 }
 0x11c   : > { %vm1668_vm14 = vcmp.gt.f32.partialorder %v1636_v33, 0.0  ;;  %v1700_v34 = vmul.f32 0.2, %v1636_v33  ;;  %v3986_v11 = vadd.f32 1.0, %v2602_v31  ;;  %2605 = vpow2.f32 %v2337_v8 }
 0x11d   : > { %2209 = vst.msk [vmem:[%s3678_s18 + $0x50] sm:$0xff] %vm4870_vm0, %v2177_v40  ;;  %vm1676_vm1 = vcmp.gt.f32.partialorder %v1644_v43, 0.0  ;;  %v1708_v1 = vmul.f32 0.2, %v1644_v43  ;;  %v1587_v27 = vmul.f32 %v3575_v60, %v1553_v39  ;;  %v3990_v63 = vadd.f32 %v3425_v49, %v2114_v53 }
 0x11e   : > { %v1732_v20 = vsel %vm1668_vm14, %v1636_v33, %v1700_v34  ;;  %v2314_v47 = vmul.f32 -1.442695, %v914_v30  ;;  %vm1240_vm3 = vweird.f32 %v1049_v54  ;;  %2607 = vrcp.f32 %v3986_v11 }
 0x11f   : > { %v2604_v6 = vpop.eup %2603  ;;  %v1766_v41 = vmul.f32 %v3642_v10, %v1732_v20  ;;  %v1740_v58 = vsel %vm1676_vm1, %v1644_v43, %v1708_v1  ;;  %v1621_v62 = vadd.f32 %v3595_v57, %v1587_v27  ;;  %vm3996_vm4 = vcmp.eq.f32.partialorder %v1244_v45, 8.507059e+37 }
 0x120   : > { %v1774_v46 = vmul.f32 %v3642_v10, %v1740_v58  ;;  %v1236_v3 = vmul.f32 %v2604_v6, %v1049_v54  ;;  %vm1241_vm5 = vweird.f32 %v2604_v6  ;;  %v1247_v2 = vor.u32 1.1754944e-38, %v1246_v28 }
 0x121   : > { %v1800_v49 = vadd.f32 %v3653_v25, %v1766_v41  ;;  %2609 = vpow2.f32 %v2314_v47  ;;  %vm1653_vm7 = vcmp.gt.f32.partialorder %v1621_v62, 0.0  ;;  %v1685_v32 = vmul.f32 0.2, %v1621_v62  ;;  %vm4007_vm2 = vmor %vm1240_vm3, %vm1241_vm5 }
 0x122   : > { %v1808_v56 = vadd.f32 %v3653_v25, %v1774_v46  ;;  %v1237_v0 = vsub.f32 1.0, %v1236_v3  ;;  %v2606_v26 = vpop.eup %2605  ;;  %vm1360_vm9 = vweird.f32 %v3986_v11  ;;  %v1364_v9 = vand.u32 2147483647, %v3986_v11  ;;  %v4064_v3 = vld [vmem:[%s4721_s3 + $0x6] ss:$0 sm:$0xff] }
 0x123   : > { %vm1832_vm8 = vcmp.gt.f32.partialorder %v1800_v49, 0.0  ;;  %v1864_v42 = vmul.f32 0.2, %v1800_v49  ;;  %v1717_v14 = vsel %vm1653_vm7, %v1621_v62, %v1685_v32  ;;  %v1366_v48 = vand.u32 2147483648, %v3986_v11 }
 0x124   : > { %vm1840_vm11 = vcmp.gt.f32.partialorder %v1808_v56, 0.0  ;;  %v1872_v52 = vmul.f32 0.2, %v1808_v56  ;;  %v1238_v59 = vmul.f32 %v2604_v6, %v1237_v0  ;;  %v2608_v21 = vpop.eup %2607  ;;  %v1751_v37 = vmul.f32 %v3642_v10, %v1717_v14  ;;  %v4080_v0 = vld [vmem:[%s4721_s3 + $0x3] ss:$0 sm:$0xff] }
 0x125   : > { %v1896_v61 = vsel %vm1832_vm8, %v1800_v49, %v1864_v42  ;;  %v4012_v50 = vadd.f32 1.0, %v2606_v26  ;;  %v1356_v13 = vmul.f32 %v2608_v21, %v3986_v11  ;;  %v744_v40 = vmul.f32 %v3331_v16, %v701_v15 }
 0x126   : > { %v2185_v8 = vadd.f32 %v3838_v17, %v1896_v61  ;;  %v1904_v7 = vsel %vm1840_vm11, %v1808_v56, %v1872_v52  ;;  %v1239_v33 = vadd.f32 %v2604_v6, %v1238_v59  ;;  %v1785_v54 = vadd.f32 %v3653_v25, %v1751_v37  ;;  %v4091_v59 = vld [vmem:[%s4721_s3 + $0x4] ss:$0 sm:$0xff] }
 0x127   : > { %v2610_v30 = vpop.eup %2609  ;;  %v2193_v31 = vadd.f32 %v3845_v38, %v1904_v7  ;;  %2611 = vrcp.f32 %v4012_v50  ;;  %v1357_v43 = vsub.f32 1.0, %v1356_v13  ;;  %vm1361_vm6 = vweird.f32 %v2608_v21  ;;  %v4886_v61 = vld [vmem:[#allocation14_spill] sm:$0xff] }
 0x128   : > { %2217 = vst.msk [vmem:[%s3678_s18 + $0x90] sm:$0xff] %vm4875_vm12, %v2185_v8  ;;  %v1243_v17 = vsel %vm4007_vm2, %v2604_v6, %v1239_v33  ;;  %v1484_v44 = vand.u32 2147483647, %v4012_v50  ;;  %vm1817_vm15 = vcmp.gt.f32.partialorder %v1785_v54, 0.0  ;;  %v1849_v38 = vmul.f32 0.2, %v1785_v54  ;;  %vm4042_vm0 = vmor %vm1360_vm9, %vm1361_vm6 }
 0x129   : > { %2225 = vst.msk [vmem:[%s3678_s18 + $0xd0] sm:$0xff] %vm4876_vm13, %v2193_v31  ;;  %v1248_v45 = vsel %vm3996_vm4, %v1247_v2, %v1243_v17  ;;  %v1486_v53 = vand.u32 2147483648, %v4012_v50  ;;  %v1358_v34 = vmul.f32 %v2608_v21, %v1357_v43  ;;  %vm4034_vm14 = vcmp.eq.f32.partialorder %v1364_v9, 8.507059e+37  ;;  %vm4883_vm4 = vmmov %vm4875_vm12  ;;  %v4888_v8 = vld [vmem:[#allocation27_spill] sm:$0xff] }
 0x12a   : > { %v1561_v15 = vmul.f32 %v1248_v45, %v4840_v4  ;;  %v4038_v39 = vadd.f32 1.0, %v2610_v30  ;;  %v1881_v28 = vsel %vm1817_vm15, %v1785_v54, %v1849_v38  ;;  %v1367_v20 = vor.u32 1.1754944e-38, %v1366_v48  ;;  %v4050_v4 = vld [vmem:[%s4721_s3 + $0x5] ss:$0 sm:$0xff]  ;;  %vm4894_vm15 = vmmov %vm4883_vm4 }
 0x12b   : > { %vm1480_vm1 = vweird.f32 %v4012_v50  ;;  %v778_v27 = vmul.f32 %v4050_v4, %v744_v40  ;;  %v2170_v47 = vadd.f32 %v3858_v23, %v1881_v28  ;;  %v1359_v11 = vadd.f32 %v2608_v21, %v1358_v34 }
 0x12c   : > { %v1595_v6 = vmul.f32 %v3575_v60, %v1561_v15  ;;  %2613 = vrcp.f32 %v4038_v39  ;;  %vm4056_vm3 = vcmp.eq.f32.partialorder %v1484_v44, 8.507059e+37  ;;  %v1487_v46 = vor.u32 1.1754944e-38, %v1486_v53 }
 0x12d   : > { %v2612_v41 = vpop.eup %2611  ;;  %v1139_v62 = vand.u32 2147483647, %v4038_v39  ;;  %v812_v23 = vadd.f32 %v4064_v3, %v778_v27  ;;  %2202 = vst.msk [vmem:[%s3678_s18 + $0x18] sm:$0xff] %vm4883_vm4, %v2170_v47  ;;  %v1363_v49 = vsel %vm4042_vm0, %v2608_v21, %v1359_v11  ;;  %v1141_v56 = vand.u32 2147483648, %v4038_v39  ;;  %v2134_v11 = vpop.f32.mrf.mxu2 }
 0x12e   : > { %v1629_v24 = vadd.f32 %v3595_v57, %v1595_v6  ;;  %v1476_v2 = vmul.f32 %v2612_v41, %v4012_v50  ;;  %v1368_v32 = vsel %vm4034_vm14, %v1367_v20, %v1363_v49  ;;  %vm1481_vm5 = vweird.f32 %v2612_v41 }
 0x12f   : > { %vm1135_vm7 = vweird.f32 %v4038_v39  ;;  %v852_v26 = vmul.f32 %v4080_v0, %v812_v23  ;;  %v1569_v9 = vmul.f32 %v1368_v32, %v4843_v18  ;;  %vm4084_vm9 = vcmp.eq.f32.partialorder %v1139_v62, 8.507059e+37  ;;  %vm4105_vm11 = vmor %vm1480_vm1, %vm1481_vm5 }
 0x130   : > { %vm1661_vm8 = vcmp.gt.f32.partialorder %v1629_v24, 0.0  ;;  %v1693_v42 = vmul.f32 0.2, %v1629_v24  ;;  %v1477_v52 = vsub.f32 1.0, %v1476_v2  ;;  %v709_v37 = vsub.f32 %v4886_v61, %v3304_v29 }
 0x131   : > { %v886_v21 = vadd.f32 %v4091_v59, %v852_v26  ;;  %v717_v48 = vsub.f32 %v4887_v5, %v3304_v29  ;;  %v771_v18 = vmul.f32 %v4050_v4, %v4888_v8  ;;  %v1603_v13 = vmul.f32 %v3575_v60, %v1569_v9 }
 0x132   : > { %v2614_v7 = vpop.eup %2613  ;;  %v1725_v33 = vsel %vm1661_vm8, %v1629_v24, %v1693_v42  ;;  %v1478_v30 = vmul.f32 %v2612_v41, %v1477_v52  ;;  %v1142_v31 = vor.u32 1.1754944e-38, %v1141_v56  ;;  %v752_v53 = vmul.f32 %v3331_v16, %v709_v37  ;;  %v4142_v42 = vld [vmem:[%s4722_s4 + $0x4] ss:$0 sm:$0xff] }
 0x133   : > { %v1759_v54 = vmul.f32 %v3642_v10, %v1725_v33  ;;  %v1131_v17 = vmul.f32 %v2614_v7, %v4038_v39  ;;  %vm1136_vm2 = vweird.f32 %v2614_v7  ;;  %v922_v43 = vsel %vm3372_vm10, %v4836_v51, %v886_v21 }
 0x134   : > { %v1637_v44 = vadd.f32 %v3595_v57, %v1603_v13  ;;  %v1479_v38 = vadd.f32 %v2612_v41, %v1478_v30  ;;  %v2322_v45 = vmul.f32 -1.442695, %v922_v43  ;;  %v760_v34 = vmul.f32 %v3331_v16, %v717_v48  ;;  %vm4126_vm13 = vmor %vm1135_vm7, %vm1136_vm2  ;;  %v2154_v48 = vpop.f32.mrf.mxu3  ;;  %v4895_v30 = vld [vmem:[#allocation4_spill] sm:$0xff] }
 0x135   : > { %v1793_v15 = vadd.f32 %v3653_v25, %v1759_v54  ;;  %v1132_v50 = vsub.f32 1.0, %v1131_v17  ;;  %v805_v19 = vadd.f32 %v4064_v3, %v771_v18  ;;  %v2135_v9 = vadd.f32 %v4142_v42, %v2134_v11 }
 0x136   : > { %vm1669_vm12 = vcmp.gt.f32.partialorder %v1637_v44, 0.0  ;;  %v1701_v28 = vmul.f32 0.2, %v1637_v44  ;;  %v1483_v1 = vsel %vm4105_vm11, %v2612_v41, %v1479_v38  ;;  %2615 = vpow2.f32 %v2322_v45 }
 0x137   : > { %vm1825_vm6 = vcmp.gt.f32.partialorder %v1793_v15, 0.0  ;;  %v1857_v20 = vmul.f32 0.2, %v1793_v15  ;;  %v1488_v27 = vsel %vm4056_vm3, %v1487_v46, %v1483_v1  ;;  %v1133_v47 = vmul.f32 %v2614_v7, %v1132_v50  ;;  %v4175_v50 = vld [vmem:[%s4722_s4 + $0x1] ss:$0 sm:$0xff]  ;;  %vm4896_vm3 = vmmov %vm4883_vm4 }
 0x138   : > { %v1733_v6 = vsel %vm1669_vm12, %v1637_v44, %v1701_v28  ;;  %v1577_v62 = vmul.f32 %v1488_v27, %v4847_v36  ;;  %v786_v41 = vmul.f32 %v4050_v4, %v752_v53  ;;  %v794_v24 = vmul.f32 %v4050_v4, %v760_v34  ;;  %vm4900_vm8 = vmmov %vm4896_vm3 }
 0x139   : > { %v1889_v49 = vsel %vm1825_vm6, %v1793_v15, %v1857_v20  ;;  %v1767_v58 = vmul.f32 %v3642_v10, %v1733_v6  ;;  %v1134_v46 = vadd.f32 %v2614_v7, %v1133_v47  ;;  %v845_v2 = vmul.f32 %v4080_v0, %v805_v19  ;;  %vm4906_vm12 = vmmov %vm4896_vm3 }
 0x13a   : > { %v2178_v36 = vadd.f32 %v3990_v63, %v1889_v49  ;;  %v1611_v56 = vmul.f32 %v3575_v60, %v1577_v62  ;;  %v820_v39 = vadd.f32 %v4064_v3, %v786_v41  ;;  %v828_v32 = vadd.f32 %v4064_v3, %v794_v24  ;;  %v4893_v63 = vld [vmem:[#allocation10_spill] sm:$0xff] }
 0x13b   : > { %v1801_v26 = vadd.f32 %v3653_v25, %v1767_v58  ;;  %v1138_v52 = vsel %vm4126_vm13, %v2614_v7, %v1134_v46  ;;  %v702_v21 = vsub.f32 %v4893_v63, %v3304_v29  ;;  %v2155_v14 = vadd.f32 %v4142_v42, %v2154_v48  ;;  %v4897_v46 = vld [vmem:[#allocation15_spill] sm:$0xff]  ;;  %v2117_v48 = vpop.f32.mrf.mxu1 }
 0x13c   : > { %v2616_v60 = vpop.eup %2615  ;;  %2210 = vst.msk [vmem:[%s3678_s18 + $0x58] sm:$0xff] %vm4894_vm15, %v2178_v36  ;;  %v1645_v37 = vadd.f32 %v3595_v57, %v1611_v56  ;;  %v1143_v8 = vsel %vm4084_vm9, %v1142_v31, %v1138_v52  ;;  %v860_v18 = vmul.f32 %v4080_v0, %v820_v39  ;;  %v868_v33 = vmul.f32 %v4080_v0, %v828_v32  ;;  %v4165_v31 = vld [vmem:[%s4722_s4] ss:$0 sm:$0xff]  ;;  %v2097_v32 = vpop.f32.mrf.mxu0 }
 0x13d   : > { %vm1833_vm14 = vcmp.gt.f32.partialorder %v1801_v26, 0.0  ;;  %v1865_v13 = vmul.f32 0.2, %v1801_v26  ;;  %v1554_v7 = vmul.f32 %v1143_v8, %v4895_v30  ;;  %v4157_v54 = vadd.f32 1.0, %v2616_v60  ;;  %v4898_v8 = vld [vmem:[#allocation21_spill] sm:$0xff] }
 0x13e   : > { %vm1677_vm0 = vcmp.gt.f32.partialorder %v1645_v37, 0.0  ;;  %v1709_v40 = vmul.f32 0.2, %v1645_v37  ;;  %v894_v17 = vadd.f32 %v4091_v59, %v860_v18  ;;  %v879_v57 = vadd.f32 %v4091_v59, %v845_v2 }
 0x13f   : > { %v1897_v43 = vsel %vm1833_vm14, %v1801_v26, %v1865_v13  ;;  %v1588_v44 = vmul.f32 %v4165_v31, %v1554_v7  ;;  %2617 = vrcp.f32 %v4157_v54  ;;  %vm1255_vm1 = vweird.f32 %v4157_v54 }
 0x140   : > { %v2186_v38 = vadd.f32 %v2135_v9, %v1897_v43  ;;  %v1741_v45 = vsel %vm1677_vm0, %v1645_v37, %v1709_v40  ;;  %v745_v53 = vmul.f32 %v3331_v16, %v702_v21  ;;  %v930_v19 = vsel %vm3372_vm10, %v4836_v51, %v894_v17  ;;  %v4208_v21 = vld [vmem:[%s4722_s4 + $0x3] ss:$0 sm:$0xff] }
 0x141   : > { %v1775_v15 = vmul.f32 %v3642_v10, %v1741_v45  ;;  %v1622_v34 = vadd.f32 %v4175_v50, %v1588_v44  ;;  %v902_v28 = vadd.f32 %v4091_v59, %v868_v33  ;;  %v1259_v1 = vand.u32 2147483647, %v4157_v54  ;;  %v4899_v33 = vld [vmem:[#allocation6_spill] sm:$0xff] }
 0x142   : > { %2218 = vst.msk [vmem:[%s3678_s18 + $0x98] sm:$0xff] %vm4896_vm3, %v2186_v38  ;;  %v1261_v20 = vand.u32 2147483648, %v4157_v54  ;;  %v2330_v10 = vmul.f32 -1.442695, %v930_v19  ;;  %v915_v27 = vsel %vm3372_vm10, %v4836_v51, %v879_v57  ;;  %v779_v41 = vmul.f32 %v4050_v4, %v745_v53 }
 0x143   : > { %v1809_v47 = vadd.f32 %v3653_v25, %v1775_v15  ;;  %vm1654_vm4 = vcmp.gt.f32.partialorder %v1622_v34, 0.0  ;;  %v1686_v6 = vmul.f32 0.2, %v1622_v34  ;;  %v938_v11 = vsel %vm3372_vm10, %v4836_v51, %v902_v28  ;;  %v4199_v25 = vld [vmem:[%s4722_s4 + $0x2] ss:$0 sm:$0xff] }
 0x144   : > { %2619 = vpow2.f32 %v2330_v10  ;;  %v2338_v62 = vmul.f32 -1.442695, %v938_v11  ;;  %v2315_v23 = vmul.f32 -1.442695, %v915_v27  ;;  %v710_v2 = vsub.f32 %v4897_v46, %v3304_v29 }
 0x145   : > { %v2618_v24 = vpop.eup %2617  ;;  %vm1841_vm5 = vcmp.gt.f32.partialorder %v1809_v47, 0.0  ;;  %v1873_v49 = vmul.f32 0.2, %v1809_v47  ;;  %v1718_v58 = vsel %vm1654_vm4, %v1622_v34, %v1686_v6  ;;  %v813_v26 = vadd.f32 %v4064_v3, %v779_v41  ;;  %v4905_v6 = vld [vmem:[#allocation11_spill] sm:$0xff]  ;;  %v2157_v41 = vpop.f32.mrf.mxu3 }
 0x146   : > { %v1752_v36 = vmul.f32 %v4199_v25, %v1718_v58  ;;  %v1251_v56 = vmul.f32 %v2618_v24, %v4157_v54  ;;  %vm1256_vm7 = vweird.f32 %v2618_v24  ;;  %2621 = vpow2.f32 %v2338_v62 }
 0x147   : > { %v1905_v39 = vsel %vm1841_vm5, %v1809_v47, %v1873_v49  ;;  %2623 = vpow2.f32 %v2315_v23  ;;  %v753_v9 = vmul.f32 %v3331_v16, %v710_v2  ;;  %v718_v18 = vsub.f32 %v4898_v8, %v3304_v29  ;;  %vm4229_vm2 = vmor %vm1255_vm1, %vm1256_vm7 }
 0x148   : > { %v2194_v52 = vadd.f32 %v2155_v14, %v1905_v39  ;;  %v1786_v60 = vadd.f32 %v4208_v21, %v1752_v36  ;;  %v1252_v37 = vsub.f32 1.0, %v1251_v56  ;;  %v696_v13 = vsub.f32 %v4899_v33, %v3304_v29 }
 0x149   : > { %v2098_v30 = vadd.f32 %v4142_v42, %v2097_v32  ;;  %v4217_v7 = vadd.f32 %v4142_v42, %v2117_v48  ;;  %v853_v40 = vmul.f32 %v4080_v0, %v813_v26  ;;  %vm4222_vm11 = vcmp.eq.f32.partialorder %v1259_v1, 8.507059e+37  ;;  %v2137_v1 = vpop.f32.mrf.mxu2 }
 0x14a   : > { %v2620_v17 = vpop.eup %2619  ;;  %2226 = vst.msk [vmem:[%s3678_s18 + $0xd8] sm:$0xff] %vm4900_vm8, %v2194_v52  ;;  %vm1818_vm9 = vcmp.gt.f32.partialorder %v1786_v60, 0.0  ;;  %v1850_v57 = vmul.f32 0.2, %v1786_v60  ;;  %v1253_v43 = vmul.f32 %v2618_v24, %v1252_v37  ;;  %v1262_v38 = vor.u32 1.1754944e-38, %v1261_v20  ;;  %v2099_v52 = vpop.f32.mrf.mxu0 }
 0x14b   : > { %v4233_v45 = vadd.f32 1.0, %v2620_v17  ;;  %v787_v53 = vmul.f32 %v4050_v4, %v753_v9  ;;  %v772_v15 = vmul.f32 %v4050_v4, %v3712_v55  ;;  %v887_v10 = vadd.f32 %v4091_v59, %v853_v40 }
 0x14c   : > { %v2622_v34 = vpop.eup %2621  ;;  %v1882_v19 = vsel %vm1818_vm9, %v1786_v60, %v1850_v57  ;;  %v1254_v28 = vadd.f32 %v2618_v24, %v1253_v43  ;;  %v761_v54 = vmul.f32 %v3331_v16, %v718_v18  ;;  %v703_v11 = vsub.f32 %v4905_v6, %v3304_v29 }
 0x14d   : > { %v2624_v27 = vpop.eup %2623  ;;  %v2171_v47 = vadd.f32 %v2098_v30, %v1882_v19  ;;  %2625 = vrcp.f32 %v4233_v45  ;;  %v1379_v20 = vand.u32 2147483647, %v4233_v45  ;;  %v1381_v62 = vand.u32 2147483648, %v4233_v45 }
 0x14e   : > { %v1258_v55 = vsel %vm4229_vm2, %v2618_v24, %v1254_v28  ;;  %v4247_v23 = vadd.f32 1.0, %v2622_v34  ;;  %v4249_v49 = vadd.f32 1.0, %v2624_v27  ;;  %v4256_v2 = vadd.f32 %v4142_v42, %v2137_v1 }
 0x14f   : > { %2203 = vst.msk [vmem:[%s3678_s18 + $0x20] sm:$0xff] %vm4906_vm12, %v2171_v47  ;;  %v1263_v58 = vsel %vm4222_vm11, %v1262_v38, %v1258_v55  ;;  %v821_v36 = vadd.f32 %v4064_v3, %v787_v53  ;;  %v806_v56 = vadd.f32 %v4064_v3, %v772_v15  ;;  %v923_v39 = vsel %vm3372_vm10, %v4836_v51, %v887_v10 }
 0x150   : > { %v1562_v24 = vmul.f32 %v1263_v58, %v4868_v12  ;;  %2627 = vrcp.f32 %v4247_v23  ;;  %v795_v32 = vmul.f32 %v4050_v4, %v761_v54  ;;  %vm1375_vm6 = vweird.f32 %v4233_v45  ;;  %v4917_v58 = vld [vmem:[#allocation5_spill] sm:$0xff] }
 0x151   : > { %v1499_v26 = vand.u32 2147483647, %v4247_v23  ;;  %v4269_v9 = vadd.f32 %v4142_v42, %v2157_v41  ;;  %2629 = vrcp.f32 %v4249_v49  ;;  %vm4273_vm13 = vcmp.eq.f32.partialorder %v1379_v20, 8.507059e+37 }
 0x152   : > { %v1596_v12 = vmul.f32 %v4165_v31, %v1562_v24  ;;  %v1382_v37 = vor.u32 1.1754944e-38, %v1381_v62  ;;  %vm1495_vm15 = vweird.f32 %v4247_v23  ;;  %v1501_v48 = vand.u32 2147483648, %v4247_v23 }
 0x153   : > { %v2626_v18 = vpop.eup %2625  ;;  %vm1150_vm14 = vweird.f32 %v4249_v49  ;;  %v1154_v30 = vand.u32 2147483647, %v4249_v49  ;;  %v2323_v40 = vmul.f32 -1.442695, %v923_v39  ;;  %v861_v17 = vmul.f32 %v4080_v0, %v821_v36 }
 0x154   : > { %v1630_v57 = vadd.f32 %v4175_v50, %v1596_v12  ;;  %v1371_v43 = vmul.f32 %v2626_v18, %v4233_v45  ;;  %v1156_v14 = vand.u32 2147483648, %v4249_v49  ;;  %v4286_v44 = vadd.f32 %v4142_v42, %v2099_v52 }
 0x155   : > { %vm4288_vm0 = vcmp.eq.f32.partialorder %v1499_v26, 8.507059e+37  ;;  %2631 = vpow2.f32 %v2323_v40  ;;  %v895_v53 = vadd.f32 %v4091_v59, %v861_v17  ;;  %v829_v15 = vadd.f32 %v4064_v3, %v795_v32 }
 0x156   : > { %v2628_v34 = vpop.eup %2627  ;;  %vm1662_vm1 = vcmp.gt.f32.partialorder %v1630_v57, 0.0  ;;  %v1694_v19 = vmul.f32 0.2, %v1630_v57  ;;  %v1372_v28 = vsub.f32 1.0, %v1371_v43  ;;  %vm1376_vm3 = vweird.f32 %v2626_v18 }
 0x157   : > { %v2630_v1 = vpop.eup %2629  ;;  %v1491_v10 = vmul.f32 %v2628_v34, %v4247_v23  ;;  %v1502_v54 = vor.u32 1.1754944e-38, %v1501_v48  ;;  %v931_v27 = vsel %vm3372_vm10, %v4836_v51, %v895_v53  ;;  %v869_v47 = vmul.f32 %v4080_v0, %v829_v15  ;;  %vm4303_vm5 = vmor %vm1375_vm6, %vm1376_vm3 }
 0x158   : > { %v1726_v20 = vsel %vm1662_vm1, %v1630_v57, %v1694_v19  ;;  %v1373_v55 = vmul.f32 %v2626_v18, %v1372_v28  ;;  %vm1496_vm4 = vweird.f32 %v2628_v34  ;;  %v1146_v62 = vmul.f32 %v2630_v1, %v4249_v49 }
 0x159   : > { %v1760_v41 = vmul.f32 %v4199_v25, %v1726_v20  ;;  %v1492_v36 = vsub.f32 1.0, %v1491_v10  ;;  %v2331_v24 = vmul.f32 -1.442695, %v931_v27  ;;  %v903_v39 = vadd.f32 %v4091_v59, %v869_v47  ;;  %vm4315_vm8 = vmor %vm1495_vm15, %vm1496_vm4 }
 0x15a   : > { %v1374_v32 = vadd.f32 %v2626_v18, %v1373_v55  ;;  %v1147_v26 = vsub.f32 1.0, %v1146_v62  ;;  %vm1151_vm7 = vweird.f32 %v2630_v1  ;;  %v1157_v52 = vor.u32 1.1754944e-38, %v1156_v14 }
 0x15b   : > { %v2632_v12 = vpop.eup %2631  ;;  %v1794_v48 = vadd.f32 %v4208_v21, %v1760_v41  ;;  %v1493_v40 = vmul.f32 %v2628_v34, %v1492_v36  ;;  %2633 = vpow2.f32 %v2331_v24  ;;  %v846_v17 = vmul.f32 %v4080_v0, %v806_v56  ;;  %vm4329_vm11 = vmor %vm1150_vm14, %vm1151_vm7  ;;  %v2119_v24 = vpop.f32.mrf.mxu1 }
 0x15c   : > { %v1378_v45 = vsel %vm4303_vm5, %v2626_v18, %v1374_v32  ;;  %v1148_v43 = vmul.f32 %v2630_v1, %v1147_v26  ;;  %v4319_v53 = vadd.f32 1.0, %v2632_v12  ;;  %v939_v14 = vsel %vm3372_vm10, %v4836_v51, %v903_v39 }
 0x15d   : > { %vm1826_vm9 = vcmp.gt.f32.partialorder %v1794_v48, 0.0  ;;  %v1858_v15 = vmul.f32 0.2, %v1794_v48  ;;  %v1383_v56 = vsel %vm4273_vm13, %v1382_v37, %v1378_v45  ;;  %v1494_v18 = vadd.f32 %v2628_v34, %v1493_v40 }
 0x15e   : > { %v1570_v19 = vmul.f32 %v1383_v56, %v4886_v61  ;;  %v1149_v28 = vadd.f32 %v2630_v1, %v1148_v43  ;;  %vm1155_vm2 = vcmp.eq.f32.partialorder %v1154_v30, 8.507059e+37  ;;  %2635 = vrcp.f32 %v4319_v53 }
 0x15f   : > { %v1890_v10 = vsel %vm1826_vm9, %v1794_v48, %v1858_v15  ;;  %v1498_v60 = vsel %vm4315_vm8, %v2628_v34, %v1494_v18  ;;  %v1274_v37 = vand.u32 2147483647, %v4319_v53  ;;  %v2339_v27 = vmul.f32 -1.442695, %v939_v14 }
 0x160   : > { %v2179_v49 = vadd.f32 %v4217_v7, %v1890_v10  ;;  %v1604_v47 = vmul.f32 %v4165_v31, %v1570_v19  ;;  %v1503_v20 = vsel %vm4288_vm0, %v1502_v54, %v1498_v60  ;;  %v1153_v61 = vsel %vm4329_vm11, %v2630_v1, %v1149_v28  ;;  %vm4922_vm11 = vmmov %vm4906_vm12 }
 0x161   : > { %v2634_v30 = vpop.eup %2633  ;;  %v1578_v55 = vmul.f32 %v1503_v20, %v4887_v5  ;;  %v1158_v62 = vsel %vm1155_vm2, %v1157_v52, %v1153_v61  ;;  %v1276_v41 = vand.u32 2147483648, %v4319_v53  ;;  %v880_v34 = vadd.f32 %v4091_v59, %v846_v17 }
 0x162   : > { %2211 = vst.msk [vmem:[%s3678_s18 + $0x60] sm:$0xff] %vm4906_vm12, %v2179_v49  ;;  %v1638_v7 = vadd.f32 %v4175_v50, %v1604_v47  ;;  %v1555_v36 = vmul.f32 %v1158_v62, %v4917_v58  ;;  %v4351_v38 = vadd.f32 1.0, %v2634_v30  ;;  %v746_v1 = vmul.f32 %v3331_v16, %v703_v11 }
 0x163   : > { %v1612_v5 = vmul.f32 %v4165_v31, %v1578_v55  ;;  %vm1270_vm6 = vweird.f32 %v4319_v53  ;;  %vm4359_vm13 = vcmp.eq.f32.partialorder %v1274_v37, 8.507059e+37  ;;  %2637 = vpow2.f32 %v2339_v27 }
 0x164   : > { %v2636_v39 = vpop.eup %2635  ;;  %vm1670_vm15 = vcmp.gt.f32.partialorder %v1638_v7, 0.0  ;;  %v1702_v32 = vmul.f32 0.2, %v1638_v7  ;;  %v1589_v26 = vmul.f32 %v4165_v31, %v1555_v36  ;;  %2639 = vrcp.f32 %v4351_v38 }
 0x165   : > { %v1646_v52 = vadd.f32 %v4175_v50, %v1612_v5  ;;  %v1266_v11 = vmul.f32 %v2636_v39, %v4319_v53  ;;  %v1277_v12 = vor.u32 1.1754944e-38, %v1276_v41  ;;  %v4368_v48 = vadd.f32 %v4142_v42, %v2119_v24 }
 0x166   : > { %v1734_v40 = vsel %vm1670_vm15, %v1638_v7, %v1702_v32  ;;  %v1623_v17 = vadd.f32 %v4175_v50, %v1589_v26  ;;  %vm1271_vm14 = vweird.f32 %v2636_v39  ;;  %v916_v45 = vsel %vm3372_vm10, %v4836_v51, %v880_v34 }
 0x167   : > { %v1768_v57 = vmul.f32 %v4199_v25, %v1734_v40  ;;  %vm1678_vm0 = vcmp.gt.f32.partialorder %v1646_v52, 0.0  ;;  %v1710_v43 = vmul.f32 0.2, %v1646_v52  ;;  %v1267_v14 = vsub.f32 1.0, %v1266_v11  ;;  %vm4383_vm4 = vmor %vm1270_vm6, %vm1271_vm14 }
 0x168   : > { %vm1655_vm1 = vcmp.gt.f32.partialorder %v1623_v17, 0.0  ;;  %v1687_v15 = vmul.f32 0.2, %v1623_v17  ;;  %vm1390_vm3 = vweird.f32 %v4351_v38  ;;  %v780_v56 = vmul.f32 %v4050_v4, %v746_v1  ;;  %vm4928_vm14 = vmmov %vm4922_vm11 }
 0x169   : > { %v2638_v18 = vpop.eup %2637  ;;  %v1802_v23 = vadd.f32 %v4208_v21, %v1768_v57  ;;  %v1742_v19 = vsel %vm1678_vm0, %v1646_v52, %v1710_v43  ;;  %v1268_v28 = vmul.f32 %v2636_v39, %v1267_v14  ;;  %v1394_v10 = vand.u32 2147483647, %v4351_v38 }
 0x16a   : > { %v2640_v60 = vpop.eup %2639  ;;  %v1776_v37 = vmul.f32 %v4199_v25, %v1742_v19  ;;  %v1719_v27 = vsel %vm1655_vm1, %v1623_v17, %v1687_v15  ;;  %v1396_v47 = vand.u32 2147483648, %v4351_v38  ;;  %v4388_v20 = vadd.f32 1.0, %v2638_v18 }
 0x16b   : > { %vm1834_vm5 = vcmp.gt.f32.partialorder %v1802_v23, 0.0  ;;  %v1866_v61 = vmul.f32 0.2, %v1802_v23  ;;  %v1753_v30 = vmul.f32 %v4199_v25, %v1719_v27  ;;  %v1269_v55 = vadd.f32 %v2636_v39, %v1268_v28 }
 0x16c   : > { %v1810_v62 = vadd.f32 %v4208_v21, %v1776_v37  ;;  %v1386_v41 = vmul.f32 %v2640_v60, %v4351_v38  ;;  %2641 = vrcp.f32 %v4388_v20  ;;  %v2316_v53 = vmul.f32 -1.442695, %v916_v45  ;;  %v4929_v38 = vld [vmem:[#allocation16_spill] sm:$0xff] }
 0x16d   : > { %v1898_v34 = vsel %vm1834_vm5, %v1802_v23, %v1866_v61  ;;  %v1787_v7 = vadd.f32 %v4208_v21, %v1753_v30  ;;  %v1273_v58 = vsel %vm4383_vm4, %v2636_v39, %v1269_v55  ;;  %vm1391_vm7 = vweird.f32 %v2640_v60  ;;  %v4930_v23 = vld [vmem:[#allocation22_spill] sm:$0xff] }
 0x16e   : > { %v2187_v36 = vadd.f32 %v4256_v2, %v1898_v34  ;;  %vm1842_vm8 = vcmp.gt.f32.partialorder %v1810_v62, 0.0  ;;  %v1874_v24 = vmul.f32 0.2, %v1810_v62  ;;  %v1278_v1 = vsel %vm4359_vm13, %v1277_v12, %v1273_v58  ;;  %vm4414_vm6 = vmor %vm1390_vm3, %vm1391_vm7 }
 0x16f   : > { %vm1819_vm9 = vcmp.gt.f32.partialorder %v1787_v7, 0.0  ;;  %v1851_v5 = vmul.f32 0.2, %v1787_v7  ;;  %v1563_v32 = vmul.f32 %v1278_v1, %v4893_v63  ;;  %v1387_v26 = vsub.f32 1.0, %v1386_v41  ;;  %vm4927_vm13 = vmmov %vm4922_vm11 }
 0x170   : > { %2219 = vst.msk [vmem:[%s3678_s18 + $0xa0] sm:$0xff] %vm4922_vm11, %v2187_v36  ;;  %v1906_v52 = vsel %vm1842_vm8, %v1810_v62, %v1874_v24  ;;  %vm4403_vm2 = vcmp.eq.f32.partialorder %v1394_v10, 8.507059e+37  ;;  %v1397_v39 = vor.u32 1.1754944e-38, %v1396_v47  ;;  %vm1510_vm12 = vweird.f32 %v4388_v20  ;;  %v2139_v62 = vpop.f32.mrf.mxu2  ;;  %vm4933_vm8 = vmmov %vm4922_vm11 }
 0x171   : > { %v2195_v2 = vadd.f32 %v4269_v9, %v1906_v52  ;;  %v1883_v54 = vsel %vm1819_vm9, %v1787_v7, %v1851_v5  ;;  %v1597_v12 = vmul.f32 %v4165_v31, %v1563_v32  ;;  %v1388_v40 = vmul.f32 %v2640_v60, %v1387_v26 }
 0x172   : > { %v2642_v63 = vpop.eup %2641  ;;  %v2172_v17 = vadd.f32 %v4286_v44, %v1883_v54  ;;  %v1514_v57 = vand.u32 2147483647, %v4388_v20  ;;  %v1516_v43 = vand.u32 2147483648, %v4388_v20  ;;  %2643 = vpow2.f32 %v2316_v53 }
 0x173   : > { %2227 = vst.msk [vmem:[%s3678_s18 + $0xe0] sm:$0xff] %vm4927_vm13, %v2195_v2  ;;  %v1631_v9 = vadd.f32 %v4175_v50, %v1597_v12  ;;  %v1389_v14 = vadd.f32 %v2640_v60, %v1388_v40  ;;  %v1506_v15 = vmul.f32 %v2642_v63, %v4388_v20  ;;  %vm1511_vm15 = vweird.f32 %v2642_v63  ;;  %vm4939_vm13 = vmmov %vm4933_vm8 }
 0x174   : > { %2204 = vst.msk [vmem:[%s3678_s18 + $0x28] sm:$0xff] %vm4928_vm14, %v2172_v17  ;;  %v814_v44 = vadd.f32 %v4064_v3, %v780_v56  ;;  %v711_v18 = vsub.f32 %v4929_v38, %v3304_v29  ;;  %v719_v19 = vsub.f32 %v4930_v23, %v3304_v29  ;;  %v739_v28 = vmul.f32 %v3331_v16, %v696_v13  ;;  %vm4447_vm1 = vmor %vm1510_vm12, %vm1511_vm15 }
 0x175   : > { %vm1663_vm0 = vcmp.gt.f32.partialorder %v1631_v9, 0.0  ;;  %v1695_v10 = vmul.f32 0.2, %v1631_v9  ;;  %v1393_v37 = vsel %vm4414_vm6, %v2640_v60, %v1389_v14  ;;  %v1507_v27 = vsub.f32 1.0, %v1506_v15  ;;  %vm4941_vm14 = vmmov %vm4933_vm8 }
 0x176   : > { %v1398_v56 = vsel %vm4403_vm2, %v1397_v39, %v1393_v37  ;;  %v854_v49 = vmul.f32 %v4080_v0, %v814_v44  ;;  %v754_v47 = vmul.f32 %v3331_v16, %v711_v18  ;;  %v762_v61 = vmul.f32 %v3331_v16, %v719_v19 }
 0x177   : > { %v1727_v30 = vsel %vm1663_vm0, %v1631_v9, %v1695_v10  ;;  %v1571_v55 = vmul.f32 %v1398_v56, %v4897_v46  ;;  %v1508_v13 = vmul.f32 %v2642_v63, %v1507_v27  ;;  %v1517_v41 = vor.u32 1.1754944e-38, %v1516_v43  ;;  %v4936_v27 = vld [vmem:[#allocation12_spill] sm:$0xff] }
 0x178   : > { %v2644_v53 = vpop.eup %2643  ;;  %v1761_v34 = vmul.f32 %v4199_v25, %v1727_v30  ;;  %v888_v7 = vadd.f32 %v4091_v59, %v854_v49  ;;  %v788_v58 = vmul.f32 %v4050_v4, %v754_v47  ;;  %v773_v36 = vmul.f32 %v4050_v4, %v739_v28 }
 0x179   : > { %v1605_v46 = vmul.f32 %v4165_v31, %v1571_v55  ;;  %v1509_v24 = vadd.f32 %v2642_v63, %v1508_v13  ;;  %vm1515_vm3 = vcmp.eq.f32.partialorder %v1514_v57, 8.507059e+37  ;;  %v1044_v1 = vadd.f32 1.0, %v2644_v53 }
 0x17a   : > { %v1795_v5 = vadd.f32 %v4208_v21, %v1761_v34  ;;  %v2140_v32 = vadd.f32 %v4142_v42, %v2139_v62  ;;  %v822_v20 = vadd.f32 %v4064_v3, %v788_v58  ;;  %v796_v26 = vmul.f32 %v4050_v4, %v762_v61 }
 0x17b   : > { %v1639_v52 = vadd.f32 %v4175_v50, %v1605_v46  ;;  %v1513_v11 = vsel %vm4447_vm1, %v2642_v63, %v1509_v24  ;;  %2645 = vrcp.f32 %v1044_v1  ;;  %v924_v39 = vsel %vm3372_vm10, %v4836_v51, %v888_v7  ;;  %v2159_v24 = vpop.f32.mrf.mxu3 }
 0x17c   : > { %vm1827_vm4 = vcmp.gt.f32.partialorder %v1795_v5, 0.0  ;;  %v1859_v2 = vmul.f32 0.2, %v1795_v5  ;;  %v1518_v54 = vsel %vm1515_vm3, %v1517_v41, %v1513_v11  ;;  %v807_v12 = vadd.f32 %v4064_v3, %v773_v36 }
 0x17d   : > { %vm1671_vm5 = vcmp.gt.f32.partialorder %v1639_v52, 0.0  ;;  %v1703_v40 = vmul.f32 0.2, %v1639_v52  ;;  %v1579_v17 = vmul.f32 %v1518_v54, %v4898_v8  ;;  %v1169_v45 = vand.u32 2147483647, %v1044_v1 }
 0x17e   : > { %v1891_v57 = vsel %vm1827_vm4, %v1795_v5, %v1859_v2  ;;  %vm1165_vm7 = vweird.f32 %v1044_v1  ;;  %v2324_v43 = vmul.f32 -1.442695, %v924_v39  ;;  %v862_v63 = vmul.f32 %v4080_v0, %v822_v20 }
 0x17f   : > { %v2180_v9 = vadd.f32 %v4368_v48, %v1891_v57  ;;  %v1735_v14 = vsel %vm1671_vm5, %v1639_v52, %v1703_v40  ;;  %v1613_v15 = vmul.f32 %v4165_v31, %v1579_v17  ;;  %v1171_v44 = vand.u32 2147483648, %v1044_v1 }
 0x180   : > { %v1769_v18 = vmul.f32 %v4199_v25, %v1735_v14  ;;  %2647 = vpow2.f32 %v2324_v43  ;;  %v896_v19 = vadd.f32 %v4091_v59, %v862_v63  ;;  %v830_v28 = vadd.f32 %v4064_v3, %v796_v26 }
 0x181   : > { %v2646_v8 = vpop.eup %2645  ;;  %2212 = vst.msk [vmem:[%s3678_s18 + $0x68] sm:$0xff] %vm4933_vm8, %v2180_v9  ;;  %v1647_v10 = vadd.f32 %v4175_v50, %v1613_v15  ;;  %vm4476_vm9 = vcmp.eq.f32.partialorder %v1169_v45, 8.507059e+37  ;;  %v847_v48 = vmul.f32 %v4080_v0, %v807_v12  ;;  %v704_v56 = vsub.f32 %v4936_v27, %v3304_v29 }
 0x182   : > { %v1803_v49 = vadd.f32 %v4208_v21, %v1769_v18  ;;  %v1161_v47 = vmul.f32 %v2646_v8, %v1044_v1  ;;  %vm1166_vm11 = vweird.f32 %v2646_v8  ;;  %v932_v61 = vsel %vm3372_vm10, %v4836_v51, %v896_v19 }
 0x183   : > { %vm1679_vm2 = vcmp.gt.f32.partialorder %v1647_v10, 0.0  ;;  %v1711_v30 = vmul.f32 0.2, %v1647_v10  ;;  %v2332_v55 = vmul.f32 -1.442695, %v932_v61  ;;  %v870_v62 = vmul.f32 %v4080_v0, %v830_v28  ;;  %vm4496_vm6 = vmor %vm1165_vm7, %vm1166_vm11 }
 0x184   : > { %vm1835_vm12 = vcmp.gt.f32.partialorder %v1803_v49, 0.0  ;;  %v1867_v13 = vmul.f32 0.2, %v1803_v49  ;;  %v1162_v41 = vsub.f32 1.0, %v1161_v47  ;;  %v881_v53 = vadd.f32 %v4091_v59, %v847_v48  ;;  %v2102_v48 = vpop.f32.mrf.mxu0 }
 0x185   : > { %v1743_v34 = vsel %vm1679_vm2, %v1647_v10, %v1711_v30  ;;  %v1172_v60 = vor.u32 1.1754944e-38, %v1171_v44  ;;  %2649 = vpow2.f32 %v2332_v55  ;;  %v904_v7 = vadd.f32 %v4091_v59, %v870_v62 }
 0x186   : > { %v2648_v58 = vpop.eup %2647  ;;  %v1899_v36 = vsel %vm1835_vm12, %v1803_v49, %v1867_v13  ;;  %v1777_v46 = vmul.f32 %v4199_v25, %v1743_v34  ;;  %v1163_v5 = vmul.f32 %v2646_v8, %v1162_v41  ;;  %v917_v20 = vsel %vm3372_vm10, %v4836_v51, %v881_v53  ;;  %v4944_v41 = vld [vmem:[#allocation23_spill] sm:$0xff] }
 0x187   : > { %v2188_v26 = vadd.f32 %v2140_v32, %v1899_v36  ;;  %v1052_v11 = vadd.f32 1.0, %v2648_v58  ;;  %v940_v39 = vsel %vm3372_vm10, %v4836_v51, %v904_v7  ;;  %v2317_v2 = vmul.f32 -1.442695, %v917_v20  ;;  %v4940_v32 = vld [vmem:[#allocation17_spill] sm:$0xff] }
 0x188   : > { %v1811_v54 = vadd.f32 %v4208_v21, %v1777_v46  ;;  %v1164_v12 = vadd.f32 %v2646_v8, %v1163_v5  ;;  %v2340_v40 = vmul.f32 -1.442695, %v940_v39  ;;  %v747_v17 = vmul.f32 %v3331_v16, %v704_v56 }
 0x189   : > { %2220 = vst.msk [vmem:[%s3678_s18 + $0xa8] sm:$0xff] %vm4939_vm13, %v2188_v26  ;;  %v2160_v1 = vadd.f32 %v4142_v42, %v2159_v24  ;;  %2651 = vrcp.f32 %v1052_v11  ;;  %v712_v45 = vsub.f32 %v4940_v32, %v3304_v29  ;;  %v1289_v14 = vand.u32 2147483647, %v1052_v11 }
 0x18a   : > { %vm1843_vm15 = vcmp.gt.f32.partialorder %v1811_v54, 0.0  ;;  %v1875_v57 = vmul.f32 0.2, %v1811_v54  ;;  %v1168_v43 = vsel %vm4496_vm6, %v2646_v8, %v1164_v12  ;;  %2653 = vpow2.f32 %v2340_v40  ;;  %v2122_v40 = vpop.f32.mrf.mxu1 }
 0x18b   : > { %v2650_v63 = vpop.eup %2649  ;;  %v1173_v9 = vsel %vm4476_vm9, %v1172_v60, %v1168_v43  ;;  %v1291_v15 = vand.u32 2147483648, %v1052_v11  ;;  %2655 = vpow2.f32 %v2317_v2  ;;  %v781_v28 = vmul.f32 %v4050_v4, %v747_v17 }
 0x18c   : > { %v1907_v44 = vsel %vm1843_vm15, %v1811_v54, %v1875_v57  ;;  %v1556_v18 = vmul.f32 %v1173_v9, %v2980_v22  ;;  %v1060_v19 = vadd.f32 1.0, %v2650_v63  ;;  %v755_v56 = vmul.f32 %v3331_v16, %v712_v45  ;;  %vm4951_vm15 = vmmov %vm4941_vm14 }
 0x18d   : > { %v2196_v10 = vadd.f32 %v2160_v1, %v1907_v44  ;;  %v4519_v49 = vadd.f32 %v4142_v42, %v2102_v48  ;;  %vm1285_vm0 = vweird.f32 %v1052_v11  ;;  %vm4523_vm1 = vcmp.eq.f32.partialorder %v1289_v14, 8.507059e+37 }
 0x18e   : > { %v1590_v8 = vmul.f32 %v4165_v31, %v1556_v18  ;;  %2657 = vrcp.f32 %v1060_v19  ;;  %v815_v22 = vadd.f32 %v4064_v3, %v781_v28  ;;  %v789_v61 = vmul.f32 %v4050_v4, %v755_v56 }
 0x18f   : > { %v2652_v37 = vpop.eup %2651  ;;  %2228 = vst.msk [vmem:[%s3678_s18 + $0xe8] sm:$0xff] %vm4941_vm14, %v2196_v10  ;;  %v1292_v13 = vor.u32 1.1754944e-38, %v1291_v15  ;;  %v720_v53 = vsub.f32 %v4944_v41, %v3304_v29  ;;  %v1409_v60 = vand.u32 2147483647, %v1060_v19  ;;  %v1411_v7 = vand.u32 2147483648, %v1060_v19 }
 0x190   : > { %v2654_v30 = vpop.eup %2653  ;;  %v1624_v55 = vadd.f32 %v4175_v50, %v1590_v8  ;;  %v1281_v62 = vmul.f32 %v2652_v37, %v1052_v11  ;;  %v855_v36 = vmul.f32 %v4080_v0, %v815_v22  ;;  %vm1286_vm4 = vweird.f32 %v2652_v37 }
 0x191   : > { %v2656_v34 = vpop.eup %2655  ;;  %v4532_v58 = vadd.f32 1.0, %v2654_v30  ;;  %vm1405_vm5 = vweird.f32 %v1060_v19  ;;  %v823_v5 = vadd.f32 %v4064_v3, %v789_v61  ;;  %vm4543_vm7 = vmor %vm1285_vm0, %vm1286_vm4  ;;  %vm4547_vm8 = vcmp.eq.f32.partialorder %v1409_v60, 8.507059e+37 }
 0x192   : > { %vm1656_vm3 = vcmp.gt.f32.partialorder %v1624_v55, 0.0  ;;  %v1688_v46 = vmul.f32 0.2, %v1624_v55  ;;  %v1282_v24 = vsub.f32 1.0, %v1281_v62  ;;  %v4538_v52 = vadd.f32 1.0, %v2656_v34 }
 0x193   : > { %2659 = vrcp.f32 %v4532_v58  ;;  %v1531_v4 = vand.u32 2147483648, %v4532_v58  ;;  %v889_v39 = vadd.f32 %v4091_v59, %v855_v36  ;;  %v763_v3 = vmul.f32 %v3331_v16, %v720_v53 }
 0x194   : > { %v2658_v20 = vpop.eup %2657  ;;  %v1720_v29 = vsel %vm1656_vm3, %v1624_v55, %v1688_v46  ;;  %v1283_v26 = vmul.f32 %v2652_v37, %v1282_v24  ;;  %v1412_v1 = vor.u32 1.1754944e-38, %v1411_v7  ;;  %vm1525_vm9 = vweird.f32 %v4532_v58 }
 0x195   : > { %v1754_v2 = vmul.f32 %v4199_v25, %v1720_v29  ;;  %v1401_v12 = vmul.f32 %v2658_v20, %v1060_v19  ;;  %2661 = vrcp.f32 %v4538_v52  ;;  %vm1406_vm11 = vweird.f32 %v2658_v20 }
 0x196   : > { %v1284_v17 = vadd.f32 %v2652_v37, %v1283_v26  ;;  %v1529_v57 = vand.u32 2147483647, %v4532_v58  ;;  %v1532_v63 = vor.u32 1.1754944e-38, %v1531_v4  ;;  %v925_v16 = vsel %vm3372_vm10, %v4836_v51, %v889_v39  ;;  %vm4566_vm12 = vmor %vm1405_vm5, %vm1406_vm11  ;;  %v2684_v39 = vld [vmem:[%s4721_s3 + $0x5] ss:$0 sm:$0xff] }
 0x197   : > { %v1788_v45 = vadd.f32 %v4208_v21, %v1754_v2  ;;  %v1402_v11 = vsub.f32 1.0, %v1401_v12  ;;  %v863_v9 = vmul.f32 %v4080_v0, %v823_v5  ;;  %vm1180_vm6 = vweird.f32 %v4538_v52  ;;  %vm4958_vm11 = vmmov %vm4951_vm15 }
 0x198   : > { %v1288_v43 = vsel %vm4543_vm7, %v2652_v37, %v1284_v17  ;;  %v1184_v0 = vand.u32 2147483647, %v4538_v52  ;;  %v2325_v37 = vmul.f32 -1.442695, %v925_v16  ;;  %v1186_v62 = vand.u32 2147483648, %v4538_v52 }
 0x199   : > { %v2660_v14 = vpop.eup %2659  ;;  %vm1820_vm2 = vcmp.gt.f32.partialorder %v1788_v45, 0.0  ;;  %v1852_v15 = vmul.f32 0.2, %v1788_v45  ;;  %v1293_v44 = vsel %vm4523_vm1, %v1292_v13, %v1288_v43  ;;  %v1403_v18 = vmul.f32 %v2658_v20, %v1402_v11 }
 0x19a   : > { %v1564_v28 = vmul.f32 %v1293_v44, %v4905_v6  ;;  %v1521_v48 = vmul.f32 %v2660_v14, %v4532_v58  ;;  %vm1526_vm13 = vweird.f32 %v2660_v14  ;;  %v897_v61 = vadd.f32 %v4091_v59, %v863_v9  ;;  %v2142_v9 = vpop.f32.mrf.mxu2 }
 0x19b   : > { %v1884_v56 = vsel %vm1820_vm2, %v1788_v45, %v1852_v15  ;;  %v1404_v8 = vadd.f32 %v2658_v20, %v1403_v18  ;;  %v2662_v47 = vpop.eup %2661  ;;  %2663 = vpow2.f32 %v2325_v37  ;;  %vm4592_vm14 = vmor %vm1525_vm9, %vm1526_vm13  ;;  %vm1530_vm3 = vcmp.eq.f32.partialorder %v1529_v57, 8.507059e+37  ;;  %v2162_v15 = vpop.f32.mrf.mxu3 }
 0x19c   : > { %v2173_v22 = vadd.f32 %v4519_v49, %v1884_v56  ;;  %v1598_v6 = vmul.f32 %v4165_v31, %v1564_v28  ;;  %v1522_v19 = vsub.f32 1.0, %v1521_v48  ;;  %v1176_v55 = vmul.f32 %v2662_v47, %v4538_v52 }
 0x19d   : > { %v1408_v30 = vsel %vm4566_vm12, %v2658_v20, %v1404_v8  ;;  %v933_v59 = vsel %vm3372_vm10, %v4836_v51, %v897_v61  ;;  %vm1181_vm0 = vweird.f32 %v2662_v47  ;;  %vm4597_vm4 = vcmp.eq.f32.partialorder %v1184_v0, 8.507059e+37 }
 0x19e   : > { %2205 = vst.msk [vmem:[%s3678_s18 + $0x30] sm:$0xff] %vm4951_vm15, %v2173_v22  ;;  %v1632_v13 = vadd.f32 %v4175_v50, %v1598_v6  ;;  %v1413_v49 = vsel %vm4547_vm8, %v1412_v1, %v1408_v30  ;;  %v1523_v53 = vmul.f32 %v2660_v14, %v1522_v19  ;;  %v1177_v7 = vsub.f32 1.0, %v1176_v55  ;;  %vm4605_vm5 = vmor %vm1180_vm6, %vm1181_vm0  ;;  %v2104_v55 = vpop.f32.mrf.mxu0 }
 0x19f   : > { %v1572_v34 = vmul.f32 %v1413_v49, %v4929_v38  ;;  %v2333_v36 = vmul.f32 -1.442695, %v933_v59  ;;  %v1187_v26 = vor.u32 1.1754944e-38, %v1186_v62  ;;  %v797_v2 = vmul.f32 %v2684_v39, %v763_v3  ;;  %vm4961_vm0 = vmmov %vm4958_vm11 }
 0x1a0   : > { %vm1664_vm1 = vcmp.gt.f32.partialorder %v1632_v13, 0.0  ;;  %v1696_v46 = vmul.f32 0.2, %v1632_v13  ;;  %v1524_v24 = vadd.f32 %v2660_v14, %v1523_v53  ;;  %v1178_v5 = vmul.f32 %v2662_v47, %v1177_v7 }
 0x1a1   : > { %v1606_v4 = vmul.f32 %v4165_v31, %v1572_v34  ;;  %2665 = vpow2.f32 %v2333_v36  ;;  %v2664_v54 = vpop.eup %2663  ;;  %v2123_v52 = vadd.f32 %v4142_v42, %v2122_v40  ;;  %v2143_v56 = vadd.f32 %v4142_v42, %v2142_v9  ;;  %v4651_v36 = vld [vmem:[%s4722_s4 + $0x4] ss:$0 sm:$0xff] }
 0x1a2   : > { %v1728_v38 = vsel %vm1664_vm1, %v1632_v13, %v1696_v46  ;;  %v1528_v58 = vsel %vm4592_vm14, %v2660_v14, %v1524_v24  ;;  %v1179_v45 = vadd.f32 %v2662_v47, %v1178_v5  ;;  %v4616_v57 = vadd.f32 1.0, %v2664_v54  ;;  %v2688_v54 = vld [vmem:[%s4721_s3 + $0x4] ss:$0 sm:$0xff] }
 0x1a3   : > { %v1762_v12 = vmul.f32 %v4199_v25, %v1728_v38  ;;  %v1640_v17 = vadd.f32 %v4175_v50, %v1606_v4  ;;  %v1533_v1 = vsel %vm1530_vm3, %v1532_v63, %v1528_v58  ;;  %v2105_v46 = vadd.f32 %v4651_v36, %v2104_v55  ;;  %v2692_v55 = vld [vmem:[%s4722_s4 + $0x3] ss:$0 sm:$0xff] }
 0x1a4   : > { %v1580_v11 = vmul.f32 %v1533_v1, %v4930_v23  ;;  %v1183_v3 = vsel %vm4605_vm5, %v2662_v47, %v1179_v45  ;;  %2667 = vrcp.f32 %v4616_v57  ;;  %v2685_v23 = vld [vmem:[%s4721_s3 + $0x6] ss:$0 sm:$0xff]  ;;  %v2163_v47 = vadd.f32 %v4142_v42, %v2162_v15  ;;  %v2686_v42 = vld [vmem:[%s4721_s3 + $0x3] ss:$0 sm:$0xff] }
 0x1a5   : > { %v1796_v43 = vadd.f32 %v4208_v21, %v1762_v12  ;;  %vm1672_vm7 = vcmp.gt.f32.partialorder %v1640_v17, 0.0  ;;  %v1704_v16 = vmul.f32 0.2, %v1640_v17  ;;  %v1188_v63 = vsel %vm4597_vm4, %v1187_v26, %v1183_v3 }
 0x1a6   : > { %v1614_v14 = vmul.f32 %v4165_v31, %v1580_v11  ;;  %v831_v44 = vadd.f32 %v2685_v23, %v797_v2  ;;  %v1557_v48 = vmul.f32 %v1188_v63, %v4899_v33  ;;  %v1304_v62 = vand.u32 2147483647, %v4616_v57 }
 0x1a7   : > { %v2666_v18 = vpop.eup %2665  ;;  %vm1828_vm8 = vcmp.gt.f32.partialorder %v1796_v43, 0.0  ;;  %v1860_v28 = vmul.f32 0.2, %v1796_v43  ;;  %v1736_v10 = vsel %vm1672_vm7, %v1640_v17, %v1704_v16  ;;  %v1306_v59 = vand.u32 2147483648, %v4616_v57  ;;  %vm4964_vm7 = vmmov %vm4961_vm0 }
 0x1a8   : > { %v1770_v0 = vmul.f32 %v4199_v25, %v1736_v10  ;;  %v1648_v8 = vadd.f32 %v4175_v50, %v1614_v14  ;;  %v1591_v22 = vmul.f32 %v4165_v31, %v1557_v48  ;;  %v4634_v6 = vadd.f32 1.0, %v2666_v18  ;;  %v2689_v18 = vld [vmem:[%s4722_s4] ss:$0 sm:$0xff]  ;;  %v2690_v48 = vld [vmem:[%s4722_s4 + $0x1] ss:$0 sm:$0xff] }
 0x1a9   : > { %v1892_v37 = vsel %vm1828_vm8, %v1796_v43, %v1860_v28  ;;  %v871_v13 = vmul.f32 %v2686_v42, %v831_v44  ;;  %vm1300_vm6 = vweird.f32 %v4616_v57  ;;  %vm4657_vm15 = vcmp.eq.f32.partialorder %v1304_v62, 8.507059e+37 }
 0x1aa   : > { %v2181_v19 = vadd.f32 %v2123_v52, %v1892_v37  ;;  %v1804_v61 = vadd.f32 %v4208_v21, %v1770_v0  ;;  %vm1680_vm9 = vcmp.gt.f32.partialorder %v1648_v8, 0.0  ;;  %v1712_v30 = vmul.f32 0.2, %v1648_v8  ;;  %v2668_v31 = vpop.eup %2667 }
 0x1ab   : > { %v1625_v33 = vadd.f32 %v4175_v50, %v1591_v22  ;;  %2669 = vrcp.f32 %v4634_v6  ;;  %v1296_v60 = vmul.f32 %v2668_v31, %v4616_v57  ;;  %vm1301_vm13 = vweird.f32 %v2668_v31 }
 0x1ac   : > { %2213 = vst.msk [vmem:[%s3678_s18 + $0x70] sm:$0xff] %vm4958_vm11, %v2181_v19  ;;  %vm1836_vm2 = vcmp.gt.f32.partialorder %v1804_v61, 0.0  ;;  %v1868_v49 = vmul.f32 0.2, %v1804_v61  ;;  %v1744_v53 = vsel %vm1680_vm9, %v1648_v8, %v1712_v30  ;;  %v1307_v29 = vor.u32 1.1754944e-38, %v1306_v59  ;;  %vm4671_vm3 = vmor %vm1300_vm6, %vm1301_vm13  ;;  %v2124_v30 = vpop.f32.mrf.mxu1 }
 0x1ad   : > { %v1778_v50 = vmul.f32 %v4199_v25, %v1744_v53  ;;  %vm1657_vm12 = vcmp.gt.f32.partialorder %v1625_v33, 0.0  ;;  %v1689_v34 = vmul.f32 0.2, %v1625_v33  ;;  %v1297_v20 = vsub.f32 1.0, %v1296_v60  ;;  %vm4965_vm9 = vmmov %vm4961_vm0  ;;  %v2691_v19 = vld [vmem:[%s4722_s4 + $0x2] ss:$0 sm:$0xff]  ;;  %v2144_v53 = vpop.f32.mrf.mxu2 }
 0x1ae   : > { %v1900_v7 = vsel %vm1836_vm2, %v1804_v61, %v1868_v49  ;;  %vm1420_vm14 = vweird.f32 %v4634_v6  ;;  %v905_v12 = vadd.f32 %v2688_v54, %v871_v13  ;;  %v1424_v1 = vand.u32 2147483647, %v4634_v6  ;;  %vm4966_vm13 = vmmov %vm4961_vm0 }
 0x1af   : > { %v2189_v24 = vadd.f32 %v2143_v56, %v1900_v7  ;;  %v1812_v4 = vadd.f32 %v4208_v21, %v1778_v50  ;;  %v1721_v5 = vsel %vm1657_vm12, %v1625_v33, %v1689_v34  ;;  %v1298_v2 = vmul.f32 %v2668_v31, %v1297_v20 }
 0x1b0   : > { %v1755_v38 = vmul.f32 %v4199_v25, %v1721_v5  ;;  %v1426_v45 = vand.u32 2147483648, %v4634_v6  ;;  %vm1425_vm8 = vcmp.eq.f32.partialorder %v1424_v1, 8.507059e+37  ;;  %v2125_v42 = vadd.f32 %v4651_v36, %v2124_v30 }
 0x1b1   : > { %v2670_v26 = vpop.eup %2669  ;;  %2221 = vst.msk [vmem:[%s3678_s18 + $0xb0] sm:$0xff] %vm4961_vm0, %v2189_v24  ;;  %vm1844_vm1 = vcmp.gt.f32.partialorder %v1812_v4, 0.0  ;;  %v1876_v39 = vmul.f32 0.2, %v1812_v4  ;;  %v1299_v11 = vadd.f32 %v2668_v31, %v1298_v2 }
 0x1b2   : > { %v1789_v25 = vadd.f32 %v4208_v21, %v1755_v38  ;;  %v1416_v17 = vmul.f32 %v2670_v26, %v4634_v6  ;;  %vm1421_vm4 = vweird.f32 %v2670_v26  ;;  %v941_v21 = vsel %vm3372_vm10, %v4836_v51, %v905_v12 }
 0x1b3   : > { %v1908_v52 = vsel %vm1844_vm1, %v1812_v4, %v1876_v39  ;;  %v1303_v9 = vsel %vm4671_vm3, %v2668_v31, %v1299_v11  ;;  %v2341_v3 = vmul.f32 -1.442695, %v941_v21  ;;  %vm1422_vm10 = vmor %vm1420_vm14, %vm1421_vm4  ;;  %v1427_v51 = vor.u32 1.1754944e-38, %v1426_v45 }
 0x1b4   : > { %v2197_v43 = vadd.f32 %v2163_v47, %v1908_v52  ;;  %vm1821_vm5 = vcmp.gt.f32.partialorder %v1789_v25, 0.0  ;;  %v1853_v57 = vmul.f32 0.2, %v1789_v25  ;;  %v1417_v16 = vsub.f32 1.0, %v1416_v17  ;;  %vm4967_vm3 = vmmov %vm4964_vm7  ;;  %v2164_v52 = vpop.f32.mrf.mxu3 }
 0x1b5   : > { %v1308_v15 = vsel %vm4657_vm15, %v1307_v29, %v1303_v9  ;;  %2671 = vpow2.f32 %v2341_v3  ;;  %v2165_v21 = vadd.f32 %v4651_v36, %v2164_v52 }
 0x1b6   : > { %2229 = vst.msk [vmem:[%s3678_s18 + $0xf0] sm:$0xff] %vm4964_vm7, %v2197_v43  ;;  %v1885_v14 = vsel %vm1821_vm5, %v1789_v25, %v1853_v57  ;;  %v1418_v63 = vmul.f32 %v2670_v26, %v1417_v16  ;;  %v1565_v35 = vmul.f32 %v1308_v15, %v4936_v27  ;;  %vm4968_vm7 = vmmov %vm4967_vm3 }
 0x1b7   : > { %v2174_v23 = vadd.f32 %v2105_v46, %v1885_v14  ;;  %v2145_v46 = vadd.f32 %v4651_v36, %v2144_v53 }
 0x1b8   : > { %v1419_v44 = vadd.f32 %v2670_v26, %v1418_v63  ;;  %v1599_v28 = vmul.f32 %v2689_v18, %v1565_v35 }
 0x1b9   : > { %2206 = vst.msk [vmem:[%s3678_s18 + $0x38] sm:$0xff] %vm4965_vm9, %v2174_v23 }
 0x1ba   : > { %v1423_v10 = vsel %vm1422_vm10, %v2670_v26, %v1419_v44  ;;  %v1633_v27 = vadd.f32 %v2690_v48, %v1599_v28 }
 0x1bb   : > { %v1428_v0 = vsel %vm1425_vm8, %v1427_v51, %v1423_v10  ;;  %v2672_v8 = vpop.eup %2671 }
 0x1bc   : > { %v1573_v56 = vmul.f32 %v1428_v0, %v4940_v32  ;;  %vm1665_vm11 = vcmp.gt.f32.partialorder %v1633_v27, 0.0  ;;  %v1697_v37 = vmul.f32 0.2, %v1633_v27  ;;  %v1069_v22 = vadd.f32 1.0, %v2672_v8 }
 0x1be   : > { %v1607_v47 = vmul.f32 %v2689_v18, %v1573_v56  ;;  %v1729_v6 = vsel %vm1665_vm11, %v1633_v27, %v1697_v37  ;;  %2673 = vrcp.f32 %v1069_v22  ;;  %vm1540_vm6 = vweird.f32 %v1069_v22 }
 0x1bf   : > { %v1763_v61 = vmul.f32 %v2691_v19, %v1729_v6  ;;  %v1544_v24 = vand.u32 2147483647, %v1069_v22  ;;  %v1546_v4 = vand.u32 2147483648, %v1069_v22 }
 0x1c0   : > { %v1641_v33 = vadd.f32 %v2690_v48, %v1607_v47 }
 0x1c1   : > { %v1797_v62 = vadd.f32 %v2692_v55, %v1763_v61  ;;  %v1547_v26 = vor.u32 1.1754944e-38, %v1546_v4  ;;  %vm1545_vm1 = vcmp.eq.f32.partialorder %v1544_v24, 8.507059e+37 }
 0x1c2   : > { %vm1673_vm2 = vcmp.gt.f32.partialorder %v1641_v33, 0.0  ;;  %v1705_v32 = vmul.f32 0.2, %v1641_v33 }
 0x1c3   : > { %vm1829_vm12 = vcmp.gt.f32.partialorder %v1797_v62, 0.0  ;;  %v1861_v13 = vmul.f32 0.2, %v1797_v62 }
 0x1c4   : > { %v1737_v31 = vsel %vm1673_vm2, %v1641_v33, %v1705_v32  ;;  %v2674_v59 = vpop.eup %2673 }
 0x1c5   : > { %v1771_v49 = vmul.f32 %v2691_v19, %v1737_v31  ;;  %v1893_v50 = vsel %vm1829_vm12, %v1797_v62, %v1861_v13  ;;  %v1536_v7 = vmul.f32 %v2674_v59, %v1069_v22  ;;  %vm1541_vm14 = vweird.f32 %v2674_v59 }
 0x1c6   : > { %v2182_v34 = vadd.f32 %v2125_v42, %v1893_v50  ;;  %vm1542_vm0 = vmor %vm1540_vm6, %vm1541_vm14 }
 0x1c7   : > { %v1805_v60 = vadd.f32 %v2692_v55, %v1771_v49  ;;  %v1537_v20 = vsub.f32 1.0, %v1536_v7 }
 0x1c8   : > { %2214 = vst.msk [vmem:[%s3678_s18 + $0x78] sm:$0xff] %vm4966_vm13, %v2182_v34 }
 0x1c9   : > { %vm1837_vm15 = vcmp.gt.f32.partialorder %v1805_v60, 0.0  ;;  %v1869_v5 = vmul.f32 0.2, %v1805_v60  ;;  %v1538_v58 = vmul.f32 %v2674_v59, %v1537_v20 }
 0x1cb   : > { %v1901_v38 = vsel %vm1837_vm15, %v1805_v60, %v1869_v5  ;;  %v1539_v39 = vadd.f32 %v2674_v59, %v1538_v58 }
 0x1cc   : > { %v2190_v29 = vadd.f32 %v2145_v46, %v1901_v38 }
 0x1cd   : > { %v1543_v2 = vsel %vm1542_vm0, %v2674_v59, %v1539_v39 }
 0x1ce   : > { %2222 = vst.msk [vmem:[%s3678_s18 + $0xb8] sm:$0xff] %vm4967_vm3, %v2190_v29  ;;  %v1548_v54 = vsel %vm1545_vm1, %v1547_v26, %v1543_v2 }
 0x1cf   : > { %v1581_v12 = vmul.f32 %v1548_v54, %v4944_v41 }
 0x1d1   : > { %v1615_v25 = vmul.f32 %v2689_v18, %v1581_v12 }
 0x1d3   : > { %v1649_v40 = vadd.f32 %v2690_v48, %v1615_v25 }
 0x1d5   : > { %vm1681_vm4 = vcmp.gt.f32.partialorder %v1649_v40, 0.0  ;;  %v1713_v17 = vmul.f32 0.2, %v1649_v40 }
 0x1d7   : > { %v1745_v1 = vsel %vm1681_vm4, %v1649_v40, %v1713_v17 }
 0x1d8   : > { %v1779_v45 = vmul.f32 %v2691_v19, %v1745_v1 }
 0x1da   : > { %v1813_v11 = vadd.f32 %v2692_v55, %v1779_v45 }
 0x1dc   : > { %vm1845_vm5 = vcmp.gt.f32.partialorder %v1813_v11, 0.0  ;;  %v1877_v43 = vmul.f32 0.2, %v1813_v11 }
 0x1de   : > { %v1909_v57 = vsel %vm1845_vm5, %v1813_v11, %v1877_v43 }
 0x1df   : > { %v2198_v16 = vadd.f32 %v2165_v21, %v1909_v57 }
 0x1e1   : > { %2230 = vst.msk [vmem:[%s3678_s18 + $0xf8] sm:$0xff] %vm4968_vm7, %v2198_v16 }
 0x1e2 PF: > { %s16_s21 = sadd.s32 1, %s2699_s21  }
 0x1e3   : > { %p13_p4 = scmp.ge.s32.totalorder %s16_s21, 4  }
 0x1e5   :  { %15 = sbr.rel (!%p13_p4) target bundleno = 1 (0x1), region = 77 }

// kernel: _lambda_.2
= control target key start
LH: loop header
LB: loop body
LE: loop exit
PB: predicated region body
PF: predicated region fallthrough
CT: control target
= control target key end

     0   :  { %s4756_s18 = smov 0   ;;  %s7159_s0 = inlined_call_operand.vmem [shape: bf16[2,18,18,4], index: 0, kind: input, shape index: {}]   ;;  %s7160_s1 = inlined_call_operand.vmem [shape: bf16[9,4,8], index: 1, kind: input, shape index: {}]   ;;  %s7161_s2 = inlined_call_operand.vmem [shape: f32[4,8], index: 2, kind: input, shape index: {}]   ;;  %s7162_s3 = inlined_call_operand.vmem [shape: bf16[9,8,16], index: 3, kind: input, shape index: {}]   ;;  %s7163_s4 = inlined_call_operand.vmem [shape: bf16[512,16], index: 4, kind: output, shape index: {0}]   ;;  %s7164_s5 = inlined_call_operand.vmem [shape: f32[2,2,16], index: 5, kind: output, shape index: {1}]  }
   0x1 LB: > { %s4762_s19 = sadd.s32 4294967295, %s4723_s18   ;;  %p4334_p0 = scmp.ge.s32.totalorder %s4723_s18, 1  ;;  %s4723_s18 = sphi %s4756_s18, %s16_s18  }
   0x2   : > { %p190_p1 = scmp.lt.s32.totalorder %s4723_s18, 3 }
   0x4   : > { %p191_p2 = pnand %p4334_p0, %p190_p1 }
   0x6   : > { %194 = sbr.rel (%p191_p2) target bundleno = 1474 (0x5c2), region = 36 }
   0xb   : > { %v362_v0 = vld [vmem:[%s7160_s1] sm:$0x3]  ;;  %vm591_vm0 = vcmask 1041408   ;;  %p222_p3 = scmp.lt.s32.totalorder %s4762_s19, 1  ;;  %v4339_v2 = vld [vmem:[%s7160_s1 + $0x2] sm:$0x3] }
   0xc   : > { %v733_v1 = vsel %vm591_vm0, %v362_v0, 0  ;;  %v4372_v3 = vld [vmem:[%s7160_s1 + $0x4] sm:$0x3]  ;;  %v593_v4 = vsel %vm591_vm0, %v4339_v2, 0  ;;  %v4389_v6 = vld [vmem:[%s7160_s1 + $0x6] sm:$0x3] }
   0xd   : > { %4690 = vmatpush.bf16.msra.mxu3 %v733_v1  ;;  %s4778_s26 = scalar_select %p222_p3, %s4762_s19, 1  ;;  %742 = vmatpush.bf16.msra.mxu1 %v733_v1  ;;  %v1004_v5 = vsel %vm591_vm0, %v4372_v3, 0  ;;  %v1134_v7 = vsel %vm591_vm0, %v4389_v6, 0  ;;  %v4406_v8 = vld [vmem:[%s7160_s1 + $0x8] sm:$0x3]  ;;  %vm542_vm1 = vcmask 31744  }
   0xe   : > { %602 = vmatpush.bf16.msra.mxu0 %v593_v4  ;;  %4689 = vmatpush.bf16.msra.mxu2 %v593_v4  ;;  %v1274_v9 = vsel %vm591_vm0, %v4406_v8, 0  ;;  %vm411_vm2 = vcmask 1046528   ;;  %vm824_vm3 = vcmask 1045504   ;;  %vm2655_vm4 = vcmask 1043456   ;;  %s4336_s8 = sshll.u32 %s4762_s19, 5 }
   0xf   : > { %s4691_s6 = smul.u32 216, %s4778_s26  ;;  %vm2269_vm5 = vcmask 64512   ;;  %vm2272_vm6 = vcmask 58368   ;;  %p228_p4 = scmp.lt.s32.totalorder %s4336_s8, 63 }
  0x10   : > { %s4338_s19 = sshll.u32 %s4778_s26, 1 }
  0x11   : > { %1143 = vmatpush.bf16.msrb.mxu3 %v1134_v7  ;;  %s4794_s9 = scalar_lea.vmem %s7159_s0, %s4691_s6  ;;  %s7450_s8 = smov (!%p228_p4, %s4336_s8), 63 }
  0x12   : > { %1013 = vmatpush.bf16.msrb.mxu2 %v1004_v5  ;;  %1283 = vmatpush.bf16.msrb.mxu0 %v1274_v9  ;;  %v4797_v10 = vld [vmem:[%s4794_s9 + $0x60] sm:$0xff]   ;;  %v4803_v12 = vld [vmem:[%s4794_s9 + $0x8] sm:$0x1]  ;;  %v4833_v28 = vld [vmem:[%s4794_s9 + $0x6c] sm:$0xff]   ;;  %s4337_s10 = sshll.u32 %s7450_s8, 2  ;;  %s236_s15 = scalar_lea.vmem %s7164_s5, %s4338_s19 }
  0x13   : > { %v4800_v11 = vld [vmem:[%s4794_s9] sm:$0xff]   ;;  %4364 = vmatmul.msk.bf16.vlgmr.msra.gmra.mxu3 %vm542_vm1, %v4797_v10  ;;  %v7201_v15 = vunpack.c.l.bf16 %v4803_v12  ;;  %v7180_v16 = vunpack.c.l.bf16 %v4797_v10  ;;  %v4812_v17 = vld [vmem:[%s4794_s9 + $0x68] sm:$0x1]  ;;  %v7178_v18 = vunpack.c.h.bf16 %v4797_v10  ;;  %7267 = vst [vmem:[#allocation3_spill] sm:$0xff] %v4833_v28  ;;  %v4838_v32 = vld [vmem:[%s4794_s9 + $0xc] sm:$0xff]   ;;  %v7176_v36 = vunpack.c.l.bf16 %v4833_v28  ;;  %s6896_s13 = scalar_lea.vmem %s7163_s4, %s4337_s10 }
  0x14   : > { %v4647_v13 = vunpack.c.l.bf16 %v4800_v11  ;;  %v7202_v14 = vunpack.c.h.bf16 %v4800_v11  ;;  %4356 = vmatmul.msk.bf16.vlgmr.msra.gmra.mxu1 %vm542_vm1, %v4800_v11  ;;  %v7177_v19 = vunpack.c.l.bf16 %v4812_v17  ;;  %v4841_v33 = vld [vmem:[%s4794_s9 + $0x14] sm:$0x1]  ;;  %v7175_v37 = vunpack.c.h.bf16 %v4833_v28  ;;  %v4882_v54 = vld [vmem:[%s4794_s9 + $0x18] sm:$0xff]   ;;  %v4885_v55 = vld [vmem:[%s4794_s9 + $0x20] sm:$0x1] }
  0x15   : > { %v415_v22 = vrot.slane %v7201_v15, 1  ;;  %v452_v23 = vrot.slane %v7180_v16, 1  ;;  %v453_v24 = vrot.slane %v7178_v18, 1  ;;  %v4846_v35 = vld [vmem:[%s4794_s9 + $0x74] sm:$0x1]  ;;  %v295_v38 = vunpack.c.l.bf16 %v4838_v32  ;;  %v4888_v56 = vld [vmem:[%s4794_s9 + $0x78] sm:$0xff]  }
  0x16   : > { %v412_v20 = vrot.slane %v4647_v13, 1  ;;  %v413_v21 = vrot.slane %v7202_v14, 1  ;;  %v455_v25 = vrot.slane %v7177_v19, 1  ;;  %v296_v39 = vunpack.c.h.bf16 %v4838_v32  ;;  %v4891_v57 = vld [vmem:[%s4794_s9 + $0x80] sm:$0x1] }
  0x17   : > { %v454_v30 = vsel %vm411_vm2, %v452_v23, %v453_v24  ;;  %v297_v40 = vunpack.c.l.bf16 %v4841_v33  ;;  %v7174_v41 = vunpack.c.l.bf16 %v4846_v35  ;;  %v417_v42 = vrot.slane %v295_v38, 1  ;;  %v4931_v23 = vld [vmem:[%s4794_s9 + $0x24] sm:$0xff]  }
  0x18   : > { %v414_v26 = vsel %vm411_vm2, %v412_v20, %v413_v21  ;;  %v416_v27 = vsel %vm411_vm2, %v413_v21, %v415_v22  ;;  %v456_v31 = vsel %vm411_vm2, %v453_v24, %v455_v25  ;;  %v418_v43 = vrot.slane %v296_v39, 1  ;;  %v4928_v22 = vld [vmem:[%s4794_s9 + $0x84] sm:$0xff]   ;;  %v4934_v24 = vld [vmem:[%s4794_s9 + $0x2c] sm:$0x1] }
  0x19   : > { %v524_v29 = vpack.c.bf16 %v416_v27, %v414_v26  ;;  %v4843_v34 = vpack.c.bf16 %v456_v31, %v454_v30  ;;  %v420_v44 = vrot.slane %v297_v40, 1  ;;  %v457_v45 = vrot.slane %v7176_v36, 1  ;;  %v4937_v25 = vld [vmem:[%s4794_s9 + $0x8c] sm:$0x1] }
  0x1a   : > { %v458_v46 = vrot.slane %v7175_v37, 1  ;;  %v460_v47 = vrot.slane %v7174_v41, 1  ;;  %v419_v48 = vsel %vm411_vm2, %v417_v42, %v418_v43  ;;  %v7200_v58 = vunpack.c.l.bf16 %v4882_v54 }
  0x1b   : > { %7268 = vst [vmem:[#allocation4_spill] sm:$0xff] %v4843_v34  ;;  %4340 = vmatmul.msk.bf16.vlgmr.msra.gmra.mxu0 %vm542_vm1, %v524_v29  ;;  %4348 = vmatmul.msk.bf16.vlgmr.msra.gmra.mxu2 %vm542_vm1, %v4843_v34  ;;  %v421_v49 = vsel %vm411_vm2, %v418_v43, %v420_v44  ;;  %v7199_v59 = vunpack.c.h.bf16 %v4882_v54  ;;  %v7198_v60 = vunpack.c.l.bf16 %v4885_v55  ;;  %v7173_v61 = vunpack.c.l.bf16 %v4888_v56 }
  0x1c   : > { %v459_v50 = vsel %vm411_vm2, %v457_v45, %v458_v46  ;;  %v461_v51 = vsel %vm411_vm2, %v458_v46, %v460_v47  ;;  %v4877_v52 = vpack.c.bf16 %v421_v49, %v419_v48  ;;  %v7172_v62 = vunpack.c.h.bf16 %v4888_v56 }
  0x1d   : > { %v4879_v53 = vpack.c.bf16 %v461_v51, %v459_v50  ;;  %v7170_v63 = vunpack.c.l.bf16 %v4891_v57  ;;  %v422_v0 = vrot.slane %v7200_v58, 1  ;;  %v423_v1 = vrot.slane %v7199_v59, 1 }
  0x1e   : > { %v425_v2 = vrot.slane %v7198_v60, 1  ;;  %v462_v3 = vrot.slane %v7173_v61, 1  ;;  %v463_v4 = vrot.slane %v7172_v62, 1  ;;  %v7168_v26 = vunpack.c.l.bf16 %v4928_v22  ;;  %v5026_v62 = vld [vmem:[%s4794_s9 + $0x44] sm:$0x1] }
  0x1f   : > { %7269 = vst [vmem:[#allocation5_spill] sm:$0xff] %v4879_v53  ;;  %v465_v5 = vrot.slane %v7170_v63, 1  ;;  %v424_v6 = vsel %vm411_vm2, %v422_v0, %v423_v1  ;;  %v7166_v27 = vunpack.c.h.bf16 %v4928_v22  ;;  %v7197_v29 = vunpack.c.l.bf16 %v4931_v23  ;;  %v5020_v63 = vld [vmem:[%s4794_s9 + $0x9c] sm:$0xff]  }
  0x20   : > { %v426_v7 = vsel %vm411_vm2, %v423_v1, %v425_v2  ;;  %v464_v8 = vsel %vm411_vm2, %v462_v3, %v463_v4  ;;  %v7196_v30 = vunpack.c.h.bf16 %v4931_v23  ;;  %v7194_v31 = vunpack.c.l.bf16 %v4934_v24  ;;  %v4974_v3 = vld [vmem:[%s4794_s9 + $0x30] sm:$0xff]  }
  0x21   : > { %v466_v9 = vsel %vm411_vm2, %v463_v4, %v465_v5  ;;  %v4923_v20 = vpack.c.bf16 %v426_v7, %v424_v6  ;;  %v7165_v42 = vunpack.c.l.bf16 %v4937_v25  ;;  %v427_v43 = vrot.slane %v7197_v29, 1  ;;  %v4977_v4 = vld [vmem:[%s4794_s9 + $0x38] sm:$0x1]  ;;  %v4980_v5 = vld [vmem:[%s4794_s9 + $0x90] sm:$0xff]  }
  0x22   : > { %v4925_v21 = vpack.c.bf16 %v466_v9, %v464_v8  ;;  %v428_v44 = vrot.slane %v7196_v30, 1  ;;  %v430_v45 = vrot.slane %v7194_v31, 1  ;;  %v467_v46 = vrot.slane %v7168_v26, 1  ;;  %v4983_v6 = vld [vmem:[%s4794_s9 + $0x98] sm:$0x1] }
  0x23   : > { %4365 = vmatmul.msk.bf16.gmra.mxu3 %vm542_vm1, %v4833_v28  ;;  %v468_v47 = vrot.slane %v7166_v27, 1  ;;  %v470_v48 = vrot.slane %v7165_v42, 1  ;;  %v7192_v7 = vunpack.c.l.bf16 %v4974_v3  ;;  %v7187_v8 = vunpack.c.h.bf16 %v4974_v3  ;;  %v5112_v31 = vld [vmem:[%s4794_s9 + $0xb4] sm:$0xff]   ;;  %v5118_v30 = vld [vmem:[%s4794_s9 + $0x5c] sm:$0x1] }
  0x24   : > { %4357 = vmatmul.msk.bf16.gmra.mxu1 %vm542_vm1, %v4838_v32  ;;  %v429_v49 = vsel %vm411_vm2, %v427_v43, %v428_v44  ;;  %v431_v50 = vsel %vm411_vm2, %v428_v44, %v430_v45  ;;  %v7186_v9 = vunpack.c.l.bf16 %v4977_v4  ;;  %v7167_v43 = vunpack.c.l.bf16 %v4980_v5  ;;  %7274 = vst [vmem:[#allocation10_spill] sm:$0xff] %v5112_v31 }
  0x25   : > { %v469_v51 = vsel %vm411_vm2, %v467_v46, %v468_v47  ;;  %v471_v0 = vsel %vm411_vm2, %v468_v47, %v470_v48  ;;  %v4969_v1 = vpack.c.bf16 %v431_v50, %v429_v49  ;;  %v7169_v44 = vunpack.c.h.bf16 %v4980_v5 }
  0x26   : > { %v4971_v2 = vpack.c.bf16 %v471_v0, %v469_v51  ;;  %v7171_v45 = vunpack.c.l.bf16 %v4983_v6  ;;  %v432_v46 = vrot.slane %v7192_v7, 1  ;;  %v433_v47 = vrot.slane %v7187_v8, 1 }
  0x27   : > { %v435_v48 = vrot.slane %v7186_v9, 1  ;;  %v472_v49 = vrot.slane %v7167_v43, 1  ;;  %v473_v50 = vrot.slane %v7169_v44, 1 }
  0x28   : > { %v475_v51 = vrot.slane %v7171_v45, 1  ;;  %v434_v0 = vsel %vm411_vm2, %v432_v46, %v433_v47  ;;  %v5023_v45 = vld [vmem:[%s4794_s9 + $0x3c] sm:$0xff]   ;;  %v5029_v46 = vld [vmem:[%s4794_s9 + $0xa4] sm:$0x1] }
  0x29   : > { %v436_v42 = vsel %vm411_vm2, %v433_v47, %v435_v48  ;;  %v474_v27 = vsel %vm411_vm2, %v472_v49, %v473_v50  ;;  %7271 = vst [vmem:[#allocation7_spill] sm:$0xff] %v5023_v45  ;;  %v7179_v47 = vunpack.c.l.bf16 %v5020_v63  ;;  %v7181_v48 = vunpack.c.h.bf16 %v5020_v63 }
  0x2a   : > { %v476_v43 = vsel %vm411_vm2, %v473_v50, %v475_v51  ;;  %v5015_v26 = vpack.c.bf16 %v436_v42, %v434_v0  ;;  %v7184_v42 = vunpack.c.h.bf16 %v5023_v45  ;;  %v7183_v49 = vunpack.c.l.bf16 %v5029_v46 }
  0x2b   : > { %4341 = vmatmul.msk.bf16.gmra.mxu0 %vm542_vm1, %v4877_v52  ;;  %4349 = vmatmul.msk.bf16.gmra.mxu2 %vm542_vm1, %v4879_v53  ;;  %v5017_v44 = vpack.c.bf16 %v476_v43, %v474_v27  ;;  %v7185_v27 = vunpack.c.l.bf16 %v5023_v45  ;;  %v7182_v43 = vunpack.c.l.bf16 %v5026_v62  ;;  %v477_v61 = vrot.slane %v7179_v47, 1 }
  0x2c   : > { %7270 = vst [vmem:[#allocation6_spill] sm:$0xff] %v5015_v26  ;;  %v438_v51 = vrot.slane %v7184_v42, 1  ;;  %v478_v41 = vrot.slane %v7181_v48, 1  ;;  %v480_v37 = vrot.slane %v7183_v49, 1  ;;  %v5069_v49 = vld [vmem:[%s4794_s9 + $0x50] sm:$0x1] }
  0x2d   : > { %v437_v50 = vrot.slane %v7185_v27, 1  ;;  %v440_v0 = vrot.slane %v7182_v43, 1  ;;  %v5066_v43 = vld [vmem:[%s4794_s9 + $0x48] sm:$0xff]  }
  0x2e   : > { %v479_v18 = vsel %vm411_vm2, %v477_v61, %v478_v41  ;;  %v481_v47 = vsel %vm411_vm2, %v478_v41, %v480_v37  ;;  %v5072_v42 = vld [vmem:[%s4794_s9 + $0xa8] sm:$0xff]   ;;  %v7188_v37 = vunpack.c.l.bf16 %v5066_v43 }
  0x2f   : > { %v439_v36 = vsel %vm411_vm2, %v437_v50, %v438_v51  ;;  %v441_v19 = vsel %vm411_vm2, %v438_v51, %v440_v0  ;;  %v5063_v48 = vpack.c.bf16 %v481_v47, %v479_v18  ;;  %v5075_v50 = vld [vmem:[%s4794_s9 + $0xb0] sm:$0x1]  ;;  %v7190_v18 = vunpack.c.l.bf16 %v5069_v49 }
  0x30   : > { %v5061_v16 = vpack.c.bf16 %v441_v19, %v439_v36  ;;  %v7189_v19 = vunpack.c.h.bf16 %v5066_v43  ;;  %v7191_v36 = vunpack.c.l.bf16 %v5072_v42  ;;  %v7193_v41 = vunpack.c.h.bf16 %v5072_v42 }
  0x31   : > { %v7195_v61 = vunpack.c.l.bf16 %v5075_v50  ;;  %v442_v47 = vrot.slane %v7188_v37, 1  ;;  %v445_v0 = vrot.slane %v7190_v18, 1 }
  0x32   : > { %7272 = vst [vmem:[#allocation8_spill] sm:$0xff] %v5061_v16  ;;  %v443_v51 = vrot.slane %v7189_v19, 1  ;;  %v482_v27 = vrot.slane %v7191_v36, 1  ;;  %v483_v9 = vrot.slane %v7193_v41, 1 }
  0x33   : > { %4366 = vmatmul.msk.bf16.gmra.mxu3 %vm542_vm1, %v4888_v56  ;;  %v485_v8 = vrot.slane %v7195_v61, 1  ;;  %v5115_v61 = vld [vmem:[%s4794_s9 + $0x54] sm:$0xff]  }
  0x34   : > { %4358 = vmatmul.msk.bf16.gmra.mxu1 %vm542_vm1, %v4882_v54  ;;  %v444_v37 = vsel %vm411_vm2, %v442_v47, %v443_v51  ;;  %v446_v19 = vsel %vm411_vm2, %v443_v51, %v445_v0  ;;  %v484_v18 = vsel %vm411_vm2, %v482_v27, %v483_v9  ;;  %7275 = vst [vmem:[#allocation11_spill] sm:$0xff] %v5115_v61  ;;  %v5121_v47 = vld [vmem:[%s4794_s9 + $0xbc] sm:$0x1]  ;;  %v7203_v51 = vunpack.c.l.bf16 %v5112_v31 }
  0x35   : > { %v486_v36 = vsel %vm411_vm2, %v483_v9, %v485_v8  ;;  %v5107_v7 = vpack.c.bf16 %v446_v19, %v444_v37  ;;  %v7205_v27 = vunpack.c.h.bf16 %v5112_v31  ;;  %v7208_v8 = vunpack.c.l.bf16 %v5115_v61  ;;  %v4440_v19 = vld [vmem:[%s7160_s1 + $0xc] sm:$0x3] }
  0x36   : > { %v5109_v41 = vpack.c.bf16 %v486_v36, %v484_v18  ;;  %v7207_v9 = vunpack.c.h.bf16 %v5115_v61  ;;  %v7206_v37 = vunpack.c.l.bf16 %v5118_v30  ;;  %v4457_v18 = vld [vmem:[%s7160_s1 + $0xe] sm:$0x3]  ;;  %v7204_v36 = vunpack.c.l.bf16 %v5121_v47 }
  0x37   : > { %7273 = vst [vmem:[#allocation9_spill] sm:$0xff] %v5107_v7  ;;  %v1541_v0 = vsel %vm591_vm0, %v4440_v19, 0  ;;  %v1681_v29 = vsel %vm591_vm0, %v4457_v18, 0  ;;  %v447_v60 = vrot.slane %v7208_v8, 1  ;;  %v487_v15 = vrot.slane %v7203_v51, 1 }
  0x38   : > { %1550 = vmatpush.bf16.msra.mxu2 %v1541_v0  ;;  %1690 = vmatpush.bf16.msra.mxu3 %v1681_v29  ;;  %v448_v59 = vrot.slane %v7207_v9, 1  ;;  %v450_v58 = vrot.slane %v7206_v37, 1  ;;  %v488_v14 = vrot.slane %v7205_v27, 1  ;;  %v490_v19 = vrot.slane %v7204_v36, 1  ;;  %v4423_v29 = vld [vmem:[%s7160_s1 + $0xa] sm:$0x3] }
  0x39   : > { %v1411_v51 = vsel %vm591_vm0, %v4423_v29, 0  ;;  %v4474_v36 = vld [vmem:[%s7160_s1 + $0x10] sm:$0x3]  ;;  %v831_v29 = vrot.slane %v296_v39, 2  ;;  %v833_v8 = vrot.slane %v297_v40, 2  ;;  %v7277_v39 = vunpack.c.h.bf16 %v4800_v11 }
  0x3a   : > { %v449_v18 = vsel %vm411_vm2, %v447_v60, %v448_v59  ;;  %v451_v0 = vsel %vm411_vm2, %v448_v59, %v450_v58  ;;  %v489_v27 = vsel %vm411_vm2, %v487_v15, %v488_v14  ;;  %v491_v37 = vsel %vm411_vm2, %v488_v14, %v490_v19  ;;  %1420 = vmatpush.bf16.msrb.mxu1 %v1411_v51 }
  0x3b   : > { %4342 = vmatmul.msk.bf16.gmra.mxu0 %vm542_vm1, %v4923_v20  ;;  %4350 = vmatmul.msk.bf16.gmra.mxu2 %vm542_vm1, %v4925_v21  ;;  %v1818_v9 = vsel %vm591_vm0, %v4474_v36, 0  ;;  %v5169_v60 = vpack.c.bf16 %v451_v0, %v449_v18  ;;  %v5171_v58 = vpack.c.bf16 %v491_v37, %v489_v27  ;;  %v830_v59 = vrot.slane %v295_v38, 2 }
  0x3c   : > { %1827 = vmatpush.bf16.msra.mxu0 %v1818_v9  ;;  %v834_v15 = vsel %vm824_vm3, %v831_v29, %v833_v8  ;;  %v825_v38 = vrot.slane %v4647_v13, 2  ;;  %v826_v33 = vrot.slane %v7277_v39, 2  ;;  %v7278_v40 = vunpack.c.l.bf16 %v4803_v12 }
  0x3d   : > { %7276 = vst [vmem:[#allocation12_spill] sm:$0xff] %v5169_v60  ;;  %v832_v14 = vsel %vm824_vm3, %v830_v59, %v831_v29  ;;  %v7279_v11 = vunpack.c.l.bf16 %v4882_v54  ;;  %v7280_v12 = vunpack.c.h.bf16 %v4882_v54 }
  0x3e   : > { %v938_v51 = vpack.c.bf16 %v834_v15, %v832_v14  ;;  %v828_v9 = vrot.slane %v7278_v40, 2  ;;  %v827_v37 = vsel %vm824_vm3, %v825_v38, %v826_v33 }
  0x3f   : > { %v835_v59 = vrot.slane %v7279_v11, 2  ;;  %v836_v29 = vrot.slane %v7280_v12, 2 }
  0x40   : > { %v829_v8 = vsel %vm824_vm3, %v826_v33, %v828_v9 }
  0x41   : > { %v937_v18 = vpack.c.bf16 %v829_v8, %v827_v37  ;;  %v837_v15 = vsel %vm824_vm3, %v835_v59, %v836_v29  ;;  %v7282_v59 = vunpack.c.l.bf16 %v4931_v23 }
  0x43   : > { %4367 = vmatmul.msk.bf16.gmra.mxu3 %vm542_vm1, %v4928_v22  ;;  %v840_v12 = vrot.slane %v7282_v59, 2 }
  0x44   : > { %4359 = vmatmul.msk.bf16.gmra.mxu1 %vm542_vm1, %v4931_v23 }
  0x4b   : > { %4343 = vmatmul.msk.bf16.gmra.mxu0 %vm542_vm1, %v4969_v1  ;;  %4351 = vmatmul.msk.bf16.gmra.mxu2 %vm542_vm1, %v4971_v2 }
  0x53   : > { %4368 = vmatmul.msk.bf16.gmra.mxu3 %vm542_vm1, %v4980_v5 }
  0x54   : > { %4360 = vmatmul.msk.bf16.gmra.mxu1 %vm542_vm1, %v4974_v3 }
  0x5b   : > { %4344 = vmatmul.msk.bf16.gmra.mxu0 %vm542_vm1, %v5015_v26  ;;  %4352 = vmatmul.msk.bf16.gmra.mxu2 %vm542_vm1, %v5017_v44 }
  0x63   : > { %4369 = vmatmul.msk.bf16.gmra.mxu3 %vm542_vm1, %v5020_v63 }
  0x64   : > { %4361 = vmatmul.msk.bf16.gmra.mxu1 %vm542_vm1, %v5023_v45 }
  0x6b   : > { %4345 = vmatmul.msk.bf16.gmra.mxu0 %vm542_vm1, %v5061_v16  ;;  %4353 = vmatmul.msk.bf16.gmra.mxu2 %vm542_vm1, %v5063_v48 }
  0x73   : > { %4370 = vmatmul.msk.bf16.gmra.mxu3 %vm542_vm1, %v5072_v42 }
  0x74   : > { %4362 = vmatmul.msk.bf16.gmra.mxu1 %vm542_vm1, %v5066_v43 }
  0x7b   : > { %4346 = vmatmul.msk.bf16.gmra.mxu0 %vm542_vm1, %v5107_v7  ;;  %4354 = vmatmul.msk.bf16.gmra.mxu2 %vm542_vm1, %v5109_v41 }
  0x83   : > { %4371 = vmatmul.msk.bf16.gmra.mxu3 %vm542_vm1, %v5112_v31 }
  0x84   : > { %4363 = vmatmul.msk.bf16.gmra.mxu1 %vm542_vm1, %v5115_v61 }
  0x8b   : > { %4347 = vmatmul.msk.bf16.gmra.mxu0 %vm542_vm1, %v5169_v60  ;;  %4355 = vmatmul.msk.bf16.gmra.mxu2 %vm542_vm1, %v5171_v58 }
  0x91   : > { %v744_v27 = vpop.f32.mrf.mxu1 }
  0x93   : > { %4390 = vmatmul.msk.bf16.vlgmr.msrb.gmra.mxu3 %vm542_vm1, %v4838_v32  ;;  %v7281_v32 = vunpack.c.l.bf16 %v4885_v55 }
  0x94   : > { %4424 = vmatmul.msk.bf16.vlgmr.msrb.gmra.mxu1 %vm542_vm1, %v938_v51 }
  0x95   : > { %v838_v14 = vrot.slane %v7281_v32, 2  ;;  %v7284_v32 = vunpack.c.l.bf16 %v4934_v24 }
  0x96   : > { %v784_v36 = vpop.f32.mrf.mxu3 }
  0x98   : > { %v604_v19 = vpop.f32.mrf.mxu0 }
  0x99   : > { %v5196_v0 = vadd.f32 %v744_v27, %v604_v19  ;;  %v746_v13 = vpop.f32.mrf.mxu1  ;;  %v839_v27 = vsel %vm824_vm3, %v836_v29, %v838_v14 }
  0x9a   : > { %v5211_v9 = vpack.c.bf16 %v839_v27, %v837_v15 }
  0x9b   : > { %4407 = vmatmul.msk.bf16.vlgmr.msrb.gmra.mxu0 %vm542_vm1, %v4877_v52  ;;  %4373 = vmatmul.msk.bf16.vlgmr.msrb.gmra.mxu2 %vm542_vm1, %v937_v18 }
  0x9e   : > { %v644_v38 = vpop.f32.mrf.mxu2  ;;  %v786_v39 = vpop.f32.mrf.mxu3 }
  0x9f   : > { %v5209_v33 = vadd.f32 %v784_v36, %v644_v38 }
  0xa0   : > { %v606_v40 = vpop.f32.mrf.mxu0 }
  0xa1   : > { %v5213_v37 = vadd.f32 %v746_v13, %v606_v40  ;;  %v749_v55 = vpop.f32.mrf.mxu1  ;;  %v7283_v13 = vunpack.c.h.bf16 %v4931_v23 }
  0xa3   : > { %4391 = vmatmul.msk.bf16.gmra.mxu3 %vm542_vm1, %v4882_v54  ;;  %v841_v29 = vrot.slane %v7283_v13, 2  ;;  %v843_v54 = vrot.slane %v7284_v32, 2 }
  0xa4   : > { %4425 = vmatmul.msk.bf16.gmra.mxu1 %vm542_vm1, %v5211_v9 }
  0xa5   : > { %v842_v14 = vsel %vm824_vm3, %v840_v12, %v841_v29  ;;  %v844_v15 = vsel %vm824_vm3, %v841_v29, %v843_v54  ;;  %v7286_v29 = vunpack.c.l.bf16 %v4974_v3 }
  0xa6   : > { %v646_v52 = vpop.f32.mrf.mxu2  ;;  %v789_v8 = vpop.f32.mrf.mxu3 }
  0xa7   : > { %v5219_v19 = vadd.f32 %v786_v39, %v646_v52  ;;  %v845_v32 = vrot.slane %v7286_v29, 2 }
  0xa8   : > { %v609_v18 = vpop.f32.mrf.mxu0 }
  0xa9   : > { %v5221_v11 = vadd.f32 %v749_v55, %v609_v18  ;;  %v751_v36 = vpop.f32.mrf.mxu1  ;;  %v5236_v55 = vpack.c.bf16 %v844_v15, %v842_v14  ;;  %v7288_v14 = vunpack.c.l.bf16 %v4977_v4 }
  0xab   : > { %4408 = vmatmul.msk.bf16.gmra.mxu0 %vm542_vm1, %v4923_v20  ;;  %4374 = vmatmul.msk.bf16.gmra.mxu2 %vm542_vm1, %v938_v51  ;;  %v848_v15 = vrot.slane %v7288_v14, 2 }
  0xae   : > { %v649_v27 = vpop.f32.mrf.mxu2  ;;  %v791_v38 = vpop.f32.mrf.mxu3 }
  0xaf   : > { %v5234_v39 = vadd.f32 %v789_v8, %v649_v27 }
  0xb0   : > { %v611_v40 = vpop.f32.mrf.mxu0 }
  0xb1   : > { %v5238_v52 = vadd.f32 %v751_v36, %v611_v40  ;;  %v754_v24 = vpop.f32.mrf.mxu1  ;;  %v7287_v36 = vunpack.c.h.bf16 %v4974_v3 }
  0xb3   : > { %4392 = vmatmul.msk.bf16.gmra.mxu3 %vm542_vm1, %v4931_v23  ;;  %v846_v54 = vrot.slane %v7287_v36, 2 }
  0xb4   : > { %4426 = vmatmul.msk.bf16.gmra.mxu1 %vm542_vm1, %v5236_v55 }
  0xb5   : > { %v847_v27 = vsel %vm824_vm3, %v845_v32, %v846_v54 }
  0xb6   : > { %v651_v51 = vpop.f32.mrf.mxu2  ;;  %v794_v18 = vpop.f32.mrf.mxu3 }
  0xb7   : > { %v5244_v59 = vadd.f32 %v791_v38, %v651_v51  ;;  %v849_v38 = vsel %vm824_vm3, %v846_v54, %v848_v15 }
  0xb8   : > { %v614_v12 = vpop.f32.mrf.mxu0  ;;  %v5262_v29 = vpack.c.bf16 %v849_v38, %v847_v27  ;;  %v7291_v27 = vunpack.c.l.bf16 %v5023_v45 }
  0xb9   : > { %7285 = vst [vmem:[#allocation13_spill] sm:$0xff] %v5244_v59  ;;  %v5246_v13 = vadd.f32 %v754_v24, %v614_v12  ;;  %v756_v8 = vpop.f32.mrf.mxu1 }
  0xba   : > { %v850_v38 = vrot.slane %v7291_v27, 2 }
  0xbb   : > { %4409 = vmatmul.msk.bf16.gmra.mxu0 %vm542_vm1, %v4969_v1  ;;  %4375 = vmatmul.msk.bf16.gmra.mxu2 %vm542_vm1, %v5211_v9 }
  0xbe   : > { %v654_v40 = vpop.f32.mrf.mxu2  ;;  %v796_v24 = vpop.f32.mrf.mxu3 }
  0xbf   : > { %v5260_v51 = vadd.f32 %v794_v18, %v654_v40 }
  0xc0   : > { %v616_v12 = vpop.f32.mrf.mxu0 }
  0xc1   : > { %7289 = vst [vmem:[#allocation14_spill] sm:$0xff] %v5260_v51  ;;  %v5264_v36 = vadd.f32 %v756_v8, %v616_v12  ;;  %v759_v4 = vpop.f32.mrf.mxu1  ;;  %v7292_v8 = vunpack.c.h.bf16 %v5023_v45  ;;  %v7293_v12 = vunpack.c.l.bf16 %v5026_v62 }
  0xc3   : > { %4393 = vmatmul.msk.bf16.gmra.mxu3 %vm542_vm1, %v4974_v3  ;;  %v851_v40 = vrot.slane %v7292_v8, 2  ;;  %v853_v3 = vrot.slane %v7293_v12, 2 }
  0xc4   : > { %4427 = vmatmul.msk.bf16.gmra.mxu1 %vm542_vm1, %v5262_v29 }
  0xc6   : > { %v656_v14 = vpop.f32.mrf.mxu2  ;;  %v799_v32 = vpop.f32.mrf.mxu3 }
  0xc7   : > { %v5270_v59 = vadd.f32 %v796_v24, %v656_v14  ;;  %v852_v24 = vsel %vm824_vm3, %v850_v38, %v851_v40 }
  0xc8   : > { %v619_v54 = vpop.f32.mrf.mxu0 }
  0xc9   : > { %7290 = vst [vmem:[#allocation15_spill] sm:$0xff] %v5270_v59  ;;  %v5272_v15 = vadd.f32 %v759_v4, %v619_v54  ;;  %v761_v18 = vpop.f32.mrf.mxu1  ;;  %v854_v4 = vsel %vm824_vm3, %v851_v40, %v853_v3 }
  0xca   : > { %v5288_v51 = vpack.c.bf16 %v854_v4, %v852_v24  ;;  %v7296_v24 = vunpack.c.l.bf16 %v5066_v43 }
  0xcb   : > { %4410 = vmatmul.msk.bf16.gmra.mxu0 %vm542_vm1, %v5015_v26  ;;  %4376 = vmatmul.msk.bf16.gmra.mxu2 %vm542_vm1, %v5236_v55 }
  0xcc   : > { %v855_v4 = vrot.slane %v7296_v24, 2 }
  0xce   : > { %v659_v14 = vpop.f32.mrf.mxu2  ;;  %v801_v54 = vpop.f32.mrf.mxu3 }
  0xcf   : > { %v5286_v59 = vadd.f32 %v799_v32, %v659_v14 }
  0xd0   : > { %v621_v27 = vpop.f32.mrf.mxu0 }
  0xd1   : > { %7294 = vst [vmem:[#allocation16_spill] sm:$0xff] %v5286_v59  ;;  %v5290_v8 = vadd.f32 %v761_v18, %v621_v27  ;;  %v764_v62 = vpop.f32.mrf.mxu1  ;;  %v7297_v18 = vunpack.c.h.bf16 %v5066_v43  ;;  %v7298_v27 = vunpack.c.l.bf16 %v5069_v49 }
  0xd3   : > { %4394 = vmatmul.msk.bf16.gmra.mxu3 %vm542_vm1, %v5023_v45  ;;  %v856_v14 = vrot.slane %v7297_v18, 2  ;;  %v858_v59 = vrot.slane %v7298_v27, 2 }
  0xd4   : > { %4428 = vmatmul.msk.bf16.gmra.mxu1 %vm542_vm1, %v5288_v51 }
  0xd6   : > { %v661_v12 = vpop.f32.mrf.mxu2  ;;  %v804_v38 = vpop.f32.mrf.mxu3 }
  0xd7   : > { %v5296_v26 = vadd.f32 %v801_v54, %v661_v12  ;;  %v857_v54 = vsel %vm824_vm3, %v855_v4, %v856_v14 }
  0xd8   : > { %v624_v40 = vpop.f32.mrf.mxu0 }
  0xd9   : > { %7295 = vst [vmem:[#allocation17_spill] sm:$0xff] %v5296_v26  ;;  %v5298_v3 = vadd.f32 %v764_v62, %v624_v40  ;;  %v766_v32 = vpop.f32.mrf.mxu1  ;;  %v859_v62 = vsel %vm824_vm3, %v856_v14, %v858_v59 }
  0xda   : > { %v5314_v45 = vpack.c.bf16 %v859_v62, %v857_v54  ;;  %v7302_v54 = vunpack.c.l.bf16 %v5115_v61 }
  0xdb   : > { %4411 = vmatmul.msk.bf16.gmra.mxu0 %vm542_vm1, %v5061_v16  ;;  %4377 = vmatmul.msk.bf16.gmra.mxu2 %vm542_vm1, %v5262_v29 }
  0xdc   : > { %7300 = vst [vmem:[#allocation19_spill] sm:$0xff] %v5314_v45  ;;  %v860_v62 = vrot.slane %v7302_v54, 2 }
  0xde   : > { %v664_v12 = vpop.f32.mrf.mxu2  ;;  %v806_v40 = vpop.f32.mrf.mxu3 }
  0xdf   : > { %v5312_v26 = vadd.f32 %v804_v38, %v664_v12 }
  0xe0   : > { %v626_v24 = vpop.f32.mrf.mxu0 }
  0xe1   : > { %7299 = vst [vmem:[#allocation18_spill] sm:$0xff] %v5312_v26  ;;  %v5316_v18 = vadd.f32 %v766_v32, %v626_v24  ;;  %v769_v49 = vpop.f32.mrf.mxu1  ;;  %v7303_v32 = vunpack.c.h.bf16 %v5115_v61  ;;  %v7304_v24 = vunpack.c.l.bf16 %v5118_v30 }
  0xe3   : > { %4395 = vmatmul.msk.bf16.gmra.mxu3 %vm542_vm1, %v5066_v43  ;;  %v861_v12 = vrot.slane %v7303_v32, 2  ;;  %v863_v43 = vrot.slane %v7304_v24, 2 }
  0xe4   : > { %4429 = vmatmul.msk.bf16.gmra.mxu1 %vm542_vm1, %v5314_v45 }
  0xe6   : > { %v666_v27 = vpop.f32.mrf.mxu2  ;;  %v809_v4 = vpop.f32.mrf.mxu3 }
  0xe7   : > { %v5322_v16 = vadd.f32 %v806_v40, %v666_v27  ;;  %v862_v40 = vsel %vm824_vm3, %v860_v62, %v861_v12 }
  0xe8   : > { %v629_v59 = vpop.f32.mrf.mxu0 }
  0xe9   : > { %7301 = vst [vmem:[#allocation20_spill] sm:$0xff] %v5322_v16  ;;  %v5324_v14 = vadd.f32 %v769_v49, %v629_v59  ;;  %v771_v38 = vpop.f32.mrf.mxu1  ;;  %v864_v49 = vsel %vm824_vm3, %v861_v12, %v863_v43 }
  0xea   : > { %v5340_v26 = vpack.c.bf16 %v864_v49, %v862_v40  ;;  %v7308_v40 = vunpack.c.l.bf16 %v4797_v10 }
  0xeb   : > { %4412 = vmatmul.msk.bf16.gmra.mxu0 %vm542_vm1, %v5107_v7  ;;  %4378 = vmatmul.msk.bf16.gmra.mxu2 %vm542_vm1, %v5288_v51 }
  0xec   : > { %7306 = vst [vmem:[#allocation22_spill] sm:$0xff] %v5340_v26  ;;  %v865_v49 = vrot.slane %v7308_v40, 2 }
  0xee   : > { %v669_v27 = vpop.f32.mrf.mxu2  ;;  %v811_v59 = vpop.f32.mrf.mxu3 }
  0xef   : > { %v5338_v16 = vadd.f32 %v809_v4, %v669_v27 }
  0xf0   : > { %v631_v54 = vpop.f32.mrf.mxu0 }
  0xf1   : > { %7305 = vst [vmem:[#allocation21_spill] sm:$0xff] %v5338_v16  ;;  %v5342_v32 = vadd.f32 %v771_v38, %v631_v54  ;;  %v774_v30 = vpop.f32.mrf.mxu1  ;;  %v7309_v38 = vunpack.c.h.bf16 %v4797_v10  ;;  %v7310_v54 = vunpack.c.l.bf16 %v4812_v17 }
  0xf3   : > { %4396 = vmatmul.msk.bf16.gmra.mxu3 %vm542_vm1, %v5115_v61  ;;  %v866_v27 = vrot.slane %v7309_v38, 2  ;;  %v868_v16 = vrot.slane %v7310_v54, 2 }
  0xf4   : > { %4430 = vmatmul.msk.bf16.gmra.mxu1 %vm542_vm1, %v5340_v26 }
  0xf6   : > { %v671_v24 = vpop.f32.mrf.mxu2  ;;  %v814_v62 = vpop.f32.mrf.mxu3 }
  0xf7   : > { %v5348_v7 = vadd.f32 %v811_v59, %v671_v24  ;;  %v867_v59 = vsel %vm824_vm3, %v865_v49, %v866_v27 }
  0xf8   : > { %v634_v12 = vpop.f32.mrf.mxu0 }
  0xf9   : > { %7307 = vst [vmem:[#allocation23_spill] sm:$0xff] %v5348_v7  ;;  %v5350_v43 = vadd.f32 %v774_v30, %v634_v12  ;;  %v776_v4 = vpop.f32.mrf.mxu1  ;;  %v869_v30 = vsel %vm824_vm3, %v866_v27, %v868_v16 }
  0xfa   : > { %v5366_v61 = vpack.c.bf16 %v869_v30, %v867_v59  ;;  %v7313_v59 = vunpack.c.l.bf16 %v4833_v28 }
  0xfb   : > { %4413 = vmatmul.msk.bf16.gmra.mxu0 %vm542_vm1, %v5169_v60  ;;  %4379 = vmatmul.msk.bf16.gmra.mxu2 %vm542_vm1, %v5314_v45 }
  0xfc   : > { %v870_v30 = vrot.slane %v7313_v59, 2 }
  0xfe   : > { %v674_v24 = vpop.f32.mrf.mxu2  ;;  %v816_v12 = vpop.f32.mrf.mxu3 }
  0xff   : > { %v5364_v7 = vadd.f32 %v814_v62, %v674_v24 }
 0x100   : > { %v636_v40 = vpop.f32.mrf.mxu0 }
 0x101   : > { %7311 = vst [vmem:[#allocation24_spill] sm:$0xff] %v5364_v7  ;;  %v5368_v38 = vadd.f32 %v776_v4, %v636_v40  ;;  %v779_v17 = vpop.f32.mrf.mxu1  ;;  %v7314_v4 = vunpack.c.h.bf16 %v4833_v28  ;;  %v7315_v40 = vunpack.c.l.bf16 %v4846_v35 }
 0x103   : > { %4397 = vmatmul.msk.bf16.gmra.mxu3 %vm542_vm1, %v4797_v10  ;;  %v871_v24 = vrot.slane %v7314_v4, 2  ;;  %v873_v10 = vrot.slane %v7315_v40, 2 }
 0x104   : > { %4431 = vmatmul.msk.bf16.gmra.mxu1 %vm542_vm1, %v5366_v61 }
 0x106   : > { %v676_v54 = vpop.f32.mrf.mxu2  ;;  %v819_v49 = vpop.f32.mrf.mxu3 }
 0x107   : > { %v5374_v60 = vadd.f32 %v816_v12, %v676_v54  ;;  %v872_v12 = vsel %vm824_vm3, %v870_v30, %v871_v24 }
 0x108   : > { %v639_v16 = vpop.f32.mrf.mxu0 }
 0x109   : > { %7312 = vst [vmem:[#allocation25_spill] sm:$0xff] %v5374_v60  ;;  %v5376_v27 = vadd.f32 %v779_v17, %v639_v16  ;;  %v781_v62 = vpop.f32.mrf.mxu1  ;;  %v874_v17 = vsel %vm824_vm3, %v871_v24, %v873_v10 }
 0x10a   : > { %v5392_v7 = vpack.c.bf16 %v874_v17, %v872_v12  ;;  %v7319_v12 = vunpack.c.h.bf16 %v4888_v56  ;;  %v7320_v17 = vunpack.c.l.bf16 %v4891_v57 }
 0x10b   : > { %4414 = vmatmul.msk.bf16.gmra.mxu0 %vm542_vm1, %v4843_v34  ;;  %4380 = vmatmul.msk.bf16.gmra.mxu2 %vm542_vm1, %v5340_v26 }
 0x10e   : > { %v679_v54 = vpop.f32.mrf.mxu2  ;;  %v821_v16 = vpop.f32.mrf.mxu3 }
 0x10f   : > { %v5390_v60 = vadd.f32 %v819_v49, %v679_v54  ;;  %v7318_v49 = vunpack.c.l.bf16 %v4888_v56 }
 0x110   : > { %v641_v59 = vpop.f32.mrf.mxu0 }
 0x111   : > { %7316 = vst [vmem:[#allocation26_spill] sm:$0xff] %v5390_v60  ;;  %v5394_v4 = vadd.f32 %v781_v62, %v641_v59  ;;  %v1422_v35 = vpop.f32.mrf.mxu1  ;;  %v875_v54 = vrot.slane %v7318_v49, 2  ;;  %v876_v62 = vrot.slane %v7319_v12, 2  ;;  %v878_v59 = vrot.slane %v7320_v17, 2  ;;  %v4491_v60 = vld [vmem:[%s7162_s3 + $0x4] sm:$0xf] }
 0x113   : > { %4398 = vmatmul.msk.bf16.gmra.mxu3 %vm542_vm1, %v4833_v28  ;;  %v879_v49 = vsel %vm824_vm3, %v876_v62, %v878_v59 }
 0x114   : > { %4432 = vmatmul.msk.bf16.gmra.mxu1 %vm542_vm1, %v5392_v7 }
 0x116   : > { %v681_v40 = vpop.f32.mrf.mxu2  ;;  %v1145_v30 = vpop.f32.mrf.mxu3 }
 0x117   : > { %v5400_v34 = vadd.f32 %v821_v16, %v681_v40  ;;  %v2657_v16 = vsel %vm2655_vm4, %v4491_v60, 0  ;;  %v877_v40 = vsel %vm824_vm3, %v875_v54, %v876_v62 }
 0x118   : > { %v1285_v24 = vpop.f32.mrf.mxu0  ;;  %2666 = vmatpush.bf16.msra.mxu1 %v2657_v16  ;;  %v5419_v28 = vpack.c.bf16 %v879_v49, %v877_v40  ;;  %v7322_v40 = vunpack.c.l.bf16 %v4928_v22 }
 0x119   : > { %7317 = vst [vmem:[#allocation27_spill] sm:$0xff] %v5400_v34  ;;  %v1424_v10 = vpop.f32.mrf.mxu1 }
 0x11a   : > { %v880_v49 = vrot.slane %v7322_v40, 2 }
 0x11b   : > { %4415 = vmatmul.msk.bf16.gmra.mxu0 %vm542_vm1, %v4879_v53  ;;  %4381 = vmatmul.msk.bf16.gmra.mxu2 %vm542_vm1, %v5366_v61 }
 0x11e   : > { %v1015_v57 = vpop.f32.mrf.mxu2  ;;  %v1147_v12 = vpop.f32.mrf.mxu3 }
 0x11f   : > { %v1095_v17 = vadd.f32 %v1015_v57, %v5196_v0 }
 0x120   : > { %v1287_v34 = vpop.f32.mrf.mxu0 }
 0x121   : > { %v1427_v26 = vpop.f32.mrf.mxu1  ;;  %v1225_v45 = vadd.f32 %v1145_v30, %v1095_v17  ;;  %v7323_v30 = vunpack.c.h.bf16 %v4928_v22 }
 0x123   : > { %4399 = vmatmul.msk.bf16.gmra.mxu3 %vm542_vm1, %v4888_v56  ;;  %v1365_v60 = vadd.f32 %v1285_v24, %v1225_v45  ;;  %v881_v57 = vrot.slane %v7323_v30, 2  ;;  %v7324_v56 = vunpack.c.l.bf16 %v4937_v25 }
 0x124   : > { %4433 = vmatmul.msk.bf16.gmra.mxu1 %vm542_vm1, %v5419_v28 }
 0x125   : > { %v5425_v16 = vadd.f32 %v1422_v35, %v1365_v60  ;;  %v883_v45 = vrot.slane %v7324_v56, 2 }
 0x126   : > { %v1017_v54 = vpop.f32.mrf.mxu2  ;;  %v1150_v62 = vpop.f32.mrf.mxu3 }
 0x127   : > { %7321 = vst [vmem:[#allocation28_spill] sm:$0xff] %v5425_v16  ;;  %v1096_v59 = vadd.f32 %v1017_v54, %v5213_v37  ;;  %v882_v37 = vsel %vm824_vm3, %v880_v49, %v881_v57  ;;  %v884_v17 = vsel %vm824_vm3, %v881_v57, %v883_v45 }
 0x128   : > { %v1290_v53 = vpop.f32.mrf.mxu0  ;;  %v5443_v56 = vpack.c.bf16 %v884_v17, %v882_v37  ;;  %v7327_v17 = vunpack.c.l.bf16 %v4983_v6 }
 0x129   : > { %v1429_v0 = vpop.f32.mrf.mxu1  ;;  %v1226_v24 = vadd.f32 %v1147_v12, %v1096_v59 }
 0x12b   : > { %4416 = vmatmul.msk.bf16.gmra.mxu0 %vm542_vm1, %v4925_v21  ;;  %4382 = vmatmul.msk.bf16.gmra.mxu2 %vm542_vm1, %v5392_v7  ;;  %v1366_v35 = vadd.f32 %v1287_v34, %v1226_v24  ;;  %v7325_v24 = vunpack.c.l.bf16 %v4980_v5 }
 0x12d   : > { %v5440_v60 = vadd.f32 %v1424_v10, %v1366_v35  ;;  %v885_v35 = vrot.slane %v7325_v24, 2 }
 0x12e   : > { %v1020_v54 = vpop.f32.mrf.mxu2  ;;  %v1152_v40 = vpop.f32.mrf.mxu3 }
 0x12f   : > { %v1097_v30 = vadd.f32 %v1020_v54, %v5221_v11 }
 0x130   : > { %v1292_v25 = vpop.f32.mrf.mxu0 }
 0x131   : > { %v1432_v12 = vpop.f32.mrf.mxu1  ;;  %v1227_v59 = vadd.f32 %v1150_v62, %v1097_v30  ;;  %v7326_v62 = vunpack.c.h.bf16 %v4980_v5 }
 0x133   : > { %4400 = vmatmul.msk.bf16.gmra.mxu3 %vm542_vm1, %v4928_v22  ;;  %v1367_v16 = vadd.f32 %v1290_v53, %v1227_v59  ;;  %v886_v37 = vrot.slane %v7326_v62, 2  ;;  %v888_v53 = vrot.slane %v7327_v17, 2 }
 0x134   : > { %4434 = vmatmul.msk.bf16.gmra.mxu1 %vm542_vm1, %v5443_v56 }
 0x135   : > { %v5449_v34 = vadd.f32 %v1427_v26, %v1367_v16  ;;  %v889_v16 = vsel %vm824_vm3, %v886_v37, %v888_v53 }
 0x136   : > { %v1022_v10 = vpop.f32.mrf.mxu2  ;;  %v1155_v49 = vpop.f32.mrf.mxu3 }
 0x137   : > { %v1098_v57 = vadd.f32 %v1022_v10, %v5238_v52  ;;  %v887_v52 = vsel %vm824_vm3, %v885_v35, %v886_v37 }
 0x138   : > { %v1295_v45 = vpop.f32.mrf.mxu0  ;;  %v5467_v62 = vpack.c.bf16 %v889_v16, %v887_v52 }
 0x139   : > { %v1434_v11 = vpop.f32.mrf.mxu1  ;;  %v1228_v54 = vadd.f32 %v1152_v40, %v1098_v57 }
 0x13b   : > { %4417 = vmatmul.msk.bf16.gmra.mxu0 %vm542_vm1, %v4971_v2  ;;  %4383 = vmatmul.msk.bf16.gmra.mxu2 %vm542_vm1, %v5419_v28  ;;  %v1368_v26 = vadd.f32 %v1292_v25, %v1228_v54  ;;  %v7328_v54 = vunpack.c.l.bf16 %v5020_v63 }
 0x13d   : > { %v5464_v30 = vadd.f32 %v1429_v0, %v1368_v26  ;;  %v890_v26 = vrot.slane %v7328_v54, 2 }
 0x13e   : > { %v1025_v59 = vpop.f32.mrf.mxu2  ;;  %v1157_v10 = vpop.f32.mrf.mxu3 }
 0x13f   : > { %v1099_v24 = vadd.f32 %v1025_v59, %v5246_v13 }
 0x140   : > { %v1297_v6 = vpop.f32.mrf.mxu0 }
 0x141   : > { %v1437_v40 = vpop.f32.mrf.mxu1  ;;  %v1229_v57 = vadd.f32 %v1155_v49, %v1099_v24  ;;  %v7329_v49 = vunpack.c.h.bf16 %v5020_v63 }
 0x143   : > { %4401 = vmatmul.msk.bf16.gmra.mxu3 %vm542_vm1, %v4980_v5  ;;  %v1369_v17 = vadd.f32 %v1295_v45, %v1229_v57  ;;  %v891_v52 = vrot.slane %v7329_v49, 2  ;;  %v7330_v5 = vunpack.c.l.bf16 %v5029_v46 }
 0x144   : > { %4435 = vmatmul.msk.bf16.gmra.mxu1 %vm542_vm1, %v5467_v62 }
 0x145   : > { %v5473_v25 = vadd.f32 %v1432_v12, %v1369_v17  ;;  %v893_v45 = vrot.slane %v7330_v5, 2 }
 0x146   : > { %v1027_v0 = vpop.f32.mrf.mxu2  ;;  %v1160_v35 = vpop.f32.mrf.mxu3 }
 0x147   : > { %v1100_v37 = vadd.f32 %v1027_v0, %v5264_v36  ;;  %v892_v36 = vsel %vm824_vm3, %v890_v26, %v891_v52  ;;  %v894_v59 = vsel %vm824_vm3, %v891_v52, %v893_v45  ;;  %v7332_v45 = vunpack.c.l.bf16 %v5072_v42 }
 0x148   : > { %v1300_v53 = vpop.f32.mrf.mxu0  ;;  %v5491_v54 = vpack.c.bf16 %v894_v59, %v892_v36 }
 0x149   : > { %v1439_v13 = vpop.f32.mrf.mxu1  ;;  %v1230_v16 = vadd.f32 %v1157_v10, %v1100_v37 }
 0x14b   : > { %4418 = vmatmul.msk.bf16.gmra.mxu0 %vm542_vm1, %v5017_v44  ;;  %4384 = vmatmul.msk.bf16.gmra.mxu2 %vm542_vm1, %v5443_v56  ;;  %v1370_v12 = vadd.f32 %v1297_v6, %v1230_v16  ;;  %v895_v16 = vrot.slane %v7332_v45, 2 }
 0x14d   : > { %v5488_v24 = vadd.f32 %v1434_v11, %v1370_v12 }
 0x14e   : > { %v1030_v57 = vpop.f32.mrf.mxu2  ;;  %v1162_v17 = vpop.f32.mrf.mxu3 }
 0x14f   : > { %v1101_v0 = vadd.f32 %v1030_v57, %v5272_v15 }
 0x150   : > { %v1302_v46 = vpop.f32.mrf.mxu0 }
 0x151   : > { %v1442_v10 = vpop.f32.mrf.mxu1  ;;  %v1231_v37 = vadd.f32 %v1160_v35, %v1101_v0  ;;  %v7333_v35 = vunpack.c.h.bf16 %v5072_v42 }
 0x153   : > { %4402 = vmatmul.msk.bf16.gmra.mxu3 %vm542_vm1, %v5020_v63  ;;  %v1371_v49 = vadd.f32 %v1300_v53, %v1231_v37  ;;  %v896_v12 = vrot.slane %v7333_v35, 2  ;;  %v7334_v53 = vunpack.c.l.bf16 %v5075_v50 }
 0x154   : > { %4436 = vmatmul.msk.bf16.gmra.mxu1 %vm542_vm1, %v5491_v54 }
 0x155   : > { %v5497_v6 = vadd.f32 %v1437_v40, %v1371_v49  ;;  %v898_v36 = vrot.slane %v7334_v53, 2  ;;  %v897_v40 = vsel %vm824_vm3, %v895_v16, %v896_v12 }
 0x156   : > { %v1032_v11 = vpop.f32.mrf.mxu2  ;;  %v1165_v26 = vpop.f32.mrf.mxu3 }
 0x157   : > { %v1102_v52 = vadd.f32 %v1032_v11, %v5290_v8  ;;  %v899_v57 = vsel %vm824_vm3, %v896_v12, %v898_v36  ;;  %v7336_v36 = vunpack.c.l.bf16 %v5112_v31 }
 0x158   : > { %v1305_v5 = vpop.f32.mrf.mxu0  ;;  %v5517_v45 = vpack.c.bf16 %v899_v57, %v897_v40 }
 0x159   : > { %v5500_v15 = vpop.f32.mrf.mxu1  ;;  %v1232_v59 = vadd.f32 %v1162_v17, %v1102_v52 }
 0x15a   : > { %7331 = vst [vmem:[#allocation29_spill] sm:$0xff] %v5500_v15 }
 0x15b   : > { %4419 = vmatmul.msk.bf16.gmra.mxu0 %vm542_vm1, %v5063_v48  ;;  %4385 = vmatmul.msk.bf16.gmra.mxu2 %vm542_vm1, %v5467_v62  ;;  %v1372_v8 = vadd.f32 %v1302_v46, %v1232_v59  ;;  %v900_v59 = vrot.slane %v7336_v36, 2  ;;  %v4688_v36 = vld [vmem:[%s4794_s9 + $0xc0] sm:$0xff]  }
 0x15d   : > { %v5514_v0 = vadd.f32 %v1439_v13, %v1372_v8 }
 0x15e   : > { %v1035_v37 = vpop.f32.mrf.mxu2  ;;  %v1167_v49 = vpop.f32.mrf.mxu3 }
 0x15f   : > { %v1103_v11 = vadd.f32 %v1035_v37, %v5298_v3 }
 0x160   : > { %v1307_v50 = vpop.f32.mrf.mxu0 }
 0x161   : > { %v1447_v17 = vpop.f32.mrf.mxu1  ;;  %v1233_v52 = vadd.f32 %v1165_v26, %v1103_v11  ;;  %v7337_v26 = vunpack.c.h.bf16 %v5112_v31 }
 0x163   : > { %4403 = vmatmul.msk.bf16.gmra.mxu3 %vm542_vm1, %v5072_v42  ;;  %v1373_v35 = vadd.f32 %v1305_v5, %v1233_v52  ;;  %v901_v8 = vrot.slane %v7337_v26, 2  ;;  %v7338_v42 = vunpack.c.l.bf16 %v5121_v47 }
 0x164   : > { %4437 = vmatmul.msk.bf16.gmra.mxu1 %vm542_vm1, %v5517_v45 }
 0x165   : > { %v5523_v46 = vadd.f32 %v1442_v10, %v1373_v35  ;;  %v903_v5 = vrot.slane %v7338_v42, 2  ;;  %v902_v10 = vsel %vm824_vm3, %v900_v59, %v901_v8  ;;  %v4679_v42 = vunpack.c.l.bf16 %v4688_v36 }
 0x166   : > { %v1037_v13 = vpop.f32.mrf.mxu2  ;;  %v1170_v16 = vpop.f32.mrf.mxu3 }
 0x167   : > { %v1104_v12 = vadd.f32 %v1037_v13, %v5316_v18  ;;  %v904_v57 = vsel %vm824_vm3, %v901_v8, %v903_v5 }
 0x168   : > { %v1310_v53 = vpop.f32.mrf.mxu0  ;;  %v5543_v35 = vpack.c.bf16 %v904_v57, %v902_v10 }
 0x169   : > { %v5526_v3 = vpop.f32.mrf.mxu1  ;;  %v1234_v40 = vadd.f32 %v1167_v49, %v1104_v12 }
 0x16a   : > { %7335 = vst [vmem:[#allocation30_spill] sm:$0xff] %v5526_v3 }
 0x16b   : > { %4420 = vmatmul.msk.bf16.gmra.mxu0 %vm542_vm1, %v5109_v41  ;;  %4386 = vmatmul.msk.bf16.gmra.mxu2 %vm542_vm1, %v5491_v54  ;;  %v5538_v18 = vadd.f32 %v1307_v50, %v1234_v40  ;;  %v288_v50 = vld [vmem:[%s4794_s9 + $0xc8] sm:$0x1] }
 0x16c   : > { %v342_v5 = vunpack.c.l.bf16 %v288_v50 }
 0x16e   : > { %v1040_v37 = vpop.f32.mrf.mxu2  ;;  %v1172_v11 = vpop.f32.mrf.mxu3 }
 0x16f   : > { %v1105_v47 = vadd.f32 %v1040_v37, %v5324_v14  ;;  %v4680_v14 = vunpack.c.h.bf16 %v4688_v36 }
 0x170   : > { %v1312_v52 = vpop.f32.mrf.mxu0 }
 0x171   : > { %v1452_v49 = vpop.f32.mrf.mxu1  ;;  %v1235_v13 = vadd.f32 %v1170_v16, %v1105_v47  ;;  %v1397_v16 = vrot.slane %v4679_v42, 2  ;;  %v1398_v57 = vrot.slane %v4680_v14, 2 }
 0x173   : > { %4404 = vmatmul.msk.bf16.gmra.mxu3 %vm542_vm1, %v5112_v31  ;;  %v1375_v12 = vadd.f32 %v1310_v53, %v1235_v13  ;;  %v1400_v53 = vrot.slane %v342_v5, 2  ;;  %v1399_v13 = vsel %vm824_vm3, %v1397_v16, %v1398_v57 }
 0x174   : > { %4438 = vmatmul.msk.bf16.gmra.mxu1 %vm542_vm1, %v5543_v35 }
 0x175   : > { %v5551_v59 = vadd.f32 %v1447_v17, %v1375_v12  ;;  %v1401_v12 = vsel %vm824_vm3, %v1398_v57, %v1400_v53 }
 0x176   : > { %v1042_v26 = vpop.f32.mrf.mxu2  ;;  %v1175_v8 = vpop.f32.mrf.mxu3 }
 0x177   : > { %7339 = vst [vmem:[#allocation31_spill] sm:$0xff] %v5551_v59  ;;  %v1106_v40 = vadd.f32 %v1042_v26, %v5342_v32  ;;  %v1260_v26 = vrot.slane %v4679_v42, 1  ;;  %v1261_v59 = vrot.slane %v4680_v14, 1 }
 0x178   : > { %v1315_v10 = vpop.f32.mrf.mxu0 }
 0x179   : > { %v5554_v37 = vpop.f32.mrf.mxu1  ;;  %v1236_v47 = vadd.f32 %v1172_v11, %v1106_v40  ;;  %v1263_v11 = vrot.slane %v342_v5, 1  ;;  %v5565_v40 = vpack.c.bf16 %v1401_v12, %v1399_v13 }
 0x17a   : > { %7340 = vst [vmem:[#allocation32_spill] sm:$0xff] %v5554_v37 }
 0x17b   : > { %4421 = vmatmul.msk.bf16.gmra.mxu0 %vm542_vm1, %v5171_v58  ;;  %4387 = vmatmul.msk.bf16.gmra.mxu2 %vm542_vm1, %v5517_v45  ;;  %v5560_v17 = vadd.f32 %v1312_v52, %v1236_v47  ;;  %v1262_v47 = vsel %vm411_vm2, %v1260_v26, %v1261_v59  ;;  %v1264_v16 = vsel %vm411_vm2, %v1261_v59, %v1263_v11 }
 0x17c   : > { %v5574_v14 = vpack.c.bf16 %v1264_v16, %v1262_v47 }
 0x17e   : > { %v1045_v32 = vpop.f32.mrf.mxu2  ;;  %v1177_v50 = vpop.f32.mrf.mxu3 }
 0x17f   : > { %v1107_v3 = vadd.f32 %v1045_v32, %v5350_v43 }
 0x180   : > { %v1317_v37 = vpop.f32.mrf.mxu0 }
 0x181   : > { %v1457_v31 = vpop.f32.mrf.mxu1  ;;  %v1237_v15 = vadd.f32 %v1175_v8, %v1107_v3 }
 0x183   : > { %4405 = vmatmul.msk.bf16.gmra.mxu3 %vm542_vm1, %v4688_v36  ;;  %v1377_v52 = vadd.f32 %v1315_v10, %v1237_v15 }
 0x184   : > { %4439 = vmatmul.msk.bf16.gmra.mxu1 %vm542_vm1, %v5565_v40 }
 0x185   : > { %v5572_v42 = vadd.f32 %v1452_v49, %v1377_v52 }
 0x186   : > { %v1047_v43 = vpop.f32.mrf.mxu2  ;;  %v1180_v57 = vpop.f32.mrf.mxu3 }
 0x187   : > { %v1108_v5 = vadd.f32 %v1047_v43, %v5368_v38 }
 0x188   : > { %v1320_v53 = vpop.f32.mrf.mxu0 }
 0x189   : > { %v5577_v3 = vpop.f32.mrf.mxu1  ;;  %v1238_v36 = vadd.f32 %v1177_v50, %v1108_v5 }
 0x18b   : > { %4422 = vmatmul.msk.bf16.gmra.mxu0 %vm542_vm1, %v5574_v14  ;;  %4388 = vmatmul.msk.bf16.gmra.mxu2 %vm542_vm1, %v5543_v35  ;;  %v5583_v15 = vadd.f32 %v1317_v37, %v1238_v36 }
 0x18e   : > { %v1050_v49 = vpop.f32.mrf.mxu2  ;;  %v1182_v59 = vpop.f32.mrf.mxu3 }
 0x18f   : > { %v1109_v8 = vadd.f32 %v1050_v49, %v5376_v27  ;;  %v4705_v27 = vld [vmem:[%s4794_s9 + $0x18] sm:$0xff]  }
 0x190   : > { %v1322_v10 = vpop.f32.mrf.mxu0 }
 0x191   : > { %v1462_v13 = vpop.f32.mrf.mxu1  ;;  %v1239_v38 = vadd.f32 %v1180_v57, %v1109_v8 }
 0x193   : > { %v1379_v12 = vadd.f32 %v1320_v53, %v1239_v38  ;;  %4458 = vmatmul.msk.bf16.vlgmr.msra.gmra.mxu3 %vm542_vm1, %v4923_v20 }
 0x195   : > { %v5588_v32 = vadd.f32 %v1457_v31, %v1379_v12 }
 0x196   : > { %v1052_v50 = vpop.f32.mrf.mxu2  ;;  %v1185_v26 = vpop.f32.mrf.mxu3 }
 0x197   : > { %v1110_v11 = vadd.f32 %v1052_v50, %v5394_v4 }
 0x198   : > { %v1325_v37 = vpop.f32.mrf.mxu0 }
 0x199   : > { %v5591_v52 = vpop.f32.mrf.mxu1  ;;  %v1240_v47 = vadd.f32 %v1182_v59, %v1110_v11 }
 0x19b   : > { %4475 = vmatmul.msk.bf16.vlgmr.msra.gmra.mxu0 %vm542_vm1, %v5211_v9  ;;  %4441 = vmatmul.msk.bf16.vlgmr.msra.gmra.mxu2 %vm542_vm1, %v4705_v27  ;;  %v5597_v16 = vadd.f32 %v1322_v10, %v1240_v47 }
 0x19e   : > { %v1055_v43 = vpop.f32.mrf.mxu2  ;;  %v1187_v20 = vpop.f32.mrf.mxu3 }
 0x19f   : > { %v1111_v31 = vadd.f32 %v1055_v43, %v5209_v33  ;;  %v7342_v43 = vld [vmem:[#allocation13_spill] sm:$0xff] }
 0x1a0   : > { %v1327_v57 = vpop.f32.mrf.mxu0 }
 0x1a1   : > { %v1467_v5 = vpop.f32.mrf.mxu1  ;;  %v1241_v53 = vadd.f32 %v1185_v26, %v1111_v31 }
 0x1a3   : > { %v1381_v4 = vadd.f32 %v1325_v37, %v1241_v53  ;;  %4459 = vmatmul.msk.bf16.gmra.mxu3 %vm542_vm1, %v4969_v1  ;;  %v7341_v37 = vld [vmem:[#allocation6_spill] sm:$0xff] }
 0x1a5   : > { %v5602_v36 = vadd.f32 %v1462_v13, %v1381_v4 }
 0x1a6   : > { %v1057_v49 = vpop.f32.mrf.mxu2  ;;  %v1190_v9 = vpop.f32.mrf.mxu3 }
 0x1a7   : > { %v1112_v59 = vadd.f32 %v1057_v49, %v5219_v19 }
 0x1a8   : > { %v1330_v8 = vpop.f32.mrf.mxu0 }
 0x1a9   : > { %v5605_v10 = vpop.f32.mrf.mxu1  ;;  %v1242_v38 = vadd.f32 %v1187_v20, %v1112_v59 }
 0x1ab   : > { %4476 = vmatmul.msk.bf16.gmra.mxu0 %vm542_vm1, %v5236_v55  ;;  %4442 = vmatmul.msk.bf16.gmra.mxu2 %vm542_vm1, %v4931_v23  ;;  %v5611_v33 = vadd.f32 %v1327_v57, %v1242_v38 }
 0x1ae   : > { %v1060_v12 = vpop.f32.mrf.mxu2  ;;  %v1192_v1 = vpop.f32.mrf.mxu3 }
 0x1af   : > { %v1113_v13 = vadd.f32 %v1060_v12, %v5234_v39  ;;  %v4706_v39 = vld [vmem:[%s4794_s9 + $0x30] sm:$0xff]  }
 0x1b0   : > { %v1332_v50 = vpop.f32.mrf.mxu0 }
 0x1b1   : > { %v1472_v26 = vpop.f32.mrf.mxu1  ;;  %v1243_v19 = vadd.f32 %v1190_v9, %v1113_v13  ;;  %v7344_v13 = vld [vmem:[#allocation8_spill] sm:$0xff] }
 0x1b3   : > { %v1383_v11 = vadd.f32 %v1330_v8, %v1243_v19  ;;  %4460 = vmatmul.msk.bf16.gmra.mxu3 %vm542_vm1, %v7341_v37 }
 0x1b5   : > { %v5616_v47 = vadd.f32 %v1467_v5, %v1383_v11  ;;  %v7343_v5 = vld [vmem:[#allocation14_spill] sm:$0xff]  ;;  %v7345_v11 = vld [vmem:[#allocation15_spill] sm:$0xff] }
 0x1b6   : > { %v1062_v55 = vpop.f32.mrf.mxu2  ;;  %v1195_v27 = vpop.f32.mrf.mxu3 }
 0x1b7   : > { %v1114_v23 = vadd.f32 %v1062_v55, %v7342_v43  ;;  %v7346_v43 = vld [vmem:[#allocation7_spill] sm:$0xff] }
 0x1b8   : > { %v1335_v20 = vpop.f32.mrf.mxu0 }
 0x1b9   : > { %v5619_v31 = vpop.f32.mrf.mxu1  ;;  %v1244_v57 = vadd.f32 %v1192_v1, %v1114_v23 }
 0x1bb   : > { %4477 = vmatmul.msk.bf16.gmra.mxu0 %vm542_vm1, %v5262_v29  ;;  %4443 = vmatmul.msk.bf16.gmra.mxu2 %vm542_vm1, %v4706_v39  ;;  %v5625_v53 = vadd.f32 %v1332_v50, %v1244_v57  ;;  %v7348_v57 = vld [vmem:[#allocation16_spill] sm:$0xff] }
 0x1be   : > { %v1065_v4 = vpop.f32.mrf.mxu2  ;;  %v1197_v49 = vpop.f32.mrf.mxu3 }
 0x1bf   : > { %v1115_v9 = vadd.f32 %v1065_v4, %v7343_v5 }
 0x1c0   : > { %v1337_v59 = vpop.f32.mrf.mxu0 }
 0x1c1   : > { %v1245_v8 = vadd.f32 %v1195_v27, %v1115_v9  ;;  %v1477_v38 = vpop.f32.mrf.mxu1 }
 0x1c3   : > { %v1385_v12 = vadd.f32 %v1335_v20, %v1245_v8  ;;  %4461 = vmatmul.msk.bf16.gmra.mxu3 %vm542_vm1, %v7344_v13  ;;  %v7349_v8 = vld [vmem:[#allocation9_spill] sm:$0xff] }
 0x1c5   : > { %v5630_v1 = vadd.f32 %v1472_v26, %v1385_v12 }
 0x1c6   : > { %v1067_v19 = vpop.f32.mrf.mxu2  ;;  %v1200_v29 = vpop.f32.mrf.mxu3 }
 0x1c7   : > { %v1116_v37 = vadd.f32 %v1067_v19, %v7345_v11 }
 0x1c8   : > { %v1340_v55 = vpop.f32.mrf.mxu0 }
 0x1c9   : > { %v1246_v50 = vadd.f32 %v1197_v49, %v1116_v37  ;;  %v5639_v23 = vpop.f32.mrf.mxu1 }
 0x1ca   : > { %7347 = vst [vmem:[#allocation6_spill] sm:$0xff] %v5639_v23 }
 0x1cb   : > { %4478 = vmatmul.msk.bf16.gmra.mxu0 %vm542_vm1, %v5288_v51  ;;  %4444 = vmatmul.msk.bf16.gmra.mxu2 %vm542_vm1, %v7346_v43  ;;  %v5637_v27 = vadd.f32 %v1337_v59, %v1246_v50  ;;  %v7350_v59 = vld [vmem:[#allocation17_spill] sm:$0xff]  ;;  %v7351_v50 = vld [vmem:[#allocation19_spill] sm:$0xff]  ;;  %v4707_v43 = vld [vmem:[%s4794_s9 + $0x48] sm:$0xff]  }
 0x1ce   : > { %v1070_v20 = vpop.f32.mrf.mxu2  ;;  %v1202_v26 = vpop.f32.mrf.mxu3 }
 0x1cf   : > { %v1117_v39 = vadd.f32 %v1070_v20, %v7348_v57  ;;  %v7353_v57 = vld [vmem:[#allocation18_spill] sm:$0xff] }
 0x1d0   : > { %v1342_v4 = vpop.f32.mrf.mxu0 }
 0x1d1   : > { %v1247_v5 = vadd.f32 %v1200_v29, %v1117_v39  ;;  %v1482_v51 = vpop.f32.mrf.mxu1 }
 0x1d3   : > { %v1387_v9 = vadd.f32 %v1340_v55, %v1247_v5  ;;  %4462 = vmatmul.msk.bf16.gmra.mxu3 %vm542_vm1, %v7349_v8 }
 0x1d5   : > { %v5644_v49 = vadd.f32 %v1477_v38, %v1387_v9 }
 0x1d6   : > { %v1072_v12 = vpop.f32.mrf.mxu2  ;;  %v1205_v13 = vpop.f32.mrf.mxu3 }
 0x1d7   : > { %v1118_v19 = vadd.f32 %v1072_v12, %v7350_v59  ;;  %v7355_v12 = vld [vmem:[#allocation12_spill] sm:$0xff] }
 0x1d8   : > { %v1345_v11 = vpop.f32.mrf.mxu0 }
 0x1d9   : > { %v1248_v37 = vadd.f32 %v1202_v26, %v1118_v19  ;;  %v5654_v5 = vpop.f32.mrf.mxu1 }
 0x1da   : > { %7354 = vst [vmem:[#allocation14_spill] sm:$0xff] %v5654_v5 }
 0x1db   : > { %4479 = vmatmul.msk.bf16.gmra.mxu0 %vm542_vm1, %v7351_v50  ;;  %4445 = vmatmul.msk.bf16.gmra.mxu2 %vm542_vm1, %v4707_v43  ;;  %v5651_v29 = vadd.f32 %v1342_v4, %v1248_v37  ;;  %v7356_v50 = vld [vmem:[#allocation20_spill] sm:$0xff] }
 0x1dd   : > { %7352 = vst [vmem:[#allocation13_spill] sm:$0xff] %v5651_v29  ;;  %v7357_v29 = vld [vmem:[#allocation22_spill] sm:$0xff] }
 0x1de   : > { %v1075_v55 = vpop.f32.mrf.mxu2  ;;  %v1207_v20 = vpop.f32.mrf.mxu3 }
 0x1df   : > { %v1119_v38 = vadd.f32 %v1075_v55, %v7353_v57  ;;  %v7358_v55 = vld [vmem:[#allocation11_spill] sm:$0xff] }
 0x1e0   : > { %v1347_v39 = vpop.f32.mrf.mxu0 }
 0x1e1   : > { %v1249_v9 = vadd.f32 %v1205_v13, %v1119_v38  ;;  %v1487_v23 = vpop.f32.mrf.mxu1 }
 0x1e3   : > { %v1389_v8 = vadd.f32 %v1345_v11, %v1249_v9  ;;  %4463 = vmatmul.msk.bf16.gmra.mxu3 %vm542_vm1, %v7355_v12 }
 0x1e5   : > { %v5658_v26 = vadd.f32 %v1482_v51, %v1389_v8  ;;  %v7359_v51 = vld [vmem:[#allocation21_spill] sm:$0xff] }
 0x1e6   : > { %v1077_v59 = vpop.f32.mrf.mxu2  ;;  %v1210_v19 = vpop.f32.mrf.mxu3 }
 0x1e7   : > { %v1120_v43 = vadd.f32 %v1077_v59, %v7356_v50  ;;  %v7360_v59 = vld [vmem:[#allocation4_spill] sm:$0xff] }
 0x1e8   : > { %v1350_v4 = vpop.f32.mrf.mxu0 }
 0x1e9   : > { %v1250_v37 = vadd.f32 %v1207_v20, %v1120_v43  ;;  %v5670_v20 = vpop.f32.mrf.mxu1 }
 0x1ea   : > { %7361 = vst [vmem:[#allocation8_spill] sm:$0xff] %v5670_v20 }
 0x1eb   : > { %4480 = vmatmul.msk.bf16.gmra.mxu0 %vm542_vm1, %v7357_v29  ;;  %4446 = vmatmul.msk.bf16.gmra.mxu2 %vm542_vm1, %v7358_v55  ;;  %v5665_v13 = vadd.f32 %v1347_v39, %v1250_v37  ;;  %v7362_v55 = vld [vmem:[#allocation23_spill] sm:$0xff] }
 0x1ee   : > { %v1080_v11 = vpop.f32.mrf.mxu2  ;;  %v1212_v57 = vpop.f32.mrf.mxu3 }
 0x1ef   : > { %v1121_v38 = vadd.f32 %v1080_v11, %v7359_v51  ;;  %v4708_v11 = vld [vmem:[%s4794_s9 + $0x60] sm:$0xff]  }
 0x1f0   : > { %v1352_v9 = vpop.f32.mrf.mxu0 }
 0x1f1   : > { %v1251_v8 = vadd.f32 %v1210_v19, %v1121_v38 }
 0x1f3   : > { %v1391_v12 = vadd.f32 %v1350_v4, %v1251_v8  ;;  %4464 = vmatmul.msk.bf16.gmra.mxu3 %vm542_vm1, %v7360_v59  ;;  %v1492_v4 = vpop.f32.mrf.mxu1  ;;  %v7364_v8 = vld [vmem:[#allocation24_spill] sm:$0xff] }
 0x1f5   : > { %v5672_v50 = vadd.f32 %v1487_v23, %v1391_v12 }
 0x1f6   : > { %v1082_v29 = vpop.f32.mrf.mxu2  ;;  %v1215_v43 = vpop.f32.mrf.mxu3 }
 0x1f7   : > { %v1122_v39 = vadd.f32 %v1082_v29, %v7362_v55  ;;  %v7365_v29 = vld [vmem:[#allocation5_spill] sm:$0xff] }
 0x1f8   : > { %v1355_v37 = vpop.f32.mrf.mxu0 }
 0x1f9   : > { %v1252_v5 = vadd.f32 %v1212_v57, %v1122_v39  ;;  %v4725_v57 = vmov 0.0  }
 0x1fa   : > { %2274 = vst.msk [vmem:[#allocation2 + $0x18] sm:$0xff] %vm2269_vm5, %v4725_v57 }
 0x1fb   : > { %4481 = vmatmul.msk.bf16.gmra.mxu0 %vm542_vm1, %v5366_v61  ;;  %4447 = vmatmul.msk.bf16.gmra.mxu2 %vm542_vm1, %v4708_v11  ;;  %v5679_v19 = vadd.f32 %v1352_v9, %v1252_v5  ;;  %2275 = vst.msk [vmem:[#allocation2 + $0x20] sm:$0xff] %vm2269_vm5, %v4725_v57  ;;  %v7369_v11 = vld [vmem:[#allocation3_spill] sm:$0xff] }
 0x1fc   : > { %2270 = vst.msk [vmem:[#allocation2] sm:$0xff] %vm2269_vm5, %v4725_v57 }
 0x1fd   : > { %7363 = vst [vmem:[#allocation15_spill] sm:$0xff] %v5679_v19 }
 0x1fe   : > { %v1085_v51 = vpop.f32.mrf.mxu2  ;;  %v1217_v38 = vpop.f32.mrf.mxu3  ;;  %2271 = vst.msk [vmem:[#allocation2 + $0x8] sm:$0xff] %vm2269_vm5, %v4725_v57 }
 0x1ff   : > { %v1123_v23 = vadd.f32 %v1085_v51, %v7364_v8  ;;  %2277 = vst.msk [vmem:[#allocation2 + $0x30] sm:$0xff] %vm2269_vm5, %v4725_v57 }
 0x200   : > { %v1357_v12 = vpop.f32.mrf.mxu0  ;;  %2278 = vst.msk [vmem:[#allocation2 + $0x38] sm:$0xff] %vm2269_vm5, %v4725_v57 }
 0x201   : > { %v1253_v59 = vadd.f32 %v1215_v43, %v1123_v23  ;;  %v7367_v43 = vld [vmem:[#allocation25_spill] sm:$0xff]  ;;  %2280 = vst.msk [vmem:[#allocation2 + $0x48] sm:$0xff] %vm2269_vm5, %v4725_v57 }
 0x202   : > { %2281 = vst.msk [vmem:[#allocation2 + $0x50] sm:$0xff] %vm2269_vm5, %v4725_v57 }
 0x203   : > { %v1393_v20 = vadd.f32 %v1355_v37, %v1253_v59  ;;  %4465 = vmatmul.msk.bf16.gmra.mxu3 %vm542_vm1, %v7365_v29  ;;  %v5697_v37 = vpop.f32.mrf.mxu1  ;;  %2283 = vst.msk [vmem:[#allocation2 + $0x60] sm:$0xff] %vm2269_vm5, %v4725_v57 }
 0x204   : > { %7368 = vst [vmem:[#allocation16_spill] sm:$0xff] %v5697_v37 }
 0x205   : > { %v5688_v61 = vadd.f32 %v1492_v4, %v1393_v20  ;;  %2284 = vst.msk [vmem:[#allocation2 + $0x68] sm:$0xff] %vm2269_vm5, %v4725_v57 }
 0x206   : > { %v1087_v5 = vpop.f32.mrf.mxu2  ;;  %v1220_v9 = vpop.f32.mrf.mxu3  ;;  %2286 = vst.msk [vmem:[#allocation2 + $0x78] sm:$0xff] %vm2269_vm5, %v4725_v57 }
 0x207   : > { %7366 = vst [vmem:[#allocation7_spill] sm:$0xff] %v5688_v61  ;;  %v1124_v55 = vadd.f32 %v1087_v5, %v7367_v43 }
 0x208   : > { %v1360_v39 = vpop.f32.mrf.mxu0  ;;  %2287 = vst.msk [vmem:[#allocation2 + $0x80] sm:$0xff] %vm2269_vm5, %v4725_v57 }
 0x209   : > { %v1254_v20 = vadd.f32 %v1217_v38, %v1124_v55  ;;  %2289 = vst.msk [vmem:[#allocation2 + $0x90] sm:$0xff] %vm2269_vm5, %v4725_v57  ;;  %v7373_v55 = vld [vmem:[#allocation27_spill] sm:$0xff] }
 0x20a   : > { %2290 = vst.msk [vmem:[#allocation2 + $0x98] sm:$0xff] %vm2269_vm5, %v4725_v57 }
 0x20b   : > { %4482 = vmatmul.msk.bf16.gmra.mxu0 %vm542_vm1, %v5392_v7  ;;  %4448 = vmatmul.msk.bf16.gmra.mxu2 %vm542_vm1, %v7369_v11  ;;  %v5709_v4 = vadd.f32 %v1357_v12, %v1254_v20  ;;  %v7371_v7 = vld [vmem:[#allocation26_spill] sm:$0xff]  ;;  %2292 = vst.msk [vmem:[#allocation2 + $0xa8] sm:$0xff] %vm2269_vm5, %v4725_v57  ;;  %v1497_v59 = vpop.f32.mrf.mxu1  ;;  %v4709_v11 = vld [vmem:[%s4794_s9 + $0x78] sm:$0xff]  }
 0x20c   : > { %2293 = vst.msk [vmem:[#allocation2 + $0xb0] sm:$0xff] %vm2269_vm5, %v4725_v57 }
 0x20d   : > { %7370 = vst [vmem:[#allocation9_spill] sm:$0xff] %v5709_v4 }
 0x20e   : > { %v1090_v51 = vpop.f32.mrf.mxu2  ;;  %v1222_v38 = vpop.f32.mrf.mxu3  ;;  %2295 = vst.msk [vmem:[#allocation2 + $0xc0] sm:$0xff] %vm2269_vm5, %v4725_v57 }
 0x20f   : > { %v1125_v8 = vadd.f32 %v1090_v51, %v7371_v7  ;;  %2296 = vst.msk [vmem:[#allocation2 + $0xc8] sm:$0xff] %vm2269_vm5, %v4725_v57 }
 0x210   : > { %v1362_v23 = vpop.f32.mrf.mxu0  ;;  %2298 = vst.msk [vmem:[#allocation2 + $0xd8] sm:$0xff] %vm2269_vm5, %v4725_v57 }
 0x211   : > { %v1255_v12 = vadd.f32 %v1220_v9, %v1125_v8  ;;  %2299 = vst.msk [vmem:[#allocation2 + $0xe0] sm:$0xff] %vm2269_vm5, %v4725_v57 }
 0x212   : > { %2301 = vst.msk [vmem:[#allocation2 + $0xf0] sm:$0xff] %vm2269_vm5, %v4725_v57 }
 0x213   : > { %v1395_v29 = vadd.f32 %v1360_v39, %v1255_v12  ;;  %4466 = vmatmul.msk.bf16.gmra.mxu3 %vm542_vm1, %v4925_v21  ;;  %2302 = vst.msk [vmem:[#allocation2 + $0xf8] sm:$0xff] %vm2269_vm5, %v4725_v57 }
 0x214   : > { %2304 = vst.msk [vmem:[#allocation2 + $0x108] sm:$0xff] %vm2269_vm5, %v4725_v57 }
 0x215   : > { %v5734_v5 = vadd.f32 %v1497_v59, %v1395_v29  ;;  %2305 = vst.msk [vmem:[#allocation2 + $0x110] sm:$0xff] %vm2269_vm5, %v4725_v57 }
 0x216   : > { %v1092_v9 = vpop.f32.mrf.mxu2  ;;  %v1692_v43 = vpop.f32.mrf.mxu3  ;;  %2307 = vst.msk [vmem:[#allocation2 + $0x120] sm:$0xff] %vm2269_vm5, %v4725_v57 }
 0x217   : > { %7372 = vst [vmem:[#allocation17_spill] sm:$0xff] %v5734_v5  ;;  %v1126_v39 = vadd.f32 %v1092_v9, %v7373_v55  ;;  %v5775_v9 = vld [vmem:[%s7161_s2] ss:$0 sm:$0xff] }
 0x218   : > { %v1829_v21 = vpop.f32.mrf.mxu0  ;;  %2308 = vst.msk [vmem:[#allocation2 + $0x128] sm:$0xff] %vm2269_vm5, %v4725_v57 }
 0x219   : > { %v1256_v20 = vadd.f32 %v1222_v38, %v1126_v39  ;;  %v2428_v38 = vld [vmem:[%s7162_s3] sm:$0xf]  ;;  %2310 = vst.msk [vmem:[#allocation2 + $0x138] sm:$0xff] %vm2269_vm5, %v4725_v57 }
 0x21a   : > { %2311 = vst.msk [vmem:[#allocation2 + $0x140] sm:$0xff] %vm2269_vm5, %v4725_v57  ;;  %v5784_v39 = vld [vmem:[%s7161_s2 + $0x1] ss:$0 sm:$0xff] }
 0x21b   : > { %4483 = vmatmul.msk.bf16.gmra.mxu0 %vm542_vm1, %v5419_v28  ;;  %4449 = vmatmul.msk.bf16.gmra.mxu2 %vm542_vm1, %v4709_v11  ;;  %v5753_v51 = vadd.f32 %v1362_v23, %v1256_v20  ;;  %v2797_v28 = vsel %vm2655_vm4, %v2428_v38, 0  ;;  %v7375_v23 = vld [vmem:[#allocation28_spill] sm:$0xff]  ;;  %2313 = vst.msk [vmem:[#allocation2 + $0x150] sm:$0xff] %vm2269_vm5, %v4725_v57 }
 0x21c   : > { %2806 = vmatpush.bf16.msrb.mxu2 %v2797_v28  ;;  %2314 = vst.msk [vmem:[#allocation2 + $0x158] sm:$0xff] %vm2269_vm5, %v4725_v57 }
 0x21d   : > { %7374 = vst [vmem:[#allocation19_spill] sm:$0xff] %v5753_v51 }
 0x21e   : > { %v1552_v7 = vpop.f32.mrf.mxu2  ;;  %v1694_v8 = vpop.f32.mrf.mxu3  ;;  %2316 = vst.msk [vmem:[#allocation2 + $0x168] sm:$0xff] %vm2269_vm5, %v4725_v57 }
 0x21f   : > { %v1632_v12 = vadd.f32 %v1552_v7, %v7375_v23  ;;  %2317 = vst.msk [vmem:[#allocation2 + $0x170] sm:$0xff] %vm2269_vm5, %v4725_v57  ;;  %v5805_v23 = vld [vmem:[#allocation2] sm:$0xff] }
 0x220   : > { %v1831_v59 = vpop.f32.mrf.mxu0  ;;  %2319 = vst.msk [vmem:[#allocation2 + $0x180] sm:$0xff] %vm2269_vm5, %v4725_v57 }
 0x221   : > { %v1772_v29 = vadd.f32 %v1692_v43, %v1632_v12  ;;  %v4524_v43 = vld [vmem:[%s7162_s3 + $0x8] sm:$0xf]  ;;  %2320 = vst.msk [vmem:[#allocation2 + $0x188] sm:$0xff] %vm2269_vm5, %v4725_v57  ;;  %v5810_v12 = vld [vmem:[%s7161_s2 + $0x2] ss:$0 sm:$0xff] }
 0x222   : > { %2322 = vst.msk [vmem:[#allocation2 + $0x198] sm:$0xff] %vm2269_vm5, %v4725_v57 }
 0x223   : > { %v1909_v55 = vadd.f32 %v1829_v21, %v1772_v29  ;;  %4467 = vmatmul.msk.bf16.gmra.mxu3 %vm542_vm1, %v4971_v2  ;;  %v3067_v21 = vsel %vm2655_vm4, %v4524_v43, 0  ;;  %2323 = vst.msk [vmem:[#allocation2 + $0x1a0] sm:$0xff] %vm2269_vm5, %v4725_v57  ;;  %v5821_v43 = vld [vmem:[%s7161_s2 + $0x3] ss:$0 sm:$0xff] }
 0x224   : > { %3076 = vmatpush.bf16.msrb.mxu3 %v3067_v21  ;;  %2276 = vst.msk [vmem:[#allocation2 + $0x28] sm:$0x3] %vm2272_vm6, %v4725_v57  ;;  %v2477_v21 = vrot.slane %v5805_v23, 1 }
 0x225   : > { %v1943_v20 = vmul.f32 %v5775_v9, %v1909_v55  ;;  %2273 = vst.msk [vmem:[#allocation2 + $0x10] sm:$0x3] %vm2272_vm6, %v4725_v57 }
 0x226   : > { %v1554_v2 = vpop.f32.mrf.mxu2  ;;  %v1697_v11 = vpop.f32.mrf.mxu3  ;;  %2279 = vst.msk [vmem:[#allocation2 + $0x40] sm:$0x3] %vm2272_vm6, %v4725_v57 }
 0x227   : > { %v1977_v38 = vadd.f32 %v5784_v39, %v1943_v20  ;;  %v1633_v28 = vadd.f32 %v1554_v2, %v5440_v60  ;;  %v5816_v60 = vld [vmem:[#allocation2 + $0x8] sm:$0xff]  ;;  %2282 = vst.msk [vmem:[#allocation2 + $0x58] sm:$0x3] %vm2272_vm6, %v4725_v57 }
 0x228   : > { %v1834_v7 = vpop.f32.mrf.mxu0  ;;  %2285 = vst.msk [vmem:[#allocation2 + $0x70] sm:$0x3] %vm2272_vm6, %v4725_v57  ;;  %v4541_v2 = vld [vmem:[%s7162_s3 + $0xc] sm:$0xf] }
 0x229   : > { %vm2009_vm7 = vcmp.gt.f32.partialorder %v1977_v38, 0.0  ;;  %v2041_v29 = vmul.f32 0.2, %v1977_v38  ;;  %v1773_v55 = vadd.f32 %v1694_v8, %v1633_v28  ;;  %v4558_v28 = vld [vmem:[%s7162_s3 + $0x10] sm:$0xf] }
 0x22a   : > { %2288 = vst.msk [vmem:[#allocation2 + $0x88] sm:$0x3] %vm2272_vm6, %v4725_v57 }
 0x22b   : > { %4484 = vmatmul.msk.bf16.gmra.mxu0 %vm542_vm1, %v5443_v56  ;;  %v2073_v20 = vsel %vm2009_vm7, %v1977_v38, %v2041_v29  ;;  %v1910_v8 = vadd.f32 %v1831_v59, %v1773_v55  ;;  %4450 = vmatmul.msk.bf16.gmra.mxu2 %vm542_vm1, %v4928_v22  ;;  %v2478_v59 = vrot.slane %v5816_v60, 1  ;;  %v3197_v38 = vsel %vm2655_vm4, %v4541_v2, 0  ;;  %2291 = vst.msk [vmem:[#allocation2 + $0xa0] sm:$0x3] %vm2272_vm6, %v4725_v57 }
 0x22c   : > { %v2107_v56 = vmul.f32 %v5810_v12, %v2073_v20  ;;  %v3337_v29 = vsel %vm2655_vm4, %v4558_v28, 0  ;;  %3206 = vmatpush.bf16.msrb.mxu0 %v3197_v38  ;;  %2294 = vst.msk [vmem:[#allocation2 + $0xb8] sm:$0x3] %vm2272_vm6, %v4725_v57  ;;  %v5854_v28 = vld [vmem:[#allocation2 + $0x10] sm:$0x3] }
 0x22d   : > { %v1944_v22 = vmul.f32 %v5775_v9, %v1910_v8  ;;  %3346 = vmatpush.bf16.msrb.mxu1 %v3337_v29  ;;  %2297 = vst.msk [vmem:[#allocation2 + $0xd0] sm:$0x3] %vm2272_vm6, %v4725_v57  ;;  %v2480_v29 = vrot.slane %v5854_v28, 1 }
 0x22e   : > { %v2141_v55 = vadd.f32 %v5821_v43, %v2107_v56  ;;  %v1557_v20 = vpop.f32.mrf.mxu2  ;;  %v1699_v51 = vpop.f32.mrf.mxu3  ;;  %2300 = vst.msk [vmem:[#allocation2 + $0xe8] sm:$0x3] %vm2272_vm6, %v4725_v57  ;;  %v2479_v56 = vsel %vm411_vm2, %v2477_v21, %v2478_v59 }
 0x22f   : > { %v1978_v5 = vadd.f32 %v5784_v39, %v1944_v22  ;;  %v1634_v2 = vadd.f32 %v1557_v20, %v5449_v34  ;;  %2303 = vst.msk [vmem:[#allocation2 + $0x100] sm:$0x3] %vm2272_vm6, %v4725_v57  ;;  %v2481_v34 = vsel %vm411_vm2, %v2478_v59, %v2480_v29 }
 0x230   : > { %v1836_v8 = vpop.f32.mrf.mxu0  ;;  %vm2173_vm8 = vcmp.gt.f32.partialorder %v2141_v55, 0.0  ;;  %v2205_v38 = vmul.f32 0.2, %v2141_v55  ;;  %2306 = vst.msk [vmem:[#allocation2 + $0x118] sm:$0x3] %vm2272_vm6, %v4725_v57  ;;  %v2589_v19 = vpack.c.bf16 %v2481_v34, %v2479_v56  ;;  %v4710_v56 = vld [vmem:[%s4794_s9 + $0x90] sm:$0xff]  }
 0x231   : > { %vm2010_vm9 = vcmp.gt.f32.partialorder %v1978_v5, 0.0  ;;  %v2042_v37 = vmul.f32 0.2, %v1978_v5  ;;  %v1774_v22 = vadd.f32 %v1697_v11, %v1634_v2  ;;  %2309 = vst.msk [vmem:[#allocation2 + $0x130] sm:$0x3] %vm2272_vm6, %v4725_v57 }
 0x232   : > { %v2237_v4 = vsel %vm2173_vm8, %v2141_v55, %v2205_v38  ;;  %2312 = vst.msk [vmem:[#allocation2 + $0x148] sm:$0x3] %vm2272_vm6, %v4725_v57  ;;  %4492 = vmatmul.msk.bf16.vlgmr.msra.gmra.mxu1 %vm2269_vm5, %v2589_v19 }
 0x233   : > { %2326 = vst.msk [vmem:[#allocation2 + $0x19] sm:$0xff] %vm2269_vm5, %v2237_v4  ;;  %v2074_v20 = vsel %vm2010_vm9, %v1978_v5, %v2042_v37  ;;  %v1911_v61 = vadd.f32 %v1834_v7, %v1774_v22  ;;  %4468 = vmatmul.msk.bf16.gmra.mxu3 %vm542_vm1, %v5017_v44 }
 0x234   : > { %v2108_v21 = vmul.f32 %v5810_v12, %v2074_v20  ;;  %2315 = vst.msk [vmem:[#allocation2 + $0x160] sm:$0x3] %vm2272_vm6, %v4725_v57 }
 0x235   : > { %v1945_v11 = vmul.f32 %v5775_v9, %v1911_v61  ;;  %2318 = vst.msk [vmem:[#allocation2 + $0x178] sm:$0x3] %vm2272_vm6, %v4725_v57 }
 0x236   : > { %v2142_v4 = vadd.f32 %v5821_v43, %v2108_v21  ;;  %v1559_v37 = vpop.f32.mrf.mxu2  ;;  %v1702_v5 = vpop.f32.mrf.mxu3  ;;  %2321 = vst.msk [vmem:[#allocation2 + $0x190] sm:$0x3] %vm2272_vm6, %v4725_v57 }
 0x237   : > { %v1979_v44 = vadd.f32 %v5784_v39, %v1945_v11  ;;  %v1635_v7 = vadd.f32 %v1559_v37, %v5464_v30  ;;  %2324 = vst.msk [vmem:[#allocation2 + $0x1a8] sm:$0x3] %vm2272_vm6, %v4725_v57 }
 0x238   : > { %v1839_v59 = vpop.f32.mrf.mxu0  ;;  %vm2174_vm10 = vcmp.gt.f32.partialorder %v2142_v4, 0.0  ;;  %v2206_v61 = vmul.f32 0.2, %v2142_v4 }
 0x239   : > { %vm2011_vm11 = vcmp.gt.f32.partialorder %v1979_v44, 0.0  ;;  %v2043_v19 = vmul.f32 0.2, %v1979_v44  ;;  %v1775_v55 = vadd.f32 %v1699_v51, %v1635_v7 }
 0x23a   : > { %v2238_v2 = vsel %vm2174_vm10, %v2142_v4, %v2206_v61  ;;  %v2361_v11 = vld [vmem:[#allocation2 + $0x18] sm:$0xff] }
 0x23b   : > { %4485 = vmatmul.msk.bf16.gmra.mxu0 %vm542_vm1, %v5467_v62  ;;  %2327 = vst.msk [vmem:[#allocation2 + $0x21] sm:$0xff] %vm2269_vm5, %v2238_v2  ;;  %v2075_v38 = vsel %vm2011_vm11, %v1979_v44, %v2043_v19  ;;  %v1912_v30 = vadd.f32 %v1836_v8, %v1775_v55  ;;  %4451 = vmatmul.msk.bf16.gmra.mxu2 %vm542_vm1, %v4710_v56  ;;  %v2482_v19 = vrot.slane %v2361_v11, 1  ;;  %v2893_v55 = vrot.slane %v2361_v11, 2 }
 0x23c   : > { %v2109_v29 = vmul.f32 %v5810_v12, %v2075_v38 }
 0x23d   : > { %v1946_v22 = vmul.f32 %v5775_v9, %v1912_v30 }
 0x23e   : > { %v2143_v57 = vadd.f32 %v5821_v43, %v2109_v29  ;;  %v1562_v34 = vpop.f32.mrf.mxu2  ;;  %v1704_v20 = vpop.f32.mrf.mxu3 }
 0x23f   : > { %v1980_v51 = vadd.f32 %v5784_v39, %v1946_v22  ;;  %v1636_v21 = vadd.f32 %v1562_v34, %v5473_v25 }
 0x240   : > { %v1841_v62 = vpop.f32.mrf.mxu0  ;;  %vm2175_vm12 = vcmp.gt.f32.partialorder %v2143_v57, 0.0  ;;  %v2207_v4 = vmul.f32 0.2, %v2143_v57 }
 0x241   : > { %vm2012_vm13 = vcmp.gt.f32.partialorder %v1980_v51, 0.0  ;;  %v2044_v8 = vmul.f32 0.2, %v1980_v51  ;;  %v1776_v37 = vadd.f32 %v1702_v5, %v1636_v21 }
 0x242   : > { %v2239_v44 = vsel %vm2175_vm12, %v2143_v57, %v2207_v4  ;;  %v2362_v7 = vld [vmem:[#allocation2 + $0x20] sm:$0xff]  ;;  %v2363_v61 = vld [vmem:[#allocation2 + $0x28] sm:$0x3] }
 0x243   : > { %2328 = vst.msk [vmem:[#allocation2 + $0x31] sm:$0xff] %vm2269_vm5, %v2239_v44  ;;  %v2076_v2 = vsel %vm2012_vm13, %v1980_v51, %v2044_v8  ;;  %v1913_v38 = vadd.f32 %v1839_v59, %v1776_v37  ;;  %4469 = vmatmul.msk.bf16.gmra.mxu3 %vm542_vm1, %v5063_v48  ;;  %v2483_v25 = vrot.slane %v2362_v7, 1  ;;  %v2485_v30 = vrot.slane %v2363_v61, 1 }
 0x244   : > { %v2110_v56 = vmul.f32 %v5810_v12, %v2076_v2  ;;  %v5900_v29 = vpack.c.bf16 %v2362_v7, %v2361_v11  ;;  %v2894_v22 = vrot.slane %v2362_v7, 2  ;;  %v2896_v5 = vrot.slane %v2363_v61, 2 }
 0x245   : > { %v1947_v57 = vmul.f32 %v5775_v9, %v1913_v38  ;;  %v2484_v34 = vsel %vm411_vm2, %v2482_v19, %v2483_v25  ;;  %v2486_v21 = vsel %vm411_vm2, %v2483_v25, %v2485_v30 }
 0x246   : > { %v2144_v51 = vadd.f32 %v5821_v43, %v2110_v56  ;;  %v1564_v59 = vpop.f32.mrf.mxu2  ;;  %v1707_v4 = vpop.f32.mrf.mxu3  ;;  %v5906_v8 = vpack.c.bf16 %v2486_v21, %v2484_v34  ;;  %v2895_v48 = vsel %vm824_vm3, %v2893_v55, %v2894_v22  ;;  %v2897_v37 = vsel %vm824_vm3, %v2894_v22, %v2896_v5 }
 0x247   : > { %v1981_v11 = vadd.f32 %v5784_v39, %v1947_v57  ;;  %v1637_v44 = vadd.f32 %v1564_v59, %v5488_v24  ;;  %v5912_v61 = vpack.c.bf16 %v2897_v37, %v2895_v48 }
 0x248   : > { %v1844_v7 = vpop.f32.mrf.mxu0  ;;  %vm2176_vm14 = vcmp.gt.f32.partialorder %v2144_v51, 0.0  ;;  %v2208_v19 = vmul.f32 0.2, %v2144_v51  ;;  %4493 = vmatmul.msk.bf16.gmra.mxu1 %vm2269_vm5, %v5906_v8 }
 0x249   : > { %vm2013_vm15 = vcmp.gt.f32.partialorder %v1981_v11, 0.0  ;;  %v2045_v2 = vmul.f32 0.2, %v1981_v11  ;;  %v1777_v38 = vadd.f32 %v1704_v20, %v1637_v44 }
 0x24a   : > { %v2240_v25 = vsel %vm2176_vm14, %v2144_v51, %v2208_v19  ;;  %v2364_v21 = vld [vmem:[#allocation2 + $0x30] sm:$0xff] }
 0x24b   : > { %4486 = vmatmul.msk.bf16.gmra.mxu0 %vm542_vm1, %v5491_v54  ;;  %2329 = vst.msk [vmem:[#allocation2 + $0x39] sm:$0xff] %vm2269_vm5, %v2240_v25  ;;  %v2077_v55 = vsel %vm2013_vm15, %v1981_v11, %v2045_v2  ;;  %v1914_v30 = vadd.f32 %v1841_v62, %v1777_v38  ;;  %4452 = vmatmul.msk.bf16.gmra.mxu2 %vm542_vm1, %v5020_v63  ;;  %v2487_v11 = vrot.slane %v2364_v21, 1  ;;  %v2898_v44 = vrot.slane %v2364_v21, 2 }
 0x24c   : > { %v2111_v24 = vmul.f32 %v5810_v12, %v2077_v55 }
 0x24d   : > { %v1948_v56 = vmul.f32 %v5775_v9, %v1914_v30 }
 0x24e   : > { %v2145_v22 = vadd.f32 %v5821_v43, %v2111_v24  ;;  %v1567_v5 = vpop.f32.mrf.mxu2  ;;  %v1709_v57 = vpop.f32.mrf.mxu3 }
 0x24f   : > { %v1982_v20 = vadd.f32 %v5784_v39, %v1948_v56  ;;  %v1638_v34 = vadd.f32 %v1567_v5, %v5497_v6 }
 0x250   : > { %v1846_v54 = vpop.f32.mrf.mxu0  ;;  %vm2177_vm0 = vcmp.gt.f32.partialorder %v2145_v22, 0.0  ;;  %v2209_v51 = vmul.f32 0.2, %v2145_v22 }
 0x251   : > { %vm2014_vm6 = vcmp.gt.f32.partialorder %v1982_v20, 0.0  ;;  %v2046_v62 = vmul.f32 0.2, %v1982_v20  ;;  %v1778_v59 = vadd.f32 %v1707_v4, %v1638_v34 }
 0x252   : > { %v2241_v63 = vsel %vm2177_vm0, %v2145_v22, %v2209_v51  ;;  %v2365_v48 = vld [vmem:[#allocation2 + $0x38] sm:$0xff]  ;;  %v2366_v37 = vld [vmem:[#allocation2 + $0x40] sm:$0x3] }
 0x253   : > { %2330 = vst.msk [vmem:[#allocation2 + $0x49] sm:$0xff] %vm2269_vm5, %v2241_v63  ;;  %v2078_v19 = vsel %vm2014_vm6, %v1982_v20, %v2046_v62  ;;  %v1915_v2 = vadd.f32 %v1844_v7, %v1778_v59  ;;  %4470 = vmatmul.msk.bf16.gmra.mxu3 %vm542_vm1, %v5109_v41  ;;  %v2488_v6 = vrot.slane %v2365_v48, 1  ;;  %v2490_v38 = vrot.slane %v2366_v37, 1 }
 0x254   : > { %v2112_v25 = vmul.f32 %v5810_v12, %v2078_v19  ;;  %v5930_v55 = vpack.c.bf16 %v2365_v48, %v2364_v21  ;;  %v2899_v30 = vrot.slane %v2365_v48, 2  ;;  %v2901_v4 = vrot.slane %v2366_v37, 2 }
 0x255   : > { %v1949_v24 = vmul.f32 %v5775_v9, %v1915_v2  ;;  %v2489_v56 = vsel %vm411_vm2, %v2487_v11, %v2488_v6  ;;  %v2491_v22 = vsel %vm411_vm2, %v2488_v6, %v2490_v38 }
 0x256   : > { %v2146_v5 = vadd.f32 %v5821_v43, %v2112_v25  ;;  %v1569_v7 = vpop.f32.mrf.mxu2  ;;  %v1712_v20 = vpop.f32.mrf.mxu3  ;;  %v5936_v34 = vpack.c.bf16 %v2491_v22, %v2489_v56  ;;  %v2900_v41 = vsel %vm824_vm3, %v2898_v44, %v2899_v30  ;;  %v2902_v51 = vsel %vm824_vm3, %v2899_v30, %v2901_v4 }
 0x257   : > { %v1983_v21 = vadd.f32 %v5784_v39, %v1949_v24  ;;  %v1639_v62 = vadd.f32 %v1569_v7, %v5514_v0  ;;  %v5942_v63 = vpack.c.bf16 %v2902_v51, %v2900_v41  ;;  %v4711_v0 = vld [vmem:[%s4794_s9 + $0xa8] sm:$0xff]  }
 0x258   : > { %v1849_v59 = vpop.f32.mrf.mxu0  ;;  %vm2178_vm7 = vcmp.gt.f32.partialorder %v2146_v5, 0.0  ;;  %v2210_v48 = vmul.f32 0.2, %v2146_v5  ;;  %4494 = vmatmul.msk.bf16.gmra.mxu1 %vm2269_vm5, %v5936_v34 }
 0x259   : > { %vm2015_vm8 = vcmp.gt.f32.partialorder %v1983_v21, 0.0  ;;  %v2047_v37 = vmul.f32 0.2, %v1983_v21  ;;  %v1779_v11 = vadd.f32 %v1709_v57, %v1639_v62 }
 0x25a   : > { %v2242_v19 = vsel %vm2178_vm7, %v2146_v5, %v2210_v48  ;;  %v2367_v56 = vld [vmem:[#allocation2 + $0x48] sm:$0xff] }
 0x25b   : > { %4487 = vmatmul.msk.bf16.gmra.mxu0 %vm542_vm1, %v5517_v45  ;;  %2331 = vst.msk [vmem:[#allocation2 + $0x51] sm:$0xff] %vm2269_vm5, %v2242_v19  ;;  %v2079_v44 = vsel %vm2015_vm8, %v1983_v21, %v2047_v37  ;;  %v1916_v2 = vadd.f32 %v1846_v54, %v1779_v11  ;;  %4453 = vmatmul.msk.bf16.gmra.mxu2 %vm542_vm1, %v4711_v0  ;;  %v2492_v21 = vrot.slane %v2367_v56, 1  ;;  %v7376_v11 = vld [vmem:[#allocation29_spill] sm:$0xff] }
 0x25c   : > { %v2113_v6 = vmul.f32 %v5810_v12, %v2079_v44  ;;  %v1511_v19 = vadd.f32 %v7376_v11, %v5538_v18 }
 0x25d   : > { %v1950_v38 = vmul.f32 %v5775_v9, %v1916_v2 }
 0x25e   : > { %v2147_v25 = vadd.f32 %v5821_v43, %v2113_v6  ;;  %v1572_v30 = vpop.f32.mrf.mxu2  ;;  %v1714_v4 = vpop.f32.mrf.mxu3 }
 0x25f   : > { %v1984_v57 = vadd.f32 %v5784_v39, %v1950_v38  ;;  %v1640_v24 = vadd.f32 %v1572_v30, %v5523_v46 }
 0x260   : > { %v1851_v45 = vpop.f32.mrf.mxu0  ;;  %vm2179_vm9 = vcmp.gt.f32.partialorder %v2147_v25, 0.0  ;;  %v2211_v22 = vmul.f32 0.2, %v2147_v25 }
 0x261   : > { %vm2016_vm10 = vcmp.gt.f32.partialorder %v1984_v57, 0.0  ;;  %v2048_v54 = vmul.f32 0.2, %v1984_v57  ;;  %v1780_v5 = vadd.f32 %v1712_v20, %v1640_v24  ;;  %v2903_v24 = vrot.slane %v2367_v56, 2 }
 0x262   : > { %v2243_v7 = vsel %vm2179_vm9, %v2147_v25, %v2211_v22  ;;  %v2368_v41 = vld [vmem:[#allocation2 + $0x50] sm:$0xff]  ;;  %v2369_v51 = vld [vmem:[#allocation2 + $0x58] sm:$0x3] }
 0x263   : > { %2332 = vst.msk [vmem:[#allocation2 + $0x61] sm:$0xff] %vm2269_vm5, %v2243_v7  ;;  %v2080_v62 = vsel %vm2016_vm10, %v1984_v57, %v2048_v54  ;;  %v1917_v48 = vadd.f32 %v1849_v59, %v1780_v5  ;;  %4471 = vmatmul.msk.bf16.gmra.mxu3 %vm542_vm1, %v5171_v58  ;;  %v2493_v37 = vrot.slane %v2368_v41, 1  ;;  %v2495_v46 = vrot.slane %v2369_v51, 1 }
 0x264   : > { %v2114_v44 = vmul.f32 %v5810_v12, %v2080_v62  ;;  %v5965_v6 = vpack.c.bf16 %v2368_v41, %v2367_v56  ;;  %v2904_v22 = vrot.slane %v2368_v41, 2  ;;  %v2906_v5 = vrot.slane %v2369_v51, 2 }
 0x265   : > { %v1951_v20 = vmul.f32 %v5775_v9, %v1917_v48  ;;  %v2494_v2 = vsel %vm411_vm2, %v2492_v21, %v2493_v37  ;;  %v2496_v0 = vsel %vm411_vm2, %v2493_v37, %v2495_v46  ;;  %v7378_v46 = vld [vmem:[#allocation10_spill] sm:$0xff] }
 0x266   : > { %v2148_v59 = vadd.f32 %v5821_v43, %v2114_v44  ;;  %v1574_v38 = vpop.f32.mrf.mxu2  ;;  %v1717_v25 = vpop.f32.mrf.mxu3  ;;  %v5968_v58 = vpack.c.bf16 %v2496_v0, %v2494_v2  ;;  %v2905_v62 = vsel %vm824_vm3, %v2903_v24, %v2904_v22  ;;  %v2907_v37 = vsel %vm824_vm3, %v2904_v22, %v2906_v5  ;;  %v7380_v2 = vld [vmem:[#allocation31_spill] sm:$0xff] }
 0x267   : > { %v1985_v30 = vadd.f32 %v5784_v39, %v1951_v20  ;;  %v1641_v57 = vadd.f32 %v1574_v38, %v1511_v19  ;;  %v5988_v38 = vld [vmem:[%s4794_s9 + $0xcc] sm:$0xff]   ;;  %v291_v22 = vld [vmem:[%s4794_s9 + $0xd4] sm:$0x1] }
 0x268   : > { %7377 = vst [vmem:[#allocation18_spill] sm:$0xff] %v5968_v58  ;;  %v1854_v18 = vpop.f32.mrf.mxu0  ;;  %vm2180_vm11 = vcmp.gt.f32.partialorder %v2148_v59, 0.0  ;;  %v2212_v54 = vmul.f32 0.2, %v2148_v59  ;;  %4495 = vmatmul.msk.bf16.gmra.mxu1 %vm2269_vm5, %v5968_v58 }
 0x269   : > { %vm2017_vm12 = vcmp.gt.f32.partialorder %v1985_v30, 0.0  ;;  %v2049_v7 = vmul.f32 0.2, %v1985_v30  ;;  %v1781_v21 = vadd.f32 %v1714_v4, %v1641_v57  ;;  %v5981_v4 = vpack.c.bf16 %v2907_v37, %v2905_v62 }
 0x26a   : > { %v2244_v48 = vsel %vm2180_vm11, %v2148_v59, %v2212_v54  ;;  %v343_v62 = vunpack.c.l.bf16 %v5988_v38 }
 0x26b   : > { %4488 = vmatmul.msk.bf16.gmra.mxu0 %vm542_vm1, %v5543_v35  ;;  %2333 = vst.msk [vmem:[#allocation2 + $0x69] sm:$0xff] %vm2269_vm5, %v2244_v48  ;;  %v2081_v56 = vsel %vm2017_vm12, %v1985_v30, %v2049_v7  ;;  %v1918_v41 = vadd.f32 %v1851_v45, %v1781_v21  ;;  %4454 = vmatmul.msk.bf16.gmra.mxu2 %vm542_vm1, %v7378_v46  ;;  %v2370_v45 = vld [vmem:[#allocation2 + $0x60] sm:$0xff]  ;;  %v344_v48 = vunpack.c.h.bf16 %v5988_v38 }
 0x26c   : > { %v2115_v51 = vmul.f32 %v5810_v12, %v2081_v56  ;;  %7379 = vst [vmem:[#allocation12_spill] sm:$0xff] %v5981_v4  ;;  %v2497_v21 = vrot.slane %v2370_v45, 1 }
 0x26d   : > { %v1952_v11 = vmul.f32 %v5775_v9, %v1918_v41 }
 0x26e   : > { %v2149_v19 = vadd.f32 %v5821_v43, %v2115_v51  ;;  %v1577_v35 = vpop.f32.mrf.mxu2  ;;  %v1719_v44 = vpop.f32.mrf.mxu3 }
 0x26f   : > { %v1986_v20 = vadd.f32 %v5784_v39, %v1952_v11  ;;  %v1642_v0 = vadd.f32 %v1577_v35, %v7380_v2 }
 0x270   : > { %v1856_v59 = vpop.f32.mrf.mxu0  ;;  %vm2181_vm13 = vcmp.gt.f32.partialorder %v2149_v19, 0.0  ;;  %v2213_v30 = vmul.f32 0.2, %v2149_v19 }
 0x271   : > { %vm2018_vm14 = vcmp.gt.f32.partialorder %v1986_v20, 0.0  ;;  %v2050_v57 = vmul.f32 0.2, %v1986_v20  ;;  %v1782_v24 = vadd.f32 %v1717_v25, %v1642_v0  ;;  %v7381_v25 = vld [vmem:[#allocation30_spill] sm:$0xff] }
 0x272   : > { %v2245_v54 = vsel %vm2181_vm13, %v2149_v19, %v2213_v30  ;;  %v2371_v5 = vld [vmem:[#allocation2 + $0x68] sm:$0xff]  ;;  %v2372_v7 = vld [vmem:[#allocation2 + $0x70] sm:$0x3]  ;;  %v1513_v51 = vadd.f32 %v7381_v25, %v5560_v17  ;;  %v345_v19 = vunpack.c.l.bf16 %v291_v22  ;;  %v2908_v25 = vrot.slane %v2370_v45, 2 }
 0x273   : > { %2334 = vst.msk [vmem:[#allocation2 + $0x79] sm:$0xff] %vm2269_vm5, %v2245_v54  ;;  %v2082_v37 = vsel %vm2018_vm14, %v1986_v20, %v2050_v57  ;;  %v1919_v56 = vadd.f32 %v1854_v18, %v1782_v24  ;;  %4472 = vmatmul.msk.bf16.gmra.mxu3 %vm542_vm1, %v5574_v14  ;;  %v2498_v41 = vrot.slane %v2371_v5, 1  ;;  %v2500_v46 = vrot.slane %v2372_v7, 1 }
 0x274   : > { %v2116_v11 = vmul.f32 %v5810_v12, %v2082_v37  ;;  %v6002_v30 = vpack.c.bf16 %v2371_v5, %v2370_v45  ;;  %v1667_v24 = vrot.slane %v343_v62, 1  ;;  %v1668_v54 = vrot.slane %v344_v48, 1 }
 0x275   : > { %v1953_v35 = vmul.f32 %v5775_v9, %v1919_v56  ;;  %v2499_v2 = vsel %vm411_vm2, %v2497_v21, %v2498_v41  ;;  %v2501_v0 = vsel %vm411_vm2, %v2498_v41, %v2500_v46  ;;  %v2909_v56 = vrot.slane %v2371_v5, 2 }
 0x276   : > { %7382 = vst [vmem:[#allocation20_spill] sm:$0xff] %v6002_v30  ;;  %v2150_v18 = vadd.f32 %v5821_v43, %v2116_v11  ;;  %v1579_v20 = vpop.f32.mrf.mxu2  ;;  %v1722_v14 = vpop.f32.mrf.mxu3  ;;  %v6005_v57 = vpack.c.bf16 %v2501_v0, %v2499_v2  ;;  %v1670_v41 = vrot.slane %v345_v19, 1  ;;  %v2911_v46 = vrot.slane %v2372_v7, 2 }
 0x277   : > { %v1987_v17 = vadd.f32 %v5784_v39, %v1953_v35  ;;  %v1643_v37 = vadd.f32 %v1579_v20, %v1513_v51  ;;  %v2910_v0 = vsel %vm824_vm3, %v2908_v25, %v2909_v56  ;;  %v4712_v35 = vld [vmem:[%s4794_s9 + $0xc0] sm:$0xff]   ;;  %v1805_v25 = vrot.slane %v344_v48, 2 }
 0x278   : > { %v1859_v22 = vpop.f32.mrf.mxu0  ;;  %vm2182_vm15 = vcmp.gt.f32.partialorder %v2150_v18, 0.0  ;;  %v2214_v21 = vmul.f32 0.2, %v2150_v18  ;;  %4496 = vmatmul.msk.bf16.gmra.mxu1 %vm2269_vm5, %v6005_v57  ;;  %v2912_v45 = vsel %vm824_vm3, %v2909_v56, %v2911_v46 }
 0x279   : > { %vm2019_vm0 = vcmp.gt.f32.partialorder %v1987_v17, 0.0  ;;  %v2051_v11 = vmul.f32 0.2, %v1987_v17  ;;  %v1783_v2 = vadd.f32 %v1719_v44, %v1643_v37  ;;  %v6017_v20 = vpack.c.bf16 %v2912_v45, %v2910_v0 }
 0x27a   : > { %v2246_v58 = vsel %vm2182_vm15, %v2150_v18, %v2214_v21  ;;  %v1669_v44 = vsel %vm411_vm2, %v1667_v24, %v1668_v54  ;;  %v1671_v18 = vsel %vm411_vm2, %v1668_v54, %v1670_v41  ;;  %v2373_v0 = vld [vmem:[#allocation2 + $0x78] sm:$0xff] }
 0x27b   : > { %4489 = vmatmul.msk.bf16.gmra.mxu0 %vm542_vm1, %v5565_v40  ;;  %2335 = vst.msk [vmem:[#allocation2 + $0x81] sm:$0xff] %vm2269_vm5, %v2246_v58  ;;  %v2083_v5 = vsel %vm2019_vm0, %v1987_v17, %v2051_v11  ;;  %v1920_v51 = vadd.f32 %v1856_v59, %v1783_v2  ;;  %4455 = vmatmul.msk.bf16.gmra.mxu2 %vm542_vm1, %v4712_v35  ;;  %v1804_v40 = vrot.slane %v343_v62, 2  ;;  %v1807_v59 = vrot.slane %v345_v19, 2  ;;  %v7384_v24 = vld [vmem:[#allocation32_spill] sm:$0xff] }
 0x27c   : > { %7383 = vst [vmem:[#allocation22_spill] sm:$0xff] %v6017_v20  ;;  %v2117_v7 = vmul.f32 %v5810_v12, %v2083_v5  ;;  %v1674_v2 = vpack.c.bf16 %v1671_v18, %v1669_v44  ;;  %v1515_v45 = vadd.f32 %v7384_v24, %v5583_v15  ;;  %v2502_v35 = vrot.slane %v2373_v0, 1 }
 0x27d   : > { %v1954_v37 = vmul.f32 %v5775_v9, %v1920_v51  ;;  %v1806_v41 = vsel %vm824_vm3, %v1804_v40, %v1805_v25 }
 0x27e   : > { %v2151_v56 = vadd.f32 %v5821_v43, %v2117_v7  ;;  %v1582_v58 = vpop.f32.mrf.mxu2  ;;  %v1724_v17 = vpop.f32.mrf.mxu3  ;;  %v1808_v7 = vsel %vm824_vm3, %v1805_v25, %v1807_v59 }
 0x27f   : > { %v1988_v21 = vadd.f32 %v5784_v39, %v1954_v37  ;;  %v1644_v46 = vadd.f32 %v1582_v58, %v5572_v42  ;;  %v2913_v42 = vrot.slane %v2373_v0, 2  ;;  %v1811_v59 = vpack.c.bf16 %v1808_v7, %v1806_v41 }
 0x280   : > { %v1861_v11 = vpop.f32.mrf.mxu0  ;;  %vm2183_vm6 = vcmp.gt.f32.partialorder %v2151_v56, 0.0  ;;  %v2215_v54 = vmul.f32 0.2, %v2151_v56  ;;  %v2889_v7 = vrot.slane %v5816_v60, 2 }
 0x281   : > { %vm2020_vm7 = vcmp.gt.f32.partialorder %v1988_v21, 0.0  ;;  %v2052_v62 = vmul.f32 0.2, %v1988_v21  ;;  %v1784_v48 = vadd.f32 %v1722_v14, %v1644_v46 }
 0x282   : > { %v2247_v5 = vsel %vm2183_vm6, %v2151_v56, %v2215_v54  ;;  %v2374_v51 = vld [vmem:[#allocation2 + $0x80] sm:$0xff]  ;;  %v2375_v19 = vld [vmem:[#allocation2 + $0x88] sm:$0x3] }
 0x283   : > { %2336 = vst.msk [vmem:[#allocation2 + $0x91] sm:$0xff] %vm2269_vm5, %v2247_v5  ;;  %v2084_v44 = vsel %vm2020_vm7, %v1988_v21, %v2052_v62  ;;  %v1921_v18 = vadd.f32 %v1859_v22, %v1784_v48  ;;  %4473 = vmatmul.msk.bf16.gmra.mxu3 %vm542_vm1, %v1674_v2  ;;  %v2503_v15 = vrot.slane %v2374_v51, 1  ;;  %v2505_v37 = vrot.slane %v2375_v19, 1 }
 0x284   : > { %v2118_v58 = vmul.f32 %v5810_v12, %v2084_v44  ;;  %v6033_v14 = vpack.c.bf16 %v2374_v51, %v2373_v0  ;;  %v2914_v40 = vrot.slane %v2374_v51, 2  ;;  %v2916_v56 = vrot.slane %v2375_v19, 2 }
 0x285   : > { %v1955_v46 = vmul.f32 %v5775_v9, %v1921_v18  ;;  %v2504_v24 = vsel %vm411_vm2, %v2502_v35, %v2503_v15  ;;  %v2506_v25 = vsel %vm411_vm2, %v2503_v15, %v2505_v37  ;;  %v2888_v19 = vrot.slane %v5805_v23, 2 }
 0x286   : > { %7385 = vst [vmem:[#allocation11_spill] sm:$0xff] %v6033_v14  ;;  %v2152_v21 = vadd.f32 %v5821_v43, %v2118_v58  ;;  %v1584_v22 = vpop.f32.mrf.mxu2  ;;  %v1727_v54 = vpop.f32.mrf.mxu3  ;;  %v6039_v2 = vpack.c.bf16 %v2506_v25, %v2504_v24  ;;  %v2915_v62 = vsel %vm824_vm3, %v2913_v42, %v2914_v40  ;;  %v2917_v0 = vsel %vm824_vm3, %v2914_v40, %v2916_v56 }
 0x287   : > { %v1989_v48 = vadd.f32 %v5784_v39, %v1955_v46  ;;  %v1645_v5 = vadd.f32 %v1584_v22, %v1515_v45  ;;  %v6045_v35 = vpack.c.bf16 %v2917_v0, %v2915_v62  ;;  %v2891_v44 = vrot.slane %v5854_v28, 2 }
 0x288   : > { %v1864_v51 = vpop.f32.mrf.mxu0  ;;  %vm2184_vm8 = vcmp.gt.f32.partialorder %v2152_v21, 0.0  ;;  %v2216_v41 = vmul.f32 0.2, %v2152_v21  ;;  %4497 = vmatmul.msk.bf16.gmra.mxu1 %vm2269_vm5, %v6039_v2  ;;  %v2890_v40 = vsel %vm824_vm3, %v2888_v19, %v2889_v7 }
 0x289   : > { %7386 = vst [vmem:[#allocation21_spill] sm:$0xff] %v6045_v35  ;;  %vm2021_vm9 = vcmp.gt.f32.partialorder %v1989_v48, 0.0  ;;  %v2053_v42 = vmul.f32 0.2, %v1989_v48  ;;  %v1785_v18 = vadd.f32 %v1724_v17, %v1645_v5  ;;  %v2892_v56 = vsel %vm824_vm3, %v2889_v7, %v2891_v44 }
 0x28a   : > { %v2248_v15 = vsel %vm2184_vm8, %v2152_v21, %v2216_v41  ;;  %v3000_v21 = vpack.c.bf16 %v2892_v56, %v2890_v40  ;;  %v2376_v22 = vld [vmem:[#allocation2 + $0x90] sm:$0xff] }
 0x28b   : > { %4490 = vmatmul.msk.bf16.gmra.mxu0 %vm542_vm1, %v1811_v59  ;;  %2337 = vst.msk [vmem:[#allocation2 + $0x99] sm:$0xff] %vm2269_vm5, %v2248_v15  ;;  %v2085_v45 = vsel %vm2021_vm9, %v1989_v48, %v2053_v42  ;;  %v1922_v37 = vadd.f32 %v1861_v11, %v1785_v18  ;;  %4456 = vmatmul.msk.bf16.gmra.mxu2 %vm542_vm1, %v5988_v38  ;;  %v2507_v41 = vrot.slane %v2376_v22, 1  ;;  %v2918_v7 = vrot.slane %v2376_v22, 2 }
 0x28c   : > { %v2119_v58 = vmul.f32 %v5810_v12, %v2085_v45 }
 0x28d   : > { %v1956_v28 = vmul.f32 %v5775_v9, %v1922_v37 }
 0x28e   : > { %v2153_v17 = vadd.f32 %v5821_v43, %v2119_v58  ;;  %v1587_v46 = vpop.f32.mrf.mxu2  ;;  %v1729_v24 = vpop.f32.mrf.mxu3 }
 0x28f   : > { %v1990_v25 = vadd.f32 %v5784_v39, %v1956_v28  ;;  %v1646_v59 = vadd.f32 %v1587_v46, %v5588_v32 }
 0x290   : > { %v1866_v11 = vpop.f32.mrf.mxu0  ;;  %vm2185_vm1 = vcmp.gt.f32.partialorder %v2153_v17, 0.0  ;;  %v2217_v38 = vmul.f32 0.2, %v2153_v17 }
 0x291   : > { %vm2022_vm10 = vcmp.gt.f32.partialorder %v1990_v25, 0.0  ;;  %v2054_v62 = vmul.f32 0.2, %v1990_v25  ;;  %v1786_v0 = vadd.f32 %v1727_v54, %v1646_v59  ;;  %v1517_v54 = vadd.f32 %v5577_v3, %v5597_v16 }
 0x292   : > { %v2249_v48 = vsel %vm2185_vm1, %v2153_v17, %v2217_v38  ;;  %v2377_v5 = vld [vmem:[#allocation2 + $0x98] sm:$0xff]  ;;  %v2378_v19 = vld [vmem:[#allocation2 + $0xa0] sm:$0x3]  ;;  %v2412_v16 = vpack.c.bf16 %v5816_v60, %v5805_v23 }
 0x293   : > { %2338 = vst.msk [vmem:[#allocation2 + $0xa9] sm:$0xff] %vm2269_vm5, %v2249_v48  ;;  %v2086_v44 = vsel %vm2022_vm10, %v1990_v25, %v2054_v62  ;;  %v1923_v42 = vadd.f32 %v1864_v51, %v1786_v0  ;;  %4525 = vmatmul.msk.bf16.vlgmr.msrb.gmra.mxu3 %vm2269_vm5, %v3000_v21  ;;  %v2508_v32 = vrot.slane %v2377_v5, 1  ;;  %v2510_v18 = vrot.slane %v2378_v19, 1 }
 0x294   : > { %v2120_v15 = vmul.f32 %v5810_v12, %v2086_v44  ;;  %v6065_v45 = vpack.c.bf16 %v2377_v5, %v2376_v22  ;;  %v2919_v37 = vrot.slane %v2377_v5, 2  ;;  %v2921_v58 = vrot.slane %v2378_v19, 2 }
 0x295   : > { %v1957_v40 = vmul.f32 %v5775_v9, %v1923_v42  ;;  %v2509_v56 = vsel %vm411_vm2, %v2507_v41, %v2508_v32  ;;  %v2511_v28 = vsel %vm411_vm2, %v2508_v32, %v2510_v18 }
 0x296   : > { %7387 = vst [vmem:[#allocation4_spill] sm:$0xff] %v6065_v45  ;;  %v2154_v51 = vadd.f32 %v5821_v43, %v2120_v15  ;;  %v1589_v17 = vpop.f32.mrf.mxu2  ;;  %v1732_v46 = vpop.f32.mrf.mxu3  ;;  %v6073_v25 = vpack.c.bf16 %v2511_v28, %v2509_v56  ;;  %v2920_v59 = vsel %vm824_vm3, %v2918_v7, %v2919_v37  ;;  %v2922_v21 = vsel %vm824_vm3, %v2919_v37, %v2921_v58 }
 0x297   : > { %v1991_v22 = vadd.f32 %v5784_v39, %v1957_v40  ;;  %v1647_v38 = vadd.f32 %v1589_v17, %v1517_v54  ;;  %v6080_v62 = vpack.c.bf16 %v2922_v21, %v2920_v59 }
 0x298   : > { %v1869_v3 = vpop.f32.mrf.mxu0  ;;  %vm2186_vm11 = vcmp.gt.f32.partialorder %v2154_v51, 0.0  ;;  %v2218_v0 = vmul.f32 0.2, %v2154_v51  ;;  %4498 = vmatmul.msk.bf16.gmra.mxu1 %vm2269_vm5, %v6073_v25 }
 0x299   : > { %7388 = vst [vmem:[#allocation23_spill] sm:$0xff] %v6080_v62  ;;  %vm2023_vm12 = vcmp.gt.f32.partialorder %v1991_v22, 0.0  ;;  %v2055_v48 = vmul.f32 0.2, %v1991_v22  ;;  %v1787_v5 = vadd.f32 %v1729_v24, %v1647_v38 }
 0x29a   : > { %v2250_v19 = vsel %vm2186_vm11, %v2154_v51, %v2218_v0  ;;  %v2379_v37 = vld [vmem:[#allocation2 + $0xa8] sm:$0xff] }
 0x29b   : > { %4542 = vmatmul.msk.bf16.vlgmr.msrb.gmra.mxu0 %vm2269_vm5, %v5900_v29  ;;  %2339 = vst.msk [vmem:[#allocation2 + $0xb1] sm:$0xff] %vm2269_vm5, %v2250_v19  ;;  %v2087_v41 = vsel %vm2023_vm12, %v1991_v22, %v2055_v48  ;;  %v1924_v7 = vadd.f32 %v1866_v11, %v1787_v5  ;;  %4508 = vmatmul.msk.bf16.vlgmr.msrb.gmra.mxu2 %vm2269_vm5, %v2412_v16  ;;  %v2512_v51 = vrot.slane %v2379_v37, 1  ;;  %v2923_v17 = vrot.slane %v2379_v37, 2 }
 0x29c   : > { %v2121_v23 = vmul.f32 %v5810_v12, %v2087_v41  ;;  %v1519_v48 = vadd.f32 %v5591_v52, %v5611_v33 }
 0x29d   : > { %v1958_v60 = vmul.f32 %v5775_v9, %v1924_v7 }
 0x29e   : > { %v2155_v44 = vadd.f32 %v5821_v43, %v2121_v23  ;;  %v1592_v42 = vpop.f32.mrf.mxu2  ;;  %v1734_v32 = vpop.f32.mrf.mxu3 }
 0x29f   : > { %v1992_v24 = vadd.f32 %v5784_v39, %v1958_v60  ;;  %v1648_v18 = vadd.f32 %v1592_v42, %v5602_v36 }
 0x2a0   : > { %v1871_v15 = vpop.f32.mrf.mxu0  ;;  %vm2187_vm13 = vcmp.gt.f32.partialorder %v2155_v44, 0.0  ;;  %v2219_v58 = vmul.f32 0.2, %v2155_v44 }
 0x2a1   : > { %vm2024_vm14 = vcmp.gt.f32.partialorder %v1992_v24, 0.0  ;;  %v2056_v11 = vmul.f32 0.2, %v1992_v24  ;;  %v1788_v54 = vadd.f32 %v1732_v46, %v1648_v18 }
 0x2a2   : > { %v2251_v40 = vsel %vm2187_vm13, %v2155_v44, %v2219_v58  ;;  %v2380_v56 = vld [vmem:[#allocation2 + $0xb0] sm:$0xff]  ;;  %v2381_v28 = vld [vmem:[#allocation2 + $0xb8] sm:$0x3] }
 0x2a3   : > { %2340 = vst.msk [vmem:[#allocation2 + $0xc1] sm:$0xff] %vm2269_vm5, %v2251_v40  ;;  %v2088_v59 = vsel %vm2024_vm14, %v1992_v24, %v2056_v11  ;;  %v1925_v21 = vadd.f32 %v1869_v3, %v1788_v54  ;;  %4526 = vmatmul.msk.bf16.gmra.mxu3 %vm2269_vm5, %v5912_v61  ;;  %v2513_v36 = vrot.slane %v2380_v56, 1  ;;  %v2515_v22 = vrot.slane %v2381_v28, 1  ;;  %v6116_v40 = vpop.f32.mrf.mxu1 }
 0x2a4   : > { %v2122_v38 = vmul.f32 %v5810_v12, %v2088_v59  ;;  %v6097_v16 = vpack.c.bf16 %v2380_v56, %v2379_v37  ;;  %v2924_v0 = vrot.slane %v2380_v56, 2  ;;  %v2926_v46 = vrot.slane %v2381_v28, 2 }
 0x2a5   : > { %v1959_v5 = vmul.f32 %v5775_v9, %v1925_v21  ;;  %v2514_v19 = vsel %vm411_vm2, %v2512_v51, %v2513_v36  ;;  %v2516_v3 = vsel %vm411_vm2, %v2513_v36, %v2515_v22 }
 0x2a6   : > { %7389 = vst [vmem:[#allocation24_spill] sm:$0xff] %v6097_v16  ;;  %v2156_v41 = vadd.f32 %v5821_v43, %v2122_v38  ;;  %v1594_v7 = vpop.f32.mrf.mxu2  ;;  %v1737_v23 = vpop.f32.mrf.mxu3  ;;  %v6105_v60 = vpack.c.bf16 %v2516_v3, %v2514_v19  ;;  %v2925_v44 = vsel %vm824_vm3, %v2923_v17, %v2924_v0  ;;  %v2927_v42 = vsel %vm824_vm3, %v2924_v0, %v2926_v46 }
 0x2a7   : > { %v1993_v24 = vadd.f32 %v5784_v39, %v1959_v5  ;;  %v1649_v18 = vadd.f32 %v1594_v7, %v1519_v48  ;;  %v6110_v33 = vpack.c.bf16 %v2927_v42, %v2925_v44  ;;  %v6134_v7 = vld [vmem:[%s7161_s2 + $0x2] ss:$0 sm:$0xff] }
 0x2a8   : > { %v1874_v52 = vpop.f32.mrf.mxu0  ;;  %vm2188_vm15 = vcmp.gt.f32.partialorder %v2156_v41, 0.0  ;;  %v2220_v37 = vmul.f32 0.2, %v2156_v41  ;;  %4499 = vmatmul.msk.bf16.gmra.mxu1 %vm2269_vm5, %v6105_v60 }
 0x2a9   : > { %7390 = vst [vmem:[#allocation5_spill] sm:$0xff] %v6110_v33  ;;  %vm2025_vm0 = vcmp.gt.f32.partialorder %v1993_v24, 0.0  ;;  %v2057_v58 = vmul.f32 0.2, %v1993_v24  ;;  %v1789_v11 = vadd.f32 %v1734_v32, %v1649_v18  ;;  %v1521_v18 = vadd.f32 %v5605_v10, %v5625_v53 }
 0x2aa   : > { %v2252_v54 = vsel %vm2188_vm15, %v2156_v41, %v2220_v37  ;;  %v2382_v0 = vld [vmem:[#allocation2 + $0xc0] sm:$0xff] }
 0x2ab   : > { %4543 = vmatmul.msk.bf16.gmra.mxu0 %vm2269_vm5, %v5930_v55  ;;  %2341 = vst.msk [vmem:[#allocation2 + $0xc9] sm:$0xff] %vm2269_vm5, %v2252_v54  ;;  %v2089_v56 = vsel %vm2025_vm0, %v1993_v24, %v2057_v58  ;;  %v1926_v28 = vadd.f32 %v1871_v15, %v1789_v11  ;;  %4509 = vmatmul.msk.bf16.gmra.mxu2 %vm2269_vm5, %v5900_v29  ;;  %v2517_v19 = vrot.slane %v2382_v0, 1  ;;  %v6152_v54 = vld [vmem:[%s7161_s2 + $0x3] ss:$0 sm:$0xff] }
 0x2ac   : > { %v2123_v51 = vmul.f32 %v5810_v12, %v2089_v56 }
 0x2ad   : > { %v1960_v17 = vmul.f32 %v5775_v9, %v1926_v28  ;;  %v2928_v9 = vrot.slane %v2382_v0, 2 }
 0x2ae   : > { %v2157_v59 = vadd.f32 %v5821_v43, %v2123_v51  ;;  %v1597_v32 = vpop.f32.mrf.mxu2  ;;  %v1739_v21 = vpop.f32.mrf.mxu3 }
 0x2af   : > { %v1994_v36 = vadd.f32 %v5784_v39, %v1960_v17  ;;  %v1650_v22 = vadd.f32 %v1597_v32, %v5616_v47  ;;  %v6127_v3 = vpop.f32.mrf.mxu1 }
 0x2b0   : > { %v1876_v38 = vpop.f32.mrf.mxu0  ;;  %vm2189_vm6 = vcmp.gt.f32.partialorder %v2157_v59, 0.0  ;;  %v2221_v46 = vmul.f32 0.2, %v2157_v59 }
 0x2b1   : > { %vm2026_vm7 = vcmp.gt.f32.partialorder %v1994_v36, 0.0  ;;  %v2058_v15 = vmul.f32 0.2, %v1994_v36  ;;  %v1790_v48 = vadd.f32 %v1737_v23, %v1650_v22 }
 0x2b2   : > { %v2253_v29 = vsel %vm2189_vm6, %v2157_v59, %v2221_v46  ;;  %v2383_v5 = vld [vmem:[#allocation2 + $0xc8] sm:$0xff]  ;;  %v2384_v12 = vld [vmem:[#allocation2 + $0xd0] sm:$0x3]  ;;  %v6162_v59 = vld [vmem:[%s7161_s2 + $0x1] ss:$0 sm:$0xff] }
 0x2b3   : > { %2342 = vst.msk [vmem:[#allocation2 + $0xd9] sm:$0xff] %vm2269_vm5, %v2253_v29  ;;  %v2090_v43 = vsel %vm2026_vm7, %v1994_v36, %v2058_v15  ;;  %v1927_v39 = vadd.f32 %v1874_v52, %v1790_v48  ;;  %4527 = vmatmul.msk.bf16.gmra.mxu3 %vm2269_vm5, %v5942_v63  ;;  %v2518_v47 = vrot.slane %v2383_v5, 1  ;;  %v2520_v41 = vrot.slane %v2384_v12, 1  ;;  %v6144_v52 = vld [vmem:[%s7161_s2] ss:$0 sm:$0xff] }
 0x2b4   : > { %v2124_v23 = vmul.f32 %v6134_v7, %v2090_v43  ;;  %v6137_v44 = vpack.c.bf16 %v2383_v5, %v2382_v0  ;;  %v2929_v42 = vrot.slane %v2383_v5, 2  ;;  %v2931_v24 = vrot.slane %v2384_v12, 2 }
 0x2b5   : > { %v1961_v37 = vmul.f32 %v6144_v52, %v1927_v39  ;;  %v2519_v58 = vsel %vm411_vm2, %v2517_v19, %v2518_v47  ;;  %v2521_v11 = vsel %vm411_vm2, %v2518_v47, %v2520_v41 }
 0x2b6   : > { %v2158_v56 = vadd.f32 %v6152_v54, %v2124_v23  ;;  %v1599_v28 = vpop.f32.mrf.mxu2  ;;  %v1742_v10 = vpop.f32.mrf.mxu3  ;;  %v6155_v53 = vpack.c.bf16 %v2521_v11, %v2519_v58  ;;  %v2930_v51 = vsel %vm824_vm3, %v2928_v9, %v2929_v42  ;;  %v2932_v17 = vsel %vm824_vm3, %v2929_v42, %v2931_v24 }
 0x2b7   : > { %v1995_v32 = vadd.f32 %v6162_v59, %v1961_v37  ;;  %v1651_v36 = vadd.f32 %v1599_v28, %v1521_v18  ;;  %v6165_v0 = vpack.c.bf16 %v2932_v17, %v2930_v51  ;;  %v6175_v9 = vpop.f32.mrf.mxu1 }
 0x2b8   : > { %v1879_v22 = vpop.f32.mrf.mxu0  ;;  %vm2190_vm8 = vcmp.gt.f32.partialorder %v2158_v56, 0.0  ;;  %v2222_v46 = vmul.f32 0.2, %v2158_v56  ;;  %4500 = vmatmul.msk.bf16.gmra.mxu1 %vm2269_vm5, %v6155_v53 }
 0x2b9   : > { %7391 = vst [vmem:[#allocation25_spill] sm:$0xff] %v6165_v0  ;;  %vm2027_vm9 = vcmp.gt.f32.partialorder %v1995_v32, 0.0  ;;  %v2059_v15 = vmul.f32 0.2, %v1995_v32  ;;  %v1791_v48 = vadd.f32 %v1739_v21, %v1651_v36 }
 0x2ba   : > { %v2254_v29 = vsel %vm2190_vm8, %v2158_v56, %v2222_v46  ;;  %v2385_v24 = vld [vmem:[#allocation2 + $0xd8] sm:$0xff] }
 0x2bb   : > { %4544 = vmatmul.msk.bf16.gmra.mxu0 %vm2269_vm5, %v5965_v6  ;;  %2343 = vst.msk [vmem:[#allocation2 + $0xe1] sm:$0xff] %vm2269_vm5, %v2254_v29  ;;  %v2091_v5 = vsel %vm2027_vm9, %v1995_v32, %v2059_v15  ;;  %v1928_v12 = vadd.f32 %v1876_v38, %v1791_v48  ;;  %4510 = vmatmul.msk.bf16.gmra.mxu2 %vm2269_vm5, %v5930_v55  ;;  %v2522_v28 = vrot.slane %v2385_v24, 1  ;;  %v2933_v51 = vrot.slane %v2385_v24, 2 }
 0x2bc   : > { %v2125_v19 = vmul.f32 %v6134_v7, %v2091_v5  ;;  %v1523_v29 = vadd.f32 %v5619_v31, %v5637_v27 }
 0x2bd   : > { %v1962_v43 = vmul.f32 %v6144_v52, %v1928_v12 }
 0x2be   : > { %v2159_v39 = vadd.f32 %v6152_v54, %v2125_v19  ;;  %v1602_v21 = vpop.f32.mrf.mxu2  ;;  %v1744_v47 = vpop.f32.mrf.mxu3 }
 0x2bf   : > { %v1996_v41 = vadd.f32 %v6162_v59, %v1962_v43  ;;  %v1652_v23 = vadd.f32 %v1602_v21, %v5630_v1 }
 0x2c0   : > { %v1881_v42 = vpop.f32.mrf.mxu0  ;;  %vm2191_vm1 = vcmp.gt.f32.partialorder %v2159_v39, 0.0  ;;  %v2223_v38 = vmul.f32 0.2, %v2159_v39 }
 0x2c1   : > { %vm2028_vm10 = vcmp.gt.f32.partialorder %v1996_v41, 0.0  ;;  %v2060_v18 = vmul.f32 0.2, %v1996_v41  ;;  %v1792_v37 = vadd.f32 %v1742_v10, %v1652_v23 }
 0x2c2   : > { %v2255_v58 = vsel %vm2191_vm1, %v2159_v39, %v2223_v38  ;;  %v2386_v11 = vld [vmem:[#allocation2 + $0xe0] sm:$0xff]  ;;  %v2387_v56 = vld [vmem:[#allocation2 + $0xe8] sm:$0x3] }
 0x2c3   : > { %2344 = vst.msk [vmem:[#allocation2 + $0xf1] sm:$0xff] %vm2269_vm5, %v2255_v58  ;;  %v2092_v17 = vsel %vm2028_vm10, %v1996_v41, %v2060_v18  ;;  %v1929_v32 = vadd.f32 %v1879_v22, %v1792_v37  ;;  %4528 = vmatmul.msk.bf16.gmra.mxu3 %vm2269_vm5, %v5981_v4  ;;  %v2523_v1 = vrot.slane %v2386_v11, 1  ;;  %v2525_v36 = vrot.slane %v2387_v56, 1 }
 0x2c4   : > { %v2126_v46 = vmul.f32 %v6134_v7, %v2092_v17  ;;  %v6185_v15 = vpack.c.bf16 %v2386_v11, %v2385_v24  ;;  %v2934_v48 = vrot.slane %v2386_v11, 2  ;;  %v2936_v10 = vrot.slane %v2387_v56, 2 }
 0x2c5   : > { %v1963_v5 = vmul.f32 %v6144_v52, %v1929_v32  ;;  %v6190_v12 = vpop.f32.mrf.mxu1  ;;  %v2524_v22 = vsel %vm411_vm2, %v2522_v28, %v2523_v1  ;;  %v2526_v19 = vsel %vm411_vm2, %v2523_v1, %v2525_v36 }
 0x2c6   : > { %v2160_v43 = vadd.f32 %v6152_v54, %v2126_v46  ;;  %v1604_v39 = vpop.f32.mrf.mxu2  ;;  %v1747_v21 = vpop.f32.mrf.mxu3  ;;  %v6195_v41 = vpack.c.bf16 %v2526_v19, %v2524_v22  ;;  %v2935_v23 = vsel %vm824_vm3, %v2933_v51, %v2934_v48  ;;  %v2937_v24 = vsel %vm824_vm3, %v2934_v48, %v2936_v10 }
 0x2c7   : > { %v1997_v31 = vadd.f32 %v6162_v59, %v1963_v5  ;;  %v1653_v27 = vadd.f32 %v1604_v39, %v1523_v29  ;;  %v6200_v18 = vpack.c.bf16 %v2937_v24, %v2935_v23 }
 0x2c8   : > { %7392 = vst [vmem:[#allocation3_spill] sm:$0xff] %v6195_v41  ;;  %v1884_v38 = vpop.f32.mrf.mxu0  ;;  %vm2192_vm11 = vcmp.gt.f32.partialorder %v2160_v43, 0.0  ;;  %v2224_v37 = vmul.f32 0.2, %v2160_v43  ;;  %4501 = vmatmul.msk.bf16.gmra.mxu1 %vm2269_vm5, %v6195_v41 }
 0x2c9   : > { %7393 = vst [vmem:[#allocation26_spill] sm:$0xff] %v6200_v18  ;;  %vm2029_vm12 = vcmp.gt.f32.partialorder %v1997_v31, 0.0  ;;  %v2061_v58 = vmul.f32 0.2, %v1997_v31  ;;  %v1793_v11 = vadd.f32 %v1744_v47, %v1653_v27 }
 0x2ca   : > { %v2256_v56 = vsel %vm2192_vm11, %v2160_v43, %v2224_v37  ;;  %v2388_v5 = vld [vmem:[#allocation2 + $0xf0] sm:$0xff] }
 0x2cb   : > { %4545 = vmatmul.msk.bf16.gmra.mxu0 %vm2269_vm5, %v6002_v30  ;;  %2345 = vst.msk [vmem:[#allocation2 + $0xf9] sm:$0xff] %vm2269_vm5, %v2256_v56  ;;  %v2093_v28 = vsel %vm2029_vm12, %v1997_v31, %v2061_v58  ;;  %v1930_v51 = vadd.f32 %v1881_v42, %v1793_v11  ;;  %4511 = vmatmul.msk.bf16.gmra.mxu2 %vm2269_vm5, %v5965_v6  ;;  %v2527_v24 = vrot.slane %v2388_v5, 1  ;;  %v2938_v31 = vrot.slane %v2388_v5, 2 }
 0x2cc   : > { %v2127_v17 = vmul.f32 %v6134_v7, %v2093_v28 }
 0x2cd   : > { %v1964_v32 = vmul.f32 %v6144_v52, %v1930_v51  ;;  %v6211_v1 = vpop.f32.mrf.mxu1  ;;  %v7394_v51 = vld [vmem:[#allocation13_spill] sm:$0xff] }
 0x2ce   : > { %v2161_v36 = vadd.f32 %v6152_v54, %v2127_v17  ;;  %v1607_v47 = vpop.f32.mrf.mxu2  ;;  %v1749_v46 = vpop.f32.mrf.mxu3  ;;  %v7395_v17 = vld [vmem:[#allocation6_spill] sm:$0xff] }
 0x2cf   : > { %v1998_v48 = vadd.f32 %v6162_v59, %v1964_v32  ;;  %v1654_v10 = vadd.f32 %v1607_v47, %v5644_v49  ;;  %v1525_v32 = vadd.f32 %v7395_v17, %v7394_v51 }
 0x2d0   : > { %v1886_v29 = vpop.f32.mrf.mxu0  ;;  %vm2193_vm13 = vcmp.gt.f32.partialorder %v2161_v36, 0.0  ;;  %v2225_v42 = vmul.f32 0.2, %v2161_v36 }
 0x2d1   : > { %vm2030_vm14 = vcmp.gt.f32.partialorder %v1998_v48, 0.0  ;;  %v2062_v22 = vmul.f32 0.2, %v1998_v48  ;;  %v1794_v19 = vadd.f32 %v1747_v21, %v1654_v10 }
 0x2d2   : > { %v2257_v43 = vsel %vm2193_vm13, %v2161_v36, %v2225_v42  ;;  %v2389_v39 = vld [vmem:[#allocation2 + $0xf8] sm:$0xff]  ;;  %v2390_v23 = vld [vmem:[#allocation2 + $0x100] sm:$0x3] }
 0x2d3   : > { %2346 = vst.msk [vmem:[#allocation2 + $0x109] sm:$0xff] %vm2269_vm5, %v2257_v43  ;;  %v2094_v27 = vsel %vm2030_vm14, %v1998_v48, %v2062_v22  ;;  %v1931_v37 = vadd.f32 %v1884_v38, %v1794_v19  ;;  %4529 = vmatmul.msk.bf16.gmra.mxu3 %vm2269_vm5, %v6017_v20  ;;  %v2528_v49 = vrot.slane %v2389_v39, 1  ;;  %v2530_v58 = vrot.slane %v2390_v23, 1 }
 0x2d4   : > { %v2128_v11 = vmul.f32 %v6134_v7, %v2094_v27  ;;  %v6220_v56 = vpack.c.bf16 %v2389_v39, %v2388_v5  ;;  %v2939_v28 = vrot.slane %v2389_v39, 2  ;;  %v2941_v21 = vrot.slane %v2390_v23, 2 }
 0x2d5   : > { %v1965_v36 = vmul.f32 %v6144_v52, %v1931_v37  ;;  %v6225_v47 = vpop.f32.mrf.mxu1  ;;  %v2529_v38 = vsel %vm411_vm2, %v2527_v24, %v2528_v49  ;;  %v2531_v48 = vsel %vm411_vm2, %v2528_v49, %v2530_v58 }
 0x2d6   : > { %v2162_v10 = vadd.f32 %v6152_v54, %v2128_v11  ;;  %v1609_v42 = vpop.f32.mrf.mxu2  ;;  %v1752_v22 = vpop.f32.mrf.mxu3  ;;  %v6230_v19 = vpack.c.bf16 %v2531_v48, %v2529_v38  ;;  %v2940_v5 = vsel %vm824_vm3, %v2938_v31, %v2939_v28  ;;  %v2942_v43 = vsel %vm824_vm3, %v2939_v28, %v2941_v21 }
 0x2d7   : > { %v1999_v39 = vadd.f32 %v6162_v59, %v1965_v36  ;;  %v1655_v23 = vadd.f32 %v1609_v42, %v1525_v32  ;;  %v6235_v37 = vpack.c.bf16 %v2942_v43, %v2940_v5 }
 0x2d8   : > { %7396 = vst [vmem:[#allocation27_spill] sm:$0xff] %v6230_v19  ;;  %v1889_v27 = vpop.f32.mrf.mxu0  ;;  %vm2194_vm15 = vcmp.gt.f32.partialorder %v2162_v10, 0.0  ;;  %v2226_v24 = vmul.f32 0.2, %v2162_v10  ;;  %4502 = vmatmul.msk.bf16.gmra.mxu1 %vm2269_vm5, %v6230_v19 }
 0x2d9   : > { %7397 = vst [vmem:[#allocation28_spill] sm:$0xff] %v6235_v37  ;;  %vm2031_vm0 = vcmp.gt.f32.partialorder %v1999_v39, 0.0  ;;  %v2063_v49 = vmul.f32 0.2, %v1999_v39  ;;  %v1795_v58 = vadd.f32 %v1749_v46, %v1655_v23 }
 0x2da   : > { %v2258_v11 = vsel %vm2194_vm15, %v2162_v10, %v2226_v24  ;;  %v2391_v42 = vld [vmem:[#allocation2 + $0x108] sm:$0xff] }
 0x2db   : > { %4546 = vmatmul.msk.bf16.gmra.mxu0 %vm2269_vm5, %v6033_v14  ;;  %2347 = vst.msk [vmem:[#allocation2 + $0x111] sm:$0xff] %vm2269_vm5, %v2258_v11  ;;  %v2095_v31 = vsel %vm2031_vm0, %v1999_v39, %v2063_v49  ;;  %v1932_v28 = vadd.f32 %v1886_v29, %v1795_v58  ;;  %4512 = vmatmul.msk.bf16.gmra.mxu2 %vm2269_vm5, %v6002_v30  ;;  %v2532_v49 = vrot.slane %v2391_v42, 1  ;;  %v2943_v58 = vrot.slane %v2391_v42, 2 }
 0x2dc   : > { %v2129_v21 = vmul.f32 %v6134_v7, %v2095_v31 }
 0x2dd   : > { %v1966_v51 = vmul.f32 %v6144_v52, %v1932_v28  ;;  %v6246_v17 = vpop.f32.mrf.mxu1 }
 0x2de   : > { %v2163_v32 = vadd.f32 %v6152_v54, %v2129_v21  ;;  %v1612_v46 = vpop.f32.mrf.mxu2  ;;  %v1754_v36 = vpop.f32.mrf.mxu3 }
 0x2df   : > { %v2000_v38 = vadd.f32 %v6162_v59, %v1966_v51  ;;  %v1656_v48 = vadd.f32 %v1612_v46, %v5658_v26 }
 0x2e0   : > { %v1891_v10 = vpop.f32.mrf.mxu0  ;;  %vm2195_vm6 = vcmp.gt.f32.partialorder %v2163_v32, 0.0  ;;  %v2227_v29 = vmul.f32 0.2, %v2163_v32 }
 0x2e1   : > { %vm2032_vm7 = vcmp.gt.f32.partialorder %v2000_v38, 0.0  ;;  %v2064_v5 = vmul.f32 0.2, %v2000_v38  ;;  %v1796_v43 = vadd.f32 %v1752_v22, %v1656_v48 }
 0x2e2   : > { %v2259_v39 = vsel %vm2195_vm6, %v2163_v32, %v2227_v29  ;;  %v2392_v23 = vld [vmem:[#allocation2 + $0x110] sm:$0xff]  ;;  %v2393_v24 = vld [vmem:[#allocation2 + $0x118] sm:$0x3]  ;;  %v7398_v32 = vld [vmem:[#allocation14_spill] sm:$0xff] }
 0x2e3   : > { %2348 = vst.msk [vmem:[#allocation2 + $0x121] sm:$0xff] %vm2269_vm5, %v2259_v39  ;;  %v2096_v11 = vsel %vm2032_vm7, %v2000_v38, %v2064_v5  ;;  %v1933_v31 = vadd.f32 %v1889_v27, %v1796_v43  ;;  %4530 = vmatmul.msk.bf16.gmra.mxu3 %vm2269_vm5, %v6045_v35  ;;  %v2533_v26 = vrot.slane %v2392_v23, 1  ;;  %v2535_v28 = vrot.slane %v2393_v24, 1 }
 0x2e4   : > { %v2130_v21 = vmul.f32 %v6134_v7, %v2096_v11  ;;  %v6255_v51 = vpack.c.bf16 %v2392_v23, %v2391_v42  ;;  %v2944_v46 = vrot.slane %v2392_v23, 2  ;;  %v2946_v22 = vrot.slane %v2393_v24, 2 }
 0x2e5   : > { %v1527_v48 = vadd.f32 %v7398_v32, %v5665_v13  ;;  %v1967_v29 = vmul.f32 %v6144_v52, %v1933_v31  ;;  %v6260_v20 = vpop.f32.mrf.mxu1  ;;  %v2534_v27 = vsel %vm411_vm2, %v2532_v49, %v2533_v26  ;;  %v2536_v38 = vsel %vm411_vm2, %v2533_v26, %v2535_v28 }
 0x2e6   : > { %v2164_v5 = vadd.f32 %v6152_v54, %v2130_v21  ;;  %v1614_v43 = vpop.f32.mrf.mxu2  ;;  %v1757_v39 = vpop.f32.mrf.mxu3  ;;  %v6265_v11 = vpack.c.bf16 %v2536_v38, %v2534_v27  ;;  %v2945_v42 = vsel %vm824_vm3, %v2943_v58, %v2944_v46  ;;  %v2947_v23 = vsel %vm824_vm3, %v2944_v46, %v2946_v22 }
 0x2e7   : > { %v2001_v13 = vadd.f32 %v6162_v59, %v1967_v29  ;;  %v1657_v24 = vadd.f32 %v1614_v43, %v1527_v48  ;;  %v6270_v32 = vpack.c.bf16 %v2947_v23, %v2945_v42 }
 0x2e8   : > { %7399 = vst [vmem:[#allocation29_spill] sm:$0xff] %v6265_v11  ;;  %v1894_v31 = vpop.f32.mrf.mxu0  ;;  %vm2196_vm8 = vcmp.gt.f32.partialorder %v2164_v5, 0.0  ;;  %v2228_v49 = vmul.f32 0.2, %v2164_v5  ;;  %4503 = vmatmul.msk.bf16.gmra.mxu1 %vm2269_vm5, %v6265_v11 }
 0x2e9   : > { %vm2033_vm9 = vcmp.gt.f32.partialorder %v2001_v13, 0.0  ;;  %v2065_v26 = vmul.f32 0.2, %v2001_v13  ;;  %v1797_v28 = vadd.f32 %v1754_v36, %v1657_v24 }
 0x2ea   : > { %v2260_v21 = vsel %vm2196_vm8, %v2164_v5, %v2228_v49  ;;  %v2394_v23 = vld [vmem:[#allocation2 + $0x120] sm:$0xff] }
 0x2eb   : > { %4547 = vmatmul.msk.bf16.gmra.mxu0 %vm2269_vm5, %v6065_v45  ;;  %2349 = vst.msk [vmem:[#allocation2 + $0x129] sm:$0xff] %vm2269_vm5, %v2260_v21  ;;  %v2097_v58 = vsel %vm2033_vm9, %v2001_v13, %v2065_v26  ;;  %v1934_v46 = vadd.f32 %v1891_v10, %v1797_v28  ;;  %4513 = vmatmul.msk.bf16.gmra.mxu2 %vm2269_vm5, %v6033_v14  ;;  %v2537_v21 = vrot.slane %v2394_v23, 1 }
 0x2ec   : > { %v2131_v22 = vmul.f32 %v6134_v7, %v2097_v58  ;;  %v2948_v58 = vrot.slane %v2394_v23, 2 }
 0x2ed   : > { %v1968_v48 = vmul.f32 %v6144_v52, %v1934_v46  ;;  %v6281_v29 = vpop.f32.mrf.mxu1 }
 0x2ee   : > { %v2165_v27 = vadd.f32 %v6152_v54, %v2131_v22  ;;  %v1617_v36 = vpop.f32.mrf.mxu2  ;;  %v1759_v38 = vpop.f32.mrf.mxu3 }
 0x2ef   : > { %v2002_v5 = vadd.f32 %v6162_v59, %v1968_v48  ;;  %v1658_v43 = vadd.f32 %v1617_v36, %v5672_v50 }
 0x2f0   : > { %v1896_v42 = vpop.f32.mrf.mxu0  ;;  %vm2197_vm1 = vcmp.gt.f32.partialorder %v2165_v27, 0.0  ;;  %v2229_v10 = vmul.f32 0.2, %v2165_v27 }
 0x2f1   : > { %vm2034_vm10 = vcmp.gt.f32.partialorder %v2002_v5, 0.0  ;;  %v2066_v13 = vmul.f32 0.2, %v2002_v5  ;;  %v1798_v24 = vadd.f32 %v1757_v39, %v1658_v43  ;;  %v7401_v43 = vld [vmem:[#allocation8_spill] sm:$0xff] }
 0x2f2   : > { %v2261_v49 = vsel %vm2197_vm1, %v2165_v27, %v2229_v10  ;;  %v2395_v26 = vld [vmem:[#allocation2 + $0x128] sm:$0xff]  ;;  %v2396_v28 = vld [vmem:[#allocation2 + $0x130] sm:$0x3] }
 0x2f3   : > { %2350 = vst.msk [vmem:[#allocation2 + $0x139] sm:$0xff] %vm2269_vm5, %v2261_v49  ;;  %v2098_v46 = vsel %vm2034_vm10, %v2002_v5, %v2066_v13  ;;  %v1935_v22 = vadd.f32 %v1894_v31, %v1798_v24  ;;  %4531 = vmatmul.msk.bf16.gmra.mxu3 %vm2269_vm5, %v6080_v62  ;;  %v2538_v50 = vrot.slane %v2395_v26, 1  ;;  %v2540_v48 = vrot.slane %v2396_v28, 1  ;;  %v7400_v27 = vld [vmem:[#allocation15_spill] sm:$0xff] }
 0x2f4   : > { %v2132_v36 = vmul.f32 %v6134_v7, %v2098_v46  ;;  %v6290_v35 = vpack.c.bf16 %v2395_v26, %v2394_v23  ;;  %v2949_v11 = vrot.slane %v2395_v26, 2  ;;  %v2951_v39 = vrot.slane %v2396_v28, 2 }
 0x2f5   : > { %v1529_v10 = vadd.f32 %v7401_v43, %v7400_v27  ;;  %v1969_v19 = vmul.f32 %v6144_v52, %v1935_v22  ;;  %v6295_v14 = vpop.f32.mrf.mxu1  ;;  %v2539_v31 = vsel %vm411_vm2, %v2537_v21, %v2538_v50  ;;  %v2541_v5 = vsel %vm411_vm2, %v2538_v50, %v2540_v48 }
 0x2f6   : > { %v2166_v13 = vadd.f32 %v6152_v54, %v2132_v36  ;;  %v1619_v24 = vpop.f32.mrf.mxu2  ;;  %v1762_v49 = vpop.f32.mrf.mxu3  ;;  %v6300_v46 = vpack.c.bf16 %v2541_v5, %v2539_v31  ;;  %v2950_v23 = vsel %vm824_vm3, %v2948_v58, %v2949_v11  ;;  %v2952_v26 = vsel %vm824_vm3, %v2949_v11, %v2951_v39 }
 0x2f7   : > { %v2003_v28 = vadd.f32 %v6162_v59, %v1969_v19  ;;  %v1659_v27 = vadd.f32 %v1619_v24, %v1529_v10  ;;  %v6305_v43 = vpack.c.bf16 %v2952_v26, %v2950_v23  ;;  %v7404_v24 = vld [vmem:[#allocation7_spill] sm:$0xff] }
 0x2f8   : > { %7402 = vst [vmem:[#allocation10_spill] sm:$0xff] %v6300_v46  ;;  %v1899_v22 = vpop.f32.mrf.mxu0  ;;  %vm2198_vm11 = vcmp.gt.f32.partialorder %v2166_v13, 0.0  ;;  %v2230_v21 = vmul.f32 0.2, %v2166_v13  ;;  %4504 = vmatmul.msk.bf16.gmra.mxu1 %vm2269_vm5, %v6300_v46 }
 0x2f9   : > { %7403 = vst [vmem:[#allocation31_spill] sm:$0xff] %v6305_v43  ;;  %vm2035_vm12 = vcmp.gt.f32.partialorder %v2003_v28, 0.0  ;;  %v2067_v50 = vmul.f32 0.2, %v2003_v28  ;;  %v1799_v48 = vadd.f32 %v1759_v38, %v1659_v27 }
 0x2fa   : > { %v2262_v36 = vsel %vm2198_vm11, %v2166_v13, %v2230_v21  ;;  %vm4069_vm11 = vcmask 130048  }
 0x2fb   : > { %4548 = vmatmul.msk.bf16.gmra.mxu0 %vm2269_vm5, %v6097_v16  ;;  %2351 = vst.msk [vmem:[#allocation2 + $0x141] sm:$0xff] %vm2269_vm5, %v2262_v36  ;;  %v2099_v11 = vsel %vm2035_vm12, %v2003_v28, %v2067_v50  ;;  %v1936_v19 = vadd.f32 %v1896_v42, %v1799_v48  ;;  %4514 = vmatmul.msk.bf16.gmra.mxu2 %vm2269_vm5, %v6065_v45  ;;  %v2397_v28 = vld [vmem:[#allocation2 + $0x138] sm:$0xff] }
 0x2fc   : > { %v2133_v58 = vmul.f32 %v6134_v7, %v2099_v11  ;;  %v2542_v11 = vrot.slane %v2397_v28, 1 }
 0x2fd   : > { %v1970_v39 = vmul.f32 %v6144_v52, %v1936_v19  ;;  %v6316_v10 = vpop.f32.mrf.mxu1  ;;  %v2953_v19 = vrot.slane %v2397_v28, 2 }
 0x2fe   : > { %v2167_v31 = vadd.f32 %v6152_v54, %v2133_v58  ;;  %v1622_v38 = vpop.f32.mrf.mxu2  ;;  %v1764_v5 = vpop.f32.mrf.mxu3 }
 0x2ff   : > { %v2004_v13 = vadd.f32 %v6162_v59, %v1970_v39  ;;  %v1660_v23 = vadd.f32 %v1622_v38, %v7404_v24 }
 0x300   : > { %v1901_v26 = vpop.f32.mrf.mxu0  ;;  %vm2199_vm13 = vcmp.gt.f32.partialorder %v2167_v31, 0.0  ;;  %v2231_v42 = vmul.f32 0.2, %v2167_v31 }
 0x301   : > { %vm2036_vm14 = vcmp.gt.f32.partialorder %v2004_v13, 0.0  ;;  %v2068_v27 = vmul.f32 0.2, %v2004_v13  ;;  %v1800_v21 = vadd.f32 %v1762_v49, %v1660_v23  ;;  %v7406_v23 = vld [vmem:[#allocation16_spill] sm:$0xff] }
 0x302   : > { %v2263_v50 = vsel %vm2199_vm13, %v2167_v31, %v2231_v42  ;;  %v2398_v48 = vld [vmem:[#allocation2 + $0x140] sm:$0xff]  ;;  %v2399_v36 = vld [vmem:[#allocation2 + $0x148] sm:$0x3] }
 0x303   : > { %2352 = vst.msk [vmem:[#allocation2 + $0x151] sm:$0xff] %vm2269_vm5, %v2263_v50  ;;  %v2100_v58 = vsel %vm2036_vm14, %v2004_v13, %v2068_v27  ;;  %v1937_v62 = vadd.f32 %v1899_v22, %v1800_v21  ;;  %4532 = vmatmul.msk.bf16.gmra.mxu3 %vm2269_vm5, %v6110_v33  ;;  %v2543_v39 = vrot.slane %v2398_v48, 1  ;;  %v2545_v38 = vrot.slane %v2399_v36, 1  ;;  %v7405_v31 = vld [vmem:[#allocation9_spill] sm:$0xff] }
 0x304   : > { %v2134_v24 = vmul.f32 %v6134_v7, %v2100_v58  ;;  %v6325_v46 = vpack.c.bf16 %v2398_v48, %v2397_v28  ;;  %v2954_v45 = vrot.slane %v2398_v48, 2  ;;  %v2956_v49 = vrot.slane %v2399_v36, 2 }
 0x305   : > { %v1531_v42 = vadd.f32 %v7406_v23, %v7405_v31  ;;  %v1971_v4 = vmul.f32 %v6144_v52, %v1937_v62  ;;  %v6330_v41 = vpop.f32.mrf.mxu1  ;;  %v2544_v22 = vsel %vm411_vm2, %v2542_v11, %v2543_v39  ;;  %v2546_v13 = vsel %vm411_vm2, %v2543_v39, %v2545_v38 }
 0x306   : > { %v2168_v27 = vadd.f32 %v6152_v54, %v2134_v24  ;;  %v1624_v21 = vpop.f32.mrf.mxu2  ;;  %v1767_v50 = vpop.f32.mrf.mxu3  ;;  %v6335_v58 = vpack.c.bf16 %v2546_v13, %v2544_v22  ;;  %v2955_v28 = vsel %vm824_vm3, %v2953_v19, %v2954_v45  ;;  %v2957_v48 = vsel %vm824_vm3, %v2954_v45, %v2956_v49  ;;  %v4575_v19 = vld [vmem:[%s7162_s3 + $0x14] sm:$0xf] }
 0x307   : > { %v2005_v36 = vadd.f32 %v6162_v59, %v1971_v4  ;;  %v1661_v31 = vadd.f32 %v1624_v21, %v1531_v42  ;;  %v6340_v23 = vpack.c.bf16 %v2957_v48, %v2955_v28  ;;  %v3474_v42 = vsel %vm2655_vm4, %v4575_v19, 0  ;;  %v7409_v28 = vld [vmem:[#allocation17_spill] sm:$0xff] }
 0x308   : > { %7407 = vst [vmem:[#allocation30_spill] sm:$0xff] %v6335_v58  ;;  %v1904_v62 = vpop.f32.mrf.mxu0  ;;  %vm2200_vm15 = vcmp.gt.f32.partialorder %v2168_v27, 0.0  ;;  %v2232_v11 = vmul.f32 0.2, %v2168_v27  ;;  %4505 = vmatmul.msk.bf16.gmra.mxu1 %vm2269_vm5, %v6335_v58  ;;  %3483 = vmatpush.bf16.msra.mxu2 %v3474_v42 }
 0x309   : > { %7408 = vst [vmem:[#allocation32_spill] sm:$0xff] %v6340_v23  ;;  %vm2037_vm0 = vcmp.gt.f32.partialorder %v2005_v36, 0.0  ;;  %v2069_v39 = vmul.f32 0.2, %v2005_v36  ;;  %v1801_v38 = vadd.f32 %v1764_v5, %v1661_v31 }
 0x30a   : > { %v2264_v24 = vsel %vm2200_vm15, %v2168_v27, %v2232_v11  ;;  %v2400_v31 = vld [vmem:[#allocation2 + $0x150] sm:$0xff] }
 0x30b   : > { %4549 = vmatmul.msk.bf16.gmra.mxu0 %vm2269_vm5, %v6137_v44  ;;  %2353 = vst.msk [vmem:[#allocation2 + $0x159] sm:$0xff] %vm2269_vm5, %v2264_v24  ;;  %v2101_v45 = vsel %vm2037_vm0, %v2005_v36, %v2069_v39  ;;  %v1938_v4 = vadd.f32 %v1901_v26, %v1801_v38  ;;  %4515 = vmatmul.msk.bf16.gmra.mxu2 %vm2269_vm5, %v6097_v16  ;;  %v4592_v24 = vld [vmem:[%s7162_s3 + $0x18] sm:$0xf]  ;;  %v7411_v16 = vld [vmem:[#allocation19_spill] sm:$0xff] }
 0x30c   : > { %v2135_v49 = vmul.f32 %v6134_v7, %v2101_v45  ;;  %v3604_v42 = vsel %vm2655_vm4, %v4592_v24, 0  ;;  %v1533_v24 = vadd.f32 %v6116_v40, %v7411_v16 }
 0x30d   : > { %v1972_v5 = vmul.f32 %v6144_v52, %v1938_v4  ;;  %v6355_v22 = vpop.f32.mrf.mxu1  ;;  %3613 = vmatpush.bf16.msra.mxu3 %v3604_v42 }
 0x30e   : > { %v2169_v13 = vadd.f32 %v6152_v54, %v2135_v49  ;;  %v1627_v27 = vpop.f32.mrf.mxu2  ;;  %v1769_v26 = vpop.f32.mrf.mxu3  ;;  %v2547_v49 = vrot.slane %v2400_v31, 1 }
 0x30f   : > { %v2006_v21 = vadd.f32 %v6162_v59, %v1972_v5  ;;  %v1662_v48 = vadd.f32 %v1627_v27, %v7409_v28  ;;  %v2958_v5 = vrot.slane %v2400_v31, 2 }
 0x310   : > { %v1906_v36 = vpop.f32.mrf.mxu0  ;;  %vm2201_vm6 = vcmp.gt.f32.partialorder %v2169_v13, 0.0  ;;  %v2233_v11 = vmul.f32 0.2, %v2169_v13 }
 0x311   : > { %vm2038_vm7 = vcmp.gt.f32.partialorder %v2006_v21, 0.0  ;;  %v2070_v39 = vmul.f32 0.2, %v2006_v21  ;;  %v1802_v38 = vadd.f32 %v1767_v50, %v1662_v48 }
 0x312   : > { %v2265_v45 = vsel %vm2201_vm6, %v2169_v13, %v2233_v11  ;;  %v2401_v4 = vld [vmem:[#allocation2 + $0x158] sm:$0xff]  ;;  %v2402_v19 = vld [vmem:[#allocation2 + $0x160] sm:$0x3] }
 0x313   : > { %2354 = vst.msk [vmem:[#allocation2 + $0x169] sm:$0xff] %vm2269_vm5, %v2265_v45  ;;  %v2102_v27 = vsel %vm2038_vm7, %v2006_v21, %v2070_v39  ;;  %v1939_v28 = vadd.f32 %v1904_v62, %v1802_v38  ;;  %4533 = vmatmul.msk.bf16.gmra.mxu3 %vm2269_vm5, %v6165_v0  ;;  %v2548_v33 = vrot.slane %v2401_v4, 1  ;;  %v2550_v50 = vrot.slane %v2402_v19, 1 }
 0x314   : > { %v2136_v48 = vmul.f32 %v6134_v7, %v2102_v27  ;;  %v6368_v58 = vpack.c.bf16 %v2401_v4, %v2400_v31  ;;  %v2959_v13 = vrot.slane %v2401_v4, 2  ;;  %v2961_v11 = vrot.slane %v2402_v19, 2 }
 0x315   : > { %v1973_v30 = vmul.f32 %v6144_v52, %v1939_v28  ;;  %v6373_v45 = vpop.f32.mrf.mxu1  ;;  %v2549_v62 = vsel %vm411_vm2, %v2547_v49, %v2548_v33  ;;  %v2551_v21 = vsel %vm411_vm2, %v2548_v33, %v2550_v50 }
 0x316   : > { %7410 = vst [vmem:[#allocation13_spill] sm:$0xff] %v6368_v58  ;;  %v2170_v39 = vadd.f32 %v6152_v54, %v2136_v48  ;;  %v1629_v38 = vpop.f32.mrf.mxu2  ;;  %v3078_v27 = vpop.f32.mrf.mxu3  ;;  %v6378_v42 = vpack.c.bf16 %v2551_v21, %v2549_v62  ;;  %v2960_v31 = vsel %vm824_vm3, %v2958_v5, %v2959_v13  ;;  %v2962_v4 = vsel %vm824_vm3, %v2959_v13, %v2961_v11  ;;  %v4609_v5 = vld [vmem:[%s7162_s3 + $0x1c] sm:$0xf]  ;;  %v4626_v13 = vld [vmem:[%s7162_s3 + $0x20] sm:$0xf] }
 0x317   : > { %v2007_v16 = vadd.f32 %v6162_v59, %v1973_v30  ;;  %v1663_v40 = vadd.f32 %v1629_v38, %v1533_v24  ;;  %v6383_v28 = vpack.c.bf16 %v2962_v4, %v2960_v31  ;;  %v3744_v30 = vsel %vm2655_vm4, %v4609_v5, 0 }
 0x318   : > { %v3208_v19 = vpop.f32.mrf.mxu0  ;;  %vm2202_vm8 = vcmp.gt.f32.partialorder %v2170_v39, 0.0  ;;  %v2234_v49 = vmul.f32 0.2, %v2170_v39  ;;  %4506 = vmatmul.msk.bf16.gmra.mxu1 %vm2269_vm5, %v6378_v42  ;;  %3753 = vmatpush.bf16.msra.mxu0 %v3744_v30 }
 0x319   : > { %7412 = vst [vmem:[#allocation6_spill] sm:$0xff] %v6383_v28  ;;  %vm2039_vm9 = vcmp.gt.f32.partialorder %v2007_v16, 0.0  ;;  %v2071_v33 = vmul.f32 0.2, %v2007_v16  ;;  %v1803_v50 = vadd.f32 %v1769_v26, %v1663_v40  ;;  %v3881_v26 = vsel %vm2655_vm4, %v4626_v13, 0 }
 0x31a   : > { %v2266_v48 = vsel %vm2202_vm8, %v2170_v39, %v2234_v49  ;;  %3890 = vmatpush.bf16.msra.mxu1 %v3881_v26  ;;  %v2403_v49 = vld [vmem:[#allocation2 + $0x168] sm:$0xff] }
 0x31b   : > { %4550 = vmatmul.msk.bf16.gmra.mxu0 %vm2269_vm5, %v6185_v15  ;;  %2355 = vst.msk [vmem:[#allocation2 + $0x171] sm:$0xff] %vm2269_vm5, %v2266_v48  ;;  %v2103_v11 = vsel %vm2039_vm9, %v2007_v16, %v2071_v33  ;;  %v1940_v24 = vadd.f32 %v1906_v36, %v1803_v50  ;;  %4516 = vmatmul.msk.bf16.gmra.mxu2 %vm2269_vm5, %v6137_v44  ;;  %v2552_v13 = vrot.slane %v2403_v49, 1 }
 0x31c   : > { %v2137_v62 = vmul.f32 %v6134_v7, %v2103_v11  ;;  %v2963_v11 = vrot.slane %v2403_v49, 2 }
 0x31d   : > { %v1974_v21 = vmul.f32 %v6144_v52, %v1940_v24  ;;  %v6402_v39 = vpop.f32.mrf.mxu1 }
 0x31e   : > { %v2171_v38 = vadd.f32 %v6152_v54, %v2137_v62  ;;  %v2808_v31 = vpop.f32.mrf.mxu2  ;;  %v3080_v4 = vpop.f32.mrf.mxu3 }
 0x31f   : > { %v2008_v16 = vadd.f32 %v6162_v59, %v1974_v21  ;;  %v2809_v36 = vadd.f32 %v2808_v31, %v6127_v3 }
 0x320   : > { %v3210_v40 = vpop.f32.mrf.mxu0  ;;  %vm2203_vm1 = vcmp.gt.f32.partialorder %v2171_v38, 0.0  ;;  %v2235_v33 = vmul.f32 0.2, %v2171_v38 }
 0x321   : > { %vm2040_vm4 = vcmp.gt.f32.partialorder %v2008_v16, 0.0  ;;  %v2072_v50 = vmul.f32 0.2, %v2008_v16  ;;  %v3158_v5 = vadd.f32 %v3078_v27, %v2809_v36 }
 0x322   : > { %v2267_v48 = vsel %vm2203_vm1, %v2171_v38, %v2235_v33  ;;  %v2404_v30 = vld [vmem:[#allocation2 + $0x170] sm:$0xff]  ;;  %v2405_v52 = vld [vmem:[#allocation2 + $0x178] sm:$0x3] }
 0x323   : > { %2356 = vst.msk [vmem:[#allocation2 + $0x181] sm:$0xff] %vm2269_vm5, %v2267_v48  ;;  %v2104_v24 = vsel %vm2040_vm4, %v2008_v16, %v2072_v50  ;;  %4534 = vmatmul.msk.bf16.gmra.mxu3 %vm2269_vm5, %v6200_v18  ;;  %v2553_v59 = vrot.slane %v2404_v30, 1  ;;  %v2555_v3 = vrot.slane %v2405_v52, 1  ;;  %v6410_v26 = vpack.c.bf16 %v2404_v30, %v2403_v49 }
 0x324   : > { %v2138_v62 = vmul.f32 %v6134_v7, %v2104_v24  ;;  %v2964_v21 = vrot.slane %v2404_v30, 2  ;;  %v2966_v31 = vrot.slane %v2405_v52, 2  ;;  %v6413_v27 = vadd.f32 %v3208_v19, %v3158_v5 }
 0x325   : > { %7413 = vst [vmem:[#allocation14_spill] sm:$0xff] %v6410_v26  ;;  %v6415_v38 = vpop.f32.mrf.mxu1  ;;  %v2554_v36 = vsel %vm411_vm2, %v2552_v13, %v2553_v59  ;;  %v2556_v33 = vsel %vm411_vm2, %v2553_v59, %v2555_v3 }
 0x326   : > { %v2172_v16 = vadd.f32 %v6152_v54, %v2138_v62  ;;  %v2810_v50 = vpop.f32.mrf.mxu2  ;;  %v3083_v48 = vpop.f32.mrf.mxu3  ;;  %v6420_v18 = vpack.c.bf16 %v2556_v33, %v2554_v36  ;;  %v2965_v49 = vsel %vm824_vm3, %v2963_v11, %v2964_v21  ;;  %v2967_v7 = vsel %vm824_vm3, %v2964_v21, %v2966_v31 }
 0x327   : > { %v2811_v30 = vadd.f32 %v2810_v50, %v6175_v9  ;;  %v6425_v5 = vpack.c.bf16 %v2967_v7, %v2965_v49 }
 0x328   : > { %7414 = vst [vmem:[#allocation15_spill] sm:$0xff] %v6420_v18  ;;  %v3213_v19 = vpop.f32.mrf.mxu0  ;;  %vm2204_vm10 = vcmp.gt.f32.partialorder %v2172_v16, 0.0  ;;  %v2236_v52 = vmul.f32 0.2, %v2172_v16  ;;  %4507 = vmatmul.msk.bf16.gmra.mxu1 %vm2269_vm5, %v6420_v18 }
 0x329   : > { %7415 = vst [vmem:[#allocation8_spill] sm:$0xff] %v6425_v5  ;;  %v3159_v13 = vadd.f32 %v3080_v4, %v2811_v30 }
 0x32a   : > { %v2268_v54 = vsel %vm2204_vm10, %v2172_v16, %v2236_v52  ;;  %v6439_v21 = vld [vmem:[#allocation2 + $0x180] sm:$0xff] }
 0x32b   : > { %4551 = vmatmul.msk.bf16.gmra.mxu0 %vm2269_vm5, %v6220_v56  ;;  %2357 = vst.msk [vmem:[#allocation2 + $0x189] sm:$0xff] %vm2269_vm5, %v2268_v54  ;;  %4517 = vmatmul.msk.bf16.gmra.mxu2 %vm2269_vm5, %v6185_v15  ;;  %v6434_v11 = vadd.f32 %v3210_v40, %v3159_v13  ;;  %v3323_v36 = vrot.slane %v6439_v21, 1  ;;  %v3460_v16 = vrot.slane %v6439_v21, 2 }
 0x32d   : > { %v6436_v9 = vpop.f32.mrf.mxu1 }
 0x32e   : > { %v2813_v24 = vpop.f32.mrf.mxu2  ;;  %v3085_v59 = vpop.f32.mrf.mxu3 }
 0x32f   : > { %v2814_v3 = vadd.f32 %v2813_v24, %v6190_v12 }
 0x330   : > { %v3215_v62 = vpop.f32.mrf.mxu0 }
 0x331   : > { %v3160_v4 = vadd.f32 %v3083_v48, %v2814_v3 }
 0x332   : > { %v6441_v31 = vld [vmem:[#allocation2 + $0x188] sm:$0xff]  ;;  %v2408_v33 = vld [vmem:[#allocation2 + $0x190] sm:$0x3] }
 0x333   : > { %4535 = vmatmul.msk.bf16.gmra.mxu3 %vm2269_vm5, %v6235_v37  ;;  %v3324_v40 = vrot.slane %v6441_v31, 1  ;;  %v3461_v50 = vrot.slane %v6441_v31, 2  ;;  %v6449_v49 = vadd.f32 %v3213_v19, %v3160_v4  ;;  %v3326_v12 = vrot.slane %v2408_v33, 1 }
 0x334   : > { %v3463_v7 = vrot.slane %v2408_v33, 2 }
 0x335   : > { %v6451_v30 = vpop.f32.mrf.mxu1  ;;  %v3325_v48 = vsel %vm411_vm2, %v3323_v36, %v3324_v40  ;;  %v3462_v52 = vsel %vm824_vm3, %v3460_v16, %v3461_v50  ;;  %v3327_v24 = vsel %vm411_vm2, %v3324_v40, %v3326_v12 }
 0x336   : > { %v2815_v13 = vpop.f32.mrf.mxu2  ;;  %v3088_v54 = vpop.f32.mrf.mxu3  ;;  %v3464_v3 = vsel %vm824_vm3, %v3461_v50, %v3463_v7  ;;  %v6458_v0 = vpack.c.bf16 %v3327_v24, %v3325_v48 }
 0x337   : > { %v2816_v37 = vadd.f32 %v2815_v13, %v6211_v1  ;;  %v6460_v19 = vpack.c.bf16 %v3464_v3, %v3462_v52 }
 0x338   : > { %v3218_v18 = vpop.f32.mrf.mxu0  ;;  %4559 = vmatmul.msk.bf16.vlgmr.msrb.gmra.mxu1 %vm2269_vm5, %v5906_v8 }
 0x339   : > { %7416 = vst [vmem:[#allocation7_spill] sm:$0xff] %v6460_v19  ;;  %v3161_v4 = vadd.f32 %v3085_v59, %v2816_v37 }
 0x33b   : > { %4552 = vmatmul.msk.bf16.gmra.mxu0 %vm2269_vm5, %v6255_v51  ;;  %4518 = vmatmul.msk.bf16.gmra.mxu2 %vm2269_vm5, %v6220_v56  ;;  %v6468_v36 = vadd.f32 %v3215_v62, %v3161_v4 }
 0x33d   : > { %v6470_v33 = vpop.f32.mrf.mxu1 }
 0x33e   : > { %v2818_v1 = vpop.f32.mrf.mxu2  ;;  %v3090_v40 = vpop.f32.mrf.mxu3 }
 0x33f   : > { %v2819_v16 = vadd.f32 %v2818_v1, %v6225_v47 }
 0x340   : > { %v3220_v50 = vpop.f32.mrf.mxu0 }
 0x341   : > { %v3162_v12 = vadd.f32 %v3088_v54, %v2819_v16 }
 0x343   : > { %4536 = vmatmul.msk.bf16.gmra.mxu3 %vm2269_vm5, %v6270_v32  ;;  %v6475_v8 = vadd.f32 %v3218_v18, %v3162_v12 }
 0x345   : > { %v6477_v37 = vpop.f32.mrf.mxu1 }
 0x346   : > { %v2820_v59 = vpop.f32.mrf.mxu2  ;;  %v3093_v7 = vpop.f32.mrf.mxu3 }
 0x347   : > { %v2821_v62 = vadd.f32 %v2820_v59, %v6246_v17  ;;  %v7417_v59 = vld [vmem:[#allocation18_spill] sm:$0xff] }
 0x348   : > { %v3223_v48 = vpop.f32.mrf.mxu0  ;;  %4560 = vmatmul.msk.bf16.gmra.mxu1 %vm2269_vm5, %v5936_v34 }
 0x349   : > { %v3163_v52 = vadd.f32 %v3090_v40, %v2821_v62 }
 0x34b   : > { %4553 = vmatmul.msk.bf16.gmra.mxu0 %vm2269_vm5, %v6290_v35  ;;  %4519 = vmatmul.msk.bf16.gmra.mxu2 %vm2269_vm5, %v6255_v51  ;;  %v6486_v47 = vadd.f32 %v3220_v50, %v3163_v52 }
 0x34d   : > { %v6488_v18 = vpop.f32.mrf.mxu1 }
 0x34e   : > { %v2823_v13 = vpop.f32.mrf.mxu2  ;;  %v3095_v54 = vpop.f32.mrf.mxu3 }
 0x34f   : > { %v2824_v24 = vadd.f32 %v2823_v13, %v6260_v20 }
 0x350   : > { %v3225_v17 = vpop.f32.mrf.mxu0 }
 0x351   : > { %v3164_v3 = vadd.f32 %v3093_v7, %v2824_v24 }
 0x353   : > { %4537 = vmatmul.msk.bf16.gmra.mxu3 %vm2269_vm5, %v6305_v43  ;;  %v6493_v4 = vadd.f32 %v3223_v48, %v3164_v3 }
 0x355   : > { %v6495_v1 = vpop.f32.mrf.mxu1 }
 0x356   : > { %v2825_v40 = vpop.f32.mrf.mxu2  ;;  %v3098_v16 = vpop.f32.mrf.mxu3 }
 0x357   : > { %v2826_v50 = vadd.f32 %v2825_v40, %v6281_v29 }
 0x358   : > { %v3228_v12 = vpop.f32.mrf.mxu0  ;;  %4561 = vmatmul.msk.bf16.gmra.mxu1 %vm2269_vm5, %v7417_v59 }
 0x359   : > { %v3165_v62 = vadd.f32 %v3095_v54, %v2826_v50 }
 0x35b   : > { %4554 = vmatmul.msk.bf16.gmra.mxu0 %vm2269_vm5, %v6325_v46  ;;  %4520 = vmatmul.msk.bf16.gmra.mxu2 %vm2269_vm5, %v6290_v35  ;;  %v6504_v20 = vadd.f32 %v3225_v17, %v3165_v62 }
 0x35d   : > { %v6506_v7 = vpop.f32.mrf.mxu1 }
 0x35e   : > { %v2828_v48 = vpop.f32.mrf.mxu2  ;;  %v3100_v52 = vpop.f32.mrf.mxu3 }
 0x35f   : > { %v2829_v13 = vadd.f32 %v2828_v48, %v6295_v14 }
 0x360   : > { %v3230_v29 = vpop.f32.mrf.mxu0 }
 0x361   : > { %v3166_v24 = vadd.f32 %v3098_v16, %v2829_v13 }
 0x363   : > { %4538 = vmatmul.msk.bf16.gmra.mxu3 %vm2269_vm5, %v6340_v23  ;;  %v6511_v54 = vadd.f32 %v3228_v12, %v3166_v24 }
 0x365   : > { %v6513_v3 = vpop.f32.mrf.mxu1 }
 0x366   : > { %v2830_v40 = vpop.f32.mrf.mxu2  ;;  %v3103_v50 = vpop.f32.mrf.mxu3 }
 0x367   : > { %v2831_v17 = vadd.f32 %v2830_v40, %v6316_v10 }
 0x368   : > { %v3233_v62 = vpop.f32.mrf.mxu0  ;;  %4562 = vmatmul.msk.bf16.gmra.mxu1 %vm2269_vm5, %v6005_v57 }
 0x369   : > { %v3167_v19 = vadd.f32 %v3100_v52, %v2831_v17 }
 0x36b   : > { %4555 = vmatmul.msk.bf16.gmra.mxu0 %vm2269_vm5, %v6368_v58  ;;  %4521 = vmatmul.msk.bf16.gmra.mxu2 %vm2269_vm5, %v6325_v46  ;;  %v6522_v14 = vadd.f32 %v3230_v29, %v3167_v19 }
 0x36d   : > { %v6524_v16 = vpop.f32.mrf.mxu1 }
 0x36e   : > { %v2833_v12 = vpop.f32.mrf.mxu2  ;;  %v3105_v48 = vpop.f32.mrf.mxu3 }
 0x36f   : > { %v2834_v13 = vadd.f32 %v2833_v12, %v6330_v41 }
 0x370   : > { %v3235_v10 = vpop.f32.mrf.mxu0 }
 0x371   : > { %v3168_v24 = vadd.f32 %v3103_v50, %v2834_v13 }
 0x373   : > { %4539 = vmatmul.msk.bf16.gmra.mxu3 %vm2269_vm5, %v6383_v28  ;;  %v6529_v52 = vadd.f32 %v3233_v62, %v3168_v24 }
 0x375   : > { %v6531_v40 = vpop.f32.mrf.mxu1 }
 0x376   : > { %v2835_v17 = vpop.f32.mrf.mxu2  ;;  %v3108_v23 = vpop.f32.mrf.mxu3 }
 0x377   : > { %v2836_v19 = vadd.f32 %v2835_v17, %v6355_v22 }
 0x378   : > { %v3238_v29 = vpop.f32.mrf.mxu0  ;;  %4563 = vmatmul.msk.bf16.gmra.mxu1 %vm2269_vm5, %v6039_v2 }
 0x379   : > { %v3169_v43 = vadd.f32 %v3105_v48, %v2836_v19 }
 0x37b   : > { %4556 = vmatmul.msk.bf16.gmra.mxu0 %vm2269_vm5, %v6410_v26  ;;  %4522 = vmatmul.msk.bf16.gmra.mxu2 %vm2269_vm5, %v6368_v58  ;;  %v6540_v41 = vadd.f32 %v3235_v10, %v3169_v43  ;;  %v7423_v58 = vld [vmem:[#allocation27_spill] sm:$0xff] }
 0x37d   : > { %v6542_v50 = vpop.f32.mrf.mxu1 }
 0x37e   : > { %v2838_v62 = vpop.f32.mrf.mxu2  ;;  %v3110_v12 = vpop.f32.mrf.mxu3 }
 0x37f   : > { %v2839_v13 = vadd.f32 %v2838_v62, %v6373_v45  ;;  %v6556_v45 = vpack.c.bf16 %v6441_v31, %v6439_v21 }
 0x380   : > { %v3240_v22 = vpop.f32.mrf.mxu0 }
 0x381   : > { %v3170_v24 = vadd.f32 %v3108_v23, %v2839_v13  ;;  %7418 = vst [vmem:[#allocation9_spill] sm:$0xff] %v6556_v45 }
 0x383   : > { %4540 = vmatmul.msk.bf16.gmra.mxu3 %vm2269_vm5, %v6425_v5  ;;  %v6547_v48 = vadd.f32 %v3238_v29, %v3170_v24 }
 0x385   : > { %v6549_v17 = vpop.f32.mrf.mxu1 }
 0x386   : > { %v2840_v19 = vpop.f32.mrf.mxu2  ;;  %v3113_v28 = vpop.f32.mrf.mxu3 }
 0x387   : > { %v2841_v43 = vadd.f32 %v2840_v19, %v6402_v39 }
 0x388   : > { %v3243_v10 = vpop.f32.mrf.mxu0  ;;  %4564 = vmatmul.msk.bf16.gmra.mxu1 %vm2269_vm5, %v6073_v25 }
 0x389   : > { %v3171_v23 = vadd.f32 %v3110_v12, %v2841_v43 }
 0x38b   : > { %4557 = vmatmul.msk.bf16.gmra.mxu0 %vm2269_vm5, %v6556_v45  ;;  %4523 = vmatmul.msk.bf16.gmra.mxu2 %vm2269_vm5, %v6410_v26  ;;  %v6562_v29 = vadd.f32 %v3240_v22, %v3171_v23  ;;  %v7420_v26 = vld [vmem:[#allocation3_spill] sm:$0xff] }
 0x38d   : > { %v6564_v62 = vpop.f32.mrf.mxu1 }
 0x38e   : > { %v2843_v39 = vpop.f32.mrf.mxu2  ;;  %v3115_v13 = vpop.f32.mrf.mxu3 }
 0x38f   : > { %v2844_v24 = vadd.f32 %v2843_v39, %v6415_v38 }
 0x390   : > { %v3245_v19 = vpop.f32.mrf.mxu0 }
 0x391   : > { %v3172_v5 = vadd.f32 %v3113_v28, %v2844_v24 }
 0x393   : > { %4593 = vmatmul.msk.bf16.vlgmr.msra.gmra.mxu3 %vm2269_vm5, %v5930_v55  ;;  %v6569_v21 = vadd.f32 %v3243_v10, %v3172_v5 }
 0x395   : > { %v6571_v31 = vpop.f32.mrf.mxu1 }
 0x396   : > { %v2845_v12 = vpop.f32.mrf.mxu2  ;;  %v3118_v43 = vpop.f32.mrf.mxu3 }
 0x397   : > { %v2846_v22 = vadd.f32 %v2845_v12, %v6436_v9 }
 0x398   : > { %v3248_v23 = vpop.f32.mrf.mxu0  ;;  %4565 = vmatmul.msk.bf16.gmra.mxu1 %vm2269_vm5, %v6105_v60 }
 0x399   : > { %v3173_v45 = vadd.f32 %v3115_v13, %v2846_v22 }
 0x39b   : > { %4610 = vmatmul.msk.bf16.vlgmr.msra.gmra.mxu0 %vm2269_vm5, %v5936_v34  ;;  %4576 = vmatmul.msk.bf16.vlgmr.msra.gmra.mxu2 %vm2269_vm5, %v5912_v61  ;;  %v6580_v55 = vadd.f32 %v3245_v19, %v3173_v45 }
 0x39d   : > { %v6582_v28 = vpop.f32.mrf.mxu1 }
 0x39e   : > { %v2848_v38 = vpop.f32.mrf.mxu2  ;;  %v3120_v5 = vpop.f32.mrf.mxu3 }
 0x39f   : > { %v2849_v10 = vadd.f32 %v2848_v38, %v6451_v30 }
 0x3a0   : > { %v3250_v9 = vpop.f32.mrf.mxu0 }
 0x3a1   : > { %v3174_v39 = vadd.f32 %v3118_v43, %v2849_v10  ;;  %v7419_v10 = vld [vmem:[#allocation20_spill] sm:$0xff] }
 0x3a3   : > { %4594 = vmatmul.msk.bf16.gmra.mxu3 %vm2269_vm5, %v5965_v6  ;;  %v6587_v13 = vadd.f32 %v3248_v23, %v3174_v39 }
 0x3a5   : > { %v6589_v24 = vpop.f32.mrf.mxu1 }
 0x3a6   : > { %v2850_v34 = vpop.f32.mrf.mxu2  ;;  %v3123_v12 = vpop.f32.mrf.mxu3 }
 0x3a7   : > { %v2851_v61 = vadd.f32 %v2850_v34, %v6470_v33 }
 0x3a8   : > { %v3253_v45 = vpop.f32.mrf.mxu0  ;;  %4566 = vmatmul.msk.bf16.gmra.mxu1 %vm2269_vm5, %v6155_v53 }
 0x3a9   : > { %v3175_v19 = vadd.f32 %v3120_v5, %v2851_v61 }
 0x3ab   : > { %4611 = vmatmul.msk.bf16.gmra.mxu0 %vm2269_vm5, %v7417_v59  ;;  %4577 = vmatmul.msk.bf16.gmra.mxu2 %vm2269_vm5, %v5942_v63  ;;  %v6598_v6 = vadd.f32 %v3250_v9, %v3175_v19 }
 0x3ad   : > { %v6600_v30 = vpop.f32.mrf.mxu1 }
 0x3ae   : > { %v2853_v43 = vpop.f32.mrf.mxu2  ;;  %v3125_v22 = vpop.f32.mrf.mxu3 }
 0x3af   : > { %v2854_v23 = vadd.f32 %v2853_v43, %v6477_v37 }
 0x3b0   : > { %v3255_v33 = vpop.f32.mrf.mxu0 }
 0x3b1   : > { %v3176_v38 = vadd.f32 %v3123_v12, %v2854_v23  ;;  %v7421_v12 = vld [vmem:[#allocation12_spill] sm:$0xff] }
 0x3b3   : > { %4595 = vmatmul.msk.bf16.gmra.mxu3 %vm2269_vm5, %v7419_v10  ;;  %v6605_v5 = vadd.f32 %v3253_v45, %v3176_v38 }
 0x3b5   : > { %v3348_v39 = vpop.f32.mrf.mxu1 }
 0x3b6   : > { %v6608_v59 = vadd.f32 %v3348_v39, %v6413_v27  ;;  %v2855_v34 = vpop.f32.mrf.mxu2  ;;  %v3128_v9 = vpop.f32.mrf.mxu3 }
 0x3b7   : > { %v2856_v61 = vadd.f32 %v2855_v34, %v6488_v18  ;;  %v7422_v34 = vld [vmem:[#allocation11_spill] sm:$0xff] }
 0x3b8   : > { %v3258_v19 = vpop.f32.mrf.mxu0  ;;  %4567 = vmatmul.msk.bf16.gmra.mxu1 %vm2269_vm5, %v7420_v26 }
 0x3b9   : > { %v3177_v37 = vadd.f32 %v3125_v22, %v2856_v61 }
 0x3bb   : > { %4612 = vmatmul.msk.bf16.gmra.mxu0 %vm2269_vm5, %v6005_v57  ;;  %4578 = vmatmul.msk.bf16.gmra.mxu2 %vm2269_vm5, %v7421_v12  ;;  %v6617_v45 = vadd.f32 %v3255_v33, %v3177_v37 }
 0x3bd   : > { %v3350_v43 = vpop.f32.mrf.mxu1 }
 0x3be   : > { %v6620_v27 = vadd.f32 %v3350_v43, %v6434_v11  ;;  %v2858_v23 = vpop.f32.mrf.mxu2  ;;  %v3130_v38 = vpop.f32.mrf.mxu3 }
 0x3bf   : > { %v2859_v18 = vadd.f32 %v2858_v23, %v6495_v1 }
 0x3c0   : > { %v3260_v10 = vpop.f32.mrf.mxu0 }
 0x3c1   : > { %v3178_v39 = vadd.f32 %v3128_v9, %v2859_v18  ;;  %v7424_v9 = vld [vmem:[#allocation22_spill] sm:$0xff] }
 0x3c3   : > { %4596 = vmatmul.msk.bf16.gmra.mxu3 %vm2269_vm5, %v7422_v34  ;;  %v6625_v22 = vadd.f32 %v3258_v19, %v3178_v39 }
 0x3c5   : > { %v3353_v57 = vpop.f32.mrf.mxu1 }
 0x3c6   : > { %v6628_v61 = vadd.f32 %v3353_v57, %v6449_v49  ;;  %v2860_v33 = vpop.f32.mrf.mxu2  ;;  %v3133_v37 = vpop.f32.mrf.mxu3 }
 0x3c7   : > { %v2861_v11 = vadd.f32 %v2860_v33, %v6506_v7  ;;  %v7426_v33 = vld [vmem:[#allocation4_spill] sm:$0xff] }
 0x3c8   : > { %v3263_v43 = vpop.f32.mrf.mxu0  ;;  %4568 = vmatmul.msk.bf16.gmra.mxu1 %vm2269_vm5, %v7423_v58 }
 0x3c9   : > { %v3179_v1 = vadd.f32 %v3130_v38, %v2861_v11 }
 0x3cb   : > { %4613 = vmatmul.msk.bf16.gmra.mxu0 %vm2269_vm5, %v6039_v2  ;;  %4579 = vmatmul.msk.bf16.gmra.mxu2 %vm2269_vm5, %v7424_v9  ;;  %v6637_v19 = vadd.f32 %v3260_v10, %v3179_v1 }
 0x3cd   : > { %7425 = vst [vmem:[#allocation16_spill] sm:$0xff] %v6637_v19  ;;  %v3355_v23 = vpop.f32.mrf.mxu1  ;;  %v7427_v19 = vld [vmem:[#allocation29_spill] sm:$0xff] }
 0x3ce   : > { %v6640_v49 = vadd.f32 %v3355_v23, %v6468_v36  ;;  %v2863_v18 = vpop.f32.mrf.mxu2  ;;  %v3135_v39 = vpop.f32.mrf.mxu3 }
 0x3cf   : > { %v2864_v7 = vadd.f32 %v2863_v18, %v6513_v3 }
 0x3d0   : > { %v3265_v34 = vpop.f32.mrf.mxu0 }
 0x3d1   : > { %v3180_v57 = vadd.f32 %v3133_v37, %v2864_v7  ;;  %v7428_v37 = vld [vmem:[#allocation21_spill] sm:$0xff] }
 0x3d3   : > { %4597 = vmatmul.msk.bf16.gmra.mxu3 %vm2269_vm5, %v7426_v33  ;;  %v6645_v38 = vadd.f32 %v3263_v43, %v3180_v57 }
 0x3d5   : > { %v3358_v2 = vpop.f32.mrf.mxu1 }
 0x3d6   : > { %v6648_v11 = vadd.f32 %v3358_v2, %v6475_v8  ;;  %v2865_v10 = vpop.f32.mrf.mxu2  ;;  %v3138_v1 = vpop.f32.mrf.mxu3 }
 0x3d7   : > { %v2866_v36 = vadd.f32 %v2865_v10, %v6524_v16  ;;  %v7430_v10 = vld [vmem:[#allocation24_spill] sm:$0xff] }
 0x3d8   : > { %v3268_v23 = vpop.f32.mrf.mxu0  ;;  %4569 = vmatmul.msk.bf16.gmra.mxu1 %vm2269_vm5, %v7427_v19 }
 0x3d9   : > { %v3181_v3 = vadd.f32 %v3135_v39, %v2866_v36 }
 0x3db   : > { %4614 = vmatmul.msk.bf16.gmra.mxu0 %vm2269_vm5, %v6073_v25  ;;  %4580 = vmatmul.msk.bf16.gmra.mxu2 %vm2269_vm5, %v7428_v37  ;;  %v6657_v43 = vadd.f32 %v3265_v34, %v3181_v3 }
 0x3dd   : > { %7429 = vst [vmem:[#allocation17_spill] sm:$0xff] %v6657_v43  ;;  %v3360_v18 = vpop.f32.mrf.mxu1  ;;  %v7431_v43 = vld [vmem:[#allocation10_spill] sm:$0xff] }
 0x3de   : > { %v6660_v8 = vadd.f32 %v3360_v18, %v6486_v47  ;;  %v2868_v7 = vpop.f32.mrf.mxu2  ;;  %v3140_v57 = vpop.f32.mrf.mxu3 }
 0x3df   : > { %v2869_v16 = vadd.f32 %v2868_v7, %v6531_v40 }
 0x3e0   : > { %v3270_v33 = vpop.f32.mrf.mxu0 }
 0x3e1   : > { %v3182_v2 = vadd.f32 %v3138_v1, %v2869_v16  ;;  %v7432_v1 = vld [vmem:[#allocation23_spill] sm:$0xff] }
 0x3e3   : > { %4598 = vmatmul.msk.bf16.gmra.mxu3 %vm2269_vm5, %v7430_v10  ;;  %v6665_v39 = vadd.f32 %v3268_v23, %v3182_v2 }
 0x3e5   : > { %v3363_v25 = vpop.f32.mrf.mxu1 }
 0x3e6   : > { %v6668_v36 = vadd.f32 %v3363_v25, %v6493_v4  ;;  %v2870_v34 = vpop.f32.mrf.mxu2  ;;  %v3143_v3 = vpop.f32.mrf.mxu3 }
 0x3e7   : > { %v2871_v47 = vadd.f32 %v2870_v34, %v6542_v50 }
 0x3e8   : > { %v3273_v18 = vpop.f32.mrf.mxu0  ;;  %4570 = vmatmul.msk.bf16.gmra.mxu1 %vm2269_vm5, %v7431_v43 }
 0x3e9   : > { %v3183_v40 = vadd.f32 %v3140_v57, %v2871_v47 }
 0x3eb   : > { %4615 = vmatmul.msk.bf16.gmra.mxu0 %vm2269_vm5, %v6105_v60  ;;  %4581 = vmatmul.msk.bf16.gmra.mxu2 %vm2269_vm5, %v7432_v1  ;;  %v6677_v23 = vadd.f32 %v3270_v33, %v3183_v40 }
 0x3ed   : > { %v3365_v7 = vpop.f32.mrf.mxu1 }
 0x3ee   : > { %v6680_v4 = vadd.f32 %v3365_v7, %v6504_v20  ;;  %v2873_v16 = vpop.f32.mrf.mxu2  ;;  %v3145_v2 = vpop.f32.mrf.mxu3  ;;  %v7433_v7 = vld [vmem:[#allocation30_spill] sm:$0xff] }
 0x3ef   : > { %v2874_v50 = vadd.f32 %v2873_v16, %v6549_v17 }
 0x3f0   : > { %v3275_v10 = vpop.f32.mrf.mxu0 }
 0x3f1   : > { %v3184_v25 = vadd.f32 %v3143_v3, %v2874_v50  ;;  %v7434_v3 = vld [vmem:[#allocation5_spill] sm:$0xff] }
 0x3f3   : > { %4599 = vmatmul.msk.bf16.gmra.mxu3 %vm2269_vm5, %v6137_v44  ;;  %v6685_v57 = vadd.f32 %v3273_v18, %v3184_v25 }
 0x3f5   : > { %v3368_v60 = vpop.f32.mrf.mxu1 }
 0x3f6   : > { %v6688_v34 = vadd.f32 %v3368_v60, %v6511_v54  ;;  %v2875_v33 = vpop.f32.mrf.mxu2  ;;  %v3148_v47 = vpop.f32.mrf.mxu3 }
 0x3f7   : > { %v2876_v20 = vadd.f32 %v2875_v33, %v6564_v62 }
 0x3f8   : > { %v3278_v40 = vpop.f32.mrf.mxu0  ;;  %4571 = vmatmul.msk.bf16.gmra.mxu1 %vm2269_vm5, %v7433_v7 }
 0x3f9   : > { %v3185_v17 = vadd.f32 %v3145_v2, %v2876_v20 }
 0x3fb   : > { %4616 = vmatmul.msk.bf16.gmra.mxu0 %vm2269_vm5, %v6155_v53  ;;  %4582 = vmatmul.msk.bf16.gmra.mxu2 %vm2269_vm5, %v7434_v3  ;;  %v6697_v44 = vadd.f32 %v3275_v10, %v3185_v17 }
 0x3fd   : > { %v3370_v18 = vpop.f32.mrf.mxu1 }
 0x3fe   : > { %v6700_v54 = vadd.f32 %v3370_v18, %v6522_v14  ;;  %v2878_v16 = vpop.f32.mrf.mxu2  ;;  %v3150_v50 = vpop.f32.mrf.mxu3 }
 0x3ff   : > { %v2879_v62 = vadd.f32 %v2878_v16, %v6571_v31 }
 0x400   : > { %v3280_v25 = vpop.f32.mrf.mxu0 }
 0x401   : > { %v3186_v60 = vadd.f32 %v3148_v47, %v2879_v62  ;;  %v7435_v47 = vld [vmem:[#allocation25_spill] sm:$0xff] }
 0x403   : > { %4600 = vmatmul.msk.bf16.gmra.mxu3 %vm2269_vm5, %v6185_v15  ;;  %v6705_v2 = vadd.f32 %v3278_v40, %v3186_v60 }
 0x405   : > { %v3373_v53 = vpop.f32.mrf.mxu1 }
 0x406   : > { %v6708_v33 = vadd.f32 %v3373_v53, %v6529_v52  ;;  %v2880_v10 = vpop.f32.mrf.mxu2  ;;  %v3153_v20 = vpop.f32.mrf.mxu3 }
 0x407   : > { %v2881_v14 = vadd.f32 %v2880_v10, %v6582_v28 }
 0x408   : > { %v3283_v17 = vpop.f32.mrf.mxu0  ;;  %4572 = vmatmul.msk.bf16.gmra.mxu1 %vm2269_vm5, %v6378_v42 }
 0x409   : > { %v3187_v31 = vadd.f32 %v3150_v50, %v2881_v14 }
 0x40b   : > { %4617 = vmatmul.msk.bf16.gmra.mxu0 %vm2269_vm5, %v7420_v26  ;;  %4583 = vmatmul.msk.bf16.gmra.mxu2 %vm2269_vm5, %v7435_v47  ;;  %v6717_v15 = vadd.f32 %v3280_v25, %v3187_v31  ;;  %v7436_v31 = vld [vmem:[#allocation15_spill] sm:$0xff] }
 0x40d   : > { %v3375_v40 = vpop.f32.mrf.mxu1 }
 0x40e   : > { %v6720_v52 = vadd.f32 %v3375_v40, %v6540_v41  ;;  %v2883_v18 = vpop.f32.mrf.mxu2  ;;  %v3155_v16 = vpop.f32.mrf.mxu3 }
 0x40f   : > { %v2884_v28 = vadd.f32 %v2883_v18, %v6589_v24 }
 0x410   : > { %v3285_v62 = vpop.f32.mrf.mxu0 }
 0x411   : > { %v3188_v60 = vadd.f32 %v3153_v20, %v2884_v28  ;;  %v7437_v20 = vld [vmem:[#allocation26_spill] sm:$0xff] }
 0x413   : > { %4601 = vmatmul.msk.bf16.gmra.mxu3 %vm2269_vm5, %v6220_v56  ;;  %v6725_v50 = vadd.f32 %v3283_v17, %v3188_v60 }
 0x415   : > { %v3378_v26 = vpop.f32.mrf.mxu1 }
 0x416   : > { %v6728_v53 = vadd.f32 %v3378_v26, %v6547_v48  ;;  %v2885_v25 = vpop.f32.mrf.mxu2  ;;  %v3615_v10 = vpop.f32.mrf.mxu3 }
 0x417   : > { %v2886_v41 = vadd.f32 %v2885_v25, %v6600_v30 }
 0x418   : > { %v3755_v14 = vpop.f32.mrf.mxu0  ;;  %4573 = vmatmul.msk.bf16.gmra.mxu1 %vm2269_vm5, %v7436_v31 }
 0x419   : > { %v3189_v24 = vadd.f32 %v3155_v16, %v2886_v41 }
 0x41b   : > { %4618 = vmatmul.msk.bf16.gmra.mxu0 %vm2269_vm5, %v7423_v58  ;;  %4584 = vmatmul.msk.bf16.gmra.mxu2 %vm2269_vm5, %v7437_v20  ;;  %v6737_v56 = vadd.f32 %v3285_v62, %v3189_v24 }
 0x41d   : > { %v3380_v17 = vpop.f32.mrf.mxu1 }
 0x41e   : > { %v6740_v48 = vadd.f32 %v3380_v17, %v6562_v29  ;;  %v3485_v40 = vpop.f32.mrf.mxu2  ;;  %v3617_v18 = vpop.f32.mrf.mxu3 }
 0x41f   : > { %v3565_v30 = vadd.f32 %v3485_v40, %v6608_v59 }
 0x420   : > { %v3757_v28 = vpop.f32.mrf.mxu0 }
 0x421   : > { %v3695_v60 = vadd.f32 %v3615_v10, %v3565_v30  ;;  %v7438_v10 = vld [vmem:[#allocation28_spill] sm:$0xff] }
 0x423   : > { %4602 = vmatmul.msk.bf16.gmra.mxu3 %vm2269_vm5, %v6255_v51  ;;  %v6745_v16 = vadd.f32 %v3755_v14, %v3695_v60 }
 0x425   : > { %v3383_v58 = vpop.f32.mrf.mxu1 }
 0x426   : > { %v6748_v26 = vadd.f32 %v3383_v58, %v6569_v21  ;;  %v3487_v62 = vpop.f32.mrf.mxu2  ;;  %v3620_v25 = vpop.f32.mrf.mxu3 }
 0x427   : > { %v3566_v29 = vadd.f32 %v3487_v62, %v6620_v27 }
 0x428   : > { %4574 = vmatmul.msk.bf16.gmra.mxu1 %vm2269_vm5, %v6458_v0  ;;  %v3760_v41 = vpop.f32.mrf.mxu0 }
 0x429   : > { %v3696_v59 = vadd.f32 %v3617_v18, %v3566_v29 }
 0x42b   : > { %4619 = vmatmul.msk.bf16.gmra.mxu0 %vm2269_vm5, %v7427_v19  ;;  %4585 = vmatmul.msk.bf16.gmra.mxu2 %vm2269_vm5, %v7438_v10  ;;  %v6757_v51 = vadd.f32 %v3757_v28, %v3696_v59 }
 0x42d   : > { %v3385_v14 = vpop.f32.mrf.mxu1 }
 0x42e   : > { %v6760_v21 = vadd.f32 %v3385_v14, %v6580_v55  ;;  %v3490_v24 = vpop.f32.mrf.mxu2  ;;  %v3622_v17 = vpop.f32.mrf.mxu3 }
 0x42f   : > { %v3567_v27 = vadd.f32 %v3490_v24, %v6628_v61 }
 0x430   : > { %v3762_v30 = vpop.f32.mrf.mxu0 }
 0x431   : > { %v3697_v40 = vadd.f32 %v3620_v25, %v3567_v27 }
 0x433   : > { %4603 = vmatmul.msk.bf16.gmra.mxu3 %vm2269_vm5, %v6290_v35  ;;  %v6765_v18 = vadd.f32 %v3760_v41, %v3697_v40 }
 0x435   : > { %v3388_v19 = vpop.f32.mrf.mxu1 }
 0x436   : > { %v6768_v60 = vadd.f32 %v3388_v19, %v6587_v13  ;;  %v3492_v28 = vpop.f32.mrf.mxu2  ;;  %v3625_v61 = vpop.f32.mrf.mxu3 }
 0x437   : > { %v3568_v58 = vadd.f32 %v3492_v28, %v6640_v49 }
 0x438   : > { %4627 = vmatmul.msk.bf16.vlgmr.msra.gmra.mxu1 %vm2269_vm5, %v5942_v63  ;;  %v3765_v62 = vpop.f32.mrf.mxu0 }
 0x439   : > { %v3698_v55 = vadd.f32 %v3622_v17, %v3568_v58 }
 0x43b   : > { %4620 = vmatmul.msk.bf16.gmra.mxu0 %vm2269_vm5, %v7431_v43  ;;  %4586 = vmatmul.msk.bf16.gmra.mxu2 %vm2269_vm5, %v6270_v32  ;;  %v6777_v35 = vadd.f32 %v3762_v30, %v3698_v55 }
 0x43d   : > { %v3390_v25 = vpop.f32.mrf.mxu1 }
 0x43e   : > { %v6780_v13 = vadd.f32 %v3390_v25, %v6598_v6  ;;  %v3495_v29 = vpop.f32.mrf.mxu2  ;;  %v3627_v43 = vpop.f32.mrf.mxu3 }
 0x43f   : > { %v3569_v49 = vadd.f32 %v3495_v29, %v6648_v11  ;;  %v7439_v11 = vld [vmem:[#allocation31_spill] sm:$0xff] }
 0x440   : > { %v3767_v14 = vpop.f32.mrf.mxu0 }
 0x441   : > { %v3699_v41 = vadd.f32 %v3625_v61, %v3569_v49  ;;  %v7441_v49 = vld [vmem:[#allocation32_spill] sm:$0xff] }
 0x443   : > { %4604 = vmatmul.msk.bf16.gmra.mxu3 %vm2269_vm5, %v6325_v46  ;;  %v6785_v63 = vadd.f32 %v3765_v62, %v3699_v41 }
 0x445   : > { %v3393_v59 = vpop.f32.mrf.mxu1 }
 0x446   : > { %v6788_v24 = vadd.f32 %v3393_v59, %v6605_v5  ;;  %v3497_v27 = vpop.f32.mrf.mxu2  ;;  %v3630_v30 = vpop.f32.mrf.mxu3 }
 0x447   : > { %v3570_v17 = vadd.f32 %v3497_v27, %v6660_v8 }
 0x448   : > { %4628 = vmatmul.msk.bf16.gmra.mxu1 %vm2269_vm5, %v7421_v12  ;;  %v3770_v28 = vpop.f32.mrf.mxu0  ;;  %v7440_v12 = vld [vmem:[#allocation13_spill] sm:$0xff] }
 0x449   : > { %v3700_v6 = vadd.f32 %v3627_v43, %v3570_v17  ;;  %v7445_v17 = vld [vmem:[#allocation17_spill] sm:$0xff] }
 0x44b   : > { %4621 = vmatmul.msk.bf16.gmra.mxu0 %vm2269_vm5, %v7433_v7  ;;  %4587 = vmatmul.msk.bf16.gmra.mxu2 %vm2269_vm5, %v7439_v11  ;;  %v6797_v46 = vadd.f32 %v3767_v14, %v3700_v6  ;;  %v7443_v14 = vld [vmem:[#allocation14_spill] sm:$0xff] }
 0x44d   : > { %v3395_v40 = vpop.f32.mrf.mxu1 }
 0x44e   : > { %v6800_v5 = vadd.f32 %v3395_v40, %v6617_v45  ;;  %v3500_v19 = vpop.f32.mrf.mxu2  ;;  %v3632_v29 = vpop.f32.mrf.mxu3  ;;  %v7446_v40 = vld [vmem:[#allocation9_spill] sm:$0xff] }
 0x44f   : > { %v3571_v8 = vadd.f32 %v3500_v19, %v6668_v36  ;;  %v6849_v19 = vld [vmem:[#allocation2 + $0x1a0] sm:$0xff] }
 0x450   : > { %v3772_v36 = vpop.f32.mrf.mxu0 }
 0x451   : > { %v3701_v58 = vadd.f32 %v3630_v30, %v3571_v8  ;;  %v6851_v8 = vld [vmem:[#allocation2 + $0x1a8] sm:$0x3] }
 0x453   : > { %4605 = vmatmul.msk.bf16.gmra.mxu3 %vm2269_vm5, %v7440_v12  ;;  %v6805_v55 = vadd.f32 %v3770_v28, %v3701_v58  ;;  %v3733_v12 = vrot.slane %v6851_v8, 1 }
 0x455   : > { %v3398_v7 = vpop.f32.mrf.mxu1 }
 0x456   : > { %v6808_v61 = vadd.f32 %v3398_v7, %v6625_v22  ;;  %v3502_v62 = vpop.f32.mrf.mxu2  ;;  %v7442_v22 = vld [vmem:[#allocation16_spill] sm:$0xff] }
 0x457   : > { %v3572_v25 = vadd.f32 %v3502_v62, %v6680_v4 }
 0x458   : > { %4629 = vmatmul.msk.bf16.gmra.mxu1 %vm2269_vm5, %v7424_v9 }
 0x459   : > { %v3702_v45 = vadd.f32 %v3632_v29, %v3572_v25 }
 0x45b   : > { %4622 = vmatmul.msk.bf16.gmra.mxu0 %vm2269_vm5, %v6378_v42  ;;  %4588 = vmatmul.msk.bf16.gmra.mxu2 %vm2269_vm5, %v7441_v49  ;;  %v6817_v41 = vadd.f32 %v3772_v36, %v3702_v45  ;;  %v7444_v42 = vld [vmem:[#allocation6_spill] sm:$0xff]  ;;  %v7448_v45 = vld [vmem:[#allocation7_spill] sm:$0xff] }
 0x45d   : > { %v3400_v43 = vpop.f32.mrf.mxu1 }
 0x45e   : > { %v6820_v59 = vadd.f32 %v3400_v43, %v7442_v22 }
 0x463   : > { %4606 = vmatmul.msk.bf16.gmra.mxu3 %vm2269_vm5, %v7443_v14 }
 0x465   : > { %v3403_v4 = vpop.f32.mrf.mxu1 }
 0x466   : > { %v6825_v9 = vadd.f32 %v3403_v4, %v6645_v38 }
 0x468   : > { %4630 = vmatmul.msk.bf16.gmra.mxu1 %vm2269_vm5, %v7428_v37  ;;  %v7447_v37 = vld [vmem:[#allocation8_spill] sm:$0xff] }
 0x46b   : > { %4623 = vmatmul.msk.bf16.gmra.mxu0 %vm2269_vm5, %v7436_v31  ;;  %4589 = vmatmul.msk.bf16.gmra.mxu2 %vm2269_vm5, %v7444_v42  ;;  %v6847_v31 = vld [vmem:[#allocation2 + $0x198] sm:$0xff] }
 0x46d   : > { %v3405_v27 = vpop.f32.mrf.mxu1 }
 0x46e   : > { %v6834_v6 = vadd.f32 %v3405_v27, %v7445_v17 }
 0x473   : > { %4607 = vmatmul.msk.bf16.gmra.mxu3 %vm2269_vm5, %v7446_v40 }
 0x475   : > { %v3408_v30 = vpop.f32.mrf.mxu1 }
 0x476   : > { %v6839_v38 = vadd.f32 %v3408_v30, %v6665_v39  ;;  %v3597_v39 = vpack.c.bf16 %v6849_v19, %v6847_v31 }
 0x478   : > { %4631 = vmatmul.msk.bf16.gmra.mxu1 %vm2269_vm5, %v7432_v1  ;;  %v3730_v1 = vrot.slane %v6847_v31, 1 }
 0x47b   : > { %4624 = vmatmul.msk.bf16.gmra.mxu0 %vm2269_vm5, %v6458_v0  ;;  %4590 = vmatmul.msk.bf16.gmra.mxu2 %vm2269_vm5, %v7447_v37  ;;  %v3731_v0 = vrot.slane %v6849_v19, 1 }
 0x47d   : > { %v3410_v28 = vpop.f32.mrf.mxu1  ;;  %v3732_v7 = vsel %vm411_vm2, %v3730_v1, %v3731_v0  ;;  %v3734_v62 = vsel %vm411_vm2, %v3731_v0, %v3733_v12  ;;  %vm4036_vm2 = vcmask 125952   ;;  %v6907_v1 = vpop.f32.mrf.mxu3 }
 0x47e   : > { %v6854_v58 = vadd.f32 %v3410_v28, %v6677_v23  ;;  %v3737_v29 = vpack.c.bf16 %v3734_v62, %v3732_v7  ;;  %v6913_v62 = vpop.f32.mrf.mxu0 }
 0x483   : > { %4608 = vmatmul.msk.bf16.gmra.mxu3 %vm2269_vm5, %v3597_v39 }
 0x485   : > { %v3413_v25 = vpop.f32.mrf.mxu1 }
 0x486   : > { %v6865_v23 = vadd.f32 %v3413_v25, %v6685_v57 }
 0x488   : > { %4632 = vmatmul.msk.bf16.gmra.mxu1 %vm2269_vm5, %v7434_v3 }
 0x48b   : > { %4625 = vmatmul.msk.bf16.gmra.mxu0 %vm2269_vm5, %v3737_v29  ;;  %4591 = vmatmul.msk.bf16.gmra.mxu2 %vm2269_vm5, %v7448_v45 }
 0x48d   : > { %v3415_v36 = vpop.f32.mrf.mxu1 }
 0x48e   : > { %v6873_v43 = vadd.f32 %v3415_v36, %v6697_v44 }
 0x495   : > { %v3418_v22 = vpop.f32.mrf.mxu1 }
 0x496   : > { %v6876_v14 = vadd.f32 %v3418_v22, %v6705_v2 }
 0x498   : > { %4633 = vmatmul.msk.bf16.gmra.mxu1 %vm2269_vm5, %v7435_v47 }
 0x49d   : > { %v3420_v57 = vpop.f32.mrf.mxu1 }
 0x49e   : > { %v6881_v4 = vadd.f32 %v3420_v57, %v6717_v15 }
 0x4a5   : > { %v3423_v3 = vpop.f32.mrf.mxu1 }
 0x4a6   : > { %v6884_v27 = vadd.f32 %v3423_v3, %v6725_v50  ;;  %v6902_v50 = vpop.f32.mrf.mxu2 }
 0x4a8   : > { %4634 = vmatmul.msk.bf16.gmra.mxu1 %vm2269_vm5, %v7437_v20 }
 0x4ad   : > { %v3425_v44 = vpop.f32.mrf.mxu1 }
 0x4ae   : > { %v6890_v2 = vadd.f32 %v3425_v44, %v6737_v56 }
 0x4b5   : > { %v3892_v47 = vpop.f32.mrf.mxu1 }
 0x4b6   : > { %v3972_v17 = vadd.f32 %v3892_v47, %v6745_v16  ;;  %v6924_v47 = vpop.f32.mrf.mxu3 }
 0x4b8   : > { %v4004_v15 = vpack.c.bf16 %v3972_v17, %v3972_v17  ;;  %4635 = vmatmul.msk.bf16.gmra.mxu1 %vm2269_vm5, %v7438_v10  ;;  %v4141_v56 = vmul.f32 %v3972_v17, %v3972_v17  ;;  %v4070_v40 = vsel %vm4069_vm11, %v3972_v17, 0.0 }
 0x4ba   : > { %4037 = vst.msk [vmem:[%s6896_s13] sm:$0xf] %vm4036_vm2, %v4004_v15  ;;  %v4173_v10 = vsel %vm4069_vm11, %v4141_v56, 0.0 }
 0x4bd   : > { %v3894_v20 = vpop.f32.mrf.mxu1 }
 0x4be   : > { %v3973_v16 = vadd.f32 %v3894_v20, %v6757_v51  ;;  %v6915_v51 = vpop.f32.mrf.mxu2  ;;  %v6926_v20 = vpop.f32.mrf.mxu0 }
 0x4c0   : > { %v4005_v30 = vpack.c.bf16 %v3973_v16, %v3973_v16  ;;  %v4071_v28 = vsel %vm4069_vm11, %v3973_v16, 0.0  ;;  %v4142_v39 = vmul.f32 %v3973_v16, %v3973_v16 }
 0x4c1   : > { %v4072_v0 = vadd.f32 %v4071_v28, %v4070_v40 }
 0x4c2   : > { %4038 = vst.msk [vmem:[%s6896_s13 + $0x4] sm:$0xf] %vm4036_vm2, %v4005_v30  ;;  %v4174_v12 = vsel %vm4069_vm11, %v4142_v39, 0.0 }
 0x4c3   : > { %v4175_v7 = vadd.f32 %v4174_v12, %v4173_v10 }
 0x4c5   : > { %v3897_v25 = vpop.f32.mrf.mxu1 }
 0x4c6   : > { %v3974_v29 = vadd.f32 %v3897_v25, %v6765_v18  ;;  %v6929_v56 = vpop.f32.mrf.mxu2 }
 0x4c8   : > { %v4006_v36 = vpack.c.bf16 %v3974_v29, %v3974_v29  ;;  %v4073_v22 = vsel %vm4069_vm11, %v3974_v29, 0.0  ;;  %v4143_v57 = vmul.f32 %v3974_v29, %v3974_v29  ;;  %4636 = vmatmul.msk.bf16.gmra.mxu1 %vm2269_vm5, %v6270_v32 }
 0x4c9   : > { %v4074_v3 = vadd.f32 %v4073_v22, %v4072_v0  ;;  %v6935_v0 = vpop.f32.mrf.mxu3 }
 0x4ca   : > { %4039 = vst.msk [vmem:[%s6896_s13 + $0x8] sm:$0xf] %vm4036_vm2, %v4006_v36  ;;  %v4176_v44 = vsel %vm4069_vm11, %v4143_v57, 0.0 }
 0x4cb   : > { %v4177_v17 = vadd.f32 %v4176_v44, %v4175_v7  ;;  %v6938_v7 = vpop.f32.mrf.mxu0 }
 0x4cd   : > { %v3899_v15 = vpop.f32.mrf.mxu1 }
 0x4ce   : > { %v3975_v18 = vadd.f32 %v3899_v15, %v6777_v35  ;;  %v6943_v36 = vpop.f32.mrf.mxu2 }
 0x4d0   : > { %v4007_v16 = vpack.c.bf16 %v3975_v18, %v3975_v18  ;;  %v4075_v40 = vsel %vm4069_vm11, %v3975_v18, 0.0  ;;  %v4144_v32 = vmul.f32 %v3975_v18, %v3975_v18 }
 0x4d1   : > { %v4076_v30 = vadd.f32 %v4075_v40, %v4074_v3 }
 0x4d2   : > { %4040 = vst.msk [vmem:[%s6896_s13 + $0xc] sm:$0xf] %vm4036_vm2, %v4007_v16  ;;  %v4178_v28 = vsel %vm4069_vm11, %v4144_v32, 0.0 }
 0x4d3   : > { %v4179_v39 = vadd.f32 %v4178_v28, %v4177_v17  ;;  %v6949_v17 = vpop.f32.mrf.mxu3 }
 0x4d5   : > { %v3902_v10 = vpop.f32.mrf.mxu1 }
 0x4d6   : > { %v3976_v12 = vadd.f32 %v3902_v10, %v6785_v63 }
 0x4d8   : > { %v4008_v35 = vpack.c.bf16 %v3976_v12, %v3976_v12  ;;  %v4077_v25 = vsel %vm4069_vm11, %v3976_v12, 0.0  ;;  %v4145_v29 = vmul.f32 %v3976_v12, %v3976_v12  ;;  %4637 = vmatmul.msk.bf16.gmra.mxu1 %vm2269_vm5, %v7439_v11  ;;  %v6952_v11 = vpop.f32.mrf.mxu0 }
 0x4d9   : > { %v4078_v22 = vadd.f32 %v4077_v25, %v4076_v30  ;;  %v6957_v30 = vpop.f32.mrf.mxu2 }
 0x4da   : > { %4041 = vst.msk [vmem:[%s6896_s13 + $0x10] sm:$0xf] %vm4036_vm2, %v4008_v35  ;;  %v4180_v57 = vsel %vm4069_vm11, %v4145_v29, 0.0 }
 0x4db   : > { %v4181_v3 = vadd.f32 %v4180_v57, %v4179_v39  ;;  %v6963_v25 = vpop.f32.mrf.mxu3 }
 0x4dd   : > { %v3904_v44 = vpop.f32.mrf.mxu1 }
 0x4de   : > { %v3977_v63 = vadd.f32 %v3904_v44, %v6797_v46 }
 0x4e0   : > { %v4009_v15 = vpack.c.bf16 %v3977_v63, %v3977_v63  ;;  %v4079_v18 = vsel %vm4069_vm11, %v3977_v63, 0.0  ;;  %v4146_v16 = vmul.f32 %v3977_v63, %v3977_v63 }
 0x4e1   : > { %v4080_v40 = vadd.f32 %v4079_v18, %v4078_v22  ;;  %v6972_v44 = vpop.f32.mrf.mxu2 }
 0x4e2   : > { %4042 = vst.msk [vmem:[%s6896_s13 + $0x14] sm:$0xf] %vm4036_vm2, %v4009_v15  ;;  %v4182_v32 = vsel %vm4069_vm11, %v4146_v16, 0.0 }
 0x4e3   : > { %v4183_v28 = vadd.f32 %v4182_v32, %v4181_v3  ;;  %v3573_v3 = vadd.f32 %v6902_v50, %v6688_v34  ;;  %v6980_v34 = vpop.f32.mrf.mxu3 }
 0x4e5   : > { %v3907_v39 = vpop.f32.mrf.mxu1 }
 0x4e6   : > { %v3978_v46 = vadd.f32 %v3907_v39, %v6805_v55  ;;  %v6970_v55 = vpop.f32.mrf.mxu0  ;;  %v3574_v39 = vadd.f32 %v6915_v51, %v6700_v54  ;;  %v3575_v51 = vadd.f32 %v6929_v56, %v6708_v33  ;;  %v3576_v56 = vadd.f32 %v6943_v36, %v6720_v52 }
 0x4e8   : > { %v4010_v10 = vpack.c.bf16 %v3978_v46, %v3978_v46  ;;  %v4081_v12 = vsel %vm4069_vm11, %v3978_v46, 0.0  ;;  %v4147_v35 = vmul.f32 %v3978_v46, %v3978_v46  ;;  %4638 = vmatmul.msk.bf16.gmra.mxu1 %vm2269_vm5, %v7441_v49  ;;  %v3703_v49 = vadd.f32 %v6907_v1, %v3573_v3 }
 0x4e9   : > { %v4082_v29 = vadd.f32 %v4081_v12, %v4080_v40  ;;  %v6987_v12 = vpop.f32.mrf.mxu2 }
 0x4ea   : > { %4043 = vst.msk [vmem:[%s6896_s13 + $0x18] sm:$0xf] %vm4036_vm2, %v4010_v10  ;;  %v4184_v22 = vsel %vm4069_vm11, %v4147_v35, 0.0  ;;  %v3704_v35 = vadd.f32 %v6924_v47, %v3574_v39 }
 0x4eb   : > { %v4185_v57 = vadd.f32 %v4184_v22, %v4183_v28  ;;  %v6999_v47 = vpop.f32.mrf.mxu3 }
 0x4ed   : > { %v3909_v63 = vpop.f32.mrf.mxu1 }
 0x4ee   : > { %v3979_v15 = vadd.f32 %v3909_v63, %v6817_v41  ;;  %v3843_v41 = vadd.f32 %v6913_v62, %v3703_v49  ;;  %v6985_v1 = vpop.f32.mrf.mxu0  ;;  %v3844_v63 = vadd.f32 %v6926_v20, %v3704_v35 }
 0x4f0   : > { %v4011_v18 = vpack.c.bf16 %v3979_v15, %v3979_v15  ;;  %v4083_v16 = vsel %vm4069_vm11, %v3979_v15, 0.0  ;;  %v4148_v40 = vmul.f32 %v3979_v15, %v3979_v15 }
 0x4f1   : > { %v4084_v32 = vadd.f32 %v4083_v16, %v4082_v29 }
 0x4f2   : > { %4044 = vst.msk [vmem:[%s6896_s13 + $0x1c] sm:$0xf] %vm4036_vm2, %v4011_v18  ;;  %v4186_v28 = vsel %vm4069_vm11, %v4148_v40, 0.0  ;;  %v3705_v18 = vadd.f32 %v6935_v0, %v3575_v51 }
 0x4f3   : > { %v4187_v50 = vadd.f32 %v4186_v28, %v4185_v57  ;;  %v7005_v28 = vpop.f32.mrf.mxu2  ;;  %v7015_v35 = vpop.f32.mrf.mxu3 }
 0x4f4   : > { %v3845_v0 = vadd.f32 %v6938_v7, %v3705_v18  ;;  %v3870_v7 = vrot.slane %v6851_v8, 2 }
 0x4f5   : > { %v3912_v46 = vpop.f32.mrf.mxu1 }
 0x4f6   : > { %v3980_v10 = vadd.f32 %v3912_v46, %v3843_v41  ;;  %v7002_v16 = vpop.f32.mrf.mxu0  ;;  %v3867_v46 = vrot.slane %v6847_v31, 2 }
 0x4f8   : > { %v4012_v29 = vpack.c.bf16 %v3980_v10, %v3980_v10  ;;  %v4085_v22 = vsel %vm4069_vm11, %v3980_v10, 0.0  ;;  %v4149_v3 = vmul.f32 %v3980_v10, %v3980_v10  ;;  %4639 = vmatmul.msk.bf16.gmra.mxu1 %vm2269_vm5, %v7444_v42  ;;  %v3868_v10 = vrot.slane %v6849_v19, 2 }
 0x4f9   : > { %v4086_v57 = vadd.f32 %v4085_v22, %v4084_v32 }
 0x4fa   : > { %4045 = vst.msk [vmem:[%s6896_s13 + $0x20] sm:$0xf] %vm4036_vm2, %v4012_v29  ;;  %v4188_v54 = vsel %vm4069_vm11, %v4149_v3, 0.0  ;;  %v3706_v29 = vadd.f32 %v6949_v17, %v3576_v56 }
 0x4fb   : > { %v4189_v62 = vadd.f32 %v4188_v54, %v4187_v50  ;;  %v7027_v19 = vpop.f32.mrf.mxu2  ;;  %v3869_v54 = vsel %vm824_vm3, %v3867_v46, %v3868_v10 }
 0x4fc   : > { %v3846_v51 = vadd.f32 %v6952_v11, %v3706_v29 }
 0x4fd   : > { %v3914_v15 = vpop.f32.mrf.mxu1 }
 0x4fe   : > { %v3981_v49 = vadd.f32 %v3914_v15, %v3844_v63  ;;  %v7022_v36 = vpop.f32.mrf.mxu0 }
 0x500   : > { %v4013_v42 = vpack.c.bf16 %v3981_v49, %v3981_v49  ;;  %v4087_v40 = vsel %vm4069_vm11, %v3981_v49, 0.0  ;;  %v4150_v32 = vmul.f32 %v3981_v49, %v3981_v49 }
 0x501   : > { %v4088_v50 = vadd.f32 %v4087_v40, %v4086_v57 }
 0x502   : > { %4046 = vst.msk [vmem:[%s6896_s13 + $0x24] sm:$0xf] %vm4036_vm2, %v4013_v42  ;;  %v4190_v33 = vsel %vm4069_vm11, %v4150_v32, 0.0  ;;  %v3655_v32 = vpop.f32.mrf.mxu3 }
 0x503   : > { %v4191_v20 = vadd.f32 %v4190_v33, %v4189_v62  ;;  %v3871_v62 = vsel %vm824_vm3, %v3868_v10, %v3870_v7  ;;  %v3527_v56 = vpop.f32.mrf.mxu2  ;;  %vm4139_vm3 = vcmask 122880  }
 0x504   : > { %v3874_v8 = vpack.c.bf16 %v3871_v62, %v3869_v54 }
 0x505   : > { %v3917_v39 = vpop.f32.mrf.mxu1 }
 0x506   : > { %v3982_v41 = vadd.f32 %v3917_v39, %v3845_v0  ;;  %v3795_v11 = vpop.f32.mrf.mxu0 }
 0x508   : > { %v4014_v22 = vpack.c.bf16 %v3982_v41, %v3982_v41  ;;  %v4089_v3 = vsel %vm4069_vm11, %v3982_v41, 0.0  ;;  %v4151_v57 = vmul.f32 %v3982_v41, %v3982_v41  ;;  %4640 = vmatmul.msk.bf16.gmra.mxu1 %vm2269_vm5, %v7447_v37  ;;  %v3577_v37 = vadd.f32 %v6957_v30, %v6728_v53 }
 0x509   : > { %v4090_v52 = vadd.f32 %v4089_v3, %v4088_v50  ;;  %v3578_v53 = vadd.f32 %v6972_v44, %v6740_v48 }
 0x50a   : > { %4047 = vst.msk [vmem:[%s6896_s13 + $0x28] sm:$0xf] %vm4036_vm2, %v4014_v22  ;;  %v4192_v31 = vsel %vm4069_vm11, %v4151_v57, 0.0  ;;  %v3707_v49 = vadd.f32 %v6963_v25, %v3577_v37  ;;  %v3657_v44 = vpop.f32.mrf.mxu3  ;;  %v3579_v22 = vadd.f32 %v6987_v12, %v6748_v26  ;;  %v3580_v26 = vadd.f32 %v7005_v28, %v6760_v21 }
 0x50b   : > { %v4193_v17 = vadd.f32 %v4192_v31, %v4191_v20  ;;  %v3708_v39 = vadd.f32 %v6980_v34, %v3578_v53  ;;  %v3530_v7 = vpop.f32.mrf.mxu2  ;;  %v3581_v28 = vadd.f32 %v7027_v19, %v6768_v60  ;;  %v3582_v60 = vadd.f32 %v3527_v56, %v6780_v13 }
 0x50c   : > { %v3847_v30 = vadd.f32 %v6970_v55, %v3707_v49  ;;  %v3709_v31 = vadd.f32 %v6999_v47, %v3579_v22  ;;  %v3710_v47 = vadd.f32 %v7015_v35, %v3580_v26 }
 0x50d   : > { %v3919_v63 = vpop.f32.mrf.mxu1  ;;  %v3848_v34 = vadd.f32 %v6985_v1, %v3708_v39  ;;  %v3712_v22 = vadd.f32 %v3657_v44, %v3582_v60 }
 0x50e   : > { %v3983_v15 = vadd.f32 %v3919_v63, %v3846_v51  ;;  %v3797_v57 = vpop.f32.mrf.mxu0  ;;  %v3849_v1 = vadd.f32 %v7002_v16, %v3709_v31  ;;  %v3850_v35 = vadd.f32 %v7022_v36, %v3710_v47 }
 0x50f   : > { %v3852_v13 = vadd.f32 %v3797_v57, %v3712_v22 }
 0x510   : > { %v4015_v18 = vpack.c.bf16 %v3983_v15, %v3983_v15  ;;  %v4091_v42 = vsel %vm4069_vm11, %v3983_v15, 0.0  ;;  %v4152_v40 = vmul.f32 %v3983_v15, %v3983_v15 }
 0x511   : > { %v4092_v50 = vadd.f32 %v4091_v42, %v4090_v52 }
 0x512   : > { %4048 = vst.msk [vmem:[%s6896_s13 + $0x2c] sm:$0xf] %vm4036_vm2, %v4015_v18  ;;  %v4194_v33 = vsel %vm4069_vm11, %v4152_v40, 0.0  ;;  %v3660_v12 = vpop.f32.mrf.mxu3 }
 0x513   : > { %v4195_v20 = vadd.f32 %v4194_v33, %v4193_v17 }
 0x515   : > { %v3922_v25 = vpop.f32.mrf.mxu1 }
 0x516   : > { %v3984_v0 = vadd.f32 %v3922_v25, %v3847_v30  ;;  %v3800_v49 = vpop.f32.mrf.mxu0  ;;  %v3711_v25 = vadd.f32 %v3655_v32, %v3581_v28 }
 0x518   : > { %v4016_v41 = vpack.c.bf16 %v3984_v0, %v3984_v0  ;;  %v4093_v46 = vsel %vm4069_vm11, %v3984_v0, 0.0  ;;  %v4153_v10 = vmul.f32 %v3984_v0, %v3984_v0  ;;  %4641 = vmatmul.msk.bf16.gmra.mxu1 %vm2269_vm5, %v7448_v45  ;;  %v3851_v36 = vadd.f32 %v3795_v11, %v3711_v25 }
 0x519   : > { %v4094_v29 = vadd.f32 %v4093_v46, %v4092_v50  ;;  %v3532_v50 = vpop.f32.mrf.mxu2 }
 0x51a   : > { %4049 = vst.msk [vmem:[%s6896_s13 + $0x30] sm:$0xf] %vm4036_vm2, %v4016_v41  ;;  %v4196_v48 = vsel %vm4069_vm11, %v4153_v10, 0.0  ;;  %v3662_v30 = vpop.f32.mrf.mxu3 }
 0x51b   : > { %v4197_v55 = vadd.f32 %v4196_v48, %v4195_v20 }
 0x51d   : > { %v3924_v3 = vpop.f32.mrf.mxu1 }
 0x51e   : > { %v3985_v52 = vadd.f32 %v3924_v3, %v3848_v34  ;;  %v3802_v46 = vpop.f32.mrf.mxu0 }
 0x520   : > { %v4017_v45 = vpack.c.bf16 %v3985_v52, %v3985_v52  ;;  %v4095_v17 = vsel %vm4069_vm11, %v3985_v52, 0.0  ;;  %v4154_v54 = vmul.f32 %v3985_v52, %v3985_v52 }
 0x521   : > { %v4096_v62 = vadd.f32 %v4095_v17, %v4094_v29  ;;  %v3535_v29 = vpop.f32.mrf.mxu2 }
 0x522   : > { %4050 = vst.msk [vmem:[%s6896_s13 + $0x34] sm:$0xf] %vm4036_vm2, %v4017_v45  ;;  %v4198_v37 = vsel %vm4069_vm11, %v4154_v54, 0.0  ;;  %v3665_v52 = vpop.f32.mrf.mxu3  ;;  %v3583_v54 = vadd.f32 %v3530_v7, %v6788_v24  ;;  %v3584_v24 = vadd.f32 %v3532_v50, %v6800_v5  ;;  %v3585_v25 = vadd.f32 %v3535_v29, %v6808_v61 }
 0x523   : > { %v4199_v51 = vadd.f32 %v4198_v37, %v4197_v55 }
 0x524   : > { %v3713_v44 = vadd.f32 %v3660_v12, %v3583_v54  ;;  %v3714_v12 = vadd.f32 %v3662_v30, %v3584_v24 }
 0x525   : > { %v3927_v63 = vpop.f32.mrf.mxu1 }
 0x526   : > { %v3986_v15 = vadd.f32 %v3927_v63, %v3849_v1  ;;  %v3853_v7 = vadd.f32 %v3800_v49, %v3713_v44  ;;  %v3854_v5 = vadd.f32 %v3802_v46, %v3714_v12 }
 0x528   : > { %v4018_v18 = vpack.c.bf16 %v3986_v15, %v3986_v15  ;;  %v4097_v42 = vsel %vm4069_vm11, %v3986_v15, 0.0  ;;  %v4155_v40 = vmul.f32 %v3986_v15, %v3986_v15  ;;  %4642 = vmatmul.msk.bf16.gmra.mxu1 %vm2269_vm5, %v3874_v8 }
 0x529   : > { %v4098_v33 = vadd.f32 %v4097_v42, %v4096_v62  ;;  %v3805_v62 = vpop.f32.mrf.mxu0  ;;  %v3537_v11 = vpop.f32.mrf.mxu2 }
 0x52a   : > { %4051 = vst.msk [vmem:[%s6896_s13 + $0x38] sm:$0xf] %vm4036_vm2, %v4018_v18  ;;  %v4200_v21 = vsel %vm4069_vm11, %v4155_v40, 0.0  ;;  %v3667_v47 = vpop.f32.mrf.mxu3  ;;  %v3586_v61 = vadd.f32 %v3537_v11, %v6820_v59 }
 0x52b   : > { %v4201_v16 = vadd.f32 %v4200_v21, %v4199_v51 }
 0x52d   : > { %v3929_v20 = vpop.f32.mrf.mxu1 }
 0x52e   : > { %v3987_v53 = vadd.f32 %v3929_v20, %v3850_v35 }
 0x530   : > { %v4019_v0 = vpack.c.bf16 %v3987_v53, %v3987_v53  ;;  %v4099_v8 = vsel %vm4069_vm11, %v3987_v53, 0.0  ;;  %v4156_v39 = vmul.f32 %v3987_v53, %v3987_v53 }
 0x531   : > { %v4100_v41 = vadd.f32 %v4099_v8, %v4098_v33  ;;  %v3807_v42 = vpop.f32.mrf.mxu0  ;;  %v3540_v33 = vpop.f32.mrf.mxu2  ;;  %v3715_v8 = vadd.f32 %v3665_v52, %v3585_v25 }
 0x532   : > { %4052 = vst.msk [vmem:[%s6896_s13 + $0x3c] sm:$0xf] %vm4036_vm2, %v4019_v0  ;;  %v4202_v10 = vsel %vm4069_vm11, %v4156_v39, 0.0  ;;  %v3670_v49 = vpop.f32.mrf.mxu3  ;;  %v3587_v59 = vadd.f32 %v3540_v33, %v6825_v9 }
 0x533   : > { %v4203_v48 = vadd.f32 %v4202_v10, %v4201_v16  ;;  %v3855_v46 = vadd.f32 %v3805_v62, %v3715_v8 }
 0x535   : > { %v3932_v19 = vpop.f32.mrf.mxu1 }
 0x536   : > { %v3988_v55 = vadd.f32 %v3932_v19, %v3851_v36 }
 0x538   : > { %v4020_v32 = vpack.c.bf16 %v3988_v55, %v3988_v55  ;;  %v4101_v34 = vsel %vm4069_vm11, %v3988_v55, 0.0  ;;  %v4157_v3 = vmul.f32 %v3988_v55, %v3988_v55 }
 0x539   : > { %v4102_v31 = vadd.f32 %v4101_v34, %v4100_v41  ;;  %v3810_v39 = vpop.f32.mrf.mxu0 }
 0x53a   : > { %4053 = vst.msk [vmem:[%s6896_s13 + $0x40] sm:$0xf] %vm4036_vm2, %v4020_v32  ;;  %v4204_v45 = vsel %vm4069_vm11, %v4157_v3, 0.0  ;;  %v3672_v22 = vpop.f32.mrf.mxu3  ;;  %v3716_v32 = vadd.f32 %v3667_v47, %v3586_v61 }
 0x53b   : > { %v4205_v17 = vadd.f32 %v4204_v45, %v4203_v48  ;;  %v3542_v48 = vpop.f32.mrf.mxu2 }
 0x53c   : > { %v3856_v62 = vadd.f32 %v3807_v42, %v3716_v32 }
 0x53d   : > { %v3934_v56 = vpop.f32.mrf.mxu1 }
 0x53e   : > { %v3989_v37 = vadd.f32 %v3934_v56, %v3852_v13 }
 0x540   : > { %v4021_v51 = vpack.c.bf16 %v3989_v37, %v3989_v37  ;;  %v4103_v26 = vsel %vm4069_vm11, %v3989_v37, 0.0  ;;  %v4158_v1 = vmul.f32 %v3989_v37, %v3989_v37  ;;  %v3717_v37 = vadd.f32 %v3670_v49, %v3587_v59 }
 0x541   : > { %v4104_v63 = vadd.f32 %v4103_v26, %v4102_v31  ;;  %v3812_v45 = vpop.f32.mrf.mxu0 }
 0x542   : > { %4054 = vst.msk [vmem:[%s6896_s13 + $0x44] sm:$0xf] %vm4036_vm2, %v4021_v51  ;;  %v4206_v15 = vsel %vm4069_vm11, %v4158_v1, 0.0  ;;  %v3675_v1 = vpop.f32.mrf.mxu3  ;;  %v3857_v9 = vadd.f32 %v3810_v39, %v3717_v37 }
 0x543   : > { %v4207_v18 = vadd.f32 %v4206_v15, %v4205_v17  ;;  %v3545_v54 = vpop.f32.mrf.mxu2 }
 0x545   : > { %v3937_v57 = vpop.f32.mrf.mxu1 }
 0x546   : > { %v3990_v40 = vadd.f32 %v3937_v57, %v3853_v7 }
 0x548   : > { %v4022_v21 = vpack.c.bf16 %v3990_v40, %v3990_v40  ;;  %v4105_v16 = vsel %vm4069_vm11, %v3990_v40, 0.0  ;;  %v4159_v28 = vmul.f32 %v3990_v40, %v3990_v40 }
 0x549   : > { %v4106_v35 = vadd.f32 %v4105_v16, %v4104_v63  ;;  %v3815_v24 = vpop.f32.mrf.mxu0 }
 0x54a   : > { %4055 = vst.msk [vmem:[%s6896_s13 + $0x48] sm:$0xf] %vm4036_vm2, %v4022_v21  ;;  %v4208_v20 = vsel %vm4069_vm11, %v4159_v28, 0.0 }
 0x54b   : > { %v4209_v53 = vadd.f32 %v4208_v20, %v4207_v18  ;;  %v3588_v18 = vadd.f32 %v3542_v48, %v6834_v6  ;;  %v3547_v7 = vpop.f32.mrf.mxu2  ;;  %v3589_v6 = vadd.f32 %v3545_v54, %v6839_v38 }
 0x54d   : > { %v3939_v50 = vpop.f32.mrf.mxu1  ;;  %v3718_v40 = vadd.f32 %v3672_v22, %v3588_v18 }
 0x54e   : > { %v3991_v0 = vadd.f32 %v3939_v50, %v3854_v5 }
 0x550   : > { %v4023_v30 = vpack.c.bf16 %v3991_v0, %v3991_v0  ;;  %v4107_v41 = vsel %vm4069_vm11, %v3991_v0, 0.0  ;;  %v4160_v10 = vmul.f32 %v3991_v0, %v3991_v0  ;;  %v3719_v0 = vadd.f32 %v3675_v1, %v3589_v6 }
 0x551   : > { %v4108_v60 = vadd.f32 %v4107_v41, %v4106_v35  ;;  %v3677_v35 = vpop.f32.mrf.mxu3  ;;  %v3817_v5 = vpop.f32.mrf.mxu0 }
 0x552   : > { %4056 = vst.msk [vmem:[%s6896_s13 + $0x4c] sm:$0xf] %vm4036_vm2, %v4023_v30  ;;  %v4210_v36 = vsel %vm4069_vm11, %v4160_v10, 0.0  ;;  %v3859_v38 = vadd.f32 %v3815_v24, %v3719_v0 }
 0x553   : > { %v4211_v19 = vadd.f32 %v4210_v36, %v4209_v53  ;;  %v3858_v53 = vadd.f32 %v3812_v45, %v3718_v40  ;;  %v3550_v50 = vpop.f32.mrf.mxu2 }
 0x555   : > { %v3942_v29 = vpop.f32.mrf.mxu1 }
 0x556   : > { %v3992_v55 = vadd.f32 %v3942_v29, %v3855_v46 }
 0x558   : > { %v4024_v34 = vpack.c.bf16 %v3992_v55, %v3992_v55  ;;  %v4109_v3 = vsel %vm4069_vm11, %v3992_v55, 0.0  ;;  %v4161_v52 = vmul.f32 %v3992_v55, %v3992_v55 }
 0x559   : > { %v4110_v31 = vadd.f32 %v4109_v3, %v4108_v60  ;;  %v3590_v60 = vadd.f32 %v3547_v7, %v6854_v58  ;;  %v3680_v36 = vpop.f32.mrf.mxu3  ;;  %v3820_v29 = vpop.f32.mrf.mxu0  ;;  %v3591_v58 = vadd.f32 %v3550_v50, %v6865_v23 }
 0x55a   : > { %4057 = vst.msk [vmem:[%s6896_s13 + $0x50] sm:$0xf] %vm4036_vm2, %v4024_v34  ;;  %v4212_v17 = vsel %vm4069_vm11, %v4161_v52, 0.0 }
 0x55b   : > { %v4213_v13 = vadd.f32 %v4212_v17, %v4211_v19  ;;  %v3720_v46 = vadd.f32 %v3677_v35, %v3590_v60  ;;  %v3552_v34 = vpop.f32.mrf.mxu2  ;;  %v3721_v59 = vadd.f32 %v3680_v36, %v3591_v58 }
 0x55c   : > { %v3592_v23 = vadd.f32 %v3552_v34, %v6873_v43 }
 0x55d   : > { %v3944_v11 = vpop.f32.mrf.mxu1  ;;  %v3860_v45 = vadd.f32 %v3817_v5, %v3720_v46 }
 0x55e   : > { %v3993_v56 = vadd.f32 %v3944_v11, %v3856_v62 }
 0x560   : > { %v4025_v44 = vpack.c.bf16 %v3993_v56, %v3993_v56  ;;  %v4111_v51 = vsel %vm4069_vm11, %v3993_v56, 0.0  ;;  %v4162_v26 = vmul.f32 %v3993_v56, %v3993_v56 }
 0x561   : > { %v4112_v63 = vadd.f32 %v4111_v51, %v4110_v31 }
 0x562   : > { %4058 = vst.msk [vmem:[%s6896_s13 + $0x54] sm:$0xf] %vm4036_vm2, %v4025_v44  ;;  %v4214_v15 = vsel %vm4069_vm11, %v4162_v26, 0.0  ;;  %v3822_v44 = vpop.f32.mrf.mxu0 }
 0x563   : > { %v4215_v47 = vadd.f32 %v4214_v15, %v4213_v13  ;;  %v3682_v13 = vpop.f32.mrf.mxu3  ;;  %v3555_v26 = vpop.f32.mrf.mxu2 }
 0x564   : > { %v3722_v18 = vadd.f32 %v3682_v13, %v3592_v23 }
 0x565   : > { %v3947_v57 = vpop.f32.mrf.mxu1 }
 0x566   : > { %v3994_v42 = vadd.f32 %v3947_v57, %v3857_v9  ;;  %v3862_v43 = vadd.f32 %v3822_v44, %v3722_v18 }
 0x568   : > { %v4026_v33 = vpack.c.bf16 %v3994_v42, %v3994_v42  ;;  %v4113_v12 = vsel %vm4069_vm11, %v3994_v42, 0.0  ;;  %v4163_v21 = vmul.f32 %v3994_v42, %v3994_v42 }
 0x569   : > { %v4114_v16 = vadd.f32 %v4113_v12, %v4112_v63  ;;  %v3861_v63 = vadd.f32 %v3820_v29, %v3721_v59 }
 0x56a   : > { %4059 = vst.msk [vmem:[%s6896_s13 + $0x58] sm:$0xf] %vm4036_vm2, %v4026_v33  ;;  %v4216_v28 = vsel %vm4069_vm11, %v4163_v21, 0.0  ;;  %v3825_v12 = vpop.f32.mrf.mxu0  ;;  %v3593_v21 = vadd.f32 %v3555_v26, %v6876_v14 }
 0x56b   : > { %v4217_v20 = vadd.f32 %v4216_v28, %v4215_v47  ;;  %v3685_v57 = vpop.f32.mrf.mxu3 }
 0x56d   : > { %v3949_v25 = vpop.f32.mrf.mxu1 }
 0x56e   : > { %v3995_v49 = vadd.f32 %v3949_v25, %v3858_v53 }
 0x570   : > { %v4027_v8 = vpack.c.bf16 %v3995_v49, %v3995_v49  ;;  %v4115_v39 = vsel %vm4069_vm11, %v3995_v49, 0.0  ;;  %v4164_v30 = vmul.f32 %v3995_v49, %v3995_v49 }
 0x571   : > { %v4116_v41 = vadd.f32 %v4115_v39, %v4114_v16  ;;  %v3557_v16 = vpop.f32.mrf.mxu2 }
 0x572   : > { %4060 = vst.msk [vmem:[%s6896_s13 + $0x5c] sm:$0xf] %vm4036_vm2, %v4027_v8  ;;  %v4218_v10 = vsel %vm4069_vm11, %v4164_v30, 0.0  ;;  %v3594_v8 = vadd.f32 %v3557_v16, %v6881_v4 }
 0x573   : > { %v4219_v48 = vadd.f32 %v4218_v10, %v4217_v20  ;;  %v3723_v20 = vadd.f32 %v3685_v57, %v3593_v21  ;;  %v3687_v50 = vpop.f32.mrf.mxu3 }
 0x575   : > { %v3952_v19 = vpop.f32.mrf.mxu1  ;;  %v3863_v14 = vadd.f32 %v3825_v12, %v3723_v20 }
 0x576   : > { %v3996_v61 = vadd.f32 %v3952_v19, %v3859_v38 }
 0x578   : > { %v4028_v55 = vpack.c.bf16 %v3996_v61, %v3996_v61  ;;  %v4117_v22 = vsel %vm4069_vm11, %v3996_v61, 0.0  ;;  %v4165_v32 = vmul.f32 %v3996_v61, %v3996_v61 }
 0x579   : > { %v4118_v3 = vadd.f32 %v4117_v22, %v4116_v41  ;;  %v3827_v41 = vpop.f32.mrf.mxu0  ;;  %v3560_v10 = vpop.f32.mrf.mxu2 }
 0x57a   : > { %4061 = vst.msk [vmem:[%s6896_s13 + $0x60] sm:$0xf] %vm4036_vm2, %v4028_v55  ;;  %v4220_v52 = vsel %vm4069_vm11, %v4165_v32, 0.0  ;;  %v3595_v4 = vadd.f32 %v3560_v10, %v6884_v27 }
 0x57b   : > { %v4221_v31 = vadd.f32 %v4220_v52, %v4219_v48  ;;  %v3724_v48 = vadd.f32 %v3687_v50, %v3594_v8  ;;  %v3690_v46 = vpop.f32.mrf.mxu3 }
 0x57d   : > { %v3954_v17 = vpop.f32.mrf.mxu1  ;;  %v3864_v55 = vadd.f32 %v3827_v41, %v3724_v48 }
 0x57e   : > { %v3997_v54 = vadd.f32 %v3954_v17, %v3860_v45 }
 0x580   : > { %v4029_v62 = vpack.c.bf16 %v3997_v54, %v3997_v54  ;;  %v4119_v11 = vsel %vm4069_vm11, %v3997_v54, 0.0  ;;  %v4166_v56 = vmul.f32 %v3997_v54, %v3997_v54 }
 0x581   : > { %v4120_v37 = vadd.f32 %v4119_v11, %v4118_v3  ;;  %v3830_v34 = vpop.f32.mrf.mxu0  ;;  %v3725_v3 = vadd.f32 %v3690_v46, %v3595_v4  ;;  %v3562_v45 = vpop.f32.mrf.mxu2 }
 0x582   : > { %4062 = vst.msk [vmem:[%s6896_s13 + $0x64] sm:$0xf] %vm4036_vm2, %v4029_v62  ;;  %v4222_v51 = vsel %vm4069_vm11, %v4166_v56, 0.0  ;;  %v3596_v27 = vadd.f32 %v3562_v45, %v6890_v2 }
 0x583   : > { %v4223_v1 = vadd.f32 %v4222_v51, %v4221_v31  ;;  %v3865_v59 = vadd.f32 %v3830_v34, %v3725_v3  ;;  %v3692_v62 = vpop.f32.mrf.mxu3 }
 0x585   : > { %v3957_v15 = vpop.f32.mrf.mxu1 }
 0x586   : > { %v3998_v47 = vadd.f32 %v3957_v15, %v3861_v63 }
 0x588   : > { %v4030_v24 = vpack.c.bf16 %v3998_v47, %v3998_v47  ;;  %v4121_v9 = vsel %vm4069_vm11, %v3998_v47, 0.0  ;;  %v4167_v7 = vmul.f32 %v3998_v47, %v3998_v47 }
 0x589   : > { %v4122_v42 = vadd.f32 %v4121_v9, %v4120_v37  ;;  %v3726_v37 = vadd.f32 %v3692_v62, %v3596_v27 }
 0x58a   : > { %4063 = vst.msk [vmem:[%s6896_s13 + $0x68] sm:$0xf] %vm4036_vm2, %v4030_v24  ;;  %v4224_v40 = vsel %vm4069_vm11, %v4167_v7, 0.0 }
 0x58b   : > { %v4225_v33 = vadd.f32 %v4224_v40, %v4223_v1  ;;  %v3832_v1 = vpop.f32.mrf.mxu0 }
 0x58c   : > { %v3866_v47 = vadd.f32 %v3832_v1, %v3726_v37 }
 0x58d   : > { %v3959_v28 = vpop.f32.mrf.mxu1 }
 0x58e   : > { %v3999_v35 = vadd.f32 %v3959_v28, %v3862_v43 }
 0x590   : > { %v4031_v6 = vpack.c.bf16 %v3999_v35, %v3999_v35  ;;  %v4123_v53 = vsel %vm4069_vm11, %v3999_v35, 0.0  ;;  %v4168_v25 = vmul.f32 %v3999_v35, %v3999_v35 }
 0x591   : > { %v4124_v5 = vadd.f32 %v4123_v53, %v4122_v42 }
 0x592   : > { %4064 = vst.msk [vmem:[%s6896_s13 + $0x6c] sm:$0xf] %vm4036_vm2, %v4031_v6  ;;  %v4226_v49 = vsel %vm4069_vm11, %v4168_v25, 0.0 }
 0x593   : > { %v4227_v0 = vadd.f32 %v4226_v49, %v4225_v33 }
 0x595   : > { %v3962_v39 = vpop.f32.mrf.mxu1 }
 0x596   : > { %v4000_v30 = vadd.f32 %v3962_v39, %v3863_v14 }
 0x598   : > { %v4032_v60 = vpack.c.bf16 %v4000_v30, %v4000_v30  ;;  %v4125_v38 = vsel %vm4069_vm11, %v4000_v30, 0.0  ;;  %v4169_v36 = vmul.f32 %v4000_v30, %v4000_v30 }
 0x599   : > { %v4126_v19 = vadd.f32 %v4125_v38, %v4124_v5 }
 0x59a   : > { %4065 = vst.msk [vmem:[%s6896_s13 + $0x70] sm:$0xf] %vm4036_vm2, %v4032_v60  ;;  %v4228_v61 = vsel %vm4069_vm11, %v4169_v36, 0.0 }
 0x59b   : > { %v4229_v29 = vadd.f32 %v4228_v61, %v4227_v0 }
 0x59d   : > { %v3964_v22 = vpop.f32.mrf.mxu1 }
 0x59e   : > { %v4001_v32 = vadd.f32 %v3964_v22, %v3864_v55 }
 0x5a0   : > { %v4033_v52 = vpack.c.bf16 %v4001_v32, %v4001_v32  ;;  %v4127_v31 = vsel %vm4069_vm11, %v4001_v32, 0.0  ;;  %v4170_v58 = vmul.f32 %v4001_v32, %v4001_v32 }
 0x5a1   : > { %v4128_v17 = vadd.f32 %v4127_v31, %v4126_v19 }
 0x5a2   : > { %4066 = vst.msk [vmem:[%s6896_s13 + $0x74] sm:$0xf] %vm4036_vm2, %v4033_v52  ;;  %v4230_v54 = vsel %vm4069_vm11, %v4170_v58, 0.0 }
 0x5a3   : > { %v4231_v13 = vadd.f32 %v4230_v54, %v4229_v29 }
 0x5a5   : > { %v3967_v11 = vpop.f32.mrf.mxu1 }
 0x5a6   : > { %v4002_v56 = vadd.f32 %v3967_v11, %v3865_v59 }
 0x5a8   : > { %v4034_v44 = vpack.c.bf16 %v4002_v56, %v4002_v56  ;;  %v4129_v51 = vsel %vm4069_vm11, %v4002_v56, 0.0  ;;  %v4171_v26 = vmul.f32 %v4002_v56, %v4002_v56 }
 0x5a9   : > { %v4130_v23 = vadd.f32 %v4129_v51, %v4128_v17 }
 0x5aa   : > { %4067 = vst.msk [vmem:[%s6896_s13 + $0x78] sm:$0xf] %vm4036_vm2, %v4034_v44  ;;  %v4232_v63 = vsel %vm4069_vm11, %v4171_v26, 0.0 }
 0x5ab   : > { %v4233_v15 = vadd.f32 %v4232_v63, %v4231_v13 }
 0x5ad   : > { %v3969_v18 = vpop.f32.mrf.mxu1 }
 0x5ae   : > { %v4003_v2 = vadd.f32 %v3969_v18, %v3866_v47 }
 0x5b0   : > { %v4035_v24 = vpack.c.bf16 %v4003_v2, %v4003_v2  ;;  %v4131_v9 = vsel %vm4069_vm11, %v4003_v2, 0.0  ;;  %v4172_v7 = vmul.f32 %v4003_v2, %v4003_v2 }
 0x5b1   : > { %v4132_v57 = vadd.f32 %v4131_v9, %v4130_v23 }
 0x5b2   : > { %4068 = vst.msk [vmem:[%s6896_s13 + $0x7c] sm:$0xf] %vm4036_vm2, %v4035_v24  ;;  %v4234_v42 = vsel %vm4069_vm11, %v4172_v7, 0.0 }
 0x5b3   : > { %v4133_v40 = vrot.slane %v4132_v57, 4  ;;  %v4235_v33 = vadd.f32 %v4234_v42, %v4233_v15 }
 0x5b5   : > { %v4134_v12 = vadd.f32 %v4133_v40, %v4132_v57  ;;  %v4236_v21 = vrot.slane %v4235_v33, 4 }
 0x5b7   : > { %v4135_v43 = vrot.slane %v4134_v12, 2  ;;  %v4237_v16 = vadd.f32 %v4236_v21, %v4235_v33 }
 0x5b9   : > { %v4136_v28 = vadd.f32 %v4135_v43, %v4134_v12  ;;  %v4238_v35 = vrot.slane %v4237_v16, 2 }
 0x5bb   : > { %v4137_v20 = vrot.slane %v4136_v28, 1  ;;  %v4239_v6 = vadd.f32 %v4238_v35, %v4237_v16 }
 0x5bd   : > { %v4138_v53 = vadd.f32 %v4137_v20, %v4136_v28  ;;  %v4240_v25 = vrot.slane %v4239_v6, 1 }
 0x5bf   : > { %4140 = vst.msk [vmem:[%s236_s15] sm:$0x1] %vm4139_vm3, %v4138_v53  ;;  %v4241_v5 = vadd.f32 %v4240_v25, %v4239_v6 }
 0x5c1   : > { %4242 = vst.msk [vmem:[%s236_s15 + $0x1] sm:$0x1] %vm4139_vm3, %v4241_v5 }
 0x5c2 PF: > { %s16_s18 = sadd.s32 1, %s4723_s18  }
 0x5c3   : > { %p13_p5 = scmp.ge.s32.totalorder %s16_s18, 4  }
 0x5c5   :  { %15 = sbr.rel (!%p13_p5) target bundleno = 1 (0x1), region = 95 }

</bundles_post_ra>
